<compile_context>
chip_gen: v7x
topology: tpu7x:2x2x1
jax: 0.10.0
libtpu: 0.0.40
codegen_flags: <defaults>
</compile_context>

<pallas_src>
import jax
import jax.numpy as jnp
from jax.experimental import pallas as pl
from jax.experimental.pallas import tpu as pltpu

BN_EPS = 1e-5


def _round_up(n, m):
    return ((n + m - 1) // m) * m


def _pad_axis_to(arr, axis, mult):
    size = arr.shape[axis]
    target = _round_up(size, mult)
    if target == size:
        return arr
    pad = [(0, 0)] * arr.ndim
    pad[axis] = (0, target - size)
    return jnp.pad(arr, pad)


# --------------------------------------------------------------------------
# Pallas kernels
# --------------------------------------------------------------------------
def _make_conv_bn_kernel(has_res, do_relu):
    """Fused: y = W @ P (MXU, f32 acc) -> batch-stat BN -> (+res) -> (ReLU)."""

    def kernel(p_ref, w_ref, g_ref, b_ref, *rest):
        if has_res:
            r_ref, o_ref = rest
        else:
            (o_ref,) = rest
        # (Cout, K) bf16 @ (K, M) bf16 -> (Cout, M) f32, M lane-dense.
        y = jnp.dot(w_ref[...], p_ref[...], preferred_element_type=jnp.float32)
        inv_m = 1.0 / float(y.shape[1])          # true M (no M padding is used)
        # Two-pass batch statistics (numerically safer than E[x^2]-mean^2).
        mean = jnp.sum(y, axis=1, keepdims=True) * inv_m
        centered = y - mean
        var = jnp.sum(centered * centered, axis=1, keepdims=True) * inv_m
        scale = g_ref[...] * jax.lax.rsqrt(var + BN_EPS)   # EUP rsqrt
        out = centered * scale + b_ref[...]
        if has_res:
            out = out + r_ref[...]
        if do_relu:
            out = jnp.maximum(out, 0.0)
        o_ref[...] = out

    return kernel


def conv_bn(patches, w_mat, gamma, beta, residual=None, relu=True):
    """One fused pallas_call per conv+BN(+residual)(+ReLU). Whole operands are
    resident in VMEM (largest call is < 1 MiB), so a single grid step is used."""
    K, M = patches.shape
    cout = w_mat.shape[0]
    operands = [patches, w_mat, gamma, beta]
    in_specs = [pl.BlockSpec((K, M), lambda i: (0, 0)),
                pl.BlockSpec((cout, K), lambda i: (0, 0)),
                pl.BlockSpec((cout, 1), lambda i: (0, 0)),
                pl.BlockSpec((cout, 1), lambda i: (0, 0))]
    if residual is not None:
        operands.append(residual)
        in_specs.append(pl.BlockSpec((cout, M), lambda i: (0, 0)))
    return pl.pallas_call(
        _make_conv_bn_kernel(residual is not None, relu),
        out_shape=jax.ShapeDtypeStruct((cout, M), jnp.float32),
        grid=(1,),
        in_specs=in_specs,
        out_specs=pl.BlockSpec((cout, M), lambda i: (0, 0)),
        compiler_params=pltpu.CompilerParams(
            dimension_semantics=("arbitrary",)),
    )(*operands)


def _pool_fc_kernel(x_ref, w_ref, b_ref, o_ref):
    pooled = jnp.mean(x_ref[...], axis=2)                       # (C, N)
    o_ref[...] = jnp.dot(w_ref[...], pooled,
                         preferred_element_type=jnp.float32) + b_ref[...]


def pool_fc(rb3_cnhw, fc_w, fc_b):
    """Fused AvgPool2d(8) + Linear in one tiny kernel."""
    C, N, H, W = rb3_cnhw.shape
    x = rb3_cnhw.reshape(C, N, H * W)
    ncls = fc_w.shape[0]
    out = pl.pallas_call(
        _pool_fc_kernel,
        out_shape=jax.ShapeDtypeStruct((ncls, N), jnp.float32),
        grid=(1,),
        in_specs=[pl.BlockSpec((C, N, H * W), lambda i: (0, 0, 0)),
                  pl.BlockSpec((ncls, C), lambda i: (0, 0)),
                  pl.BlockSpec((ncls, 1), lambda i: (0, 0))],
        out_specs=pl.BlockSpec((ncls, N), lambda i: (0, 0)),
        compiler_params=pltpu.CompilerParams(
            dimension_semantics=("arbitrary",)),
    )(x, fc_w, fc_b)
    return out.T                                                # (N, ncls)


# --------------------------------------------------------------------------
# im2col glue (XLA) -> (K, M) bf16 patches, K ordered (kh, kw, cin)
# --------------------------------------------------------------------------
# TODO(synk): patch gathering is still done in XLA; in-kernel tap gathering
# (9 shifted pl.ds reads) would cut patch HBM traffic further but is not
# needed at these sizes.
def im2col_3x3(x_cnhw, stride):
    C, N, H, W = x_cnhw.shape
    OH = (H + 2 - 3) // stride + 1
    OW = (W + 2 - 3) // stride + 1
    xp = jnp.pad(x_cnhw, ((0, 0), (0, 0), (1, 1), (1, 1)))
    taps = []
    for kh in range(3):
        for kw in range(3):
            taps.append(xp[:, :, kh:kh + (OH - 1) * stride + 1:stride,
                              kw:kw + (OW - 1) * stride + 1:stride])
    pat = jnp.stack(taps, axis=0).reshape(9 * C, N * OH * OW)
    pat = _pad_axis_to(pat, 0, 8)          # sublane-align K (only stem: 27->32)
    return pat.astype(jnp.bfloat16), (N, OH, OW)


def resblock_forward(x_cnhw, p):
    cin = x_cnhw.shape[0]
    cout = p["conv1_w"].shape[0]
    downsample = "ds_w" in p
    if downsample:
        pat1, (n, oh, ow) = im2col_3x3(x_cnhw, stride=2)
        xs = x_cnhw[:, :, ::2, ::2].reshape(cin, n * oh * ow)
        xs = _pad_axis_to(xs, 0, 8).astype(jnp.bfloat16)
        residual = conv_bn(xs, p["ds_w"], p["ds_g"], p["ds_b"], relu=False)
    else:
        pat1, (n, oh, ow) = im2col_3x3(x_cnhw, stride=1)
        residual = x_cnhw.reshape(cin, -1)
    o1 = conv_bn(pat1, p["conv1_w"], p["bn1_g"], p["bn1_b"], relu=True)
    pat2, _ = im2col_3x3(o1.reshape(cout, n, oh, ow), stride=1)
    o2 = conv_bn(pat2, p["conv2_w"], p["bn2_g"], p["bn2_b"],
                 residual=residual, relu=True)
    return o2.reshape(cout, n, oh, ow)


# --------------------------------------------------------------------------
# Parameters: PyTorch-style init, then one-time (hoisted) kernel prep
# --------------------------------------------------------------------------
def init_params(seed=0, num_class=10):
    keys = iter(jax.random.split(jax.random.PRNGKey(seed), 64))

    def conv_init(cout, cin, kh, kw):
        fan_out = cout * kh * kw                 # kaiming_normal_, mode=fan_out
        std = (2.0 / fan_out) ** 0.5
        return std * jax.random.normal(next(keys), (cout, cin, kh, kw),
                                       jnp.float32)

    def block_init(cin, cout):
        p = {"conv1_w": conv_init(cout, cin, 3, 3),
             "bn1_g": jnp.ones((cout,), jnp.float32),
             "bn1_b": jnp.zeros((cout,), jnp.float32),
             "conv2_w": conv_init(cout, cout, 3, 3),
             "bn2_g": jnp.ones((cout,), jnp.float32),
             "bn2_b": jnp.zeros((cout,), jnp.float32)}
        if cin != cout:
            p["ds_w"] = conv_init(cout, cin, 1, 1)
            p["ds_g"] = jnp.ones((cout,), jnp.float32)
            p["ds_b"] = jnp.zeros((cout,), jnp.float32)
        return p

    params = {
        "conv1_w": conv_init(16, 3, 3, 3),
        "bn1_g": jnp.ones((16,), jnp.float32),
        "bn1_b": jnp.zeros((16,), jnp.float32),
        "res1": [block_init(16, 16), block_init(16, 16), block_init(16, 16)],
        "res2": [block_init(16, 32), block_init(32, 32), block_init(32, 32)],
        "res3": [block_init(32, 64), block_init(64, 64), block_init(64, 64)],
    }
    bound = 1.0 / (64.0 ** 0.5)                  # PyTorch Linear default init
    params["fc_w"] = jax.random.uniform(next(keys), (num_class, 64),
                                        jnp.float32, -bound, bound)
    params["fc_b"] = jax.random.uniform(next(keys), (num_class,),
                                        jnp.float32, -bound, bound)
    return params


def prepare_params(raw):
    """Hoisted weight prep: conv -> (Cout, K) bf16 matmul weights, K ordered
    (kh, kw, cin) and sublane-padded; BN/fc vectors become (C, 1) columns."""

    def prep_conv3(w):
        cout, cin = w.shape[0], w.shape[1]
        wm = jnp.transpose(w, (0, 2, 3, 1)).reshape(cout, 9 * cin)
        return _pad_axis_to(wm, 1, 8).astype(jnp.bfloat16)

    def prep_conv1(w):
        cout, cin = w.shape[0], w.shape[1]
        return _pad_axis_to(w.reshape(cout, cin), 1, 8).astype(jnp.bfloat16)

    def col(v):
        return v.reshape(-1, 1).astype(jnp.float32)

    def prep_block(p):
        q = {"conv1_w": prep_conv3(p["conv1_w"]),
             "bn1_g": col(p["bn1_g"]), "bn1_b": col(p["bn1_b"]),
             "conv2_w": prep_conv3(p["conv2_w"]),
             "bn2_g": col(p["bn2_g"]), "bn2_b": col(p["bn2_b"])}
        if "ds_w" in p:
            q["ds_w"] = prep_conv1(p["ds_w"])
            q["ds_g"] = col(p["ds_g"])
            q["ds_b"] = col(p["ds_b"])
        return q

    return {
        "conv1_w": prep_conv3(raw["conv1_w"]),
        "bn1_g": col(raw["bn1_g"]), "bn1_b": col(raw["bn1_b"]),
        "res1": [prep_block(p) for p in raw["res1"]],
        "res2": [prep_block(p) for p in raw["res2"]],
        "res3": [prep_block(p) for p in raw["res3"]],
        "fc_w": raw["fc_w"].astype(jnp.float32),
        "fc_b": col(raw["fc_b"]),
    }


# --------------------------------------------------------------------------
# Full forward pass (returns (pre, rb1, rb2, rb3, logits) like the nn.Module)
# --------------------------------------------------------------------------
@jax.jit
def resnet20_forward(params, x_nchw):
    # NCHW -> CNHW so activations are (C, M=N*H*W) with M lane-dense.
    x = jnp.transpose(x_nchw.astype(jnp.float32), (1, 0, 2, 3))

    pat, (n, oh, ow) = im2col_3x3(x, stride=1)
    pre = conv_bn(pat, params["conv1_w"], params["bn1_g"], params["bn1_b"],
                  relu=True).reshape(16, n, oh, ow)

    rb = pre
    for p in params["res1"]:
        rb = resblock_forward(rb, p)
    rb1 = rb
    for p in params["res2"]:
        rb = resblock_forward(rb, p)
    rb2 = rb
    for p in params["res3"]:
        rb = resblock_forward(rb, p)
    rb3 = rb                                               # (64, N, 8, 8)

    logits = pool_fc(rb3, params["fc_w"], params["fc_b"])  # (N, num_class)

    to_nchw = lambda t: jnp.transpose(t, (1, 0, 2, 3))
    return (to_nchw(pre), to_nchw(rb1), to_nchw(rb2), to_nchw(rb3), logits)


if __name__ == "__main__":
    # resnet20's avgpool(8) after two stride-2 stages implies 32x32 inputs.
    x = jax.random.normal(jax.random.PRNGKey(0), (2, 3, 32, 32), jnp.float32)
    params = prepare_params(init_params(seed=0, num_class=10))

    pre, rb1, rb2, rb3, out = resnet20_forward(params, x)
    jax.block_until_ready(out)

    assert pre.shape == (2, 16, 32, 32)
    assert rb1.shape == (2, 16, 32, 32)
    assert rb2.shape == (2, 32, 16, 16)
    assert rb3.shape == (2, 64, 8, 8)
    assert out.shape == (2, 10)
    print("KERNEL_OK")
</pallas_src>

<mosaic_0001>
module attributes {stable_mosaic.version = 11 : i64} {
  func.func @kernel(%arg0: i32, %arg1: memref<32x2048xbf16, #tpu.memory_space<vmem>>, %arg2: memref<16x32xbf16, #tpu.memory_space<vmem>>, %arg3: memref<16x1xf32, #tpu.memory_space<vmem>>, %arg4: memref<16x1xf32, #tpu.memory_space<vmem>>, %arg5: memref<16x2048xf32, #tpu.memory_space<vmem>>) attributes {dimension_semantics = [#tpu.dimension_semantics<arbitrary>], iteration_bounds = array<i64: 1>, scalar_prefetch = 0 : i64, scratch_operands = 0 : i64, tpu.core_type = #tpu.core_type<tc>, window_params = [{pipeline_mode = #tpu.pipeline_mode<synchronous>, transform_indices = @transform_0, window_bounds = array<i64: 32, 2048>}, {pipeline_mode = #tpu.pipeline_mode<synchronous>, transform_indices = @transform_1, window_bounds = array<i64: 16, 32>}, {pipeline_mode = #tpu.pipeline_mode<synchronous>, transform_indices = @transform_2, window_bounds = array<i64: 16, 1>}, {pipeline_mode = #tpu.pipeline_mode<synchronous>, transform_indices = @transform_3, window_bounds = array<i64: 16, 1>}, {pipeline_mode = #tpu.pipeline_mode<synchronous>, transform_indices = @transform_4, window_bounds = array<i64: 16, 2048>}]} {
    %c0 = arith.constant 0 : index
    %c0_0 = arith.constant 0 : index
    %0 = vector.load %arg2[%c0, %c0_0] : memref<16x32xbf16, #tpu.memory_space<vmem>>, vector<16x32xbf16>
    %c0_1 = arith.constant 0 : index
    %c0_2 = arith.constant 0 : index
    %1 = vector.load %arg1[%c0_1, %c0_2] : memref<32x2048xbf16, #tpu.memory_space<vmem>>, vector<32x2048xbf16>
    %cst = arith.constant dense<0.000000e+00> : vector<16x2048xf32>
    %2 = tpu.matmul %0, %1, %cst {dimension_numbers = #tpu.dot_dimension_numbers<[1], [0], [0], [1], [0, 0, 1, 1], [], []>} : vector<16x32xbf16>, vector<32x2048xbf16>, vector<16x2048xf32> -> vector<16x2048xf32>
    %cst_3 = arith.constant dense<0.000000e+00> : vector<16xf32>
    %3 = vector.multi_reduction <add>, %2, %cst_3 [1] : vector<16x2048xf32> to vector<16xf32>
    %4 = vector.shape_cast %3 : vector<16xf32> to vector<16x1xf32>
    %cst_4 = arith.constant 4.8828125E-4 : f32
    %5 = vector.broadcast %cst_4 : f32 to vector<16x1xf32>
    %6 = arith.mulf %4, %5 : vector<16x1xf32>
    %7 = vector.broadcast %6 : vector<16x1xf32> to vector<16x2048xf32>
    %8 = arith.subf %2, %7 : vector<16x2048xf32>
    %9 = arith.mulf %8, %8 : vector<16x2048xf32>
    %cst_5 = arith.constant dense<0.000000e+00> : vector<16xf32>
    %10 = vector.multi_reduction <add>, %9, %cst_5 [1] : vector<16x2048xf32> to vector<16xf32>
    %11 = vector.shape_cast %10 : vector<16xf32> to vector<16x1xf32>
    %cst_6 = arith.constant 4.8828125E-4 : f32
    %12 = vector.broadcast %cst_6 : f32 to vector<16x1xf32>
    %13 = arith.mulf %11, %12 : vector<16x1xf32>
    %c0_7 = arith.constant 0 : index
    %c0_8 = arith.constant 0 : index
    %14 = vector.load %arg3[%c0_7, %c0_8] : memref<16x1xf32, #tpu.memory_space<vmem>>, vector<16x1xf32>
    %cst_9 = arith.constant 9.99999974E-6 : f32
    %15 = vector.broadcast %cst_9 : f32 to vector<16x1xf32>
    %16 = arith.addf %13, %15 : vector<16x1xf32>
    %17 = math.rsqrt %16 : vector<16x1xf32>
    %18 = arith.mulf %14, %17 : vector<16x1xf32>
    %19 = vector.broadcast %18 : vector<16x1xf32> to vector<16x2048xf32>
    %20 = arith.mulf %8, %19 : vector<16x2048xf32>
    %c0_10 = arith.constant 0 : index
    %c0_11 = arith.constant 0 : index
    %21 = vector.load %arg4[%c0_10, %c0_11] : memref<16x1xf32, #tpu.memory_space<vmem>>, vector<16x1xf32>
    %22 = vector.broadcast %21 : vector<16x1xf32> to vector<16x2048xf32>
    %23 = arith.addf %20, %22 : vector<16x2048xf32>
    %cst_12 = arith.constant 0.000000e+00 : f32
    %24 = vector.broadcast %cst_12 : f32 to vector<16x2048xf32>
    %25 = arith.maximumf %23, %24 : vector<16x2048xf32>
    %c0_13 = arith.constant 0 : index
    %c0_14 = arith.constant 0 : index
    %26 = vector.load %arg5[%c0_13, %c0_14] : memref<16x2048xf32, #tpu.memory_space<vmem>>, vector<16x2048xf32>
    tpu.vector_store %arg5[%c0_13, %c0_14], %25 {strides = array<i32>} : memref<16x2048xf32, #tpu.memory_space<vmem>>, vector<16x2048xf32>,
    return
  }
  func.func @transform_0(%arg0: i32) -> (i32, i32) {
    %c0_i32 = arith.constant 0 : i32
    %c0_i32_0 = arith.constant 0 : i32
    %c0_i32_1 = arith.constant 0 : i32
    return %c0_i32, %c0_i32_0 : i32, i32
  }
  func.func @transform_1(%arg0: i32) -> (i32, i32) {
    %c0_i32 = arith.constant 0 : i32
    %c0_i32_0 = arith.constant 0 : i32
    %c0_i32_1 = arith.constant 0 : i32
    return %c0_i32, %c0_i32_0 : i32, i32
  }
  func.func @transform_2(%arg0: i32) -> (i32, i32) {
    %c0_i32 = arith.constant 0 : i32
    %c0_i32_0 = arith.constant 0 : i32
    %c0_i32_1 = arith.constant 0 : i32
    return %c0_i32, %c0_i32_0 : i32, i32
  }
  func.func @transform_3(%arg0: i32) -> (i32, i32) {
    %c0_i32 = arith.constant 0 : i32
    %c0_i32_0 = arith.constant 0 : i32
    %c0_i32_1 = arith.constant 0 : i32
    return %c0_i32, %c0_i32_0 : i32, i32
  }
  func.func @transform_4(%arg0: i32) -> (i32, i32) {
    %c0_i32 = arith.constant 0 : i32
    %c0_i32_0 = arith.constant 0 : i32
    %c0_i32_1 = arith.constant 0 : i32
    return %c0_i32, %c0_i32_0 : i32, i32
  }
}

module attributes {stable_mosaic.version = 11 : i64} {
  func.func @kernel(%arg0: i32, %arg1: memref<144x2048xbf16, #tpu.memory_space<vmem>>, %arg2: memref<16x144xbf16, #tpu.memory_space<vmem>>, %arg3: memref<16x1xf32, #tpu.memory_space<vmem>>, %arg4: memref<16x1xf32, #tpu.memory_space<vmem>>, %arg5: memref<16x2048xf32, #tpu.memory_space<vmem>>) attributes {dimension_semantics = [#tpu.dimension_semantics<arbitrary>], iteration_bounds = array<i64: 1>, scalar_prefetch = 0 : i64, scratch_operands = 0 : i64, tpu.core_type = #tpu.core_type<tc>, window_params = [{pipeline_mode = #tpu.pipeline_mode<synchronous>, transform_indices = @transform_0, window_bounds = array<i64: 144, 2048>}, {pipeline_mode = #tpu.pipeline_mode<synchronous>, transform_indices = @transform_1, window_bounds = array<i64: 16, 144>}, {pipeline_mode = #tpu.pipeline_mode<synchronous>, transform_indices = @transform_2, window_bounds = array<i64: 16, 1>}, {pipeline_mode = #tpu.pipeline_mode<synchronous>, transform_indices = @transform_3, window_bounds = array<i64: 16, 1>}, {pipeline_mode = #tpu.pipeline_mode<synchronous>, transform_indices = @transform_4, window_bounds = array<i64: 16, 2048>}]} {
    %c0 = arith.constant 0 : index
    %c0_0 = arith.constant 0 : index
    %0 = vector.load %arg2[%c0, %c0_0] : memref<16x144xbf16, #tpu.memory_space<vmem>>, vector<16x144xbf16>
    %c0_1 = arith.constant 0 : index
    %c0_2 = arith.constant 0 : index
    %1 = vector.load %arg1[%c0_1, %c0_2] : memref<144x2048xbf16, #tpu.memory_space<vmem>>, vector<144x2048xbf16>
    %cst = arith.constant dense<0.000000e+00> : vector<16x2048xf32>
    %2 = tpu.matmul %0, %1, %cst {dimension_numbers = #tpu.dot_dimension_numbers<[1], [0], [0], [1], [0, 0, 1, 1], [], []>} : vector<16x144xbf16>, vector<144x2048xbf16>, vector<16x2048xf32> -> vector<16x2048xf32>
    %cst_3 = arith.constant dense<0.000000e+00> : vector<16xf32>
    %3 = vector.multi_reduction <add>, %2, %cst_3 [1] : vector<16x2048xf32> to vector<16xf32>
    %4 = vector.shape_cast %3 : vector<16xf32> to vector<16x1xf32>
    %cst_4 = arith.constant 4.8828125E-4 : f32
    %5 = vector.broadcast %cst_4 : f32 to vector<16x1xf32>
    %6 = arith.mulf %4, %5 : vector<16x1xf32>
    %7 = vector.broadcast %6 : vector<16x1xf32> to vector<16x2048xf32>
    %8 = arith.subf %2, %7 : vector<16x2048xf32>
    %9 = arith.mulf %8, %8 : vector<16x2048xf32>
    %cst_5 = arith.constant dense<0.000000e+00> : vector<16xf32>
    %10 = vector.multi_reduction <add>, %9, %cst_5 [1] : vector<16x2048xf32> to vector<16xf32>
    %11 = vector.shape_cast %10 : vector<16xf32> to vector<16x1xf32>
    %cst_6 = arith.constant 4.8828125E-4 : f32
    %12 = vector.broadcast %cst_6 : f32 to vector<16x1xf32>
    %13 = arith.mulf %11, %12 : vector<16x1xf32>
    %c0_7 = arith.constant 0 : index
    %c0_8 = arith.constant 0 : index
    %14 = vector.load %arg3[%c0_7, %c0_8] : memref<16x1xf32, #tpu.memory_space<vmem>>, vector<16x1xf32>
    %cst_9 = arith.constant 9.99999974E-6 : f32
    %15 = vector.broadcast %cst_9 : f32 to vector<16x1xf32>
    %16 = arith.addf %13, %15 : vector<16x1xf32>
    %17 = math.rsqrt %16 : vector<16x1xf32>
    %18 = arith.mulf %14, %17 : vector<16x1xf32>
    %19 = vector.broadcast %18 : vector<16x1xf32> to vector<16x2048xf32>
    %20 = arith.mulf %8, %19 : vector<16x2048xf32>
    %c0_10 = arith.constant 0 : index
    %c0_11 = arith.constant 0 : index
    %21 = vector.load %arg4[%c0_10, %c0_11] : memref<16x1xf32, #tpu.memory_space<vmem>>, vector<16x1xf32>
    %22 = vector.broadcast %21 : vector<16x1xf32> to vector<16x2048xf32>
    %23 = arith.addf %20, %22 : vector<16x2048xf32>
    %cst_12 = arith.constant 0.000000e+00 : f32
    %24 = vector.broadcast %cst_12 : f32 to vector<16x2048xf32>
    %25 = arith.maximumf %23, %24 : vector<16x2048xf32>
    %c0_13 = arith.constant 0 : index
    %c0_14 = arith.constant 0 : index
    %26 = vector.load %arg5[%c0_13, %c0_14] : memref<16x2048xf32, #tpu.memory_space<vmem>>, vector<16x2048xf32>
    tpu.vector_store %arg5[%c0_13, %c0_14], %25 {strides = array<i32>} : memref<16x2048xf32, #tpu.memory_space<vmem>>, vector<16x2048xf32>,
    return
  }
  func.func @transform_0(%arg0: i32) -> (i32, i32) {
    %c0_i32 = arith.constant 0 : i32
    %c0_i32_0 = arith.constant 0 : i32
    %c0_i32_1 = arith.constant 0 : i32
    return %c0_i32, %c0_i32_0 : i32, i32
  }
  func.func @transform_1(%arg0: i32) -> (i32, i32) {
    %c0_i32 = arith.constant 0 : i32
    %c0_i32_0 = arith.constant 0 : i32
    %c0_i32_1 = arith.constant 0 : i32
    return %c0_i32, %c0_i32_0 : i32, i32
  }
  func.func @transform_2(%arg0: i32) -> (i32, i32) {
    %c0_i32 = arith.constant 0 : i32
    %c0_i32_0 = arith.constant 0 : i32
    %c0_i32_1 = arith.constant 0 : i32
    return %c0_i32, %c0_i32_0 : i32, i32
  }
  func.func @transform_3(%arg0: i32) -> (i32, i32) {
    %c0_i32 = arith.constant 0 : i32
    %c0_i32_0 = arith.constant 0 : i32
    %c0_i32_1 = arith.constant 0 : i32
    return %c0_i32, %c0_i32_0 : i32, i32
  }
  func.func @transform_4(%arg0: i32) -> (i32, i32) {
    %c0_i32 = arith.constant 0 : i32
    %c0_i32_0 = arith.constant 0 : i32
    %c0_i32_1 = arith.constant 0 : i32
    return %c0_i32, %c0_i32_0 : i32, i32
  }
}

module attributes {stable_mosaic.version = 11 : i64} {
  func.func @kernel(%arg0: i32, %arg1: memref<144x2048xbf16, #tpu.memory_space<vmem>>, %arg2: memref<16x144xbf16, #tpu.memory_space<vmem>>, %arg3: memref<16x1xf32, #tpu.memory_space<vmem>>, %arg4: memref<16x1xf32, #tpu.memory_space<vmem>>, %arg5: memref<16x2048xf32, #tpu.memory_space<vmem>>, %arg6: memref<16x2048xf32, #tpu.memory_space<vmem>>) attributes {dimension_semantics = [#tpu.dimension_semantics<arbitrary>], iteration_bounds = array<i64: 1>, scalar_prefetch = 0 : i64, scratch_operands = 0 : i64, tpu.core_type = #tpu.core_type<tc>, window_params = [{pipeline_mode = #tpu.pipeline_mode<synchronous>, transform_indices = @transform_0, window_bounds = array<i64: 144, 2048>}, {pipeline_mode = #tpu.pipeline_mode<synchronous>, transform_indices = @transform_1, window_bounds = array<i64: 16, 144>}, {pipeline_mode = #tpu.pipeline_mode<synchronous>, transform_indices = @transform_2, window_bounds = array<i64: 16, 1>}, {pipeline_mode = #tpu.pipeline_mode<synchronous>, transform_indices = @transform_3, window_bounds = array<i64: 16, 1>}, {pipeline_mode = #tpu.pipeline_mode<synchronous>, transform_indices = @transform_4, window_bounds = array<i64: 16, 2048>}, {pipeline_mode = #tpu.pipeline_mode<synchronous>, transform_indices = @transform_5, window_bounds = array<i64: 16, 2048>}]} {
    %c0 = arith.constant 0 : index
    %c0_0 = arith.constant 0 : index
    %0 = vector.load %arg2[%c0, %c0_0] : memref<16x144xbf16, #tpu.memory_space<vmem>>, vector<16x144xbf16>
    %c0_1 = arith.constant 0 : index
    %c0_2 = arith.constant 0 : index
    %1 = vector.load %arg1[%c0_1, %c0_2] : memref<144x2048xbf16, #tpu.memory_space<vmem>>, vector<144x2048xbf16>
    %cst = arith.constant dense<0.000000e+00> : vector<16x2048xf32>
    %2 = tpu.matmul %0, %1, %cst {dimension_numbers = #tpu.dot_dimension_numbers<[1], [0], [0], [1], [0, 0, 1, 1], [], []>} : vector<16x144xbf16>, vector<144x2048xbf16>, vector<16x2048xf32> -> vector<16x2048xf32>
    %cst_3 = arith.constant dense<0.000000e+00> : vector<16xf32>
    %3 = vector.multi_reduction <add>, %2, %cst_3 [1] : vector<16x2048xf32> to vector<16xf32>
    %4 = vector.shape_cast %3 : vector<16xf32> to vector<16x1xf32>
    %cst_4 = arith.constant 4.8828125E-4 : f32
    %5 = vector.broadcast %cst_4 : f32 to vector<16x1xf32>
    %6 = arith.mulf %4, %5 : vector<16x1xf32>
    %7 = vector.broadcast %6 : vector<16x1xf32> to vector<16x2048xf32>
    %8 = arith.subf %2, %7 : vector<16x2048xf32>
    %9 = arith.mulf %8, %8 : vector<16x2048xf32>
    %cst_5 = arith.constant dense<0.000000e+00> : vector<16xf32>
    %10 = vector.multi_reduction <add>, %9, %cst_5 [1] : vector<16x2048xf32> to vector<16xf32>
    %11 = vector.shape_cast %10 : vector<16xf32> to vector<16x1xf32>
    %cst_6 = arith.constant 4.8828125E-4 : f32
    %12 = vector.broadcast %cst_6 : f32 to vector<16x1xf32>
    %13 = arith.mulf %11, %12 : vector<16x1xf32>
    %c0_7 = arith.constant 0 : index
    %c0_8 = arith.constant 0 : index
    %14 = vector.load %arg3[%c0_7, %c0_8] : memref<16x1xf32, #tpu.memory_space<vmem>>, vector<16x1xf32>
    %cst_9 = arith.constant 9.99999974E-6 : f32
    %15 = vector.broadcast %cst_9 : f32 to vector<16x1xf32>
    %16 = arith.addf %13, %15 : vector<16x1xf32>
    %17 = math.rsqrt %16 : vector<16x1xf32>
    %18 = arith.mulf %14, %17 : vector<16x1xf32>
    %19 = vector.broadcast %18 : vector<16x1xf32> to vector<16x2048xf32>
    %20 = arith.mulf %8, %19 : vector<16x2048xf32>
    %c0_10 = arith.constant 0 : index
    %c0_11 = arith.constant 0 : index
    %21 = vector.load %arg4[%c0_10, %c0_11] : memref<16x1xf32, #tpu.memory_space<vmem>>, vector<16x1xf32>
    %22 = vector.broadcast %21 : vector<16x1xf32> to vector<16x2048xf32>
    %23 = arith.addf %20, %22 : vector<16x2048xf32>
    %c0_12 = arith.constant 0 : index
    %c0_13 = arith.constant 0 : index
    %24 = vector.load %arg5[%c0_12, %c0_13] : memref<16x2048xf32, #tpu.memory_space<vmem>>, vector<16x2048xf32>
    %25 = arith.addf %23, %24 : vector<16x2048xf32>
    %cst_14 = arith.constant 0.000000e+00 : f32
    %26 = vector.broadcast %cst_14 : f32 to vector<16x2048xf32>
    %27 = arith.maximumf %25, %26 : vector<16x2048xf32>
    %c0_15 = arith.constant 0 : index
    %c0_16 = arith.constant 0 : index
    %28 = vector.load %arg6[%c0_15, %c0_16] : memref<16x2048xf32, #tpu.memory_space<vmem>>, vector<16x2048xf32>
    tpu.vector_store %arg6[%c0_15, %c0_16], %27 {strides = array<i32>} : memref<16x2048xf32, #tpu.memory_space<vmem>>, vector<16x2048xf32>,
    return
  }
  func.func @transform_0(%arg0: i32) -> (i32, i32) {
    %c0_i32 = arith.constant 0 : i32
    %c0_i32_0 = arith.constant 0 : i32
    %c0_i32_1 = arith.constant 0 : i32
    return %c0_i32, %c0_i32_0 : i32, i32
  }
  func.func @transform_1(%arg0: i32) -> (i32, i32) {
    %c0_i32 = arith.constant 0 : i32
    %c0_i32_0 = arith.constant 0 : i32
    %c0_i32_1 = arith.constant 0 : i32
    return %c0_i32, %c0_i32_0 : i32, i32
  }
  func.func @transform_2(%arg0: i32) -> (i32, i32) {
    %c0_i32 = arith.constant 0 : i32
    %c0_i32_0 = arith.constant 0 : i32
    %c0_i32_1 = arith.constant 0 : i32
    return %c0_i32, %c0_i32_0 : i32, i32
  }
  func.func @transform_3(%arg0: i32) -> (i32, i32) {
    %c0_i32 = arith.constant 0 : i32
    %c0_i32_0 = arith.constant 0 : i32
    %c0_i32_1 = arith.constant 0 : i32
    return %c0_i32, %c0_i32_0 : i32, i32
  }
  func.func @transform_4(%arg0: i32) -> (i32, i32) {
    %c0_i32 = arith.constant 0 : i32
    %c0_i32_0 = arith.constant 0 : i32
    %c0_i32_1 = arith.constant 0 : i32
    return %c0_i32, %c0_i32_0 : i32, i32
  }
  func.func @transform_5(%arg0: i32) -> (i32, i32) {
    %c0_i32 = arith.constant 0 : i32
    %c0_i32_0 = arith.constant 0 : i32
    %c0_i32_1 = arith.constant 0 : i32
    return %c0_i32, %c0_i32_0 : i32, i32
  }
}

module attributes {stable_mosaic.version = 11 : i64} {
  func.func @kernel(%arg0: i32, %arg1: memref<144x512xbf16, #tpu.memory_space<vmem>>, %arg2: memref<32x144xbf16, #tpu.memory_space<vmem>>, %arg3: memref<32x1xf32, #tpu.memory_space<vmem>>, %arg4: memref<32x1xf32, #tpu.memory_space<vmem>>, %arg5: memref<32x512xf32, #tpu.memory_space<vmem>>) attributes {dimension_semantics = [#tpu.dimension_semantics<arbitrary>], iteration_bounds = array<i64: 1>, scalar_prefetch = 0 : i64, scratch_operands = 0 : i64, tpu.core_type = #tpu.core_type<tc>, window_params = [{pipeline_mode = #tpu.pipeline_mode<synchronous>, transform_indices = @transform_0, window_bounds = array<i64: 144, 512>}, {pipeline_mode = #tpu.pipeline_mode<synchronous>, transform_indices = @transform_1, window_bounds = array<i64: 32, 144>}, {pipeline_mode = #tpu.pipeline_mode<synchronous>, transform_indices = @transform_2, window_bounds = array<i64: 32, 1>}, {pipeline_mode = #tpu.pipeline_mode<synchronous>, transform_indices = @transform_3, window_bounds = array<i64: 32, 1>}, {pipeline_mode = #tpu.pipeline_mode<synchronous>, transform_indices = @transform_4, window_bounds = array<i64: 32, 512>}]} {
    %c0 = arith.constant 0 : index
    %c0_0 = arith.constant 0 : index
    %0 = vector.load %arg2[%c0, %c0_0] : memref<32x144xbf16, #tpu.memory_space<vmem>>, vector<32x144xbf16>
    %c0_1 = arith.constant 0 : index
    %c0_2 = arith.constant 0 : index
    %1 = vector.load %arg1[%c0_1, %c0_2] : memref<144x512xbf16, #tpu.memory_space<vmem>>, vector<144x512xbf16>
    %cst = arith.constant dense<0.000000e+00> : vector<32x512xf32>
    %2 = tpu.matmul %0, %1, %cst {dimension_numbers = #tpu.dot_dimension_numbers<[1], [0], [0], [1], [0, 0, 1, 1], [], []>} : vector<32x144xbf16>, vector<144x512xbf16>, vector<32x512xf32> -> vector<32x512xf32>
    %cst_3 = arith.constant dense<0.000000e+00> : vector<32xf32>
    %3 = vector.multi_reduction <add>, %2, %cst_3 [1] : vector<32x512xf32> to vector<32xf32>
    %4 = vector.shape_cast %3 : vector<32xf32> to vector<32x1xf32>
    %cst_4 = arith.constant 0.001953125 : f32
    %5 = vector.broadcast %cst_4 : f32 to vector<32x1xf32>
    %6 = arith.mulf %4, %5 : vector<32x1xf32>
    %7 = vector.broadcast %6 : vector<32x1xf32> to vector<32x512xf32>
    %8 = arith.subf %2, %7 : vector<32x512xf32>
    %9 = arith.mulf %8, %8 : vector<32x512xf32>
    %cst_5 = arith.constant dense<0.000000e+00> : vector<32xf32>
    %10 = vector.multi_reduction <add>, %9, %cst_5 [1] : vector<32x512xf32> to vector<32xf32>
    %11 = vector.shape_cast %10 : vector<32xf32> to vector<32x1xf32>
    %cst_6 = arith.constant 0.001953125 : f32
    %12 = vector.broadcast %cst_6 : f32 to vector<32x1xf32>
    %13 = arith.mulf %11, %12 : vector<32x1xf32>
    %c0_7 = arith.constant 0 : index
    %c0_8 = arith.constant 0 : index
    %14 = vector.load %arg3[%c0_7, %c0_8] : memref<32x1xf32, #tpu.memory_space<vmem>>, vector<32x1xf32>
    %cst_9 = arith.constant 9.99999974E-6 : f32
    %15 = vector.broadcast %cst_9 : f32 to vector<32x1xf32>
    %16 = arith.addf %13, %15 : vector<32x1xf32>
    %17 = math.rsqrt %16 : vector<32x1xf32>
    %18 = arith.mulf %14, %17 : vector<32x1xf32>
    %19 = vector.broadcast %18 : vector<32x1xf32> to vector<32x512xf32>
    %20 = arith.mulf %8, %19 : vector<32x512xf32>
    %c0_10 = arith.constant 0 : index
    %c0_11 = arith.constant 0 : index
    %21 = vector.load %arg4[%c0_10, %c0_11] : memref<32x1xf32, #tpu.memory_space<vmem>>, vector<32x1xf32>
    %22 = vector.broadcast %21 : vector<32x1xf32> to vector<32x512xf32>
    %23 = arith.addf %20, %22 : vector<32x512xf32>
    %cst_12 = arith.constant 0.000000e+00 : f32
    %24 = vector.broadcast %cst_12 : f32 to vector<32x512xf32>
    %25 = arith.maximumf %23, %24 : vector<32x512xf32>
    %c0_13 = arith.constant 0 : index
    %c0_14 = arith.constant 0 : index
    %26 = vector.load %arg5[%c0_13, %c0_14] : memref<32x512xf32, #tpu.memory_space<vmem>>, vector<32x512xf32>
    tpu.vector_store %arg5[%c0_13, %c0_14], %25 {strides = array<i32>} : memref<32x512xf32, #tpu.memory_space<vmem>>, vector<32x512xf32>,
    return
  }
  func.func @transform_0(%arg0: i32) -> (i32, i32) {
    %c0_i32 = arith.constant 0 : i32
    %c0_i32_0 = arith.constant 0 : i32
    %c0_i32_1 = arith.constant 0 : i32
    return %c0_i32, %c0_i32_0 : i32, i32
  }
  func.func @transform_1(%arg0: i32) -> (i32, i32) {
    %c0_i32 = arith.constant 0 : i32
    %c0_i32_0 = arith.constant 0 : i32
    %c0_i32_1 = arith.constant 0 : i32
    return %c0_i32, %c0_i32_0 : i32, i32
  }
  func.func @transform_2(%arg0: i32) -> (i32, i32) {
    %c0_i32 = arith.constant 0 : i32
    %c0_i32_0 = arith.constant 0 : i32
    %c0_i32_1 = arith.constant 0 : i32
    return %c0_i32, %c0_i32_0 : i32, i32
  }
  func.func @transform_3(%arg0: i32) -> (i32, i32) {
    %c0_i32 = arith.constant 0 : i32
    %c0_i32_0 = arith.constant 0 : i32
    %c0_i32_1 = arith.constant 0 : i32
    return %c0_i32, %c0_i32_0 : i32, i32
  }
  func.func @transform_4(%arg0: i32) -> (i32, i32) {
    %c0_i32 = arith.constant 0 : i32
    %c0_i32_0 = arith.constant 0 : i32
    %c0_i32_1 = arith.constant 0 : i32
    return %c0_i32, %c0_i32_0 : i32, i32
  }
}

module attributes {stable_mosaic.version = 11 : i64} {
  func.func @kernel(%arg0: i32, %arg1: memref<16x512xbf16, #tpu.memory_space<vmem>>, %arg2: memref<32x16xbf16, #tpu.memory_space<vmem>>, %arg3: memref<32x1xf32, #tpu.memory_space<vmem>>, %arg4: memref<32x1xf32, #tpu.memory_space<vmem>>, %arg5: memref<32x512xf32, #tpu.memory_space<vmem>>) attributes {dimension_semantics = [#tpu.dimension_semantics<arbitrary>], iteration_bounds = array<i64: 1>, scalar_prefetch = 0 : i64, scratch_operands = 0 : i64, tpu.core_type = #tpu.core_type<tc>, window_params = [{pipeline_mode = #tpu.pipeline_mode<synchronous>, transform_indices = @transform_0, window_bounds = array<i64: 16, 512>}, {pipeline_mode = #tpu.pipeline_mode<synchronous>, transform_indices = @transform_1, window_bounds = array<i64: 32, 16>}, {pipeline_mode = #tpu.pipeline_mode<synchronous>, transform_indices = @transform_2, window_bounds = array<i64: 32, 1>}, {pipeline_mode = #tpu.pipeline_mode<synchronous>, transform_indices = @transform_3, window_bounds = array<i64: 32, 1>}, {pipeline_mode = #tpu.pipeline_mode<synchronous>, transform_indices = @transform_4, window_bounds = array<i64: 32, 512>}]} {
    %c0 = arith.constant 0 : index
    %c0_0 = arith.constant 0 : index
    %0 = vector.load %arg2[%c0, %c0_0] : memref<32x16xbf16, #tpu.memory_space<vmem>>, vector<32x16xbf16>
    %c0_1 = arith.constant 0 : index
    %c0_2 = arith.constant 0 : index
    %1 = vector.load %arg1[%c0_1, %c0_2] : memref<16x512xbf16, #tpu.memory_space<vmem>>, vector<16x512xbf16>
    %cst = arith.constant dense<0.000000e+00> : vector<32x512xf32>
    %2 = tpu.matmul %0, %1, %cst {dimension_numbers = #tpu.dot_dimension_numbers<[1], [0], [0], [1], [0, 0, 1, 1], [], []>} : vector<32x16xbf16>, vector<16x512xbf16>, vector<32x512xf32> -> vector<32x512xf32>
    %cst_3 = arith.constant dense<0.000000e+00> : vector<32xf32>
    %3 = vector.multi_reduction <add>, %2, %cst_3 [1] : vector<32x512xf32> to vector<32xf32>
    %4 = vector.shape_cast %3 : vector<32xf32> to vector<32x1xf32>
    %cst_4 = arith.constant 0.001953125 : f32
    %5 = vector.broadcast %cst_4 : f32 to vector<32x1xf32>
    %6 = arith.mulf %4, %5 : vector<32x1xf32>
    %7 = vector.broadcast %6 : vector<32x1xf32> to vector<32x512xf32>
    %8 = arith.subf %2, %7 : vector<32x512xf32>
    %9 = arith.mulf %8, %8 : vector<32x512xf32>
    %cst_5 = arith.constant dense<0.000000e+00> : vector<32xf32>
    %10 = vector.multi_reduction <add>, %9, %cst_5 [1] : vector<32x512xf32> to vector<32xf32>
    %11 = vector.shape_cast %10 : vector<32xf32> to vector<32x1xf32>
    %cst_6 = arith.constant 0.001953125 : f32
    %12 = vector.broadcast %cst_6 : f32 to vector<32x1xf32>
    %13 = arith.mulf %11, %12 : vector<32x1xf32>
    %c0_7 = arith.constant 0 : index
    %c0_8 = arith.constant 0 : index
    %14 = vector.load %arg3[%c0_7, %c0_8] : memref<32x1xf32, #tpu.memory_space<vmem>>, vector<32x1xf32>
    %cst_9 = arith.constant 9.99999974E-6 : f32
    %15 = vector.broadcast %cst_9 : f32 to vector<32x1xf32>
    %16 = arith.addf %13, %15 : vector<32x1xf32>
    %17 = math.rsqrt %16 : vector<32x1xf32>
    %18 = arith.mulf %14, %17 : vector<32x1xf32>
    %19 = vector.broadcast %18 : vector<32x1xf32> to vector<32x512xf32>
    %20 = arith.mulf %8, %19 : vector<32x512xf32>
    %c0_10 = arith.constant 0 : index
    %c0_11 = arith.constant 0 : index
    %21 = vector.load %arg4[%c0_10, %c0_11] : memref<32x1xf32, #tpu.memory_space<vmem>>, vector<32x1xf32>
    %22 = vector.broadcast %21 : vector<32x1xf32> to vector<32x512xf32>
    %23 = arith.addf %20, %22 : vector<32x512xf32>
    %c0_12 = arith.constant 0 : index
    %c0_13 = arith.constant 0 : index
    %24 = vector.load %arg5[%c0_12, %c0_13] : memref<32x512xf32, #tpu.memory_space<vmem>>, vector<32x512xf32>
    tpu.vector_store %arg5[%c0_12, %c0_13], %23 {strides = array<i32>} : memref<32x512xf32, #tpu.memory_space<vmem>>, vector<32x512xf32>,
    return
  }
  func.func @transform_0(%arg0: i32) -> (i32, i32) {
    %c0_i32 = arith.constant 0 : i32
    %c0_i32_0 = arith.constant 0 : i32
    %c0_i32_1 = arith.constant 0 : i32
    return %c0_i32, %c0_i32_0 : i32, i32
  }
  func.func @transform_1(%arg0: i32) -> (i32, i32) {
    %c0_i32 = arith.constant 0 : i32
    %c0_i32_0 = arith.constant 0 : i32
    %c0_i32_1 = arith.constant 0 : i32
    return %c0_i32, %c0_i32_0 : i32, i32
  }
  func.func @transform_2(%arg0: i32) -> (i32, i32) {
    %c0_i32 = arith.constant 0 : i32
    %c0_i32_0 = arith.constant 0 : i32
    %c0_i32_1 = arith.constant 0 : i32
    return %c0_i32, %c0_i32_0 : i32, i32
  }
  func.func @transform_3(%arg0: i32) -> (i32, i32) {
    %c0_i32 = arith.constant 0 : i32
    %c0_i32_0 = arith.constant 0 : i32
    %c0_i32_1 = arith.constant 0 : i32
    return %c0_i32, %c0_i32_0 : i32, i32
  }
  func.func @transform_4(%arg0: i32) -> (i32, i32) {
    %c0_i32 = arith.constant 0 : i32
    %c0_i32_0 = arith.constant 0 : i32
    %c0_i32_1 = arith.constant 0 : i32
    return %c0_i32, %c0_i32_0 : i32, i32
  }
}

module attributes {stable_mosaic.version = 11 : i64} {
  func.func @kernel(%arg0: i32, %arg1: memref<288x512xbf16, #tpu.memory_space<vmem>>, %arg2: memref<32x288xbf16, #tpu.memory_space<vmem>>, %arg3: memref<32x1xf32, #tpu.memory_space<vmem>>, %arg4: memref<32x1xf32, #tpu.memory_space<vmem>>, %arg5: memref<32x512xf32, #tpu.memory_space<vmem>>, %arg6: memref<32x512xf32, #tpu.memory_space<vmem>>) attributes {dimension_semantics = [#tpu.dimension_semantics<arbitrary>], iteration_bounds = array<i64: 1>, scalar_prefetch = 0 : i64, scratch_operands = 0 : i64, tpu.core_type = #tpu.core_type<tc>, window_params = [{pipeline_mode = #tpu.pipeline_mode<synchronous>, transform_indices = @transform_0, window_bounds = array<i64: 288, 512>}, {pipeline_mode = #tpu.pipeline_mode<synchronous>, transform_indices = @transform_1, window_bounds = array<i64: 32, 288>}, {pipeline_mode = #tpu.pipeline_mode<synchronous>, transform_indices = @transform_2, window_bounds = array<i64: 32, 1>}, {pipeline_mode = #tpu.pipeline_mode<synchronous>, transform_indices = @transform_3, window_bounds = array<i64: 32, 1>}, {pipeline_mode = #tpu.pipeline_mode<synchronous>, transform_indices = @transform_4, window_bounds = array<i64: 32, 512>}, {pipeline_mode = #tpu.pipeline_mode<synchronous>, transform_indices = @transform_5, window_bounds = array<i64: 32, 512>}]} {
    %c0 = arith.constant 0 : index
    %c0_0 = arith.constant 0 : index
    %0 = vector.load %arg2[%c0, %c0_0] : memref<32x288xbf16, #tpu.memory_space<vmem>>, vector<32x288xbf16>
    %c0_1 = arith.constant 0 : index
    %c0_2 = arith.constant 0 : index
    %1 = vector.load %arg1[%c0_1, %c0_2] : memref<288x512xbf16, #tpu.memory_space<vmem>>, vector<288x512xbf16>
    %cst = arith.constant dense<0.000000e+00> : vector<32x512xf32>
    %2 = tpu.matmul %0, %1, %cst {dimension_numbers = #tpu.dot_dimension_numbers<[1], [0], [0], [1], [0, 0, 1, 1], [], []>} : vector<32x288xbf16>, vector<288x512xbf16>, vector<32x512xf32> -> vector<32x512xf32>
    %cst_3 = arith.constant dense<0.000000e+00> : vector<32xf32>
    %3 = vector.multi_reduction <add>, %2, %cst_3 [1] : vector<32x512xf32> to vector<32xf32>
    %4 = vector.shape_cast %3 : vector<32xf32> to vector<32x1xf32>
    %cst_4 = arith.constant 0.001953125 : f32
    %5 = vector.broadcast %cst_4 : f32 to vector<32x1xf32>
    %6 = arith.mulf %4, %5 : vector<32x1xf32>
    %7 = vector.broadcast %6 : vector<32x1xf32> to vector<32x512xf32>
    %8 = arith.subf %2, %7 : vector<32x512xf32>
    %9 = arith.mulf %8, %8 : vector<32x512xf32>
    %cst_5 = arith.constant dense<0.000000e+00> : vector<32xf32>
    %10 = vector.multi_reduction <add>, %9, %cst_5 [1] : vector<32x512xf32> to vector<32xf32>
    %11 = vector.shape_cast %10 : vector<32xf32> to vector<32x1xf32>
    %cst_6 = arith.constant 0.001953125 : f32
    %12 = vector.broadcast %cst_6 : f32 to vector<32x1xf32>
    %13 = arith.mulf %11, %12 : vector<32x1xf32>
    %c0_7 = arith.constant 0 : index
    %c0_8 = arith.constant 0 : index
    %14 = vector.load %arg3[%c0_7, %c0_8] : memref<32x1xf32, #tpu.memory_space<vmem>>, vector<32x1xf32>
    %cst_9 = arith.constant 9.99999974E-6 : f32
    %15 = vector.broadcast %cst_9 : f32 to vector<32x1xf32>
    %16 = arith.addf %13, %15 : vector<32x1xf32>
    %17 = math.rsqrt %16 : vector<32x1xf32>
    %18 = arith.mulf %14, %17 : vector<32x1xf32>
    %19 = vector.broadcast %18 : vector<32x1xf32> to vector<32x512xf32>
    %20 = arith.mulf %8, %19 : vector<32x512xf32>
    %c0_10 = arith.constant 0 : index
    %c0_11 = arith.constant 0 : index
    %21 = vector.load %arg4[%c0_10, %c0_11] : memref<32x1xf32, #tpu.memory_space<vmem>>, vector<32x1xf32>
    %22 = vector.broadcast %21 : vector<32x1xf32> to vector<32x512xf32>
    %23 = arith.addf %20, %22 : vector<32x512xf32>
    %c0_12 = arith.constant 0 : index
    %c0_13 = arith.constant 0 : index
    %24 = vector.load %arg5[%c0_12, %c0_13] : memref<32x512xf32, #tpu.memory_space<vmem>>, vector<32x512xf32>
    %25 = arith.addf %23, %24 : vector<32x512xf32>
    %cst_14 = arith.constant 0.000000e+00 : f32
    %26 = vector.broadcast %cst_14 : f32 to vector<32x512xf32>
    %27 = arith.maximumf %25, %26 : vector<32x512xf32>
    %c0_15 = arith.constant 0 : index
    %c0_16 = arith.constant 0 : index
    %28 = vector.load %arg6[%c0_15, %c0_16] : memref<32x512xf32, #tpu.memory_space<vmem>>, vector<32x512xf32>
    tpu.vector_store %arg6[%c0_15, %c0_16], %27 {strides = array<i32>} : memref<32x512xf32, #tpu.memory_space<vmem>>, vector<32x512xf32>,
    return
  }
  func.func @transform_0(%arg0: i32) -> (i32, i32) {
    %c0_i32 = arith.constant 0 : i32
    %c0_i32_0 = arith.constant 0 : i32
    %c0_i32_1 = arith.constant 0 : i32
    return %c0_i32, %c0_i32_0 : i32, i32
  }
  func.func @transform_1(%arg0: i32) -> (i32, i32) {
    %c0_i32 = arith.constant 0 : i32
    %c0_i32_0 = arith.constant 0 : i32
    %c0_i32_1 = arith.constant 0 : i32
    return %c0_i32, %c0_i32_0 : i32, i32
  }
  func.func @transform_2(%arg0: i32) -> (i32, i32) {
    %c0_i32 = arith.constant 0 : i32
    %c0_i32_0 = arith.constant 0 : i32
    %c0_i32_1 = arith.constant 0 : i32
    return %c0_i32, %c0_i32_0 : i32, i32
  }
  func.func @transform_3(%arg0: i32) -> (i32, i32) {
    %c0_i32 = arith.constant 0 : i32
    %c0_i32_0 = arith.constant 0 : i32
    %c0_i32_1 = arith.constant 0 : i32
    return %c0_i32, %c0_i32_0 : i32, i32
  }
  func.func @transform_4(%arg0: i32) -> (i32, i32) {
    %c0_i32 = arith.constant 0 : i32
    %c0_i32_0 = arith.constant 0 : i32
    %c0_i32_1 = arith.constant 0 : i32
    return %c0_i32, %c0_i32_0 : i32, i32
  }
  func.func @transform_5(%arg0: i32) -> (i32, i32) {
    %c0_i32 = arith.constant 0 : i32
    %c0_i32_0 = arith.constant 0 : i32
    %c0_i32_1 = arith.constant 0 : i32
    return %c0_i32, %c0_i32_0 : i32, i32
  }
}

module attributes {stable_mosaic.version = 11 : i64} {
  func.func @kernel(%arg0: i32, %arg1: memref<288x512xbf16, #tpu.memory_space<vmem>>, %arg2: memref<32x288xbf16, #tpu.memory_space<vmem>>, %arg3: memref<32x1xf32, #tpu.memory_space<vmem>>, %arg4: memref<32x1xf32, #tpu.memory_space<vmem>>, %arg5: memref<32x512xf32, #tpu.memory_space<vmem>>) attributes {dimension_semantics = [#tpu.dimension_semantics<arbitrary>], iteration_bounds = array<i64: 1>, scalar_prefetch = 0 : i64, scratch_operands = 0 : i64, tpu.core_type = #tpu.core_type<tc>, window_params = [{pipeline_mode = #tpu.pipeline_mode<synchronous>, transform_indices = @transform_0, window_bounds = array<i64: 288, 512>}, {pipeline_mode = #tpu.pipeline_mode<synchronous>, transform_indices = @transform_1, window_bounds = array<i64: 32, 288>}, {pipeline_mode = #tpu.pipeline_mode<synchronous>, transform_indices = @transform_2, window_bounds = array<i64: 32, 1>}, {pipeline_mode = #tpu.pipeline_mode<synchronous>, transform_indices = @transform_3, window_bounds = array<i64: 32, 1>}, {pipeline_mode = #tpu.pipeline_mode<synchronous>, transform_indices = @transform_4, window_bounds = array<i64: 32, 512>}]} {
    %c0 = arith.constant 0 : index
    %c0_0 = arith.constant 0 : index
    %0 = vector.load %arg2[%c0, %c0_0] : memref<32x288xbf16, #tpu.memory_space<vmem>>, vector<32x288xbf16>
    %c0_1 = arith.constant 0 : index
    %c0_2 = arith.constant 0 : index
    %1 = vector.load %arg1[%c0_1, %c0_2] : memref<288x512xbf16, #tpu.memory_space<vmem>>, vector<288x512xbf16>
    %cst = arith.constant dense<0.000000e+00> : vector<32x512xf32>
    %2 = tpu.matmul %0, %1, %cst {dimension_numbers = #tpu.dot_dimension_numbers<[1], [0], [0], [1], [0, 0, 1, 1], [], []>} : vector<32x288xbf16>, vector<288x512xbf16>, vector<32x512xf32> -> vector<32x512xf32>
    %cst_3 = arith.constant dense<0.000000e+00> : vector<32xf32>
    %3 = vector.multi_reduction <add>, %2, %cst_3 [1] : vector<32x512xf32> to vector<32xf32>
    %4 = vector.shape_cast %3 : vector<32xf32> to vector<32x1xf32>
    %cst_4 = arith.constant 0.001953125 : f32
    %5 = vector.broadcast %cst_4 : f32 to vector<32x1xf32>
    %6 = arith.mulf %4, %5 : vector<32x1xf32>
    %7 = vector.broadcast %6 : vector<32x1xf32> to vector<32x512xf32>
    %8 = arith.subf %2, %7 : vector<32x512xf32>
    %9 = arith.mulf %8, %8 : vector<32x512xf32>
    %cst_5 = arith.constant dense<0.000000e+00> : vector<32xf32>
    %10 = vector.multi_reduction <add>, %9, %cst_5 [1] : vector<32x512xf32> to vector<32xf32>
    %11 = vector.shape_cast %10 : vector<32xf32> to vector<32x1xf32>
    %cst_6 = arith.constant 0.001953125 : f32
    %12 = vector.broadcast %cst_6 : f32 to vector<32x1xf32>
    %13 = arith.mulf %11, %12 : vector<32x1xf32>
    %c0_7 = arith.constant 0 : index
    %c0_8 = arith.constant 0 : index
    %14 = vector.load %arg3[%c0_7, %c0_8] : memref<32x1xf32, #tpu.memory_space<vmem>>, vector<32x1xf32>
    %cst_9 = arith.constant 9.99999974E-6 : f32
    %15 = vector.broadcast %cst_9 : f32 to vector<32x1xf32>
    %16 = arith.addf %13, %15 : vector<32x1xf32>
    %17 = math.rsqrt %16 : vector<32x1xf32>
    %18 = arith.mulf %14, %17 : vector<32x1xf32>
    %19 = vector.broadcast %18 : vector<32x1xf32> to vector<32x512xf32>
    %20 = arith.mulf %8, %19 : vector<32x512xf32>
    %c0_10 = arith.constant 0 : index
    %c0_11 = arith.constant 0 : index
    %21 = vector.load %arg4[%c0_10, %c0_11] : memref<32x1xf32, #tpu.memory_space<vmem>>, vector<32x1xf32>
    %22 = vector.broadcast %21 : vector<32x1xf32> to vector<32x512xf32>
    %23 = arith.addf %20, %22 : vector<32x512xf32>
    %cst_12 = arith.constant 0.000000e+00 : f32
    %24 = vector.broadcast %cst_12 : f32 to vector<32x512xf32>
    %25 = arith.maximumf %23, %24 : vector<32x512xf32>
    %c0_13 = arith.constant 0 : index
    %c0_14 = arith.constant 0 : index
    %26 = vector.load %arg5[%c0_13, %c0_14] : memref<32x512xf32, #tpu.memory_space<vmem>>, vector<32x512xf32>
    tpu.vector_store %arg5[%c0_13, %c0_14], %25 {strides = array<i32>} : memref<32x512xf32, #tpu.memory_space<vmem>>, vector<32x512xf32>,
    return
  }
  func.func @transform_0(%arg0: i32) -> (i32, i32) {
    %c0_i32 = arith.constant 0 : i32
    %c0_i32_0 = arith.constant 0 : i32
    %c0_i32_1 = arith.constant 0 : i32
    return %c0_i32, %c0_i32_0 : i32, i32
  }
  func.func @transform_1(%arg0: i32) -> (i32, i32) {
    %c0_i32 = arith.constant 0 : i32
    %c0_i32_0 = arith.constant 0 : i32
    %c0_i32_1 = arith.constant 0 : i32
    return %c0_i32, %c0_i32_0 : i32, i32
  }
  func.func @transform_2(%arg0: i32) -> (i32, i32) {
    %c0_i32 = arith.constant 0 : i32
    %c0_i32_0 = arith.constant 0 : i32
    %c0_i32_1 = arith.constant 0 : i32
    return %c0_i32, %c0_i32_0 : i32, i32
  }
  func.func @transform_3(%arg0: i32) -> (i32, i32) {
    %c0_i32 = arith.constant 0 : i32
    %c0_i32_0 = arith.constant 0 : i32
    %c0_i32_1 = arith.constant 0 : i32
    return %c0_i32, %c0_i32_0 : i32, i32
  }
  func.func @transform_4(%arg0: i32) -> (i32, i32) {
    %c0_i32 = arith.constant 0 : i32
    %c0_i32_0 = arith.constant 0 : i32
    %c0_i32_1 = arith.constant 0 : i32
    return %c0_i32, %c0_i32_0 : i32, i32
  }
}

module attributes {stable_mosaic.version = 11 : i64} {
  func.func @kernel(%arg0: i32, %arg1: memref<288x128xbf16, #tpu.memory_space<vmem>>, %arg2: memref<64x288xbf16, #tpu.memory_space<vmem>>, %arg3: memref<64x1xf32, #tpu.memory_space<vmem>>, %arg4: memref<64x1xf32, #tpu.memory_space<vmem>>, %arg5: memref<64x128xf32, #tpu.memory_space<vmem>>) attributes {dimension_semantics = [#tpu.dimension_semantics<arbitrary>], iteration_bounds = array<i64: 1>, scalar_prefetch = 0 : i64, scratch_operands = 0 : i64, tpu.core_type = #tpu.core_type<tc>, window_params = [{pipeline_mode = #tpu.pipeline_mode<synchronous>, transform_indices = @transform_0, window_bounds = array<i64: 288, 128>}, {pipeline_mode = #tpu.pipeline_mode<synchronous>, transform_indices = @transform_1, window_bounds = array<i64: 64, 288>}, {pipeline_mode = #tpu.pipeline_mode<synchronous>, transform_indices = @transform_2, window_bounds = array<i64: 64, 1>}, {pipeline_mode = #tpu.pipeline_mode<synchronous>, transform_indices = @transform_3, window_bounds = array<i64: 64, 1>}, {pipeline_mode = #tpu.pipeline_mode<synchronous>, transform_indices = @transform_4, window_bounds = array<i64: 64, 128>}]} {
    %c0 = arith.constant 0 : index
    %c0_0 = arith.constant 0 : index
    %0 = vector.load %arg2[%c0, %c0_0] : memref<64x288xbf16, #tpu.memory_space<vmem>>, vector<64x288xbf16>
    %c0_1 = arith.constant 0 : index
    %c0_2 = arith.constant 0 : index
    %1 = vector.load %arg1[%c0_1, %c0_2] : memref<288x128xbf16, #tpu.memory_space<vmem>>, vector<288x128xbf16>
    %cst = arith.constant dense<0.000000e+00> : vector<64x128xf32>
    %2 = tpu.matmul %0, %1, %cst {dimension_numbers = #tpu.dot_dimension_numbers<[1], [0], [0], [1], [0, 0, 1, 1], [], []>} : vector<64x288xbf16>, vector<288x128xbf16>, vector<64x128xf32> -> vector<64x128xf32>
    %cst_3 = arith.constant dense<0.000000e+00> : vector<64xf32>
    %3 = vector.multi_reduction <add>, %2, %cst_3 [1] : vector<64x128xf32> to vector<64xf32>
    %4 = vector.shape_cast %3 : vector<64xf32> to vector<64x1xf32>
    %cst_4 = arith.constant 7.812500e-03 : f32
    %5 = vector.broadcast %cst_4 : f32 to vector<64x1xf32>
    %6 = arith.mulf %4, %5 : vector<64x1xf32>
    %7 = vector.broadcast %6 : vector<64x1xf32> to vector<64x128xf32>
    %8 = arith.subf %2, %7 : vector<64x128xf32>
    %9 = arith.mulf %8, %8 : vector<64x128xf32>
    %cst_5 = arith.constant dense<0.000000e+00> : vector<64xf32>
    %10 = vector.multi_reduction <add>, %9, %cst_5 [1] : vector<64x128xf32> to vector<64xf32>
    %11 = vector.shape_cast %10 : vector<64xf32> to vector<64x1xf32>
    %cst_6 = arith.constant 7.812500e-03 : f32
    %12 = vector.broadcast %cst_6 : f32 to vector<64x1xf32>
    %13 = arith.mulf %11, %12 : vector<64x1xf32>
    %c0_7 = arith.constant 0 : index
    %c0_8 = arith.constant 0 : index
    %14 = vector.load %arg3[%c0_7, %c0_8] : memref<64x1xf32, #tpu.memory_space<vmem>>, vector<64x1xf32>
    %cst_9 = arith.constant 9.99999974E-6 : f32
    %15 = vector.broadcast %cst_9 : f32 to vector<64x1xf32>
    %16 = arith.addf %13, %15 : vector<64x1xf32>
    %17 = math.rsqrt %16 : vector<64x1xf32>
    %18 = arith.mulf %14, %17 : vector<64x1xf32>
    %19 = vector.broadcast %18 : vector<64x1xf32> to vector<64x128xf32>
    %20 = arith.mulf %8, %19 : vector<64x128xf32>
    %c0_10 = arith.constant 0 : index
    %c0_11 = arith.constant 0 : index
    %21 = vector.load %arg4[%c0_10, %c0_11] : memref<64x1xf32, #tpu.memory_space<vmem>>, vector<64x1xf32>
    %22 = vector.broadcast %21 : vector<64x1xf32> to vector<64x128xf32>
    %23 = arith.addf %20, %22 : vector<64x128xf32>
    %cst_12 = arith.constant 0.000000e+00 : f32
    %24 = vector.broadcast %cst_12 : f32 to vector<64x128xf32>
    %25 = arith.maximumf %23, %24 : vector<64x128xf32>
    %c0_13 = arith.constant 0 : index
    %c0_14 = arith.constant 0 : index
    %26 = vector.load %arg5[%c0_13, %c0_14] : memref<64x128xf32, #tpu.memory_space<vmem>>, vector<64x128xf32>
    tpu.vector_store %arg5[%c0_13, %c0_14], %25 {strides = array<i32>} : memref<64x128xf32, #tpu.memory_space<vmem>>, vector<64x128xf32>,
    return
  }
  func.func @transform_0(%arg0: i32) -> (i32, i32) {
    %c0_i32 = arith.constant 0 : i32
    %c0_i32_0 = arith.constant 0 : i32
    %c0_i32_1 = arith.constant 0 : i32
    return %c0_i32, %c0_i32_0 : i32, i32
  }
  func.func @transform_1(%arg0: i32) -> (i32, i32) {
    %c0_i32 = arith.constant 0 : i32
    %c0_i32_0 = arith.constant 0 : i32
    %c0_i32_1 = arith.constant 0 : i32
    return %c0_i32, %c0_i32_0 : i32, i32
  }
  func.func @transform_2(%arg0: i32) -> (i32, i32) {
    %c0_i32 = arith.constant 0 : i32
    %c0_i32_0 = arith.constant 0 : i32
    %c0_i32_1 = arith.constant 0 : i32
    return %c0_i32, %c0_i32_0 : i32, i32
  }
  func.func @transform_3(%arg0: i32) -> (i32, i32) {
    %c0_i32 = arith.constant 0 : i32
    %c0_i32_0 = arith.constant 0 : i32
    %c0_i32_1 = arith.constant 0 : i32
    return %c0_i32, %c0_i32_0 : i32, i32
  }
  func.func @transform_4(%arg0: i32) -> (i32, i32) {
    %c0_i32 = arith.constant 0 : i32
    %c0_i32_0 = arith.constant 0 : i32
    %c0_i32_1 = arith.constant 0 : i32
    return %c0_i32, %c0_i32_0 : i32, i32
  }
}

module attributes {stable_mosaic.version = 11 : i64} {
  func.func @kernel(%arg0: i32, %arg1: memref<32x128xbf16, #tpu.memory_space<vmem>>, %arg2: memref<64x32xbf16, #tpu.memory_space<vmem>>, %arg3: memref<64x1xf32, #tpu.memory_space<vmem>>, %arg4: memref<64x1xf32, #tpu.memory_space<vmem>>, %arg5: memref<64x128xf32, #tpu.memory_space<vmem>>) attributes {dimension_semantics = [#tpu.dimension_semantics<arbitrary>], iteration_bounds = array<i64: 1>, scalar_prefetch = 0 : i64, scratch_operands = 0 : i64, tpu.core_type = #tpu.core_type<tc>, window_params = [{pipeline_mode = #tpu.pipeline_mode<synchronous>, transform_indices = @transform_0, window_bounds = array<i64: 32, 128>}, {pipeline_mode = #tpu.pipeline_mode<synchronous>, transform_indices = @transform_1, window_bounds = array<i64: 64, 32>}, {pipeline_mode = #tpu.pipeline_mode<synchronous>, transform_indices = @transform_2, window_bounds = array<i64: 64, 1>}, {pipeline_mode = #tpu.pipeline_mode<synchronous>, transform_indices = @transform_3, window_bounds = array<i64: 64, 1>}, {pipeline_mode = #tpu.pipeline_mode<synchronous>, transform_indices = @transform_4, window_bounds = array<i64: 64, 128>}]} {
    %c0 = arith.constant 0 : index
    %c0_0 = arith.constant 0 : index
    %0 = vector.load %arg2[%c0, %c0_0] : memref<64x32xbf16, #tpu.memory_space<vmem>>, vector<64x32xbf16>
    %c0_1 = arith.constant 0 : index
    %c0_2 = arith.constant 0 : index
    %1 = vector.load %arg1[%c0_1, %c0_2] : memref<32x128xbf16, #tpu.memory_space<vmem>>, vector<32x128xbf16>
    %cst = arith.constant dense<0.000000e+00> : vector<64x128xf32>
    %2 = tpu.matmul %0, %1, %cst {dimension_numbers = #tpu.dot_dimension_numbers<[1], [0], [0], [1], [0, 0, 1, 1], [], []>} : vector<64x32xbf16>, vector<32x128xbf16>, vector<64x128xf32> -> vector<64x128xf32>
    %cst_3 = arith.constant dense<0.000000e+00> : vector<64xf32>
    %3 = vector.multi_reduction <add>, %2, %cst_3 [1] : vector<64x128xf32> to vector<64xf32>
    %4 = vector.shape_cast %3 : vector<64xf32> to vector<64x1xf32>
    %cst_4 = arith.constant 7.812500e-03 : f32
    %5 = vector.broadcast %cst_4 : f32 to vector<64x1xf32>
    %6 = arith.mulf %4, %5 : vector<64x1xf32>
    %7 = vector.broadcast %6 : vector<64x1xf32> to vector<64x128xf32>
    %8 = arith.subf %2, %7 : vector<64x128xf32>
    %9 = arith.mulf %8, %8 : vector<64x128xf32>
    %cst_5 = arith.constant dense<0.000000e+00> : vector<64xf32>
    %10 = vector.multi_reduction <add>, %9, %cst_5 [1] : vector<64x128xf32> to vector<64xf32>
    %11 = vector.shape_cast %10 : vector<64xf32> to vector<64x1xf32>
    %cst_6 = arith.constant 7.812500e-03 : f32
    %12 = vector.broadcast %cst_6 : f32 to vector<64x1xf32>
    %13 = arith.mulf %11, %12 : vector<64x1xf32>
    %c0_7 = arith.constant 0 : index
    %c0_8 = arith.constant 0 : index
    %14 = vector.load %arg3[%c0_7, %c0_8] : memref<64x1xf32, #tpu.memory_space<vmem>>, vector<64x1xf32>
    %cst_9 = arith.constant 9.99999974E-6 : f32
    %15 = vector.broadcast %cst_9 : f32 to vector<64x1xf32>
    %16 = arith.addf %13, %15 : vector<64x1xf32>
    %17 = math.rsqrt %16 : vector<64x1xf32>
    %18 = arith.mulf %14, %17 : vector<64x1xf32>
    %19 = vector.broadcast %18 : vector<64x1xf32> to vector<64x128xf32>
    %20 = arith.mulf %8, %19 : vector<64x128xf32>
    %c0_10 = arith.constant 0 : index
    %c0_11 = arith.constant 0 : index
    %21 = vector.load %arg4[%c0_10, %c0_11] : memref<64x1xf32, #tpu.memory_space<vmem>>, vector<64x1xf32>
    %22 = vector.broadcast %21 : vector<64x1xf32> to vector<64x128xf32>
    %23 = arith.addf %20, %22 : vector<64x128xf32>
    %c0_12 = arith.constant 0 : index
    %c0_13 = arith.constant 0 : index
    %24 = vector.load %arg5[%c0_12, %c0_13] : memref<64x128xf32, #tpu.memory_space<vmem>>, vector<64x128xf32>
    tpu.vector_store %arg5[%c0_12, %c0_13], %23 {strides = array<i32>} : memref<64x128xf32, #tpu.memory_space<vmem>>, vector<64x128xf32>,
    return
  }
  func.func @transform_0(%arg0: i32) -> (i32, i32) {
    %c0_i32 = arith.constant 0 : i32
    %c0_i32_0 = arith.constant 0 : i32
    %c0_i32_1 = arith.constant 0 : i32
    return %c0_i32, %c0_i32_0 : i32, i32
  }
  func.func @transform_1(%arg0: i32) -> (i32, i32) {
    %c0_i32 = arith.constant 0 : i32
    %c0_i32_0 = arith.constant 0 : i32
    %c0_i32_1 = arith.constant 0 : i32
    return %c0_i32, %c0_i32_0 : i32, i32
  }
  func.func @transform_2(%arg0: i32) -> (i32, i32) {
    %c0_i32 = arith.constant 0 : i32
    %c0_i32_0 = arith.constant 0 : i32
    %c0_i32_1 = arith.constant 0 : i32
    return %c0_i32, %c0_i32_0 : i32, i32
  }
  func.func @transform_3(%arg0: i32) -> (i32, i32) {
    %c0_i32 = arith.constant 0 : i32
    %c0_i32_0 = arith.constant 0 : i32
    %c0_i32_1 = arith.constant 0 : i32
    return %c0_i32, %c0_i32_0 : i32, i32
  }
  func.func @transform_4(%arg0: i32) -> (i32, i32) {
    %c0_i32 = arith.constant 0 : i32
    %c0_i32_0 = arith.constant 0 : i32
    %c0_i32_1 = arith.constant 0 : i32
    return %c0_i32, %c0_i32_0 : i32, i32
  }
}

module attributes {stable_mosaic.version = 11 : i64} {
  func.func @kernel(%arg0: i32, %arg1: memref<576x128xbf16, #tpu.memory_space<vmem>>, %arg2: memref<64x576xbf16, #tpu.memory_space<vmem>>, %arg3: memref<64x1xf32, #tpu.memory_space<vmem>>, %arg4: memref<64x1xf32, #tpu.memory_space<vmem>>, %arg5: memref<64x128xf32, #tpu.memory_space<vmem>>, %arg6: memref<64x128xf32, #tpu.memory_space<vmem>>) attributes {dimension_semantics = [#tpu.dimension_semantics<arbitrary>], iteration_bounds = array<i64: 1>, scalar_prefetch = 0 : i64, scratch_operands = 0 : i64, tpu.core_type = #tpu.core_type<tc>, window_params = [{pipeline_mode = #tpu.pipeline_mode<synchronous>, transform_indices = @transform_0, window_bounds = array<i64: 576, 128>}, {pipeline_mode = #tpu.pipeline_mode<synchronous>, transform_indices = @transform_1, window_bounds = array<i64: 64, 576>}, {pipeline_mode = #tpu.pipeline_mode<synchronous>, transform_indices = @transform_2, window_bounds = array<i64: 64, 1>}, {pipeline_mode = #tpu.pipeline_mode<synchronous>, transform_indices = @transform_3, window_bounds = array<i64: 64, 1>}, {pipeline_mode = #tpu.pipeline_mode<synchronous>, transform_indices = @transform_4, window_bounds = array<i64: 64, 128>}, {pipeline_mode = #tpu.pipeline_mode<synchronous>, transform_indices = @transform_5, window_bounds = array<i64: 64, 128>}]} {
    %c0 = arith.constant 0 : index
    %c0_0 = arith.constant 0 : index
    %0 = vector.load %arg2[%c0, %c0_0] : memref<64x576xbf16, #tpu.memory_space<vmem>>, vector<64x576xbf16>
    %c0_1 = arith.constant 0 : index
    %c0_2 = arith.constant 0 : index
    %1 = vector.load %arg1[%c0_1, %c0_2] : memref<576x128xbf16, #tpu.memory_space<vmem>>, vector<576x128xbf16>
    %cst = arith.constant dense<0.000000e+00> : vector<64x128xf32>
    %2 = tpu.matmul %0, %1, %cst {dimension_numbers = #tpu.dot_dimension_numbers<[1], [0], [0], [1], [0, 0, 1, 1], [], []>} : vector<64x576xbf16>, vector<576x128xbf16>, vector<64x128xf32> -> vector<64x128xf32>
    %cst_3 = arith.constant dense<0.000000e+00> : vector<64xf32>
    %3 = vector.multi_reduction <add>, %2, %cst_3 [1] : vector<64x128xf32> to vector<64xf32>
    %4 = vector.shape_cast %3 : vector<64xf32> to vector<64x1xf32>
    %cst_4 = arith.constant 7.812500e-03 : f32
    %5 = vector.broadcast %cst_4 : f32 to vector<64x1xf32>
    %6 = arith.mulf %4, %5 : vector<64x1xf32>
    %7 = vector.broadcast %6 : vector<64x1xf32> to vector<64x128xf32>
    %8 = arith.subf %2, %7 : vector<64x128xf32>
    %9 = arith.mulf %8, %8 : vector<64x128xf32>
    %cst_5 = arith.constant dense<0.000000e+00> : vector<64xf32>
    %10 = vector.multi_reduction <add>, %9, %cst_5 [1] : vector<64x128xf32> to vector<64xf32>
    %11 = vector.shape_cast %10 : vector<64xf32> to vector<64x1xf32>
    %cst_6 = arith.constant 7.812500e-03 : f32
    %12 = vector.broadcast %cst_6 : f32 to vector<64x1xf32>
    %13 = arith.mulf %11, %12 : vector<64x1xf32>
    %c0_7 = arith.constant 0 : index
    %c0_8 = arith.constant 0 : index
    %14 = vector.load %arg3[%c0_7, %c0_8] : memref<64x1xf32, #tpu.memory_space<vmem>>, vector<64x1xf32>
    %cst_9 = arith.constant 9.99999974E-6 : f32
    %15 = vector.broadcast %cst_9 : f32 to vector<64x1xf32>
    %16 = arith.addf %13, %15 : vector<64x1xf32>
    %17 = math.rsqrt %16 : vector<64x1xf32>
    %18 = arith.mulf %14, %17 : vector<64x1xf32>
    %19 = vector.broadcast %18 : vector<64x1xf32> to vector<64x128xf32>
    %20 = arith.mulf %8, %19 : vector<64x128xf32>
    %c0_10 = arith.constant 0 : index
    %c0_11 = arith.constant 0 : index
    %21 = vector.load %arg4[%c0_10, %c0_11] : memref<64x1xf32, #tpu.memory_space<vmem>>, vector<64x1xf32>
    %22 = vector.broadcast %21 : vector<64x1xf32> to vector<64x128xf32>
    %23 = arith.addf %20, %22 : vector<64x128xf32>
    %c0_12 = arith.constant 0 : index
    %c0_13 = arith.constant 0 : index
    %24 = vector.load %arg5[%c0_12, %c0_13] : memref<64x128xf32, #tpu.memory_space<vmem>>, vector<64x128xf32>
    %25 = arith.addf %23, %24 : vector<64x128xf32>
    %cst_14 = arith.constant 0.000000e+00 : f32
    %26 = vector.broadcast %cst_14 : f32 to vector<64x128xf32>
    %27 = arith.maximumf %25, %26 : vector<64x128xf32>
    %c0_15 = arith.constant 0 : index
    %c0_16 = arith.constant 0 : index
    %28 = vector.load %arg6[%c0_15, %c0_16] : memref<64x128xf32, #tpu.memory_space<vmem>>, vector<64x128xf32>
    tpu.vector_store %arg6[%c0_15, %c0_16], %27 {strides = array<i32>} : memref<64x128xf32, #tpu.memory_space<vmem>>, vector<64x128xf32>,
    return
  }
  func.func @transform_0(%arg0: i32) -> (i32, i32) {
    %c0_i32 = arith.constant 0 : i32
    %c0_i32_0 = arith.constant 0 : i32
    %c0_i32_1 = arith.constant 0 : i32
    return %c0_i32, %c0_i32_0 : i32, i32
  }
  func.func @transform_1(%arg0: i32) -> (i32, i32) {
    %c0_i32 = arith.constant 0 : i32
    %c0_i32_0 = arith.constant 0 : i32
    %c0_i32_1 = arith.constant 0 : i32
    return %c0_i32, %c0_i32_0 : i32, i32
  }
  func.func @transform_2(%arg0: i32) -> (i32, i32) {
    %c0_i32 = arith.constant 0 : i32
    %c0_i32_0 = arith.constant 0 : i32
    %c0_i32_1 = arith.constant 0 : i32
    return %c0_i32, %c0_i32_0 : i32, i32
  }
  func.func @transform_3(%arg0: i32) -> (i32, i32) {
    %c0_i32 = arith.constant 0 : i32
    %c0_i32_0 = arith.constant 0 : i32
    %c0_i32_1 = arith.constant 0 : i32
    return %c0_i32, %c0_i32_0 : i32, i32
  }
  func.func @transform_4(%arg0: i32) -> (i32, i32) {
    %c0_i32 = arith.constant 0 : i32
    %c0_i32_0 = arith.constant 0 : i32
    %c0_i32_1 = arith.constant 0 : i32
    return %c0_i32, %c0_i32_0 : i32, i32
  }
  func.func @transform_5(%arg0: i32) -> (i32, i32) {
    %c0_i32 = arith.constant 0 : i32
    %c0_i32_0 = arith.constant 0 : i32
    %c0_i32_1 = arith.constant 0 : i32
    return %c0_i32, %c0_i32_0 : i32, i32
  }
}

module attributes {stable_mosaic.version = 11 : i64} {
  func.func @kernel(%arg0: i32, %arg1: memref<576x128xbf16, #tpu.memory_space<vmem>>, %arg2: memref<64x576xbf16, #tpu.memory_space<vmem>>, %arg3: memref<64x1xf32, #tpu.memory_space<vmem>>, %arg4: memref<64x1xf32, #tpu.memory_space<vmem>>, %arg5: memref<64x128xf32, #tpu.memory_space<vmem>>) attributes {dimension_semantics = [#tpu.dimension_semantics<arbitrary>], iteration_bounds = array<i64: 1>, scalar_prefetch = 0 : i64, scratch_operands = 0 : i64, tpu.core_type = #tpu.core_type<tc>, window_params = [{pipeline_mode = #tpu.pipeline_mode<synchronous>, transform_indices = @transform_0, window_bounds = array<i64: 576, 128>}, {pipeline_mode = #tpu.pipeline_mode<synchronous>, transform_indices = @transform_1, window_bounds = array<i64: 64, 576>}, {pipeline_mode = #tpu.pipeline_mode<synchronous>, transform_indices = @transform_2, window_bounds = array<i64: 64, 1>}, {pipeline_mode = #tpu.pipeline_mode<synchronous>, transform_indices = @transform_3, window_bounds = array<i64: 64, 1>}, {pipeline_mode = #tpu.pipeline_mode<synchronous>, transform_indices = @transform_4, window_bounds = array<i64: 64, 128>}]} {
    %c0 = arith.constant 0 : index
    %c0_0 = arith.constant 0 : index
    %0 = vector.load %arg2[%c0, %c0_0] : memref<64x576xbf16, #tpu.memory_space<vmem>>, vector<64x576xbf16>
    %c0_1 = arith.constant 0 : index
    %c0_2 = arith.constant 0 : index
    %1 = vector.load %arg1[%c0_1, %c0_2] : memref<576x128xbf16, #tpu.memory_space<vmem>>, vector<576x128xbf16>
    %cst = arith.constant dense<0.000000e+00> : vector<64x128xf32>
    %2 = tpu.matmul %0, %1, %cst {dimension_numbers = #tpu.dot_dimension_numbers<[1], [0], [0], [1], [0, 0, 1, 1], [], []>} : vector<64x576xbf16>, vector<576x128xbf16>, vector<64x128xf32> -> vector<64x128xf32>
    %cst_3 = arith.constant dense<0.000000e+00> : vector<64xf32>
    %3 = vector.multi_reduction <add>, %2, %cst_3 [1] : vector<64x128xf32> to vector<64xf32>
    %4 = vector.shape_cast %3 : vector<64xf32> to vector<64x1xf32>
    %cst_4 = arith.constant 7.812500e-03 : f32
    %5 = vector.broadcast %cst_4 : f32 to vector<64x1xf32>
    %6 = arith.mulf %4, %5 : vector<64x1xf32>
    %7 = vector.broadcast %6 : vector<64x1xf32> to vector<64x128xf32>
    %8 = arith.subf %2, %7 : vector<64x128xf32>
    %9 = arith.mulf %8, %8 : vector<64x128xf32>
    %cst_5 = arith.constant dense<0.000000e+00> : vector<64xf32>
    %10 = vector.multi_reduction <add>, %9, %cst_5 [1] : vector<64x128xf32> to vector<64xf32>
    %11 = vector.shape_cast %10 : vector<64xf32> to vector<64x1xf32>
    %cst_6 = arith.constant 7.812500e-03 : f32
    %12 = vector.broadcast %cst_6 : f32 to vector<64x1xf32>
    %13 = arith.mulf %11, %12 : vector<64x1xf32>
    %c0_7 = arith.constant 0 : index
    %c0_8 = arith.constant 0 : index
    %14 = vector.load %arg3[%c0_7, %c0_8] : memref<64x1xf32, #tpu.memory_space<vmem>>, vector<64x1xf32>
    %cst_9 = arith.constant 9.99999974E-6 : f32
    %15 = vector.broadcast %cst_9 : f32 to vector<64x1xf32>
    %16 = arith.addf %13, %15 : vector<64x1xf32>
    %17 = math.rsqrt %16 : vector<64x1xf32>
    %18 = arith.mulf %14, %17 : vector<64x1xf32>
    %19 = vector.broadcast %18 : vector<64x1xf32> to vector<64x128xf32>
    %20 = arith.mulf %8, %19 : vector<64x128xf32>
    %c0_10 = arith.constant 0 : index
    %c0_11 = arith.constant 0 : index
    %21 = vector.load %arg4[%c0_10, %c0_11] : memref<64x1xf32, #tpu.memory_space<vmem>>, vector<64x1xf32>
    %22 = vector.broadcast %21 : vector<64x1xf32> to vector<64x128xf32>
    %23 = arith.addf %20, %22 : vector<64x128xf32>
    %cst_12 = arith.constant 0.000000e+00 : f32
    %24 = vector.broadcast %cst_12 : f32 to vector<64x128xf32>
    %25 = arith.maximumf %23, %24 : vector<64x128xf32>
    %c0_13 = arith.constant 0 : index
    %c0_14 = arith.constant 0 : index
    %26 = vector.load %arg5[%c0_13, %c0_14] : memref<64x128xf32, #tpu.memory_space<vmem>>, vector<64x128xf32>
    tpu.vector_store %arg5[%c0_13, %c0_14], %25 {strides = array<i32>} : memref<64x128xf32, #tpu.memory_space<vmem>>, vector<64x128xf32>,
    return
  }
  func.func @transform_0(%arg0: i32) -> (i32, i32) {
    %c0_i32 = arith.constant 0 : i32
    %c0_i32_0 = arith.constant 0 : i32
    %c0_i32_1 = arith.constant 0 : i32
    return %c0_i32, %c0_i32_0 : i32, i32
  }
  func.func @transform_1(%arg0: i32) -> (i32, i32) {
    %c0_i32 = arith.constant 0 : i32
    %c0_i32_0 = arith.constant 0 : i32
    %c0_i32_1 = arith.constant 0 : i32
    return %c0_i32, %c0_i32_0 : i32, i32
  }
  func.func @transform_2(%arg0: i32) -> (i32, i32) {
    %c0_i32 = arith.constant 0 : i32
    %c0_i32_0 = arith.constant 0 : i32
    %c0_i32_1 = arith.constant 0 : i32
    return %c0_i32, %c0_i32_0 : i32, i32
  }
  func.func @transform_3(%arg0: i32) -> (i32, i32) {
    %c0_i32 = arith.constant 0 : i32
    %c0_i32_0 = arith.constant 0 : i32
    %c0_i32_1 = arith.constant 0 : i32
    return %c0_i32, %c0_i32_0 : i32, i32
  }
  func.func @transform_4(%arg0: i32) -> (i32, i32) {
    %c0_i32 = arith.constant 0 : i32
    %c0_i32_0 = arith.constant 0 : i32
    %c0_i32_1 = arith.constant 0 : i32
    return %c0_i32, %c0_i32_0 : i32, i32
  }
}

module attributes {stable_mosaic.version = 11 : i64} {
  func.func @_pool_fc_kernel(%arg0: i32, %arg1: memref<64x2x64xf32, #tpu.memory_space<vmem>>, %arg2: memref<10x64xf32, #tpu.memory_space<vmem>>, %arg3: memref<10x1xf32, #tpu.memory_space<vmem>>, %arg4: memref<10x2xf32, #tpu.memory_space<vmem>>) attributes {dimension_semantics = [#tpu.dimension_semantics<arbitrary>], iteration_bounds = array<i64: 1>, scalar_prefetch = 0 : i64, scratch_operands = 0 : i64, tpu.core_type = #tpu.core_type<tc>, window_params = [{pipeline_mode = #tpu.pipeline_mode<synchronous>, transform_indices = @transform_0, window_bounds = array<i64: 64, 2, 64>}, {pipeline_mode = #tpu.pipeline_mode<synchronous>, transform_indices = @transform_1, window_bounds = array<i64: 10, 64>}, {pipeline_mode = #tpu.pipeline_mode<synchronous>, transform_indices = @transform_2, window_bounds = array<i64: 10, 1>}, {pipeline_mode = #tpu.pipeline_mode<synchronous>, transform_indices = @transform_3, window_bounds = array<i64: 10, 2>}]} {
    %c0 = arith.constant 0 : index
    %c0_0 = arith.constant 0 : index
    %c0_1 = arith.constant 0 : index
    %0 = vector.load %arg1[%c0, %c0_0, %c0_1] : memref<64x2x64xf32, #tpu.memory_space<vmem>>, vector<64x2x64xf32>
    %cst = arith.constant dense<0.000000e+00> : vector<64x2xf32>
    %1 = vector.multi_reduction <add>, %0, %cst [2] : vector<64x2x64xf32> to vector<64x2xf32>
    %cst_2 = arith.constant 6.400000e+01 : f32
    %2 = vector.broadcast %cst_2 : f32 to vector<64x2xf32>
    %3 = arith.divf %1, %2 : vector<64x2xf32>
    %c0_3 = arith.constant 0 : index
    %c0_4 = arith.constant 0 : index
    %4 = vector.load %arg2[%c0_3, %c0_4] : memref<10x64xf32, #tpu.memory_space<vmem>>, vector<10x64xf32>
    %cst_5 = arith.constant dense<0.000000e+00> : vector<10x2xf32>
    %5 = tpu.matmul %4, %3, %cst_5 {dimension_numbers = #tpu.dot_dimension_numbers<[1], [0], [0], [1], [0, 0, 1, 1], [], []>} : vector<10x64xf32>, vector<64x2xf32>, vector<10x2xf32> -> vector<10x2xf32>
    %c0_6 = arith.constant 0 : index
    %c0_7 = arith.constant 0 : index
    %6 = vector.load %arg3[%c0_6, %c0_7] : memref<10x1xf32, #tpu.memory_space<vmem>>, vector<10x1xf32>
    %7 = vector.broadcast %6 : vector<10x1xf32> to vector<10x2xf32>
    %8 = arith.addf %5, %7 : vector<10x2xf32>
    %c0_8 = arith.constant 0 : index
    %c0_9 = arith.constant 0 : index
    %9 = vector.load %arg4[%c0_8, %c0_9] : memref<10x2xf32, #tpu.memory_space<vmem>>, vector<10x2xf32>
    tpu.vector_store %arg4[%c0_8, %c0_9], %8 {strides = array<i32>} : memref<10x2xf32, #tpu.memory_space<vmem>>, vector<10x2xf32>,
    return
  }
  func.func @transform_0(%arg0: i32) -> (i32, i32, i32) {
    %c0_i32 = arith.constant 0 : i32
    %c0_i32_0 = arith.constant 0 : i32
    %c0_i32_1 = arith.constant 0 : i32
    %c0_i32_2 = arith.constant 0 : i32
    return %c0_i32, %c0_i32_0, %c0_i32_1 : i32, i32, i32
  }
  func.func @transform_1(%arg0: i32) -> (i32, i32) {
    %c0_i32 = arith.constant 0 : i32
    %c0_i32_0 = arith.constant 0 : i32
    %c0_i32_1 = arith.constant 0 : i32
    return %c0_i32, %c0_i32_0 : i32, i32
  }
  func.func @transform_2(%arg0: i32) -> (i32, i32) {
    %c0_i32 = arith.constant 0 : i32
    %c0_i32_0 = arith.constant 0 : i32
    %c0_i32_1 = arith.constant 0 : i32
    return %c0_i32, %c0_i32_0 : i32, i32
  }
  func.func @transform_3(%arg0: i32) -> (i32, i32) {
    %c0_i32 = arith.constant 0 : i32
    %c0_i32_0 = arith.constant 0 : i32
    %c0_i32_1 = arith.constant 0 : i32
    return %c0_i32, %c0_i32_0 : i32, i32
  }
}

</mosaic_0001>

<bundles_post_ra>
// kernel: resnet20_forward.22
= control target key start
LH: loop header
LB: loop body
LE: loop exit
PB: predicated region body
PF: predicated region fallthrough
CT: control target
= control target key end

     0   :  { %v912_v3 = vmov 0   ;;  %vm217_vm0 = vcmask 261120   ;;  %s1493_s0 = inlined_call_operand.vmem [shape: bf16[32,2048], index: 0, kind: input, shape index: {}]   ;;  %s1494_s1 = inlined_call_operand.vmem [shape: bf16[16,32], index: 1, kind: input, shape index: {}]   ;;  %s1495_s3 = inlined_call_operand.vmem [shape: f32[16,1], index: 3, kind: input, shape index: {}]   ;;  %s1496_s2 = inlined_call_operand.vmem [shape: f32[16,1], index: 2, kind: input, shape index: {}]   ;;  %s1497_s4 = inlined_call_operand.vmem [shape: f32[16,2048], index: 4, kind: output, shape index: {}]  }
   0x1   :  { %v20_v0 = vld [vmem:[%s1493_s0] sm:$0xff]  ;;  %v21_v2 = vld [vmem:[%s1493_s0 + $0x8] sm:$0xff]  ;;  %253 = vmatprep.mubr.bf16.mxu0 %v912_v3  ;;  %296 = vmatprep.mubr.bf16.mxu1 %v912_v3  ;;  %v22_v15 = vld [vmem:[%s1493_s0 + $0x10] sm:$0xff] }
   0x2   :  { %v28_v1 = vld [vmem:[%s1493_s0 + $0x40] sm:$0xff]  ;;  %v29_v6 = vld [vmem:[%s1493_s0 + $0x48] sm:$0xff]  ;;  %906 = vset.pattern.permute.xlu1 %v912_v3  ;;  %905 = vset.pattern.permute.xlu0 %v912_v3  ;;  %v30_v17 = vld [vmem:[%s1493_s0 + $0x50] sm:$0xff] }
   0x3   :  { %v865_v4 = vcombine.high %v20_v0, %v28_v1  ;;  %v864_v5 = vcombine.low %v20_v0, %v28_v1  ;;  %v36_v7 = vld [vmem:[%s1493_s0 + $0x80] sm:$0xff]  ;;  %v867_v9 = vcombine.high %v21_v2, %v29_v6  ;;  %v866_v10 = vcombine.low %v21_v2, %v29_v6  ;;  %v37_v12 = vld [vmem:[%s1493_s0 + $0x88] sm:$0xff]  ;;  %v23_v18 = vld [vmem:[%s1493_s0 + $0x18] sm:$0xff] }
   0x4   :  { %v44_v8 = vld [vmem:[%s1493_s0 + $0xc0] sm:$0xff]  ;;  %v45_v13 = vld [vmem:[%s1493_s0 + $0xc8] sm:$0xff]  ;;  %v31_v19 = vld [vmem:[%s1493_s0 + $0x58] sm:$0xff]  ;;  %v869_v21 = vcombine.high %v22_v15, %v30_v17  ;;  %v868_v28 = vcombine.low %v22_v15, %v30_v17 }
   0x5   :  { %v881_v11 = vcombine.high %v36_v7, %v44_v8  ;;  %221 = vmatprep.subr.bf16.mxu0 %v865_v4  ;;  %v883_v14 = vcombine.high %v37_v12, %v45_v13  ;;  %264 = vmatprep.subr.bf16.mxu1 %v867_v9  ;;  %v880_v16 = vcombine.low %v36_v7, %v44_v8  ;;  %v38_v23 = vld [vmem:[%s1493_s0 + $0x90] sm:$0xff]  ;;  %v987_v25 = vld [vmem:[%s1494_s1] sm:$0xff]   ;;  %v39_v26 = vld [vmem:[%s1493_s0 + $0x98] sm:$0xff] }
   0x6   :  { %222 = vmatpush1.bf16.msra.mxu0 %v864_v5  ;;  %265 = vmatpush1.bf16.msra.mxu1 %v866_v10  ;;  %v882_v20 = vcombine.low %v37_v12, %v45_v13  ;;  %v871_v22 = vcombine.high %v23_v18, %v31_v19  ;;  %v46_v24 = vld [vmem:[%s1493_s0 + $0xd0] sm:$0xff]  ;;  %v47_v27 = vld [vmem:[%s1493_s0 + $0xd8] sm:$0xff]  ;;  %v870_v29 = vcombine.low %v23_v18, %v31_v19  ;;  %v24_v32 = vld [vmem:[%s1493_s0 + $0x20] sm:$0xff] }
   0x7   :  { %223 = vmatprep.subr.bf16.mxu0 %v881_v11  ;;  %266 = vmatprep.subr.bf16.mxu1 %v883_v14  ;;  %v885_v30 = vcombine.high %v38_v23, %v46_v24  ;;  %v887_v31 = vcombine.high %v39_v26, %v47_v27  ;;  %v32_v33 = vld [vmem:[%s1493_s0 + $0x60] sm:$0xff]  ;;  %v25_v34 = vld [vmem:[%s1493_s0 + $0x28] sm:$0xff]  ;;  %v884_v36 = vcombine.low %v38_v23, %v46_v24  ;;  %v26_v48 = vld [vmem:[%s1493_s0 + $0x30] sm:$0xff] }
   0x8   :  { %v33_v35 = vld [vmem:[%s1493_s0 + $0x68] sm:$0xff]  ;;  %v886_v37 = vcombine.low %v39_v26, %v47_v27  ;;  %v873_v38 = vcombine.high %v24_v32, %v32_v33  ;;  %v40_v40 = vld [vmem:[%s1493_s0 + $0xa0] sm:$0xff]  ;;  %v872_v44 = vcombine.low %v24_v32, %v32_v33  ;;  %v34_v49 = vld [vmem:[%s1493_s0 + $0x70] sm:$0xff] }
   0x9   :  { %v875_v39 = vcombine.high %v25_v34, %v33_v35  ;;  %v48_v41 = vld [vmem:[%s1493_s0 + $0xe0] sm:$0xff]  ;;  %v41_v42 = vld [vmem:[%s1493_s0 + $0xa8] sm:$0xff]  ;;  %v874_v45 = vcombine.low %v25_v34, %v33_v35  ;;  %v27_v50 = vld [vmem:[%s1493_s0 + $0x38] sm:$0xff]  ;;  %v877_v54 = vcombine.high %v26_v48, %v34_v49  ;;  %v876_v60 = vcombine.low %v26_v48, %v34_v49 }
   0xa   :  { %224 = vmatpush1.bf16.msra.mxu0 %v880_v16  ;;  %267 = vmatpush1.bf16.msra.mxu1 %v882_v20  ;;  %v49_v43 = vld [vmem:[%s1493_s0 + $0xe8] sm:$0xff]  ;;  %v889_v46 = vcombine.high %v40_v40, %v48_v41  ;;  %v35_v51 = vld [vmem:[%s1493_s0 + $0x78] sm:$0xff]  ;;  %v888_v52 = vcombine.low %v40_v40, %v48_v41  ;;  %v42_v56 = vld [vmem:[%s1493_s0 + $0xb0] sm:$0xff] }
   0xb   :  { %307 = vmatprep.subr.bf16.mxu0 %v869_v21  ;;  %350 = vmatprep.subr.bf16.mxu1 %v871_v22  ;;  %v891_v47 = vcombine.high %v41_v42, %v49_v43  ;;  %v890_v53 = vcombine.low %v41_v42, %v49_v43  ;;  %v879_v55 = vcombine.high %v27_v50, %v35_v51  ;;  %v50_v57 = vld [vmem:[%s1493_s0 + $0xf0] sm:$0xff]  ;;  %v43_v58 = vld [vmem:[%s1493_s0 + $0xb8] sm:$0xff] }
   0xc   :  { %v51_v59 = vld [vmem:[%s1493_s0 + $0xf8] sm:$0xff]  ;;  %v878_v61 = vcombine.low %v27_v50, %v35_v51  ;;  %v893_v62 = vcombine.high %v42_v56, %v50_v57  ;;  %v892_v0 = vcombine.low %v42_v56, %v50_v57 }
   0xd   :  { %896 = vmatmul.mubr.msk.bf16.vlgmr.msra.gmra.mrb[0].mxu0 %vm217_vm0, %v987_v25  ;;  %897 = vmatmul.mubr.msk.bf16.vlgmr.msra.gmra.mrb[0].mxu1 %vm217_vm0, %v987_v25  ;;  %v895_v63 = vcombine.high %v43_v58, %v51_v59  ;;  %v894_v1 = vcombine.low %v43_v58, %v51_v59 }
   0xe   :  { %308 = vmatpush1.bf16.msra.mxu0 %v868_v28  ;;  %351 = vmatpush1.bf16.msra.mxu1 %v870_v29 }
   0xf   :  { %309 = vmatprep.subr.bf16.mxu0 %v885_v30  ;;  %352 = vmatprep.subr.bf16.mxu1 %v887_v31 }
  0x10   :  { %339 = vmatprep.mubr.bf16.mxu0 %v912_v3  ;;  %382 = vmatprep.mubr.bf16.mxu1 %v912_v3 }
  0x12   :  { %310 = vmatpush1.bf16.msra.mxu0 %v884_v36  ;;  %353 = vmatpush1.bf16.msra.mxu1 %v886_v37 }
  0x13   :  { %393 = vmatprep.subr.bf16.mxu0 %v873_v38  ;;  %436 = vmatprep.subr.bf16.mxu1 %v875_v39 }
  0x15   :  { %898 = vmatmul.mubr.msk.bf16.vlgmr.msra.gmra.mrb[4].mxu0 %vm217_vm0, %v987_v25  ;;  %899 = vmatmul.mubr.msk.bf16.vlgmr.msra.gmra.mrb[4].mxu1 %vm217_vm0, %v987_v25 }
  0x16   :  { %394 = vmatpush1.bf16.msra.mxu0 %v872_v44  ;;  %437 = vmatpush1.bf16.msra.mxu1 %v874_v45 }
  0x17   :  { %395 = vmatprep.subr.bf16.mxu0 %v889_v46  ;;  %438 = vmatprep.subr.bf16.mxu1 %v891_v47 }
  0x18   :  { %425 = vmatprep.mubr.bf16.mxu0 %v912_v3  ;;  %468 = vmatprep.mubr.bf16.mxu1 %v912_v3 }
  0x1a   :  { %396 = vmatpush1.bf16.msra.mxu0 %v888_v52  ;;  %439 = vmatpush1.bf16.msra.mxu1 %v890_v53 }
  0x1b   :  { %479 = vmatprep.subr.bf16.mxu0 %v877_v54  ;;  %522 = vmatprep.subr.bf16.mxu1 %v879_v55 }
  0x1d   :  { %900 = vmatmul.mubr.msk.bf16.vlgmr.msra.gmra.mrb[8].mxu0 %vm217_vm0, %v987_v25  ;;  %901 = vmatmul.mubr.msk.bf16.vlgmr.msra.gmra.mrb[8].mxu1 %vm217_vm0, %v987_v25 }
  0x1e   :  { %480 = vmatpush1.bf16.msra.mxu0 %v876_v60  ;;  %523 = vmatpush1.bf16.msra.mxu1 %v878_v61 }
  0x1f   :  { %481 = vmatprep.subr.bf16.mxu0 %v893_v62  ;;  %524 = vmatprep.subr.bf16.mxu1 %v895_v63 }
  0x20   :  { %511 = vmatprep.mubr.bf16.mxu0 %v912_v3  ;;  %554 = vmatprep.mubr.bf16.mxu1 %v912_v3 }
  0x22   :  { %482 = vmatpush1.bf16.msra.mxu0 %v892_v0  ;;  %525 = vmatpush1.bf16.msra.mxu1 %v894_v1 }
  0x25   :  { %902 = vmatmul.mubr.msk.bf16.vlgmr.msra.gmra.mrb[12].mxu0 %vm217_vm0, %v987_v25  ;;  %903 = vmatmul.mubr.msk.bf16.vlgmr.msra.gmra.mrb[12].mxu1 %vm217_vm0, %v987_v25 }
  0xe0   :  { %v1065_v2 = vpop.f32.mrb[0].mxu0  ;;  %v1069_v5 = vpop.f32.mrb[0].mxu1 }
  0xe1   :  { %v1067_v4 = vpop.f32.mrb[1].mxu0  ;;  %v1075_v3 = vpop.f32.mrb[1].mxu1 }
  0xe2   :  { %v565_v6 = vadd.f32 %v1067_v4, %v1065_v2  ;;  %v1073_v7 = vpop.f32.mrb[2].mxu0  ;;  %v1079_v9 = vpop.f32.mrb[2].mxu1 }
  0xe3   :  { %v1077_v8 = vpop.f32.mrb[3].mxu0  ;;  %v1084_v12 = vpop.f32.mrb[3].mxu1 }
  0xe4   :  { %v566_v10 = vadd.f32 %v565_v6, %v1069_v5  ;;  %v582_v11 = vadd.f32 %v1077_v8, %v1073_v7 }
  0xe6   :  { %v567_v13 = vadd.f32 %v566_v10, %v1075_v3  ;;  %v583_v14 = vadd.f32 %v582_v11, %v1079_v9 }
  0xe8   :  { %v584_v15 = vadd.f32 %v583_v14, %v1084_v12  ;;  %v341_v16 = vpop.f32.mrb[4].mxu0  ;;  %v1091_v19 = vpop.f32.mrb[4].mxu1 }
  0xe9   :  { %v568_v17 = vadd.f32 %v567_v13, %v341_v16  ;;  %v1089_v18 = vpop.f32.mrb[5].mxu0  ;;  %v1095_v21 = vpop.f32.mrb[5].mxu1 }
  0xea   :  { %v1093_v20 = vpop.f32.mrb[6].mxu0  ;;  %v1101_v25 = vpop.f32.mrb[6].mxu1 }
  0xeb   :  { %v569_v22 = vadd.f32 %v568_v17, %v1089_v18  ;;  %v585_v23 = vadd.f32 %v584_v15, %v1093_v20  ;;  %v1099_v24 = vpop.f32.mrb[7].mxu0  ;;  %v1103_v26 = vpop.f32.mrb[7].mxu1 }
  0xed   :  { %v570_v27 = vadd.f32 %v569_v22, %v1091_v19  ;;  %v586_v28 = vadd.f32 %v585_v23, %v1099_v24 }
  0xef   :  { %v571_v29 = vadd.f32 %v570_v27, %v1095_v21  ;;  %v587_v30 = vadd.f32 %v586_v28, %v1101_v25 }
  0xf0   :  { %v1109_v31 = vpop.f32.mrb[8].mxu0  ;;  %v1115_v35 = vpop.f32.mrb[8].mxu1 }
  0xf1   :  { %v588_v32 = vadd.f32 %v587_v30, %v1103_v26  ;;  %v572_v33 = vadd.f32 %v571_v29, %v1109_v31  ;;  %v1113_v34 = vpop.f32.mrb[9].mxu0  ;;  %v1119_v37 = vpop.f32.mrb[9].mxu1 }
  0xf2   :  { %v1117_v36 = vpop.f32.mrb[10].mxu0  ;;  %v1125_v41 = vpop.f32.mrb[10].mxu1 }
  0xf3   :  { %v573_v38 = vadd.f32 %v572_v33, %v1113_v34  ;;  %v589_v39 = vadd.f32 %v588_v32, %v1117_v36  ;;  %v1123_v40 = vpop.f32.mrb[11].mxu0  ;;  %v1127_v42 = vpop.f32.mrb[11].mxu1 }
  0xf5   :  { %v574_v43 = vadd.f32 %v573_v38, %v1115_v35  ;;  %v590_v44 = vadd.f32 %v589_v39, %v1123_v40 }
  0xf7   :  { %v575_v45 = vadd.f32 %v574_v43, %v1119_v37  ;;  %v591_v46 = vadd.f32 %v590_v44, %v1125_v41 }
  0xf8   :  { %v1133_v47 = vpop.f32.mrb[12].mxu0  ;;  %v1139_v51 = vpop.f32.mrb[12].mxu1 }
  0xf9   :  { %v592_v48 = vadd.f32 %v591_v46, %v1127_v42  ;;  %v576_v49 = vadd.f32 %v575_v45, %v1133_v47  ;;  %v1137_v50 = vpop.f32.mrb[13].mxu0  ;;  %v1143_v53 = vpop.f32.mrb[13].mxu1 }
  0xfa   :  { %v1141_v52 = vpop.f32.mrb[14].mxu0  ;;  %v1149_v57 = vpop.f32.mrb[14].mxu1 }
  0xfb   :  { %v577_v54 = vadd.f32 %v576_v49, %v1137_v50  ;;  %v593_v55 = vadd.f32 %v592_v48, %v1141_v52  ;;  %v1147_v56 = vpop.f32.mrb[15].mxu0  ;;  %v1151_v58 = vpop.f32.mrb[15].mxu1 }
  0xfd   :  { %v578_v59 = vadd.f32 %v577_v54, %v1139_v51  ;;  %v594_v60 = vadd.f32 %v593_v55, %v1147_v56 }
  0xff   :  { %v595_v61 = vadd.f32 %v594_v60, %v1149_v57  ;;  %v579_v62 = vadd.f32 %v578_v59, %v1143_v53 }
 0x101   :  { %v596_v63 = vadd.f32 %v595_v61, %v1151_v58  ;;  %580 = vadd.xlane.f32.xlu0 %v579_v62 }
 0x105   :  { %597 = vadd.xlane.f32.xlu0 %v596_v63 }
 0x18e   :  { %v581_v0 = vpop.xlane.xlu0 %580 }
 0x18f   :  { %v1158_v1 = vmul.f32 0.00048828125, %v581_v0 }
 0x191   :  { %v1162_v6 = vsub.f32 %v1065_v2, %v1158_v1  ;;  %v1166_v10 = vsub.f32 %v1067_v4, %v1158_v1  ;;  %v1170_v13 = vsub.f32 %v1069_v5, %v1158_v1  ;;  %v1180_v2 = vsub.f32 %v1075_v3, %v1158_v1 }
 0x192   :  { %v598_v11 = vpop.xlane.xlu0 %597  ;;  %v1183_v4 = vsub.f32 %v341_v16, %v1158_v1  ;;  %v1197_v28 = vsub.f32 %v1089_v18, %v1158_v1  ;;  %v1203_v29 = vsub.f32 %v1091_v19, %v1158_v1  ;;  %v1217_v33 = vsub.f32 %v1095_v21, %v1158_v1 }
 0x193   :  { %v633_v14 = vmul.f32 %v1162_v6, %v1162_v6  ;;  %v634_v15 = vmul.f32 %v1166_v10, %v1166_v10  ;;  %v1176_v17 = vmul.f32 0.00048828125, %v598_v11  ;;  %v635_v22 = vmul.f32 %v1170_v13, %v1170_v13 }
 0x194   :  { %v636_v3 = vmul.f32 %v1180_v2, %v1180_v2  ;;  %v638_v19 = vmul.f32 %v1197_v28, %v1197_v28  ;;  %v639_v43 = vmul.f32 %v1203_v29, %v1203_v29  ;;  %v1251_v55 = vsub.f32 %v1115_v35, %v1158_v1 }
 0x195   :  { %v665_v5 = vadd.f32 %v634_v15, %v633_v14  ;;  %v1189_v23 = vsub.f32 %v1073_v7, %v1176_v17  ;;  %v1193_v27 = vsub.f32 %v1077_v8, %v1176_v17  ;;  %v637_v7 = vmul.f32 %v1183_v4, %v1183_v4 }
 0x196   :  { %v1209_v8 = vsub.f32 %v1079_v9, %v1176_v17  ;;  %v1223_v39 = vsub.f32 %v1084_v12, %v1176_v17  ;;  %v1227_v9 = vsub.f32 %v1109_v31, %v1158_v1  ;;  %v1233_v21 = vsub.f32 %v1093_v20, %v1176_v17 }
 0x197   :  { %v666_v16 = vadd.f32 %v665_v5, %v635_v22  ;;  %v649_v18 = vmul.f32 %v1189_v23, %v1189_v23  ;;  %v650_v32 = vmul.f32 %v1193_v27, %v1193_v27  ;;  %v1239_v12 = vsub.f32 %v1113_v34, %v1158_v1 }
 0x198   :  { %v651_v45 = vmul.f32 %v1209_v8, %v1209_v8  ;;  %v640_v31 = vmul.f32 %v1217_v33, %v1217_v33  ;;  %v1245_v49 = vsub.f32 %v1099_v24, %v1176_v17  ;;  %v652_v20 = vmul.f32 %v1223_v39, %v1223_v39 }
 0x199   :  { %v667_v30 = vadd.f32 %v666_v16, %v636_v3  ;;  %v682_v46 = vadd.f32 %v650_v32, %v649_v18  ;;  %v641_v34 = vmul.f32 %v1227_v9, %v1227_v9  ;;  %v1257_v60 = vsub.f32 %v1101_v25, %v1176_v17 }
 0x19a   :  { %v653_v24 = vmul.f32 %v1233_v21, %v1233_v21  ;;  %v1263_v62 = vsub.f32 %v1119_v37, %v1158_v1  ;;  %v642_v35 = vmul.f32 %v1239_v12, %v1239_v12  ;;  %v1269_v0 = vsub.f32 %v1103_v26, %v1176_v17 }
 0x19b   :  { %v668_v38 = vadd.f32 %v667_v30, %v637_v7  ;;  %v683_v54 = vadd.f32 %v682_v46, %v651_v45  ;;  %v654_v25 = vmul.f32 %v1245_v49, %v1245_v49  ;;  %v1275_v14 = vsub.f32 %v1133_v47, %v1158_v1 }
 0x19c   :  { %v643_v37 = vmul.f32 %v1251_v55, %v1251_v55  ;;  %v1281_v22 = vsub.f32 %v1117_v36, %v1176_v17  ;;  %v655_v26 = vmul.f32 %v1257_v60, %v1257_v60  ;;  %v1287_v3 = vsub.f32 %v1137_v50, %v1158_v1 }
 0x19d   :  { %v669_v44 = vadd.f32 %v668_v38, %v638_v19  ;;  %v684_v61 = vadd.f32 %v683_v54, %v652_v20  ;;  %v644_v47 = vmul.f32 %v1263_v62, %v1263_v62  ;;  %v1293_v7 = vsub.f32 %v1123_v40, %v1176_v17 }
 0x19e   :  { %v656_v36 = vmul.f32 %v1269_v0, %v1269_v0  ;;  %v1299_v18 = vsub.f32 %v1139_v51, %v1158_v1  ;;  %v645_v50 = vmul.f32 %v1275_v14, %v1275_v14  ;;  %v1305_v19 = vsub.f32 %v1125_v41, %v1176_v17 }
 0x19f   :  { %v670_v48 = vadd.f32 %v669_v44, %v639_v43  ;;  %v685_v11 = vadd.f32 %v684_v61, %v653_v24  ;;  %v657_v40 = vmul.f32 %v1281_v22, %v1281_v22  ;;  %v1311_v43 = vsub.f32 %v1143_v53, %v1158_v1 }
 0x1a0   :  { %v646_v51 = vmul.f32 %v1287_v3, %v1287_v3  ;;  %v1317_v45 = vsub.f32 %v1127_v42, %v1176_v17  ;;  %v658_v41 = vmul.f32 %v1293_v7, %v1293_v7  ;;  %v1325_v53 = vsub.f32 %v1141_v52, %v1176_v17 }
 0x1a1   :  { %v671_v59 = vadd.f32 %v670_v48, %v640_v31  ;;  %v686_v5 = vadd.f32 %v685_v11, %v654_v25  ;;  %v647_v31 = vmul.f32 %v1299_v18, %v1299_v18  ;;  %v659_v1 = vmul.f32 %v1305_v19, %v1305_v19 }
 0x1a2   :  { %v648_v42 = vmul.f32 %v1311_v43, %v1311_v43  ;;  %v1339_v52 = vsub.f32 %v1149_v57, %v1176_v17  ;;  %v1345_v25 = vsub.f32 %v1151_v58, %v1176_v17 }
 0x1a3   :  { %v672_v63 = vadd.f32 %v671_v59, %v641_v34  ;;  %v687_v30 = vadd.f32 %v686_v5, %v655_v26  ;;  %v1333_v34 = vsub.f32 %v1147_v56, %v1176_v17  ;;  %v660_v59 = vmul.f32 %v1317_v45, %v1317_v45 }
 0x1a4   :  { %v664_v57 = vmul.f32 %v1345_v25, %v1345_v25 }
 0x1a5   :  { %v673_v15 = vadd.f32 %v672_v63, %v642_v35  ;;  %v688_v38 = vadd.f32 %v687_v30, %v656_v36  ;;  %v661_v35 = vmul.f32 %v1325_v53, %v1325_v53  ;;  %v662_v56 = vmul.f32 %v1333_v34, %v1333_v34 }
 0x1a7   :  { %v674_v16 = vadd.f32 %v673_v15, %v643_v37  ;;  %v689_v46 = vadd.f32 %v688_v38, %v657_v40  ;;  %v663_v37 = vmul.f32 %v1339_v52, %v1339_v52 }
 0x1a9   :  { %v675_v32 = vadd.f32 %v674_v16, %v644_v47  ;;  %v690_v20 = vadd.f32 %v689_v46, %v658_v41  ;;  %v751_v47 = vld [vmem:[%s1495_s3] sm:$0xff]  ;;  %v752_v46 = vld [vmem:[%s1495_s3 + $0x8] sm:$0xff] }
 0x1ab   :  { %v676_v44 = vadd.f32 %v675_v32, %v645_v50  ;;  %v691_v24 = vadd.f32 %v690_v20, %v659_v1  ;;  %v701_v32 = vld [vmem:[%s1496_s2] sm:$0xff] }
 0x1ad   :  { %v677_v48 = vadd.f32 %v676_v44, %v646_v51  ;;  %v692_v63 = vadd.f32 %v691_v24, %v660_v59  ;;  %v702_v51 = vld [vmem:[%s1496_s2 + $0x8] sm:$0xff] }
 0x1af   :  { %v678_v54 = vadd.f32 %v677_v48, %v647_v31  ;;  %v693_v11 = vadd.f32 %v692_v63, %v661_v35 }
 0x1b1   :  { %v679_v61 = vadd.f32 %v678_v54, %v648_v42  ;;  %v694_v15 = vadd.f32 %v693_v11, %v662_v56 }
 0x1b3   :  { %680 = vadd.xlane.f32.xlu1 %v679_v61  ;;  %v695_v26 = vadd.f32 %v694_v15, %v663_v37 }
 0x1b5   :  { %v696_v5 = vadd.f32 %v695_v26, %v664_v57 }
 0x1b7   :  { %697 = vadd.xlane.f32.xlu1 %v696_v5 }
 0x1c8   :  { %755 = vperm.xlu1 %906, %v751_v47  }
 0x240   :  { %v681_v58 = vpop.xlane.xlu1 %680 }
 0x241   :  { %v699_v17 = vmul.f32 0.00048828125, %v681_v58 }
 0x243   :  { %v703_v16 = vadd.f32 1e-05, %v699_v17 }
 0x244   :  { %v698_v36 = vpop.xlane.xlu1 %697 }
 0x245   :  { %908 = vrsqrt.f32 %v703_v16  ;;  %v700_v30 = vmul.f32 0.00048828125, %v698_v36 }
 0x247   :  { %v704_v50 = vadd.f32 1e-05, %v700_v30 }
 0x248   :  { %v756_v35 = vpop.permute.xlu1 %755 }
 0x249   :  { %910 = vrsqrt.f32 %v704_v50 }
 0x24f   :  { %v909_v40 = vpop.eup %908 }
 0x250   :  { %v707_v38 = vmul.f32 %v909_v40, %v701_v32 }
 0x252   :  { %711 = vperm.xlu0 %905, %v707_v38  }
 0x253   :  { %v911_v44 = vpop.eup %910 }
 0x254   :  { %v708_v41 = vmul.f32 %v911_v44, %v702_v51 }
 0x256   :  { %716 = vperm.xlu1 %906, %v708_v41  }
 0x25a   :  { %760 = vperm.xlu1 %906, %v752_v46  }
 0x2d1   :  { %v712_v31 = vpop.permute.xlu0 %711 }
 0x2d2   :  { %v719_v48 = vmul.f32 %v712_v31, %v1162_v6  ;;  %v720_v1 = vmul.f32 %v712_v31, %v1166_v10  ;;  %v721_v20 = vmul.f32 %v712_v31, %v1170_v13  ;;  %v722_v42 = vmul.f32 %v712_v31, %v1180_v2 }
 0x2d3   :  { %v723_v54 = vmul.f32 %v712_v31, %v1183_v4  ;;  %v724_v59 = vmul.f32 %v712_v31, %v1197_v28  ;;  %v725_v24 = vmul.f32 %v712_v31, %v1203_v29  ;;  %v726_v61 = vmul.f32 %v712_v31, %v1217_v33 }
 0x2d4   :  { %v727_v63 = vmul.f32 %v712_v31, %v1227_v9  ;;  %v728_v56 = vmul.f32 %v712_v31, %v1239_v12  ;;  %v729_v6 = vmul.f32 %v712_v31, %v1251_v55  ;;  %v730_v10 = vmul.f32 %v712_v31, %v1263_v62 }
 0x2d5   :  { %v731_v13 = vmul.f32 %v712_v31, %v1275_v14  ;;  %v732_v2 = vmul.f32 %v712_v31, %v1287_v3  ;;  %v733_v4 = vmul.f32 %v712_v31, %v1299_v18  ;;  %v734_v28 = vmul.f32 %v712_v31, %v1311_v43  ;;  %v717_v36 = vpop.permute.xlu1 %716 }
 0x2d6   :  { %v763_v29 = vadd.f32 %v756_v35, %v719_v48  ;;  %v764_v11 = vadd.f32 %v756_v35, %v720_v1  ;;  %v765_v33 = vadd.f32 %v756_v35, %v721_v20  ;;  %v766_v37 = vadd.f32 %v756_v35, %v722_v42 }
 0x2d7   :  { %v767_v15 = vadd.f32 %v756_v35, %v723_v54  ;;  %v768_v9 = vadd.f32 %v756_v35, %v724_v59  ;;  %v769_v57 = vadd.f32 %v756_v35, %v725_v24  ;;  %v770_v12 = vadd.f32 %v756_v35, %v726_v61 }
 0x2d8   :  { %v771_v26 = vadd.f32 %v756_v35, %v727_v63  ;;  %v772_v55 = vadd.f32 %v756_v35, %v728_v56  ;;  %v773_v5 = vadd.f32 %v756_v35, %v729_v6  ;;  %v774_v62 = vadd.f32 %v756_v35, %v730_v10 }
 0x2d9   :  { %v775_v47 = vadd.f32 %v756_v35, %v731_v13  ;;  %v776_v14 = vadd.f32 %v756_v35, %v732_v2  ;;  %v777_v58 = vadd.f32 %v756_v35, %v733_v4  ;;  %v778_v3 = vadd.f32 %v756_v35, %v734_v28  ;;  %v761_v24 = vpop.permute.xlu1 %760 }
 0x2da   :  { %v795_v17 = vmax.f32 %v763_v29, 0.0  ;;  %v796_v18 = vmax.f32 %v764_v11, 0.0  ;;  %v797_v16 = vmax.f32 %v765_v33, 0.0  ;;  %v798_v43 = vmax.f32 %v766_v37, 0.0 }
 0x2db   :  { %v799_v30 = vmax.f32 %v767_v15, 0.0  ;;  %v800_v50 = vmax.f32 %v768_v9, 0.0  ;;  %v801_v32 = vmax.f32 %v769_v57, 0.0  ;;  %v802_v40 = vmax.f32 %v770_v12, 0.0 }
 0x2dc   :  { %v803_v38 = vmax.f32 %v771_v26, 0.0  ;;  %v804_v51 = vmax.f32 %v772_v55, 0.0  ;;  %v805_v44 = vmax.f32 %v773_v5, 0.0  ;;  %v806_v41 = vmax.f32 %v774_v62, 0.0  ;;  %827 = vst [vmem:[%s1497_s4] sm:$0xff] %v795_v17  ;;  %828 = vst [vmem:[%s1497_s4 + $0x8] sm:$0xff] %v796_v18 }
 0x2dd   :  { %829 = vst [vmem:[%s1497_s4 + $0x10] sm:$0xff] %v797_v16  ;;  %830 = vst [vmem:[%s1497_s4 + $0x18] sm:$0xff] %v798_v43  ;;  %v807_v46 = vmax.f32 %v775_v47, 0.0  ;;  %v808_v31 = vmax.f32 %v776_v14, 0.0  ;;  %v809_v48 = vmax.f32 %v777_v58, 0.0  ;;  %v810_v1 = vmax.f32 %v778_v3, 0.0 }
 0x2de   :  { %831 = vst [vmem:[%s1497_s4 + $0x20] sm:$0xff] %v799_v30  ;;  %832 = vst [vmem:[%s1497_s4 + $0x28] sm:$0xff] %v800_v50  ;;  %v735_v20 = vmul.f32 %v717_v36, %v1189_v23  ;;  %v736_v42 = vmul.f32 %v717_v36, %v1193_v27  ;;  %v737_v54 = vmul.f32 %v717_v36, %v1209_v8 }
 0x2df   :  { %833 = vst [vmem:[%s1497_s4 + $0x30] sm:$0xff] %v801_v32  ;;  %834 = vst [vmem:[%s1497_s4 + $0x38] sm:$0xff] %v802_v40  ;;  %v738_v59 = vmul.f32 %v717_v36, %v1223_v39  ;;  %v739_v23 = vmul.f32 %v717_v36, %v1233_v21  ;;  %v740_v27 = vmul.f32 %v717_v36, %v1245_v49 }
 0x2e0   :  { %835 = vst [vmem:[%s1497_s4 + $0x40] sm:$0xff] %v803_v38  ;;  %836 = vst [vmem:[%s1497_s4 + $0x48] sm:$0xff] %v804_v51  ;;  %v741_v8 = vmul.f32 %v717_v36, %v1257_v60  ;;  %v742_v39 = vmul.f32 %v717_v36, %v1269_v0  ;;  %v743_v61 = vmul.f32 %v717_v36, %v1281_v22 }
 0x2e1   :  { %837 = vst [vmem:[%s1497_s4 + $0x50] sm:$0xff] %v805_v44  ;;  %838 = vst [vmem:[%s1497_s4 + $0x58] sm:$0xff] %v806_v41  ;;  %v744_v35 = vmul.f32 %v717_v36, %v1293_v7  ;;  %v745_v63 = vmul.f32 %v717_v36, %v1305_v19  ;;  %v746_v56 = vmul.f32 %v717_v36, %v1317_v45 }
 0x2e2   :  { %839 = vst [vmem:[%s1497_s4 + $0x60] sm:$0xff] %v807_v46  ;;  %840 = vst [vmem:[%s1497_s4 + $0x68] sm:$0xff] %v808_v31  ;;  %v747_v6 = vmul.f32 %v717_v36, %v1325_v53  ;;  %v748_v10 = vmul.f32 %v717_v36, %v1333_v34  ;;  %v749_v21 = vmul.f32 %v717_v36, %v1339_v52 }
 0x2e3   :  { %841 = vst [vmem:[%s1497_s4 + $0x70] sm:$0xff] %v809_v48  ;;  %842 = vst [vmem:[%s1497_s4 + $0x78] sm:$0xff] %v810_v1  ;;  %v750_v49 = vmul.f32 %v717_v36, %v1345_v25  ;;  %v779_v60 = vadd.f32 %v761_v24, %v735_v20  ;;  %v780_v13 = vadd.f32 %v761_v24, %v736_v42 }
 0x2e4   :  { %v781_v0 = vadd.f32 %v761_v24, %v737_v54  ;;  %v782_v2 = vadd.f32 %v761_v24, %v738_v59  ;;  %v783_v4 = vadd.f32 %v761_v24, %v739_v23  ;;  %v784_v22 = vadd.f32 %v761_v24, %v740_v27 }
 0x2e5   :  { %v785_v28 = vadd.f32 %v761_v24, %v741_v8  ;;  %v786_v7 = vadd.f32 %v761_v24, %v742_v39  ;;  %v787_v29 = vadd.f32 %v761_v24, %v743_v61  ;;  %v788_v19 = vadd.f32 %v761_v24, %v744_v35 }
 0x2e6   :  { %v789_v11 = vadd.f32 %v761_v24, %v745_v63  ;;  %v790_v45 = vadd.f32 %v761_v24, %v746_v56  ;;  %v791_v33 = vadd.f32 %v761_v24, %v747_v6  ;;  %v792_v53 = vadd.f32 %v761_v24, %v748_v10 }
 0x2e7   :  { %v793_v37 = vadd.f32 %v761_v24, %v749_v21  ;;  %v794_v34 = vadd.f32 %v761_v24, %v750_v49  ;;  %v811_v15 = vmax.f32 %v779_v60, 0.0  ;;  %v812_v52 = vmax.f32 %v780_v13, 0.0 }
 0x2e8   :  { %v813_v9 = vmax.f32 %v781_v0, 0.0  ;;  %v814_v25 = vmax.f32 %v782_v2, 0.0  ;;  %v815_v57 = vmax.f32 %v783_v4, 0.0  ;;  %v816_v12 = vmax.f32 %v784_v22, 0.0 }
 0x2e9   :  { %v817_v26 = vmax.f32 %v785_v28, 0.0  ;;  %v818_v55 = vmax.f32 %v786_v7, 0.0  ;;  %v819_v5 = vmax.f32 %v787_v29, 0.0  ;;  %v820_v62 = vmax.f32 %v788_v19, 0.0  ;;  %843 = vst [vmem:[%s1497_s4 + $0x80] sm:$0xff] %v811_v15  ;;  %844 = vst [vmem:[%s1497_s4 + $0x88] sm:$0xff] %v812_v52 }
 0x2ea   :  { %v821_v47 = vmax.f32 %v789_v11, 0.0  ;;  %v822_v14 = vmax.f32 %v790_v45, 0.0  ;;  %845 = vst [vmem:[%s1497_s4 + $0x90] sm:$0xff] %v813_v9  ;;  %846 = vst [vmem:[%s1497_s4 + $0x98] sm:$0xff] %v814_v25  ;;  %v823_v58 = vmax.f32 %v791_v33, 0.0  ;;  %v824_v3 = vmax.f32 %v792_v53, 0.0 }
 0x2eb   :  { %v825_v17 = vmax.f32 %v793_v37, 0.0  ;;  %v826_v18 = vmax.f32 %v794_v34, 0.0  ;;  %847 = vst [vmem:[%s1497_s4 + $0xa0] sm:$0xff] %v815_v57  ;;  %848 = vst [vmem:[%s1497_s4 + $0xa8] sm:$0xff] %v816_v12 }
 0x2ec   :  { %849 = vst [vmem:[%s1497_s4 + $0xb0] sm:$0xff] %v817_v26  ;;  %850 = vst [vmem:[%s1497_s4 + $0xb8] sm:$0xff] %v818_v55 }
 0x2ed   :  { %851 = vst [vmem:[%s1497_s4 + $0xc0] sm:$0xff] %v819_v5  ;;  %852 = vst [vmem:[%s1497_s4 + $0xc8] sm:$0xff] %v820_v62 }
 0x2ee   :  { %853 = vst [vmem:[%s1497_s4 + $0xd0] sm:$0xff] %v821_v47  ;;  %854 = vst [vmem:[%s1497_s4 + $0xd8] sm:$0xff] %v822_v14 }
 0x2ef   :  { %855 = vst [vmem:[%s1497_s4 + $0xe0] sm:$0xff] %v823_v58  ;;  %856 = vst [vmem:[%s1497_s4 + $0xe8] sm:$0xff] %v824_v3 }
 0x2f0   :  { %857 = vst [vmem:[%s1497_s4 + $0xf0] sm:$0xff] %v825_v17  ;;  %858 = vst [vmem:[%s1497_s4 + $0xf8] sm:$0xff] %v826_v18 }

// kernel: resnet20_forward.23
= control target key start
LH: loop header
LB: loop body
LE: loop exit
PB: predicated region body
PF: predicated region fallthrough
CT: control target
= control target key end

     0   :  { %vm893_vm0 = vcmask 130048   ;;  %s2619_s0 = inlined_call_operand.vmem [shape: bf16[144,2048], index: 0, kind: input, shape index: {}]   ;;  %s2620_s1 = inlined_call_operand.vmem [shape: bf16[16,144], index: 1, kind: input, shape index: {}]   ;;  %s2621_s3 = inlined_call_operand.vmem [shape: f32[16,1], index: 3, kind: input, shape index: {}]   ;;  %s2622_s2 = inlined_call_operand.vmem [shape: f32[16,1], index: 2, kind: input, shape index: {}]   ;;  %s2623_s4 = inlined_call_operand.vmem [shape: f32[16,2048], index: 4, kind: output, shape index: {}]  }
   0x1   :  { %v20_v0 = vld [vmem:[%s2619_s0] sm:$0xff]  ;;  %v21_v2 = vld [vmem:[%s2619_s0 + $0x8] sm:$0xff] }
   0x2   :  { %v28_v1 = vld [vmem:[%s2619_s0 + $0x40] sm:$0xff]  ;;  %v29_v5 = vld [vmem:[%s2619_s0 + $0x48] sm:$0xff] }
   0x3   :  { %v1542_v3 = vcombine.high %v20_v0, %v28_v1  ;;  %v1541_v4 = vcombine.low %v20_v0, %v28_v1  ;;  %v36_v6 = vld [vmem:[%s2619_s0 + $0x80] sm:$0xff]  ;;  %v1544_v8 = vcombine.high %v21_v2, %v29_v5  ;;  %v1543_v9 = vcombine.low %v21_v2, %v29_v5  ;;  %v37_v11 = vld [vmem:[%s2619_s0 + $0x88] sm:$0xff] }
   0x4   :  { %v44_v7 = vld [vmem:[%s2619_s0 + $0xc0] sm:$0xff]  ;;  %v45_v12 = vld [vmem:[%s2619_s0 + $0xc8] sm:$0xff] }
   0x5   :  { %v1558_v10 = vcombine.high %v36_v6, %v44_v7  ;;  %v52_v13 = vld [vmem:[%s2619_s0 + $0x100] sm:$0xff]  ;;  %897 = vmatprep.subr.bf16.mxu0 %v1542_v3  ;;  %v1560_v14 = vcombine.high %v37_v11, %v45_v12  ;;  %v53_v16 = vld [vmem:[%s2619_s0 + $0x108] sm:$0xff]  ;;  %940 = vmatprep.subr.bf16.mxu1 %v1544_v8  ;;  %v1557_v18 = vcombine.low %v36_v6, %v44_v7  ;;  %v22_v7 = vld [vmem:[%s2619_s0 + $0x10] sm:$0xff] }
   0x6   :  { %v60_v15 = vld [vmem:[%s2619_s0 + $0x140] sm:$0xff]  ;;  %v61_v17 = vld [vmem:[%s2619_s0 + $0x148] sm:$0xff]  ;;  %898 = vmatpush1.bf16.msra.mxu0 %v1541_v4  ;;  %941 = vmatpush1.bf16.msra.mxu1 %v1543_v9  ;;  %v1559_v19 = vcombine.low %v37_v11, %v45_v12  ;;  %v30_v8 = vld [vmem:[%s2619_s0 + $0x50] sm:$0xff] }
   0x7   :  { %899 = vmatprep.subr.bf16.mxu0 %v1558_v10  ;;  %v1574_v20 = vcombine.high %v52_v13, %v60_v15  ;;  %942 = vmatprep.subr.bf16.mxu1 %v1560_v14  ;;  %v1576_v21 = vcombine.high %v53_v16, %v61_v17  ;;  %v68_v22 = vld [vmem:[%s2619_s0 + $0x180] sm:$0xff]  ;;  %v69_v24 = vld [vmem:[%s2619_s0 + $0x188] sm:$0xff]  ;;  %v1573_v26 = vcombine.low %v52_v13, %v60_v15  ;;  %v23_v9 = vld [vmem:[%s2619_s0 + $0x18] sm:$0xff] }
   0x8   :  { %v76_v23 = vld [vmem:[%s2619_s0 + $0x1c0] sm:$0xff]  ;;  %v77_v25 = vld [vmem:[%s2619_s0 + $0x1c8] sm:$0xff]  ;;  %v1575_v27 = vcombine.low %v53_v16, %v61_v17  ;;  %v31_v10 = vld [vmem:[%s2619_s0 + $0x58] sm:$0xff]  ;;  %v1546_v13 = vcombine.high %v22_v7, %v30_v8 }
   0x9   :  { %v1590_v28 = vcombine.high %v68_v22, %v76_v23  ;;  %v1592_v29 = vcombine.high %v69_v24, %v77_v25  ;;  %v84_v30 = vld [vmem:[%s2619_s0 + $0x200] sm:$0xff]  ;;  %v85_v32 = vld [vmem:[%s2619_s0 + $0x208] sm:$0xff]  ;;  %v1589_v34 = vcombine.low %v68_v22, %v76_v23  ;;  %v1591_v36 = vcombine.low %v69_v24, %v77_v25  ;;  %v38_v15 = vld [vmem:[%s2619_s0 + $0x90] sm:$0xff] }
   0xa   :  { %900 = vmatpush1.bf16.msra.mxu0 %v1557_v18  ;;  %943 = vmatpush1.bf16.msra.mxu1 %v1559_v19  ;;  %v92_v31 = vld [vmem:[%s2619_s0 + $0x240] sm:$0xff]  ;;  %v93_v33 = vld [vmem:[%s2619_s0 + $0x248] sm:$0xff]  ;;  %v1548_v14 = vcombine.high %v23_v9, %v31_v10  ;;  %v46_v16 = vld [vmem:[%s2619_s0 + $0xd0] sm:$0xff] }
   0xb   :  { %901 = vmatprep.subr.bf16.mxu0 %v1574_v20  ;;  %944 = vmatprep.subr.bf16.mxu1 %v1576_v21  ;;  %v1792_v35 = vld [vmem:[%s2620_s1 + $0x4] ss:$8 sps:$4 sm:$0xff]   ;;  %v1606_v37 = vcombine.high %v84_v30, %v92_v31  ;;  %v1608_v38 = vcombine.high %v85_v32, %v93_v33  ;;  %v1605_v43 = vcombine.low %v84_v30, %v92_v31  ;;  %v1867_v17 = vld [vmem:[%s2620_s1] ss:$8 sps:$4 sm:$0xff]   ;;  %v39_v18 = vld [vmem:[%s2619_s0 + $0x98] sm:$0xff] }
   0xc   :  { %v100_v39 = vld [vmem:[%s2619_s0 + $0x280] sm:$0xff]  ;;  %1685 = vmatprep.mubr.msk.bf16.mxu0 %vm893_vm0, %v1792_v35  ;;  %v101_v41 = vld [vmem:[%s2619_s0 + $0x288] sm:$0xff]  ;;  %1686 = vmatprep.mubr.msk.bf16.mxu1 %vm893_vm0, %v1792_v35  ;;  %v1607_v44 = vcombine.low %v85_v32, %v93_v33  ;;  %v47_v19 = vld [vmem:[%s2619_s0 + $0xd8] sm:$0xff]  ;;  %v1545_v20 = vcombine.low %v22_v7, %v30_v8  ;;  %v1547_v21 = vcombine.low %v23_v9, %v31_v10 }
   0xd   :  { %v108_v40 = vld [vmem:[%s2619_s0 + $0x2c0] sm:$0xff]  ;;  %v109_v42 = vld [vmem:[%s2619_s0 + $0x2c8] sm:$0xff]  ;;  %v1562_v22 = vcombine.high %v38_v15, %v46_v16  ;;  %v1564_v23 = vcombine.high %v39_v18, %v47_v19  ;;  %v54_v24 = vld [vmem:[%s2619_s0 + $0x110] sm:$0xff] }
   0xe   :  { %902 = vmatpush1.bf16.msra.mxu0 %v1573_v26  ;;  %945 = vmatpush1.bf16.msra.mxu1 %v1575_v27  ;;  %v1622_v45 = vcombine.high %v100_v39, %v108_v40  ;;  %v1624_v46 = vcombine.high %v101_v41, %v109_v42  ;;  %v116_v47 = vld [vmem:[%s2619_s0 + $0x300] sm:$0xff]  ;;  %v117_v49 = vld [vmem:[%s2619_s0 + $0x308] sm:$0xff]  ;;  %v1621_v51 = vcombine.low %v100_v39, %v108_v40  ;;  %v62_v25 = vld [vmem:[%s2619_s0 + $0x150] sm:$0xff] }
   0xf   :  { %903 = vmatprep.subr.bf16.mxu0 %v1590_v28  ;;  %946 = vmatprep.subr.bf16.mxu1 %v1592_v29  ;;  %v124_v48 = vld [vmem:[%s2619_s0 + $0x340] sm:$0xff]  ;;  %v125_v50 = vld [vmem:[%s2619_s0 + $0x348] sm:$0xff]  ;;  %v1623_v52 = vcombine.low %v101_v41, %v109_v42  ;;  %v55_v26 = vld [vmem:[%s2619_s0 + $0x118] sm:$0xff]  ;;  %v1561_v28 = vcombine.low %v38_v15, %v46_v16  ;;  %v1563_v29 = vcombine.low %v39_v18, %v47_v19 }
  0x10   :  { %v1638_v53 = vcombine.high %v116_v47, %v124_v48  ;;  %v1640_v54 = vcombine.high %v117_v49, %v125_v50  ;;  %v132_v55 = vld [vmem:[%s2619_s0 + $0x380] sm:$0xff]  ;;  %v133_v57 = vld [vmem:[%s2619_s0 + $0x388] sm:$0xff]  ;;  %v1637_v59 = vcombine.low %v116_v47, %v124_v48  ;;  %v1639_v60 = vcombine.low %v117_v49, %v125_v50  ;;  %v63_v27 = vld [vmem:[%s2619_s0 + $0x158] sm:$0xff] }
  0x11   :  { %v140_v56 = vld [vmem:[%s2619_s0 + $0x3c0] sm:$0xff]  ;;  %v141_v58 = vld [vmem:[%s2619_s0 + $0x3c8] sm:$0xff]  ;;  %v1578_v30 = vcombine.high %v54_v24, %v62_v25  ;;  %v1580_v31 = vcombine.high %v55_v26, %v63_v27  ;;  %v70_v32 = vld [vmem:[%s2619_s0 + $0x190] sm:$0xff] }
  0x12   :  { %904 = vmatpush1.bf16.msra.mxu0 %v1589_v34  ;;  %947 = vmatpush1.bf16.msra.mxu1 %v1591_v36  ;;  %v1654_v61 = vcombine.high %v132_v55, %v140_v56  ;;  %v1656_v62 = vcombine.high %v133_v57, %v141_v58  ;;  %v148_v63 = vld [vmem:[%s2619_s0 + $0x400] sm:$0xff]  ;;  %v149_v1 = vld [vmem:[%s2619_s0 + $0x408] sm:$0xff]  ;;  %v1653_v3 = vcombine.low %v132_v55, %v140_v56  ;;  %v78_v33 = vld [vmem:[%s2619_s0 + $0x1d0] sm:$0xff] }
  0x13   :  { %905 = vmatprep.subr.bf16.mxu0 %v1606_v37  ;;  %948 = vmatprep.subr.bf16.mxu1 %v1608_v38  ;;  %v156_v0 = vld [vmem:[%s2619_s0 + $0x440] sm:$0xff]  ;;  %v157_v2 = vld [vmem:[%s2619_s0 + $0x448] sm:$0xff]  ;;  %v1655_v4 = vcombine.low %v133_v57, %v141_v58  ;;  %v71_v34 = vld [vmem:[%s2619_s0 + $0x198] sm:$0xff]  ;;  %v1577_v37 = vcombine.low %v54_v24, %v62_v25  ;;  %v1579_v38 = vcombine.low %v55_v26, %v63_v27 }
  0x14   :  { %v1670_v5 = vcombine.high %v148_v63, %v156_v0  ;;  %v1672_v6 = vcombine.high %v149_v1, %v157_v2  ;;  %v1669_v11 = vcombine.low %v148_v63, %v156_v0  ;;  %v1671_v12 = vcombine.low %v149_v1, %v157_v2  ;;  %v79_v36 = vld [vmem:[%s2619_s0 + $0x1d8] sm:$0xff]  ;;  %v86_v41 = vld [vmem:[%s2619_s0 + $0x210] sm:$0xff]  ;;  %v24_v18 = vld [vmem:[%s2619_s0 + $0x20] sm:$0xff] }
  0x15   :  { %v1594_v39 = vcombine.high %v70_v32, %v78_v33  ;;  %v1596_v40 = vcombine.high %v71_v34, %v79_v36  ;;  %v94_v42 = vld [vmem:[%s2619_s0 + $0x250] sm:$0xff]  ;;  %v32_v19 = vld [vmem:[%s2619_s0 + $0x60] sm:$0xff] }
  0x16   :  { %906 = vmatpush1.bf16.msra.mxu0 %v1605_v43  ;;  %949 = vmatpush1.bf16.msra.mxu1 %v1607_v44  ;;  %v87_v43 = vld [vmem:[%s2619_s0 + $0x218] sm:$0xff]  ;;  %v1610_v47 = vcombine.high %v86_v41, %v94_v42  ;;  %v102_v49 = vld [vmem:[%s2619_s0 + $0x290] sm:$0xff]  ;;  %v1550_v24 = vcombine.high %v24_v18, %v32_v19  ;;  %v40_v26 = vld [vmem:[%s2619_s0 + $0xa0] sm:$0xff] }
  0x17   :  { %907 = vmatprep.subr.bf16.mxu0 %v1622_v45  ;;  %950 = vmatprep.subr.bf16.mxu1 %v1624_v46  ;;  %v95_v44 = vld [vmem:[%s2619_s0 + $0x258] sm:$0xff]  ;;  %v1593_v45 = vcombine.low %v70_v32, %v78_v33  ;;  %v1595_v46 = vcombine.low %v71_v34, %v79_v36  ;;  %v110_v50 = vld [vmem:[%s2619_s0 + $0x2d0] sm:$0xff]  ;;  %v48_v27 = vld [vmem:[%s2619_s0 + $0xe0] sm:$0xff] }
  0x18   :  { %v1612_v48 = vcombine.high %v87_v43, %v95_v44  ;;  %v1626_v55 = vcombine.high %v102_v49, %v110_v50  ;;  %v118_v57 = vld [vmem:[%s2619_s0 + $0x310] sm:$0xff]  ;;  %v1566_v32 = vcombine.high %v40_v26, %v48_v27  ;;  %v56_v34 = vld [vmem:[%s2619_s0 + $0x120] sm:$0xff] }
  0x19   :  { %v126_v58 = vld [vmem:[%s2619_s0 + $0x350] sm:$0xff]  ;;  %v64_v36 = vld [vmem:[%s2619_s0 + $0x160] sm:$0xff] }
  0x1a   :  { %908 = vmatpush1.bf16.msra.mxu0 %v1621_v51  ;;  %951 = vmatpush1.bf16.msra.mxu1 %v1623_v52  ;;  %v103_v51 = vld [vmem:[%s2619_s0 + $0x298] sm:$0xff]  ;;  %v1642_v63 = vcombine.high %v118_v57, %v126_v58  ;;  %v134_v1 = vld [vmem:[%s2619_s0 + $0x390] sm:$0xff] }
  0x1b   :  { %909 = vmatprep.subr.bf16.mxu0 %v1638_v53  ;;  %952 = vmatprep.subr.bf16.mxu1 %v1640_v54  ;;  %v111_v52 = vld [vmem:[%s2619_s0 + $0x2d8] sm:$0xff]  ;;  %v1609_v53 = vcombine.low %v86_v41, %v94_v42  ;;  %v1611_v54 = vcombine.low %v87_v43, %v95_v44  ;;  %v142_v2 = vld [vmem:[%s2619_s0 + $0x3d0] sm:$0xff]  ;;  %v1582_v41 = vcombine.high %v56_v34, %v64_v36  ;;  %v72_v43 = vld [vmem:[%s2619_s0 + $0x1a0] sm:$0xff] }
  0x1c   :  { %v1628_v56 = vcombine.high %v103_v51, %v111_v52  ;;  %v1658_v7 = vcombine.high %v134_v1, %v142_v2  ;;  %v150_v9 = vld [vmem:[%s2619_s0 + $0x410] sm:$0xff]  ;;  %v80_v44 = vld [vmem:[%s2619_s0 + $0x1e0] sm:$0xff] }
  0x1d   :  { %v158_v10 = vld [vmem:[%s2619_s0 + $0x450] sm:$0xff] }
  0x1e   :  { %910 = vmatpush1.bf16.msra.mxu0 %v1637_v59  ;;  %953 = vmatpush1.bf16.msra.mxu1 %v1639_v60  ;;  %v119_v59 = vld [vmem:[%s2619_s0 + $0x318] sm:$0xff]  ;;  %v1674_v15 = vcombine.high %v150_v9, %v158_v10 }
  0x1f   :  { %911 = vmatprep.subr.bf16.mxu0 %v1654_v61  ;;  %954 = vmatprep.subr.bf16.mxu1 %v1656_v62  ;;  %v127_v60 = vld [vmem:[%s2619_s0 + $0x358] sm:$0xff]  ;;  %v1625_v61 = vcombine.low %v102_v49, %v110_v50  ;;  %v1627_v62 = vcombine.low %v103_v51, %v111_v52  ;;  %v1598_v49 = vcombine.high %v72_v43, %v80_v44  ;;  %v88_v51 = vld [vmem:[%s2619_s0 + $0x220] sm:$0xff] }
  0x20   :  { %v1644_v0 = vcombine.high %v119_v59, %v127_v60  ;;  %v96_v52 = vld [vmem:[%s2619_s0 + $0x260] sm:$0xff] }
  0x22   :  { %912 = vmatpush1.bf16.msra.mxu0 %v1653_v3  ;;  %955 = vmatpush1.bf16.msra.mxu1 %v1655_v4  ;;  %v135_v3 = vld [vmem:[%s2619_s0 + $0x398] sm:$0xff] }
  0x23   :  { %913 = vmatprep.subr.bf16.mxu0 %v1670_v5  ;;  %956 = vmatprep.subr.bf16.mxu1 %v1672_v6  ;;  %v143_v4 = vld [vmem:[%s2619_s0 + $0x3d8] sm:$0xff]  ;;  %v1641_v5 = vcombine.low %v118_v57, %v126_v58  ;;  %v1643_v6 = vcombine.low %v119_v59, %v127_v60  ;;  %v1614_v57 = vcombine.high %v88_v51, %v96_v52  ;;  %v104_v59 = vld [vmem:[%s2619_s0 + $0x2a0] sm:$0xff] }
  0x24   :  { %v1660_v8 = vcombine.high %v135_v3, %v143_v4  ;;  %v112_v60 = vld [vmem:[%s2619_s0 + $0x2e0] sm:$0xff] }
  0x26   :  { %914 = vmatpush1.bf16.msra.mxu0 %v1669_v11  ;;  %957 = vmatpush1.bf16.msra.mxu1 %v1671_v12  ;;  %v151_v11 = vld [vmem:[%s2619_s0 + $0x418] sm:$0xff] }
  0x27   :  { %983 = vmatprep.subr.bf16.mxu0 %v1546_v13  ;;  %1026 = vmatprep.subr.bf16.mxu1 %v1548_v14  ;;  %v159_v12 = vld [vmem:[%s2619_s0 + $0x458] sm:$0xff]  ;;  %v1657_v13 = vcombine.low %v134_v1, %v142_v2  ;;  %v1659_v14 = vcombine.low %v135_v3, %v143_v4  ;;  %v1630_v1 = vcombine.high %v104_v59, %v112_v60  ;;  %v120_v3 = vld [vmem:[%s2619_s0 + $0x320] sm:$0xff] }
  0x28   :  { %v1676_v16 = vcombine.high %v151_v11, %v159_v12  ;;  %v128_v4 = vld [vmem:[%s2619_s0 + $0x360] sm:$0xff] }
  0x29   :  { %930 = vmatmul.mubr.bf16.vlgmr.msra.gmra.mrb[0].mxu0 %v1867_v17  ;;  %973 = vmatmul.mubr.bf16.vlgmr.msra.gmra.mrb[0].mxu1 %v1867_v17 }
  0x2a   :  { %984 = vmatpush1.bf16.msra.mxu0 %v1545_v20  ;;  %1027 = vmatpush1.bf16.msra.mxu1 %v1547_v21  ;;  %v25_v20 = vld [vmem:[%s2619_s0 + $0x28] sm:$0xff] }
  0x2b   :  { %985 = vmatprep.subr.bf16.mxu0 %v1562_v22  ;;  %1028 = vmatprep.subr.bf16.mxu1 %v1564_v23  ;;  %v33_v21 = vld [vmem:[%s2619_s0 + $0x68] sm:$0xff]  ;;  %v1673_v22 = vcombine.low %v150_v9, %v158_v10  ;;  %v1675_v23 = vcombine.low %v151_v11, %v159_v12  ;;  %v1646_v9 = vcombine.high %v120_v3, %v128_v4  ;;  %v136_v11 = vld [vmem:[%s2619_s0 + $0x3a0] sm:$0xff] }
  0x2c   :  { %1687 = vmatprep.mubr.msk.bf16.mxu0 %vm893_vm0, %v1792_v35  ;;  %1688 = vmatprep.mubr.msk.bf16.mxu1 %vm893_vm0, %v1792_v35  ;;  %v1552_v25 = vcombine.high %v25_v20, %v33_v21  ;;  %v144_v12 = vld [vmem:[%s2619_s0 + $0x3e0] sm:$0xff] }
  0x2e   :  { %986 = vmatpush1.bf16.msra.mxu0 %v1561_v28  ;;  %1029 = vmatpush1.bf16.msra.mxu1 %v1563_v29  ;;  %v41_v28 = vld [vmem:[%s2619_s0 + $0xa8] sm:$0xff] }
  0x2f   :  { %987 = vmatprep.subr.bf16.mxu0 %v1578_v30  ;;  %1030 = vmatprep.subr.bf16.mxu1 %v1580_v31  ;;  %v49_v29 = vld [vmem:[%s2619_s0 + $0xe8] sm:$0xff]  ;;  %v1549_v30 = vcombine.low %v24_v18, %v32_v19  ;;  %v1551_v31 = vcombine.low %v25_v20, %v33_v21  ;;  %v1662_v18 = vcombine.high %v136_v11, %v144_v12  ;;  %v152_v20 = vld [vmem:[%s2619_s0 + $0x420] sm:$0xff] }
  0x30   :  { %v1568_v33 = vcombine.high %v41_v28, %v49_v29  ;;  %v160_v21 = vld [vmem:[%s2619_s0 + $0x460] sm:$0xff] }
  0x32   :  { %988 = vmatpush1.bf16.msra.mxu0 %v1577_v37  ;;  %1031 = vmatpush1.bf16.msra.mxu1 %v1579_v38  ;;  %v57_v37 = vld [vmem:[%s2619_s0 + $0x128] sm:$0xff] }
  0x33   :  { %989 = vmatprep.subr.bf16.mxu0 %v1594_v39  ;;  %1032 = vmatprep.subr.bf16.mxu1 %v1596_v40  ;;  %v65_v38 = vld [vmem:[%s2619_s0 + $0x168] sm:$0xff]  ;;  %v1565_v39 = vcombine.low %v40_v26, %v48_v27  ;;  %v1567_v40 = vcombine.low %v41_v28, %v49_v29  ;;  %v1678_v26 = vcombine.high %v152_v20, %v160_v21  ;;  %v26_v28 = vld [vmem:[%s2619_s0 + $0x30] sm:$0xff] }
  0x34   :  { %v1584_v42 = vcombine.high %v57_v37, %v65_v38  ;;  %v34_v29 = vld [vmem:[%s2619_s0 + $0x70] sm:$0xff] }
  0x36   :  { %990 = vmatpush1.bf16.msra.mxu0 %v1593_v45  ;;  %1033 = vmatpush1.bf16.msra.mxu1 %v1595_v46  ;;  %v73_v45 = vld [vmem:[%s2619_s0 + $0x1a8] sm:$0xff] }
  0x37   :  { %991 = vmatprep.subr.bf16.mxu0 %v1610_v47  ;;  %1034 = vmatprep.subr.bf16.mxu1 %v1612_v48  ;;  %v81_v46 = vld [vmem:[%s2619_s0 + $0x1e8] sm:$0xff]  ;;  %v1581_v47 = vcombine.low %v56_v34, %v64_v36  ;;  %v1583_v48 = vcombine.low %v57_v37, %v65_v38  ;;  %v1554_v34 = vcombine.high %v26_v28, %v34_v29  ;;  %v42_v37 = vld [vmem:[%s2619_s0 + $0xb0] sm:$0xff] }
  0x38   :  { %v1600_v50 = vcombine.high %v73_v45, %v81_v46  ;;  %v50_v38 = vld [vmem:[%s2619_s0 + $0xf0] sm:$0xff] }
  0x3a   :  { %992 = vmatpush1.bf16.msra.mxu0 %v1609_v53  ;;  %1035 = vmatpush1.bf16.msra.mxu1 %v1611_v54  ;;  %v89_v53 = vld [vmem:[%s2619_s0 + $0x228] sm:$0xff] }
  0x3b   :  { %993 = vmatprep.subr.bf16.mxu0 %v1626_v55  ;;  %1036 = vmatprep.subr.bf16.mxu1 %v1628_v56  ;;  %v97_v54 = vld [vmem:[%s2619_s0 + $0x268] sm:$0xff]  ;;  %v1597_v55 = vcombine.low %v72_v43, %v80_v44  ;;  %v1599_v56 = vcombine.low %v73_v45, %v81_v46  ;;  %v1570_v43 = vcombine.high %v42_v37, %v50_v38  ;;  %v58_v45 = vld [vmem:[%s2619_s0 + $0x130] sm:$0xff] }
  0x3c   :  { %v1616_v58 = vcombine.high %v89_v53, %v97_v54  ;;  %v66_v46 = vld [vmem:[%s2619_s0 + $0x170] sm:$0xff] }
  0x3e   :  { %994 = vmatpush1.bf16.msra.mxu0 %v1625_v61  ;;  %1037 = vmatpush1.bf16.msra.mxu1 %v1627_v62  ;;  %v105_v61 = vld [vmem:[%s2619_s0 + $0x2a8] sm:$0xff] }
  0x3f   :  { %995 = vmatprep.subr.bf16.mxu0 %v1642_v63  ;;  %1038 = vmatprep.subr.bf16.mxu1 %v1644_v0  ;;  %v113_v62 = vld [vmem:[%s2619_s0 + $0x2e8] sm:$0xff]  ;;  %v1613_v63 = vcombine.low %v88_v51, %v96_v52  ;;  %v1615_v0 = vcombine.low %v89_v53, %v97_v54  ;;  %v1586_v51 = vcombine.high %v58_v45, %v66_v46  ;;  %v74_v53 = vld [vmem:[%s2619_s0 + $0x1b0] sm:$0xff] }
  0x40   :  { %v1632_v2 = vcombine.high %v105_v61, %v113_v62  ;;  %v82_v54 = vld [vmem:[%s2619_s0 + $0x1f0] sm:$0xff] }
  0x42   :  { %996 = vmatpush1.bf16.msra.mxu0 %v1641_v5  ;;  %1039 = vmatpush1.bf16.msra.mxu1 %v1643_v6  ;;  %v121_v5 = vld [vmem:[%s2619_s0 + $0x328] sm:$0xff] }
  0x43   :  { %997 = vmatprep.subr.bf16.mxu0 %v1658_v7  ;;  %1040 = vmatprep.subr.bf16.mxu1 %v1660_v8  ;;  %v129_v6 = vld [vmem:[%s2619_s0 + $0x368] sm:$0xff]  ;;  %v1629_v7 = vcombine.low %v104_v59, %v112_v60  ;;  %v1631_v8 = vcombine.low %v105_v61, %v113_v62  ;;  %v1602_v59 = vcombine.high %v74_v53, %v82_v54  ;;  %v90_v61 = vld [vmem:[%s2619_s0 + $0x230] sm:$0xff] }
  0x44   :  { %v1648_v10 = vcombine.high %v121_v5, %v129_v6  ;;  %v98_v62 = vld [vmem:[%s2619_s0 + $0x270] sm:$0xff] }
  0x46   :  { %998 = vmatpush1.bf16.msra.mxu0 %v1657_v13  ;;  %1041 = vmatpush1.bf16.msra.mxu1 %v1659_v14  ;;  %v137_v13 = vld [vmem:[%s2619_s0 + $0x3a8] sm:$0xff] }
  0x47   :  { %999 = vmatprep.subr.bf16.mxu0 %v1674_v15  ;;  %1042 = vmatprep.subr.bf16.mxu1 %v1676_v16  ;;  %v145_v14 = vld [vmem:[%s2619_s0 + $0x3e8] sm:$0xff]  ;;  %v1645_v15 = vcombine.low %v120_v3, %v128_v4  ;;  %v1647_v16 = vcombine.low %v121_v5, %v129_v6  ;;  %v106_v4 = vld [vmem:[%s2619_s0 + $0x2b0] sm:$0xff]  ;;  %v107_v6 = vld [vmem:[%s2619_s0 + $0x2b8] sm:$0xff] }
  0x48   :  { %v1664_v19 = vcombine.high %v137_v13, %v145_v14  ;;  %v114_v5 = vld [vmem:[%s2619_s0 + $0x2f0] sm:$0xff] }
  0x4a   :  { %1000 = vmatpush1.bf16.msra.mxu0 %v1673_v22  ;;  %1043 = vmatpush1.bf16.msra.mxu1 %v1675_v23  ;;  %v153_v22 = vld [vmem:[%s2619_s0 + $0x428] sm:$0xff] }
  0x4b   :  { %1069 = vmatprep.subr.bf16.mxu0 %v1550_v24  ;;  %1112 = vmatprep.subr.bf16.mxu1 %v1552_v25  ;;  %v161_v23 = vld [vmem:[%s2619_s0 + $0x468] sm:$0xff]  ;;  %v1661_v24 = vcombine.low %v136_v11, %v144_v12  ;;  %v1663_v25 = vcombine.low %v137_v13, %v145_v14  ;;  %v122_v12 = vld [vmem:[%s2619_s0 + $0x330] sm:$0xff]  ;;  %v123_v14 = vld [vmem:[%s2619_s0 + $0x338] sm:$0xff] }
  0x4c   :  { %v1680_v27 = vcombine.high %v153_v22, %v161_v23  ;;  %v130_v13 = vld [vmem:[%s2619_s0 + $0x370] sm:$0xff] }
  0x4d   :  { %1016 = vmatmul.mubr.bf16.vlgmr.msra.gmra.mrb[4].mxu0 %v1867_v17  ;;  %1059 = vmatmul.mubr.bf16.vlgmr.msra.gmra.mrb[4].mxu1 %v1867_v17 }
  0x4e   :  { %1070 = vmatpush1.bf16.msra.mxu0 %v1549_v30  ;;  %1113 = vmatpush1.bf16.msra.mxu1 %v1551_v31  ;;  %v27_v30 = vld [vmem:[%s2619_s0 + $0x38] sm:$0xff] }
  0x4f   :  { %1071 = vmatprep.subr.bf16.mxu0 %v1566_v32  ;;  %1114 = vmatprep.subr.bf16.mxu1 %v1568_v33  ;;  %v35_v31 = vld [vmem:[%s2619_s0 + $0x78] sm:$0xff]  ;;  %v1677_v32 = vcombine.low %v152_v20, %v160_v21  ;;  %v1679_v33 = vcombine.low %v153_v22, %v161_v23  ;;  %v138_v21 = vld [vmem:[%s2619_s0 + $0x3b0] sm:$0xff] }
  0x50   :  { %1689 = vmatprep.mubr.msk.bf16.mxu0 %vm893_vm0, %v1792_v35  ;;  %1690 = vmatprep.mubr.msk.bf16.mxu1 %vm893_vm0, %v1792_v35  ;;  %v1556_v36 = vcombine.high %v27_v30, %v35_v31  ;;  %v146_v22 = vld [vmem:[%s2619_s0 + $0x3f0] sm:$0xff]  ;;  %v139_v23 = vld [vmem:[%s2619_s0 + $0x3b8] sm:$0xff] }
  0x52   :  { %1072 = vmatpush1.bf16.msra.mxu0 %v1565_v39  ;;  %1115 = vmatpush1.bf16.msra.mxu1 %v1567_v40  ;;  %v43_v39 = vld [vmem:[%s2619_s0 + $0xb8] sm:$0xff] }
  0x53   :  { %1073 = vmatprep.subr.bf16.mxu0 %v1582_v41  ;;  %1116 = vmatprep.subr.bf16.mxu1 %v1584_v42  ;;  %v51_v40 = vld [vmem:[%s2619_s0 + $0xf8] sm:$0xff]  ;;  %v1553_v41 = vcombine.low %v26_v28, %v34_v29  ;;  %v1555_v42 = vcombine.low %v27_v30, %v35_v31  ;;  %v154_v29 = vld [vmem:[%s2619_s0 + $0x430] sm:$0xff] }
  0x54   :  { %v1572_v44 = vcombine.high %v43_v39, %v51_v40  ;;  %v162_v30 = vld [vmem:[%s2619_s0 + $0x470] sm:$0xff]  ;;  %v155_v31 = vld [vmem:[%s2619_s0 + $0x438] sm:$0xff] }
  0x56   :  { %1074 = vmatpush1.bf16.msra.mxu0 %v1581_v47  ;;  %1117 = vmatpush1.bf16.msra.mxu1 %v1583_v48  ;;  %v59_v47 = vld [vmem:[%s2619_s0 + $0x138] sm:$0xff] }
  0x57   :  { %1075 = vmatprep.subr.bf16.mxu0 %v1598_v49  ;;  %1118 = vmatprep.subr.bf16.mxu1 %v1600_v50  ;;  %v67_v48 = vld [vmem:[%s2619_s0 + $0x178] sm:$0xff]  ;;  %v1569_v49 = vcombine.low %v42_v37, %v50_v38  ;;  %v1571_v50 = vcombine.low %v43_v39, %v51_v40  ;;  %v1681_v38 = vcombine.low %v154_v29, %v162_v30 }
  0x58   :  { %v1588_v52 = vcombine.high %v59_v47, %v67_v48 }
  0x5a   :  { %1076 = vmatpush1.bf16.msra.mxu0 %v1597_v55  ;;  %1119 = vmatpush1.bf16.msra.mxu1 %v1599_v56  ;;  %v75_v55 = vld [vmem:[%s2619_s0 + $0x1b8] sm:$0xff] }
  0x5b   :  { %1077 = vmatprep.subr.bf16.mxu0 %v1614_v57  ;;  %1120 = vmatprep.subr.bf16.mxu1 %v1616_v58  ;;  %v83_v56 = vld [vmem:[%s2619_s0 + $0x1f8] sm:$0xff]  ;;  %v1585_v57 = vcombine.low %v58_v45, %v66_v46  ;;  %v1587_v58 = vcombine.low %v59_v47, %v67_v48 }
  0x5c   :  { %v1604_v60 = vcombine.high %v75_v55, %v83_v56 }
  0x5e   :  { %1078 = vmatpush1.bf16.msra.mxu0 %v1613_v63  ;;  %1121 = vmatpush1.bf16.msra.mxu1 %v1615_v0  ;;  %v99_v63 = vld [vmem:[%s2619_s0 + $0x278] sm:$0xff]  ;;  %v1601_v0 = vcombine.low %v74_v53, %v82_v54 }
  0x5f   :  { %1079 = vmatprep.subr.bf16.mxu0 %v1630_v1  ;;  %1122 = vmatprep.subr.bf16.mxu1 %v1632_v2  ;;  %v1603_v1 = vcombine.low %v75_v55, %v83_v56  ;;  %v1618_v2 = vcombine.high %v90_v61, %v98_v62 }
  0x62   :  { %1080 = vmatpush1.bf16.msra.mxu0 %v1629_v7  ;;  %1123 = vmatpush1.bf16.msra.mxu1 %v1631_v8  ;;  %v115_v7 = vld [vmem:[%s2619_s0 + $0x2f8] sm:$0xff]  ;;  %v1617_v8 = vcombine.low %v90_v61, %v98_v62 }
  0x63   :  { %1081 = vmatprep.subr.bf16.mxu0 %v1646_v9  ;;  %1124 = vmatprep.subr.bf16.mxu1 %v1648_v10  ;;  %v1634_v10 = vcombine.high %v106_v4, %v114_v5  ;;  %v1636_v11 = vcombine.high %v107_v6, %v115_v7 }
  0x66   :  { %1082 = vmatpush1.bf16.msra.mxu0 %v1645_v15  ;;  %1125 = vmatpush1.bf16.msra.mxu1 %v1647_v16  ;;  %v131_v15 = vld [vmem:[%s2619_s0 + $0x378] sm:$0xff]  ;;  %v1633_v16 = vcombine.low %v106_v4, %v114_v5 }
  0x67   :  { %1083 = vmatprep.subr.bf16.mxu0 %v1662_v18  ;;  %1126 = vmatprep.subr.bf16.mxu1 %v1664_v19  ;;  %v1635_v18 = vcombine.low %v107_v6, %v115_v7  ;;  %v1650_v19 = vcombine.high %v122_v12, %v130_v13  ;;  %v1652_v20 = vcombine.high %v123_v14, %v131_v15 }
  0x6a   :  { %1084 = vmatpush1.bf16.msra.mxu0 %v1661_v24  ;;  %1127 = vmatpush1.bf16.msra.mxu1 %v1663_v25  ;;  %v147_v24 = vld [vmem:[%s2619_s0 + $0x3f8] sm:$0xff]  ;;  %v1649_v25 = vcombine.low %v122_v12, %v130_v13 }
  0x6b   :  { %1085 = vmatprep.subr.bf16.mxu0 %v1678_v26  ;;  %1128 = vmatprep.subr.bf16.mxu1 %v1680_v27  ;;  %v1651_v26 = vcombine.low %v123_v14, %v131_v15  ;;  %v1666_v27 = vcombine.high %v138_v21, %v146_v22  ;;  %v1668_v28 = vcombine.high %v139_v23, %v147_v24 }
  0x6e   :  { %1086 = vmatpush1.bf16.msra.mxu0 %v1677_v32  ;;  %1129 = vmatpush1.bf16.msra.mxu1 %v1679_v33  ;;  %v163_v32 = vld [vmem:[%s2619_s0 + $0x478] sm:$0xff]  ;;  %v1665_v33 = vcombine.low %v138_v21, %v146_v22 }
  0x6f   :  { %1155 = vmatprep.subr.bf16.mxu0 %v1554_v34  ;;  %1198 = vmatprep.subr.bf16.mxu1 %v1556_v36  ;;  %v1667_v34 = vcombine.low %v139_v23, %v147_v24  ;;  %v1682_v36 = vcombine.high %v154_v29, %v162_v30  ;;  %v1684_v37 = vcombine.high %v155_v31, %v163_v32 }
  0x70   :  { %v1683_v39 = vcombine.low %v155_v31, %v163_v32 }
  0x71   :  { %1102 = vmatmul.mubr.bf16.vlgmr.msra.gmra.mrb[8].mxu0 %v1867_v17  ;;  %1145 = vmatmul.mubr.bf16.vlgmr.msra.gmra.mrb[8].mxu1 %v1867_v17 }
  0x72   :  { %1156 = vmatpush1.bf16.msra.mxu0 %v1553_v41  ;;  %1199 = vmatpush1.bf16.msra.mxu1 %v1555_v42 }
  0x73   :  { %1157 = vmatprep.subr.bf16.mxu0 %v1570_v43  ;;  %1200 = vmatprep.subr.bf16.mxu1 %v1572_v44 }
  0x74   :  { %1691 = vmatprep.mubr.msk.bf16.mxu0 %vm893_vm0, %v1792_v35  ;;  %1692 = vmatprep.mubr.msk.bf16.mxu1 %vm893_vm0, %v1792_v35  ;;  %v91_v35 = vld [vmem:[%s2619_s0 + $0x238] sm:$0xff] }
  0x75   :  { %v1620_v3 = vcombine.high %v91_v35, %v99_v63  ;;  %v1619_v9 = vcombine.low %v91_v35, %v99_v63 }
  0x76   :  { %1158 = vmatpush1.bf16.msra.mxu0 %v1569_v49  ;;  %1201 = vmatpush1.bf16.msra.mxu1 %v1571_v50 }
  0x77   :  { %1159 = vmatprep.subr.bf16.mxu0 %v1586_v51  ;;  %1202 = vmatprep.subr.bf16.mxu1 %v1588_v52 }
  0x7a   :  { %1160 = vmatpush1.bf16.msra.mxu0 %v1585_v57  ;;  %1203 = vmatpush1.bf16.msra.mxu1 %v1587_v58 }
  0x7b   :  { %1161 = vmatprep.subr.bf16.mxu0 %v1602_v59  ;;  %1204 = vmatprep.subr.bf16.mxu1 %v1604_v60 }
  0x7e   :  { %1162 = vmatpush1.bf16.msra.mxu0 %v1601_v0  ;;  %1205 = vmatpush1.bf16.msra.mxu1 %v1603_v1 }
  0x7f   :  { %1163 = vmatprep.subr.bf16.mxu0 %v1618_v2  ;;  %1206 = vmatprep.subr.bf16.mxu1 %v1620_v3 }
  0x82   :  { %1164 = vmatpush1.bf16.msra.mxu0 %v1617_v8  ;;  %1207 = vmatpush1.bf16.msra.mxu1 %v1619_v9 }
  0x83   :  { %1165 = vmatprep.subr.bf16.mxu0 %v1634_v10  ;;  %1208 = vmatprep.subr.bf16.mxu1 %v1636_v11 }
  0x86   :  { %1166 = vmatpush1.bf16.msra.mxu0 %v1633_v16  ;;  %1209 = vmatpush1.bf16.msra.mxu1 %v1635_v18 }
  0x87   :  { %1167 = vmatprep.subr.bf16.mxu0 %v1650_v19  ;;  %1210 = vmatprep.subr.bf16.mxu1 %v1652_v20 }
  0x8a   :  { %1168 = vmatpush1.bf16.msra.mxu0 %v1649_v25  ;;  %1211 = vmatpush1.bf16.msra.mxu1 %v1651_v26 }
  0x8b   :  { %1169 = vmatprep.subr.bf16.mxu0 %v1666_v27  ;;  %1212 = vmatprep.subr.bf16.mxu1 %v1668_v28 }
  0x8e   :  { %1170 = vmatpush1.bf16.msra.mxu0 %v1665_v33  ;;  %1213 = vmatpush1.bf16.msra.mxu1 %v1667_v34 }
  0x8f   :  { %1171 = vmatprep.subr.bf16.mxu0 %v1682_v36  ;;  %1214 = vmatprep.subr.bf16.mxu1 %v1684_v37 }
  0x92   :  { %1172 = vmatpush1.bf16.msra.mxu0 %v1681_v38  ;;  %1215 = vmatpush1.bf16.msra.mxu1 %v1683_v39 }
  0x95   :  { %1188 = vmatmul.mubr.bf16.vlgmr.msra.gmra.mrb[12].mxu0 %v1867_v17  ;;  %1231 = vmatmul.mubr.bf16.vlgmr.msra.gmra.mrb[12].mxu1 %v1867_v17 }
  0xfc   :  { %v2195_v40 = vpop.f32.mrb[0].mxu0  ;;  %v2199_v42 = vpop.f32.mrb[0].mxu1 }
  0xfd   :  { %v2197_v41 = vpop.f32.mrb[1].mxu0  ;;  %v2205_v45 = vpop.f32.mrb[1].mxu1 }
  0xfe   :  { %v1241_v43 = vadd.f32 %v2197_v41, %v2195_v40  ;;  %v2203_v44 = vpop.f32.mrb[2].mxu0  ;;  %v2209_v47 = vpop.f32.mrb[2].mxu1 }
  0xff   :  { %v2207_v46 = vpop.f32.mrb[3].mxu0  ;;  %v2214_v49 = vpop.f32.mrb[3].mxu1 }
 0x100   :  { %v1242_v48 = vadd.f32 %v1241_v43, %v2199_v42  ;;  %v1258_v17 = vadd.f32 %v2207_v46, %v2203_v44 }
 0x102   :  { %v1243_v50 = vadd.f32 %v1242_v48, %v2205_v45  ;;  %v1259_v51 = vadd.f32 %v1258_v17, %v2209_v47 }
 0x104   :  { %v1260_v52 = vadd.f32 %v1259_v51, %v2214_v49 }
 0x120   :  { %v1017_v53 = vpop.f32.mrb[4].mxu0  ;;  %v2221_v56 = vpop.f32.mrb[4].mxu1 }
 0x121   :  { %v1244_v54 = vadd.f32 %v1243_v50, %v1017_v53  ;;  %v2219_v55 = vpop.f32.mrb[5].mxu0  ;;  %v2225_v58 = vpop.f32.mrb[5].mxu1 }
 0x122   :  { %v2223_v57 = vpop.f32.mrb[6].mxu0  ;;  %v2231_v62 = vpop.f32.mrb[6].mxu1 }
 0x123   :  { %v1245_v59 = vadd.f32 %v1244_v54, %v2219_v55  ;;  %v1261_v60 = vadd.f32 %v1260_v52, %v2223_v57  ;;  %v2229_v61 = vpop.f32.mrb[7].mxu0  ;;  %v2233_v35 = vpop.f32.mrb[7].mxu1 }
 0x125   :  { %v1246_v63 = vadd.f32 %v1245_v59, %v2221_v56  ;;  %v1262_v0 = vadd.f32 %v1261_v60, %v2229_v61 }
 0x127   :  { %v1247_v1 = vadd.f32 %v1246_v63, %v2225_v58  ;;  %v1263_v2 = vadd.f32 %v1262_v0, %v2231_v62 }
 0x129   :  { %v1264_v3 = vadd.f32 %v1263_v2, %v2233_v35 }
 0x144   :  { %v1103_v4 = vpop.f32.mrb[8].mxu0  ;;  %v2242_v7 = vpop.f32.mrb[8].mxu1 }
 0x145   :  { %v1248_v5 = vadd.f32 %v1247_v1, %v1103_v4  ;;  %v2240_v6 = vpop.f32.mrb[9].mxu0  ;;  %v2246_v9 = vpop.f32.mrb[9].mxu1 }
 0x146   :  { %v2244_v8 = vpop.f32.mrb[10].mxu0  ;;  %v2252_v13 = vpop.f32.mrb[10].mxu1 }
 0x147   :  { %v1249_v10 = vadd.f32 %v1248_v5, %v2240_v6  ;;  %v1265_v11 = vadd.f32 %v1264_v3, %v2244_v8  ;;  %v2250_v12 = vpop.f32.mrb[11].mxu0  ;;  %v2254_v14 = vpop.f32.mrb[11].mxu1 }
 0x149   :  { %v1250_v15 = vadd.f32 %v1249_v10, %v2242_v7  ;;  %v1266_v16 = vadd.f32 %v1265_v11, %v2250_v12 }
 0x14b   :  { %v1251_v18 = vadd.f32 %v1250_v15, %v2246_v9  ;;  %v1267_v19 = vadd.f32 %v1266_v16, %v2252_v13 }
 0x14d   :  { %v1268_v20 = vadd.f32 %v1267_v19, %v2254_v14 }
 0x168   :  { %v2261_v21 = vpop.f32.mrb[12].mxu0  ;;  %v2266_v24 = vpop.f32.mrb[12].mxu1 }
 0x169   :  { %v1252_v22 = vadd.f32 %v1251_v18, %v2261_v21  ;;  %v2264_v23 = vpop.f32.mrb[13].mxu0  ;;  %v2270_v26 = vpop.f32.mrb[13].mxu1 }
 0x16a   :  { %v2268_v25 = vpop.f32.mrb[14].mxu0  ;;  %v2276_v30 = vpop.f32.mrb[14].mxu1 }
 0x16b   :  { %v1253_v27 = vadd.f32 %v1252_v22, %v2264_v23  ;;  %v1269_v28 = vadd.f32 %v1268_v20, %v2268_v25  ;;  %v2274_v29 = vpop.f32.mrb[15].mxu0  ;;  %v2278_v31 = vpop.f32.mrb[15].mxu1 }
 0x16d   :  { %v1254_v32 = vadd.f32 %v1253_v27, %v2266_v24  ;;  %v1270_v33 = vadd.f32 %v1269_v28, %v2274_v29 }
 0x16f   :  { %v1271_v34 = vadd.f32 %v1270_v33, %v2276_v30  ;;  %v1255_v36 = vadd.f32 %v1254_v32, %v2270_v26 }
 0x171   :  { %v1272_v37 = vadd.f32 %v1271_v34, %v2278_v31  ;;  %1256 = vadd.xlane.f32.xlu0 %v1255_v36 }
 0x175   :  { %1273 = vadd.xlane.f32.xlu0 %v1272_v37 }
 0x1fe   :  { %v1257_v38 = vpop.xlane.xlu0 %1256 }
 0x1ff   :  { %v2285_v39 = vmul.f32 0.00048828125, %v1257_v38 }
 0x201   :  { %v2289_v43 = vsub.f32 %v2195_v40, %v2285_v39  ;;  %v2293_v48 = vsub.f32 %v2197_v41, %v2285_v39  ;;  %v2297_v50 = vsub.f32 %v2199_v42, %v2285_v39  ;;  %v2307_v40 = vsub.f32 %v2205_v45, %v2285_v39 }
 0x202   :  { %v1274_v17 = vpop.xlane.xlu0 %1273  ;;  %v2310_v41 = vsub.f32 %v1017_v53, %v2285_v39  ;;  %v2324_v0 = vsub.f32 %v2219_v55, %v2285_v39  ;;  %v2330_v1 = vsub.f32 %v2221_v56, %v2285_v39  ;;  %v2344_v5 = vsub.f32 %v2225_v58, %v2285_v39 }
 0x203   :  { %v1309_v51 = vmul.f32 %v2289_v43, %v2289_v43  ;;  %v1310_v52 = vmul.f32 %v2293_v48, %v2293_v48  ;;  %v2303_v54 = vmul.f32 0.00048828125, %v1274_v17  ;;  %v1311_v59 = vmul.f32 %v2297_v50, %v2297_v50 }
 0x204   :  { %v1312_v45 = vmul.f32 %v2307_v40, %v2307_v40  ;;  %v1314_v56 = vmul.f32 %v2324_v0, %v2324_v0  ;;  %v1315_v15 = vmul.f32 %v2330_v1, %v2330_v1  ;;  %v2365_v20 = vsub.f32 %v2240_v6, %v2285_v39 }
 0x205   :  { %v1341_v42 = vadd.f32 %v1310_v52, %v1309_v51  ;;  %v2316_v60 = vsub.f32 %v2203_v44, %v2303_v54  ;;  %v2320_v63 = vsub.f32 %v2207_v46, %v2303_v54  ;;  %v1313_v44 = vmul.f32 %v2310_v41, %v2310_v41 }
 0x206   :  { %v2336_v46 = vsub.f32 %v2209_v47, %v2303_v54  ;;  %v2350_v11 = vsub.f32 %v2214_v49, %v2303_v54  ;;  %v2353_v47 = vsub.f32 %v1103_v4, %v2285_v39  ;;  %v2359_v18 = vsub.f32 %v2223_v57, %v2303_v54 }
 0x207   :  { %v1342_v53 = vadd.f32 %v1341_v42, %v1311_v59  ;;  %v1325_v55 = vmul.f32 %v2316_v60, %v2316_v60  ;;  %v1326_v3 = vmul.f32 %v2320_v63, %v2320_v63  ;;  %v1316_v49 = vmul.f32 %v2344_v5, %v2344_v5 }
 0x208   :  { %v1327_v58 = vmul.f32 %v2336_v46, %v2336_v46  ;;  %v2371_v22 = vsub.f32 %v2229_v61, %v2303_v54  ;;  %v1328_v57 = vmul.f32 %v2350_v11, %v2350_v11  ;;  %v2377_v28 = vsub.f32 %v2242_v7, %v2285_v39 }
 0x209   :  { %v1343_v2 = vadd.f32 %v1342_v53, %v1312_v45  ;;  %v1358_v19 = vadd.f32 %v1326_v3, %v1325_v55  ;;  %v1317_v6 = vmul.f32 %v2353_v47, %v2353_v47  ;;  %v2383_v33 = vsub.f32 %v2231_v62, %v2303_v54 }
 0x20a   :  { %v1329_v61 = vmul.f32 %v2359_v18, %v2359_v18  ;;  %v2389_v36 = vsub.f32 %v2246_v9, %v2285_v39  ;;  %v1318_v7 = vmul.f32 %v2365_v20, %v2365_v20  ;;  %v2395_v38 = vsub.f32 %v2233_v35, %v2303_v54 }
 0x20b   :  { %v1344_v10 = vadd.f32 %v1343_v2, %v1313_v44  ;;  %v1359_v27 = vadd.f32 %v1358_v19, %v1327_v58  ;;  %v1330_v62 = vmul.f32 %v2371_v22, %v2371_v22  ;;  %v2401_v51 = vsub.f32 %v2261_v21, %v2285_v39 }
 0x20c   :  { %v1319_v9 = vmul.f32 %v2377_v28, %v2377_v28  ;;  %v2407_v59 = vsub.f32 %v2244_v8, %v2303_v54  ;;  %v1331_v35 = vmul.f32 %v2383_v33, %v2383_v33  ;;  %v2413_v45 = vsub.f32 %v2264_v23, %v2285_v39 }
 0x20d   :  { %v1345_v16 = vadd.f32 %v1344_v10, %v1314_v56  ;;  %v1360_v34 = vadd.f32 %v1359_v27, %v1328_v57  ;;  %v1320_v21 = vmul.f32 %v2389_v36, %v2389_v36  ;;  %v2419_v44 = vsub.f32 %v2250_v12, %v2303_v54 }
 0x20e   :  { %v1332_v8 = vmul.f32 %v2395_v38, %v2395_v38  ;;  %v2425_v55 = vsub.f32 %v2266_v24, %v2285_v39  ;;  %v1321_v23 = vmul.f32 %v2401_v51, %v2401_v51  ;;  %v2431_v56 = vsub.f32 %v2252_v13, %v2303_v54 }
 0x20f   :  { %v1346_v4 = vadd.f32 %v1345_v16, %v1315_v15  ;;  %v1361_v17 = vadd.f32 %v1360_v34, %v1329_v61  ;;  %v1333_v12 = vmul.f32 %v2407_v59, %v2407_v59  ;;  %v2437_v15 = vsub.f32 %v2270_v26, %v2285_v39 }
 0x210   :  { %v1322_v24 = vmul.f32 %v2413_v45, %v2413_v45  ;;  %v2443_v58 = vsub.f32 %v2254_v14, %v2303_v54  ;;  %v1334_v13 = vmul.f32 %v2419_v44, %v2419_v44  ;;  %v2451_v26 = vsub.f32 %v2268_v25, %v2303_v54 }
 0x211   :  { %v1347_v32 = vadd.f32 %v1346_v4, %v1316_v49  ;;  %v1362_v42 = vadd.f32 %v1361_v17, %v1330_v62  ;;  %v1323_v49 = vmul.f32 %v2425_v55, %v2425_v55  ;;  %v1335_v39 = vmul.f32 %v2431_v56, %v2431_v56 }
 0x212   :  { %v1324_v14 = vmul.f32 %v2437_v15, %v2437_v15  ;;  %v2465_v25 = vsub.f32 %v2276_v30, %v2303_v54  ;;  %v2471_v62 = vsub.f32 %v2278_v31, %v2303_v54  ;;  %v1427_v31 = vld [vmem:[%s2621_s3] sm:$0xff] }
 0x213   :  { %v1348_v37 = vadd.f32 %v1347_v32, %v1317_v6  ;;  %v1363_v2 = vadd.f32 %v1362_v42, %v1331_v35  ;;  %v2459_v6 = vsub.f32 %v2274_v29, %v2303_v54  ;;  %v1336_v32 = vmul.f32 %v2443_v58, %v2443_v58 }
 0x214   :  { %v1340_v30 = vmul.f32 %v2471_v62, %v2471_v62 }
 0x215   :  { %v1349_v52 = vadd.f32 %v1348_v37, %v1318_v7  ;;  %v1364_v10 = vadd.f32 %v1363_v2, %v1332_v8  ;;  %v1337_v7 = vmul.f32 %v2451_v26, %v2451_v26  ;;  %v1338_v29 = vmul.f32 %v2459_v6, %v2459_v6 }
 0x217   :  { %v1350_v53 = vadd.f32 %v1349_v52, %v1319_v9  ;;  %v1365_v19 = vadd.f32 %v1364_v10, %v1333_v12  ;;  %v1339_v9 = vmul.f32 %v2465_v25, %v2465_v25  ;;  %v1377_v12 = vld [vmem:[%s2622_s2] sm:$0xff] }
 0x219   :  { %v1351_v3 = vadd.f32 %v1350_v53, %v1320_v21  ;;  %v1366_v57 = vadd.f32 %v1365_v19, %v1334_v13  ;;  %v1703_v21 = vmov 0  }
 0x21a   :  { %1695 = vset.pattern.permute.xlu1 %v1703_v21  ;;  %1694 = vset.pattern.permute.xlu0 %v1703_v21 }
 0x21b   :  { %v1352_v16 = vadd.f32 %v1351_v3, %v1321_v23  ;;  %v1367_v61 = vadd.f32 %v1366_v57, %v1335_v39 }
 0x21d   :  { %v1353_v4 = vadd.f32 %v1352_v16, %v1322_v24  ;;  %v1368_v37 = vadd.f32 %v1367_v61, %v1336_v32  ;;  %v1378_v16 = vld [vmem:[%s2622_s2 + $0x8] sm:$0xff] }
 0x21f   :  { %v1354_v27 = vadd.f32 %v1353_v4, %v1323_v49  ;;  %v1369_v17 = vadd.f32 %v1368_v37, %v1337_v7  ;;  %v1428_v49 = vld [vmem:[%s2621_s3 + $0x8] sm:$0xff] }
 0x221   :  { %v1355_v34 = vadd.f32 %v1354_v27, %v1324_v14  ;;  %v1370_v52 = vadd.f32 %v1369_v17, %v1338_v29 }
 0x223   :  { %1356 = vadd.xlane.f32.xlu1 %v1355_v34  ;;  %v1371_v35 = vadd.f32 %v1370_v52, %v1339_v9 }
 0x225   :  { %v1372_v42 = vadd.f32 %v1371_v35, %v1340_v30 }
 0x227   :  { %1373 = vadd.xlane.f32.xlu1 %v1372_v42 }
 0x238   :  { %1431 = vperm.xlu1 %1695, %v1427_v31  }
 0x2b0   :  { %v1357_v54 = vpop.xlane.xlu1 %1356 }
 0x2b1   :  { %v1375_v53 = vmul.f32 0.00048828125, %v1357_v54 }
 0x2b3   :  { %v1379_v8 = vadd.f32 1e-05, %v1375_v53 }
 0x2b4   :  { %v1374_v2 = vpop.xlane.xlu1 %1373 }
 0x2b5   :  { %1699 = vrsqrt.f32 %v1379_v8  ;;  %v1376_v23 = vmul.f32 0.00048828125, %v1374_v2 }
 0x2b7   :  { %v1380_v3 = vadd.f32 1e-05, %v1376_v23 }
 0x2b8   :  { %v1432_v37 = vpop.permute.xlu1 %1431 }
 0x2b9   :  { %1701 = vrsqrt.f32 %v1380_v3 }
 0x2bf   :  { %v1700_v10 = vpop.eup %1699 }
 0x2c0   :  { %v1383_v24 = vmul.f32 %v1700_v10, %v1377_v12 }
 0x2c2   :  { %1387 = vperm.xlu0 %1694, %v1383_v24  }
 0x2c3   :  { %v1702_v13 = vpop.eup %1701 }
 0x2c4   :  { %v1384_v19 = vmul.f32 %v1702_v13, %v1378_v16 }
 0x2c6   :  { %1392 = vperm.xlu1 %1695, %v1384_v19  }
 0x2ca   :  { %1436 = vperm.xlu1 %1695, %v1428_v49  }
 0x341   :  { %v1388_v4 = vpop.permute.xlu0 %1387 }
 0x342   :  { %v1395_v39 = vmul.f32 %v1388_v4, %v2289_v43  ;;  %v1396_v57 = vmul.f32 %v1388_v4, %v2293_v48  ;;  %v1397_v14 = vmul.f32 %v1388_v4, %v2297_v50  ;;  %v1398_v27 = vmul.f32 %v1388_v4, %v2307_v40 }
 0x343   :  { %v1399_v32 = vmul.f32 %v1388_v4, %v2310_v41  ;;  %v1400_v61 = vmul.f32 %v1388_v4, %v2324_v0  ;;  %v1401_v34 = vmul.f32 %v1388_v4, %v2330_v1  ;;  %v1402_v7 = vmul.f32 %v1388_v4, %v2344_v5 }
 0x344   :  { %v1403_v29 = vmul.f32 %v1388_v4, %v2353_v47  ;;  %v1404_v17 = vmul.f32 %v1388_v4, %v2365_v20  ;;  %v1405_v43 = vmul.f32 %v1388_v4, %v2377_v28  ;;  %v1406_v48 = vmul.f32 %v1388_v4, %v2389_v36 }
 0x345   :  { %v1407_v50 = vmul.f32 %v1388_v4, %v2401_v51  ;;  %v1408_v40 = vmul.f32 %v1388_v4, %v2413_v45  ;;  %v1409_v41 = vmul.f32 %v1388_v4, %v2425_v55  ;;  %v1410_v0 = vmul.f32 %v1388_v4, %v2437_v15  ;;  %v1393_v2 = vpop.permute.xlu1 %1392 }
 0x346   :  { %v1439_v1 = vadd.f32 %v1432_v37, %v1395_v39  ;;  %v1440_v9 = vadd.f32 %v1432_v37, %v1396_v57  ;;  %v1441_v5 = vadd.f32 %v1432_v37, %v1397_v14  ;;  %v1442_v52 = vadd.f32 %v1432_v37, %v1398_v27 }
 0x347   :  { %v1443_v30 = vadd.f32 %v1432_v37, %v1399_v32  ;;  %v1444_v47 = vadd.f32 %v1432_v37, %v1400_v61  ;;  %v1445_v35 = vadd.f32 %v1432_v37, %v1401_v34  ;;  %v1446_v20 = vadd.f32 %v1432_v37, %v1402_v7 }
 0x348   :  { %v1447_v42 = vadd.f32 %v1432_v37, %v1403_v29  ;;  %v1448_v28 = vadd.f32 %v1432_v37, %v1404_v17  ;;  %v1449_v21 = vadd.f32 %v1432_v37, %v1405_v43  ;;  %v1450_v36 = vadd.f32 %v1432_v37, %v1406_v48 }
 0x349   :  { %v1451_v31 = vadd.f32 %v1432_v37, %v1407_v50  ;;  %v1452_v51 = vadd.f32 %v1432_v37, %v1408_v40  ;;  %v1453_v54 = vadd.f32 %v1432_v37, %v1409_v41  ;;  %v1454_v45 = vadd.f32 %v1432_v37, %v1410_v0  ;;  %v1437_v34 = vpop.permute.xlu1 %1436 }
 0x34a   :  { %v1471_v53 = vmax.f32 %v1439_v1, 0.0  ;;  %v1472_v55 = vmax.f32 %v1440_v9, 0.0  ;;  %v1473_v8 = vmax.f32 %v1441_v5, 0.0  ;;  %v1474_v15 = vmax.f32 %v1442_v52, 0.0 }
 0x34b   :  { %v1475_v23 = vmax.f32 %v1443_v30, 0.0  ;;  %v1476_v3 = vmax.f32 %v1444_v47, 0.0  ;;  %v1477_v12 = vmax.f32 %v1445_v35, 0.0  ;;  %v1478_v10 = vmax.f32 %v1446_v20, 0.0 }
 0x34c   :  { %v1479_v24 = vmax.f32 %v1447_v42, 0.0  ;;  %v1480_v16 = vmax.f32 %v1448_v28, 0.0  ;;  %v1481_v13 = vmax.f32 %v1449_v21, 0.0  ;;  %v1482_v19 = vmax.f32 %v1450_v36, 0.0  ;;  %1503 = vst [vmem:[%s2623_s4] sm:$0xff] %v1471_v53  ;;  %1504 = vst [vmem:[%s2623_s4 + $0x8] sm:$0xff] %v1472_v55 }
 0x34d   :  { %1505 = vst [vmem:[%s2623_s4 + $0x10] sm:$0xff] %v1473_v8  ;;  %1506 = vst [vmem:[%s2623_s4 + $0x18] sm:$0xff] %v1474_v15  ;;  %v1483_v49 = vmax.f32 %v1451_v31, 0.0  ;;  %v1484_v4 = vmax.f32 %v1452_v51, 0.0  ;;  %v1485_v39 = vmax.f32 %v1453_v54, 0.0  ;;  %v1486_v57 = vmax.f32 %v1454_v45, 0.0 }
 0x34e   :  { %1507 = vst [vmem:[%s2623_s4 + $0x20] sm:$0xff] %v1475_v23  ;;  %1508 = vst [vmem:[%s2623_s4 + $0x28] sm:$0xff] %v1476_v3  ;;  %v1411_v14 = vmul.f32 %v1393_v2, %v2316_v60  ;;  %v1412_v27 = vmul.f32 %v1393_v2, %v2320_v63  ;;  %v1413_v32 = vmul.f32 %v1393_v2, %v2336_v46 }
 0x34f   :  { %1509 = vst [vmem:[%s2623_s4 + $0x30] sm:$0xff] %v1477_v12  ;;  %1510 = vst [vmem:[%s2623_s4 + $0x38] sm:$0xff] %v1478_v10  ;;  %v1414_v61 = vmul.f32 %v1393_v2, %v2350_v11  ;;  %v1415_v60 = vmul.f32 %v1393_v2, %v2359_v18  ;;  %v1416_v63 = vmul.f32 %v1393_v2, %v2371_v22 }
 0x350   :  { %1511 = vst [vmem:[%s2623_s4 + $0x40] sm:$0xff] %v1479_v24  ;;  %1512 = vst [vmem:[%s2623_s4 + $0x48] sm:$0xff] %v1480_v16  ;;  %v1417_v46 = vmul.f32 %v1393_v2, %v2383_v33  ;;  %v1418_v11 = vmul.f32 %v1393_v2, %v2395_v38  ;;  %v1419_v7 = vmul.f32 %v1393_v2, %v2407_v59 }
 0x351   :  { %1513 = vst [vmem:[%s2623_s4 + $0x50] sm:$0xff] %v1481_v13  ;;  %1514 = vst [vmem:[%s2623_s4 + $0x58] sm:$0xff] %v1482_v19  ;;  %v1420_v37 = vmul.f32 %v1393_v2, %v2419_v44  ;;  %v1421_v29 = vmul.f32 %v1393_v2, %v2431_v56  ;;  %v1422_v17 = vmul.f32 %v1393_v2, %v2443_v58 }
 0x352   :  { %1515 = vst [vmem:[%s2623_s4 + $0x60] sm:$0xff] %v1483_v49  ;;  %1516 = vst [vmem:[%s2623_s4 + $0x68] sm:$0xff] %v1484_v4  ;;  %v1423_v43 = vmul.f32 %v1393_v2, %v2451_v26  ;;  %v1424_v48 = vmul.f32 %v1393_v2, %v2459_v6  ;;  %v1425_v18 = vmul.f32 %v1393_v2, %v2465_v25 }
 0x353   :  { %1517 = vst [vmem:[%s2623_s4 + $0x70] sm:$0xff] %v1485_v39  ;;  %1518 = vst [vmem:[%s2623_s4 + $0x78] sm:$0xff] %v1486_v57  ;;  %v1426_v22 = vmul.f32 %v1393_v2, %v2471_v62  ;;  %v1455_v33 = vadd.f32 %v1437_v34, %v1411_v14  ;;  %v1456_v50 = vadd.f32 %v1437_v34, %v1412_v27 }
 0x354   :  { %v1457_v38 = vadd.f32 %v1437_v34, %v1413_v32  ;;  %v1458_v40 = vadd.f32 %v1437_v34, %v1414_v61  ;;  %v1459_v41 = vadd.f32 %v1437_v34, %v1415_v60  ;;  %v1460_v59 = vadd.f32 %v1437_v34, %v1416_v63 }
 0x355   :  { %v1461_v0 = vadd.f32 %v1437_v34, %v1417_v46  ;;  %v1462_v44 = vadd.f32 %v1437_v34, %v1418_v11  ;;  %v1463_v1 = vadd.f32 %v1437_v34, %v1419_v7  ;;  %v1464_v56 = vadd.f32 %v1437_v34, %v1420_v37 }
 0x356   :  { %v1465_v9 = vadd.f32 %v1437_v34, %v1421_v29  ;;  %v1466_v58 = vadd.f32 %v1437_v34, %v1422_v17  ;;  %v1467_v5 = vadd.f32 %v1437_v34, %v1423_v43  ;;  %v1468_v26 = vadd.f32 %v1437_v34, %v1424_v48 }
 0x357   :  { %v1469_v52 = vadd.f32 %v1437_v34, %v1425_v18  ;;  %v1470_v6 = vadd.f32 %v1437_v34, %v1426_v22  ;;  %v1487_v30 = vmax.f32 %v1455_v33, 0.0  ;;  %v1488_v25 = vmax.f32 %v1456_v50, 0.0 }
 0x358   :  { %v1489_v47 = vmax.f32 %v1457_v38, 0.0  ;;  %v1490_v62 = vmax.f32 %v1458_v40, 0.0  ;;  %v1491_v35 = vmax.f32 %v1459_v41, 0.0  ;;  %v1492_v20 = vmax.f32 %v1460_v59, 0.0 }
 0x359   :  { %v1493_v42 = vmax.f32 %v1461_v0, 0.0  ;;  %v1494_v28 = vmax.f32 %v1462_v44, 0.0  ;;  %v1495_v21 = vmax.f32 %v1463_v1, 0.0  ;;  %v1496_v36 = vmax.f32 %v1464_v56, 0.0  ;;  %1519 = vst [vmem:[%s2623_s4 + $0x80] sm:$0xff] %v1487_v30  ;;  %1520 = vst [vmem:[%s2623_s4 + $0x88] sm:$0xff] %v1488_v25 }
 0x35a   :  { %v1497_v31 = vmax.f32 %v1465_v9, 0.0  ;;  %v1498_v51 = vmax.f32 %v1466_v58, 0.0  ;;  %1521 = vst [vmem:[%s2623_s4 + $0x90] sm:$0xff] %v1489_v47  ;;  %1522 = vst [vmem:[%s2623_s4 + $0x98] sm:$0xff] %v1490_v62  ;;  %v1499_v54 = vmax.f32 %v1467_v5, 0.0  ;;  %v1500_v45 = vmax.f32 %v1468_v26, 0.0 }
 0x35b   :  { %v1501_v53 = vmax.f32 %v1469_v52, 0.0  ;;  %v1502_v55 = vmax.f32 %v1470_v6, 0.0  ;;  %1523 = vst [vmem:[%s2623_s4 + $0xa0] sm:$0xff] %v1491_v35  ;;  %1524 = vst [vmem:[%s2623_s4 + $0xa8] sm:$0xff] %v1492_v20 }
 0x35c   :  { %1525 = vst [vmem:[%s2623_s4 + $0xb0] sm:$0xff] %v1493_v42  ;;  %1526 = vst [vmem:[%s2623_s4 + $0xb8] sm:$0xff] %v1494_v28 }
 0x35d   :  { %1527 = vst [vmem:[%s2623_s4 + $0xc0] sm:$0xff] %v1495_v21  ;;  %1528 = vst [vmem:[%s2623_s4 + $0xc8] sm:$0xff] %v1496_v36 }
 0x35e   :  { %1529 = vst [vmem:[%s2623_s4 + $0xd0] sm:$0xff] %v1497_v31  ;;  %1530 = vst [vmem:[%s2623_s4 + $0xd8] sm:$0xff] %v1498_v51 }
 0x35f   :  { %1531 = vst [vmem:[%s2623_s4 + $0xe0] sm:$0xff] %v1499_v54  ;;  %1532 = vst [vmem:[%s2623_s4 + $0xe8] sm:$0xff] %v1500_v45 }
 0x360   :  { %1533 = vst [vmem:[%s2623_s4 + $0xf0] sm:$0xff] %v1501_v53  ;;  %1534 = vst [vmem:[%s2623_s4 + $0xf8] sm:$0xff] %v1502_v55 }

// kernel: resnet20_forward.24
= control target key start
LH: loop header
LB: loop body
LE: loop exit
PB: predicated region body
PF: predicated region fallthrough
CT: control target
= control target key end

     0   :  { %vm896_vm0 = vcmask 130048   ;;  %s2787_s0 = inlined_call_operand.vmem [shape: bf16[144,2048], index: 0, kind: input, shape index: {}]   ;;  %s2788_s1 = inlined_call_operand.vmem [shape: bf16[16,144], index: 1, kind: input, shape index: {}]   ;;  %s2789_s3 = inlined_call_operand.vmem [shape: f32[16,1], index: 3, kind: input, shape index: {}]   ;;  %s2790_s2 = inlined_call_operand.vmem [shape: f32[16,1], index: 2, kind: input, shape index: {}]   ;;  %s2791_s4 = inlined_call_operand.vmem [shape: f32[16,2048], index: 4, kind: input, shape index: {}]   ;;  %s2792_s5 = inlined_call_operand.vmem [shape: f32[16,2048], index: 5, kind: output, shape index: {}]  }
   0x1   :  { %v23_v0 = vld [vmem:[%s2787_s0] sm:$0xff]  ;;  %v24_v2 = vld [vmem:[%s2787_s0 + $0x8] sm:$0xff] }
   0x2   :  { %v31_v1 = vld [vmem:[%s2787_s0 + $0x40] sm:$0xff]  ;;  %v32_v5 = vld [vmem:[%s2787_s0 + $0x48] sm:$0xff] }
   0x3   :  { %v1609_v3 = vcombine.high %v23_v0, %v31_v1  ;;  %v1608_v4 = vcombine.low %v23_v0, %v31_v1  ;;  %v39_v6 = vld [vmem:[%s2787_s0 + $0x80] sm:$0xff]  ;;  %v1611_v8 = vcombine.high %v24_v2, %v32_v5  ;;  %v1610_v9 = vcombine.low %v24_v2, %v32_v5  ;;  %v40_v11 = vld [vmem:[%s2787_s0 + $0x88] sm:$0xff] }
   0x4   :  { %v47_v7 = vld [vmem:[%s2787_s0 + $0xc0] sm:$0xff]  ;;  %v48_v12 = vld [vmem:[%s2787_s0 + $0xc8] sm:$0xff] }
   0x5   :  { %v1625_v10 = vcombine.high %v39_v6, %v47_v7  ;;  %v55_v13 = vld [vmem:[%s2787_s0 + $0x100] sm:$0xff]  ;;  %900 = vmatprep.subr.bf16.mxu0 %v1609_v3  ;;  %v1627_v14 = vcombine.high %v40_v11, %v48_v12  ;;  %v56_v16 = vld [vmem:[%s2787_s0 + $0x108] sm:$0xff]  ;;  %943 = vmatprep.subr.bf16.mxu1 %v1611_v8  ;;  %v1624_v18 = vcombine.low %v39_v6, %v47_v7  ;;  %v25_v7 = vld [vmem:[%s2787_s0 + $0x10] sm:$0xff] }
   0x6   :  { %v63_v15 = vld [vmem:[%s2787_s0 + $0x140] sm:$0xff]  ;;  %v64_v17 = vld [vmem:[%s2787_s0 + $0x148] sm:$0xff]  ;;  %901 = vmatpush1.bf16.msra.mxu0 %v1608_v4  ;;  %944 = vmatpush1.bf16.msra.mxu1 %v1610_v9  ;;  %v1626_v19 = vcombine.low %v40_v11, %v48_v12  ;;  %v33_v8 = vld [vmem:[%s2787_s0 + $0x50] sm:$0xff] }
   0x7   :  { %902 = vmatprep.subr.bf16.mxu0 %v1625_v10  ;;  %v1641_v20 = vcombine.high %v55_v13, %v63_v15  ;;  %945 = vmatprep.subr.bf16.mxu1 %v1627_v14  ;;  %v1643_v21 = vcombine.high %v56_v16, %v64_v17  ;;  %v71_v22 = vld [vmem:[%s2787_s0 + $0x180] sm:$0xff]  ;;  %v72_v24 = vld [vmem:[%s2787_s0 + $0x188] sm:$0xff]  ;;  %v1640_v26 = vcombine.low %v55_v13, %v63_v15  ;;  %v26_v9 = vld [vmem:[%s2787_s0 + $0x18] sm:$0xff] }
   0x8   :  { %v79_v23 = vld [vmem:[%s2787_s0 + $0x1c0] sm:$0xff]  ;;  %v80_v25 = vld [vmem:[%s2787_s0 + $0x1c8] sm:$0xff]  ;;  %v1642_v27 = vcombine.low %v56_v16, %v64_v17  ;;  %v34_v10 = vld [vmem:[%s2787_s0 + $0x58] sm:$0xff]  ;;  %v1613_v13 = vcombine.high %v25_v7, %v33_v8 }
   0x9   :  { %v1657_v28 = vcombine.high %v71_v22, %v79_v23  ;;  %v1659_v29 = vcombine.high %v72_v24, %v80_v25  ;;  %v87_v30 = vld [vmem:[%s2787_s0 + $0x200] sm:$0xff]  ;;  %v88_v32 = vld [vmem:[%s2787_s0 + $0x208] sm:$0xff]  ;;  %v1656_v34 = vcombine.low %v71_v22, %v79_v23  ;;  %v1658_v36 = vcombine.low %v72_v24, %v80_v25  ;;  %v41_v15 = vld [vmem:[%s2787_s0 + $0x90] sm:$0xff] }
   0xa   :  { %903 = vmatpush1.bf16.msra.mxu0 %v1624_v18  ;;  %946 = vmatpush1.bf16.msra.mxu1 %v1626_v19  ;;  %v95_v31 = vld [vmem:[%s2787_s0 + $0x240] sm:$0xff]  ;;  %v96_v33 = vld [vmem:[%s2787_s0 + $0x248] sm:$0xff]  ;;  %v1615_v14 = vcombine.high %v26_v9, %v34_v10  ;;  %v49_v16 = vld [vmem:[%s2787_s0 + $0xd0] sm:$0xff] }
   0xb   :  { %904 = vmatprep.subr.bf16.mxu0 %v1641_v20  ;;  %947 = vmatprep.subr.bf16.mxu1 %v1643_v21  ;;  %v1864_v35 = vld [vmem:[%s2788_s1 + $0x4] ss:$8 sps:$4 sm:$0xff]   ;;  %v1673_v37 = vcombine.high %v87_v30, %v95_v31  ;;  %v1675_v38 = vcombine.high %v88_v32, %v96_v33  ;;  %v1672_v43 = vcombine.low %v87_v30, %v95_v31  ;;  %v1939_v17 = vld [vmem:[%s2788_s1] ss:$8 sps:$4 sm:$0xff]   ;;  %v42_v18 = vld [vmem:[%s2787_s0 + $0x98] sm:$0xff] }
   0xc   :  { %v103_v39 = vld [vmem:[%s2787_s0 + $0x280] sm:$0xff]  ;;  %1752 = vmatprep.mubr.msk.bf16.mxu0 %vm896_vm0, %v1864_v35  ;;  %v104_v41 = vld [vmem:[%s2787_s0 + $0x288] sm:$0xff]  ;;  %1753 = vmatprep.mubr.msk.bf16.mxu1 %vm896_vm0, %v1864_v35  ;;  %v1674_v44 = vcombine.low %v88_v32, %v96_v33  ;;  %v50_v19 = vld [vmem:[%s2787_s0 + $0xd8] sm:$0xff]  ;;  %v1612_v20 = vcombine.low %v25_v7, %v33_v8  ;;  %v1614_v21 = vcombine.low %v26_v9, %v34_v10 }
   0xd   :  { %v111_v40 = vld [vmem:[%s2787_s0 + $0x2c0] sm:$0xff]  ;;  %v112_v42 = vld [vmem:[%s2787_s0 + $0x2c8] sm:$0xff]  ;;  %v1629_v22 = vcombine.high %v41_v15, %v49_v16  ;;  %v1631_v23 = vcombine.high %v42_v18, %v50_v19  ;;  %v57_v24 = vld [vmem:[%s2787_s0 + $0x110] sm:$0xff] }
   0xe   :  { %905 = vmatpush1.bf16.msra.mxu0 %v1640_v26  ;;  %948 = vmatpush1.bf16.msra.mxu1 %v1642_v27  ;;  %v1689_v45 = vcombine.high %v103_v39, %v111_v40  ;;  %v1691_v46 = vcombine.high %v104_v41, %v112_v42  ;;  %v119_v47 = vld [vmem:[%s2787_s0 + $0x300] sm:$0xff]  ;;  %v120_v49 = vld [vmem:[%s2787_s0 + $0x308] sm:$0xff]  ;;  %v1688_v51 = vcombine.low %v103_v39, %v111_v40  ;;  %v65_v25 = vld [vmem:[%s2787_s0 + $0x150] sm:$0xff] }
   0xf   :  { %906 = vmatprep.subr.bf16.mxu0 %v1657_v28  ;;  %949 = vmatprep.subr.bf16.mxu1 %v1659_v29  ;;  %v127_v48 = vld [vmem:[%s2787_s0 + $0x340] sm:$0xff]  ;;  %v128_v50 = vld [vmem:[%s2787_s0 + $0x348] sm:$0xff]  ;;  %v1690_v52 = vcombine.low %v104_v41, %v112_v42  ;;  %v58_v26 = vld [vmem:[%s2787_s0 + $0x118] sm:$0xff]  ;;  %v1628_v28 = vcombine.low %v41_v15, %v49_v16  ;;  %v1630_v29 = vcombine.low %v42_v18, %v50_v19 }
  0x10   :  { %v1705_v53 = vcombine.high %v119_v47, %v127_v48  ;;  %v1707_v54 = vcombine.high %v120_v49, %v128_v50  ;;  %v135_v55 = vld [vmem:[%s2787_s0 + $0x380] sm:$0xff]  ;;  %v136_v57 = vld [vmem:[%s2787_s0 + $0x388] sm:$0xff]  ;;  %v1704_v59 = vcombine.low %v119_v47, %v127_v48  ;;  %v1706_v60 = vcombine.low %v120_v49, %v128_v50  ;;  %v66_v27 = vld [vmem:[%s2787_s0 + $0x158] sm:$0xff] }
  0x11   :  { %v143_v56 = vld [vmem:[%s2787_s0 + $0x3c0] sm:$0xff]  ;;  %v144_v58 = vld [vmem:[%s2787_s0 + $0x3c8] sm:$0xff]  ;;  %v1645_v30 = vcombine.high %v57_v24, %v65_v25  ;;  %v1647_v31 = vcombine.high %v58_v26, %v66_v27  ;;  %v73_v32 = vld [vmem:[%s2787_s0 + $0x190] sm:$0xff] }
  0x12   :  { %907 = vmatpush1.bf16.msra.mxu0 %v1656_v34  ;;  %950 = vmatpush1.bf16.msra.mxu1 %v1658_v36  ;;  %v1721_v61 = vcombine.high %v135_v55, %v143_v56  ;;  %v1723_v62 = vcombine.high %v136_v57, %v144_v58  ;;  %v151_v63 = vld [vmem:[%s2787_s0 + $0x400] sm:$0xff]  ;;  %v152_v1 = vld [vmem:[%s2787_s0 + $0x408] sm:$0xff]  ;;  %v1720_v3 = vcombine.low %v135_v55, %v143_v56  ;;  %v81_v33 = vld [vmem:[%s2787_s0 + $0x1d0] sm:$0xff] }
  0x13   :  { %908 = vmatprep.subr.bf16.mxu0 %v1673_v37  ;;  %951 = vmatprep.subr.bf16.mxu1 %v1675_v38  ;;  %v159_v0 = vld [vmem:[%s2787_s0 + $0x440] sm:$0xff]  ;;  %v160_v2 = vld [vmem:[%s2787_s0 + $0x448] sm:$0xff]  ;;  %v1722_v4 = vcombine.low %v136_v57, %v144_v58  ;;  %v74_v34 = vld [vmem:[%s2787_s0 + $0x198] sm:$0xff]  ;;  %v1644_v37 = vcombine.low %v57_v24, %v65_v25  ;;  %v1646_v38 = vcombine.low %v58_v26, %v66_v27 }
  0x14   :  { %v1737_v5 = vcombine.high %v151_v63, %v159_v0  ;;  %v1739_v6 = vcombine.high %v152_v1, %v160_v2  ;;  %v1736_v11 = vcombine.low %v151_v63, %v159_v0  ;;  %v1738_v12 = vcombine.low %v152_v1, %v160_v2  ;;  %v82_v36 = vld [vmem:[%s2787_s0 + $0x1d8] sm:$0xff]  ;;  %v89_v41 = vld [vmem:[%s2787_s0 + $0x210] sm:$0xff]  ;;  %v27_v18 = vld [vmem:[%s2787_s0 + $0x20] sm:$0xff] }
  0x15   :  { %v1661_v39 = vcombine.high %v73_v32, %v81_v33  ;;  %v1663_v40 = vcombine.high %v74_v34, %v82_v36  ;;  %v97_v42 = vld [vmem:[%s2787_s0 + $0x250] sm:$0xff]  ;;  %v35_v19 = vld [vmem:[%s2787_s0 + $0x60] sm:$0xff] }
  0x16   :  { %909 = vmatpush1.bf16.msra.mxu0 %v1672_v43  ;;  %952 = vmatpush1.bf16.msra.mxu1 %v1674_v44  ;;  %v90_v43 = vld [vmem:[%s2787_s0 + $0x218] sm:$0xff]  ;;  %v1677_v47 = vcombine.high %v89_v41, %v97_v42  ;;  %v105_v49 = vld [vmem:[%s2787_s0 + $0x290] sm:$0xff]  ;;  %v1617_v24 = vcombine.high %v27_v18, %v35_v19  ;;  %v43_v26 = vld [vmem:[%s2787_s0 + $0xa0] sm:$0xff] }
  0x17   :  { %910 = vmatprep.subr.bf16.mxu0 %v1689_v45  ;;  %953 = vmatprep.subr.bf16.mxu1 %v1691_v46  ;;  %v98_v44 = vld [vmem:[%s2787_s0 + $0x258] sm:$0xff]  ;;  %v1660_v45 = vcombine.low %v73_v32, %v81_v33  ;;  %v1662_v46 = vcombine.low %v74_v34, %v82_v36  ;;  %v113_v50 = vld [vmem:[%s2787_s0 + $0x2d0] sm:$0xff]  ;;  %v51_v27 = vld [vmem:[%s2787_s0 + $0xe0] sm:$0xff] }
  0x18   :  { %v1679_v48 = vcombine.high %v90_v43, %v98_v44  ;;  %v1693_v55 = vcombine.high %v105_v49, %v113_v50  ;;  %v121_v57 = vld [vmem:[%s2787_s0 + $0x310] sm:$0xff]  ;;  %v1633_v32 = vcombine.high %v43_v26, %v51_v27  ;;  %v59_v34 = vld [vmem:[%s2787_s0 + $0x120] sm:$0xff] }
  0x19   :  { %v129_v58 = vld [vmem:[%s2787_s0 + $0x350] sm:$0xff]  ;;  %v67_v36 = vld [vmem:[%s2787_s0 + $0x160] sm:$0xff] }
  0x1a   :  { %911 = vmatpush1.bf16.msra.mxu0 %v1688_v51  ;;  %954 = vmatpush1.bf16.msra.mxu1 %v1690_v52  ;;  %v106_v51 = vld [vmem:[%s2787_s0 + $0x298] sm:$0xff]  ;;  %v1709_v63 = vcombine.high %v121_v57, %v129_v58  ;;  %v137_v1 = vld [vmem:[%s2787_s0 + $0x390] sm:$0xff] }
  0x1b   :  { %912 = vmatprep.subr.bf16.mxu0 %v1705_v53  ;;  %955 = vmatprep.subr.bf16.mxu1 %v1707_v54  ;;  %v114_v52 = vld [vmem:[%s2787_s0 + $0x2d8] sm:$0xff]  ;;  %v1676_v53 = vcombine.low %v89_v41, %v97_v42  ;;  %v1678_v54 = vcombine.low %v90_v43, %v98_v44  ;;  %v145_v2 = vld [vmem:[%s2787_s0 + $0x3d0] sm:$0xff]  ;;  %v1649_v41 = vcombine.high %v59_v34, %v67_v36  ;;  %v75_v43 = vld [vmem:[%s2787_s0 + $0x1a0] sm:$0xff] }
  0x1c   :  { %v1695_v56 = vcombine.high %v106_v51, %v114_v52  ;;  %v1725_v7 = vcombine.high %v137_v1, %v145_v2  ;;  %v153_v9 = vld [vmem:[%s2787_s0 + $0x410] sm:$0xff]  ;;  %v83_v44 = vld [vmem:[%s2787_s0 + $0x1e0] sm:$0xff] }
  0x1d   :  { %v161_v10 = vld [vmem:[%s2787_s0 + $0x450] sm:$0xff] }
  0x1e   :  { %913 = vmatpush1.bf16.msra.mxu0 %v1704_v59  ;;  %956 = vmatpush1.bf16.msra.mxu1 %v1706_v60  ;;  %v122_v59 = vld [vmem:[%s2787_s0 + $0x318] sm:$0xff]  ;;  %v1741_v15 = vcombine.high %v153_v9, %v161_v10 }
  0x1f   :  { %914 = vmatprep.subr.bf16.mxu0 %v1721_v61  ;;  %957 = vmatprep.subr.bf16.mxu1 %v1723_v62  ;;  %v130_v60 = vld [vmem:[%s2787_s0 + $0x358] sm:$0xff]  ;;  %v1692_v61 = vcombine.low %v105_v49, %v113_v50  ;;  %v1694_v62 = vcombine.low %v106_v51, %v114_v52  ;;  %v1665_v49 = vcombine.high %v75_v43, %v83_v44  ;;  %v91_v51 = vld [vmem:[%s2787_s0 + $0x220] sm:$0xff] }
  0x20   :  { %v1711_v0 = vcombine.high %v122_v59, %v130_v60  ;;  %v99_v52 = vld [vmem:[%s2787_s0 + $0x260] sm:$0xff] }
  0x22   :  { %915 = vmatpush1.bf16.msra.mxu0 %v1720_v3  ;;  %958 = vmatpush1.bf16.msra.mxu1 %v1722_v4  ;;  %v138_v3 = vld [vmem:[%s2787_s0 + $0x398] sm:$0xff] }
  0x23   :  { %916 = vmatprep.subr.bf16.mxu0 %v1737_v5  ;;  %959 = vmatprep.subr.bf16.mxu1 %v1739_v6  ;;  %v146_v4 = vld [vmem:[%s2787_s0 + $0x3d8] sm:$0xff]  ;;  %v1708_v5 = vcombine.low %v121_v57, %v129_v58  ;;  %v1710_v6 = vcombine.low %v122_v59, %v130_v60  ;;  %v1681_v57 = vcombine.high %v91_v51, %v99_v52  ;;  %v107_v59 = vld [vmem:[%s2787_s0 + $0x2a0] sm:$0xff] }
  0x24   :  { %v1727_v8 = vcombine.high %v138_v3, %v146_v4  ;;  %v115_v60 = vld [vmem:[%s2787_s0 + $0x2e0] sm:$0xff] }
  0x26   :  { %917 = vmatpush1.bf16.msra.mxu0 %v1736_v11  ;;  %960 = vmatpush1.bf16.msra.mxu1 %v1738_v12  ;;  %v154_v11 = vld [vmem:[%s2787_s0 + $0x418] sm:$0xff] }
  0x27   :  { %986 = vmatprep.subr.bf16.mxu0 %v1613_v13  ;;  %1029 = vmatprep.subr.bf16.mxu1 %v1615_v14  ;;  %v162_v12 = vld [vmem:[%s2787_s0 + $0x458] sm:$0xff]  ;;  %v1724_v13 = vcombine.low %v137_v1, %v145_v2  ;;  %v1726_v14 = vcombine.low %v138_v3, %v146_v4  ;;  %v1697_v1 = vcombine.high %v107_v59, %v115_v60  ;;  %v123_v3 = vld [vmem:[%s2787_s0 + $0x320] sm:$0xff] }
  0x28   :  { %v1743_v16 = vcombine.high %v154_v11, %v162_v12  ;;  %v131_v4 = vld [vmem:[%s2787_s0 + $0x360] sm:$0xff] }
  0x29   :  { %933 = vmatmul.mubr.bf16.vlgmr.msra.gmra.mrb[0].mxu0 %v1939_v17  ;;  %976 = vmatmul.mubr.bf16.vlgmr.msra.gmra.mrb[0].mxu1 %v1939_v17 }
  0x2a   :  { %987 = vmatpush1.bf16.msra.mxu0 %v1612_v20  ;;  %1030 = vmatpush1.bf16.msra.mxu1 %v1614_v21  ;;  %v28_v20 = vld [vmem:[%s2787_s0 + $0x28] sm:$0xff] }
  0x2b   :  { %988 = vmatprep.subr.bf16.mxu0 %v1629_v22  ;;  %1031 = vmatprep.subr.bf16.mxu1 %v1631_v23  ;;  %v36_v21 = vld [vmem:[%s2787_s0 + $0x68] sm:$0xff]  ;;  %v1740_v22 = vcombine.low %v153_v9, %v161_v10  ;;  %v1742_v23 = vcombine.low %v154_v11, %v162_v12  ;;  %v1713_v9 = vcombine.high %v123_v3, %v131_v4  ;;  %v139_v11 = vld [vmem:[%s2787_s0 + $0x3a0] sm:$0xff] }
  0x2c   :  { %1754 = vmatprep.mubr.msk.bf16.mxu0 %vm896_vm0, %v1864_v35  ;;  %1755 = vmatprep.mubr.msk.bf16.mxu1 %vm896_vm0, %v1864_v35  ;;  %v1619_v25 = vcombine.high %v28_v20, %v36_v21  ;;  %v147_v12 = vld [vmem:[%s2787_s0 + $0x3e0] sm:$0xff] }
  0x2e   :  { %989 = vmatpush1.bf16.msra.mxu0 %v1628_v28  ;;  %1032 = vmatpush1.bf16.msra.mxu1 %v1630_v29  ;;  %v44_v28 = vld [vmem:[%s2787_s0 + $0xa8] sm:$0xff] }
  0x2f   :  { %990 = vmatprep.subr.bf16.mxu0 %v1645_v30  ;;  %1033 = vmatprep.subr.bf16.mxu1 %v1647_v31  ;;  %v52_v29 = vld [vmem:[%s2787_s0 + $0xe8] sm:$0xff]  ;;  %v1616_v30 = vcombine.low %v27_v18, %v35_v19  ;;  %v1618_v31 = vcombine.low %v28_v20, %v36_v21  ;;  %v1729_v18 = vcombine.high %v139_v11, %v147_v12  ;;  %v155_v20 = vld [vmem:[%s2787_s0 + $0x420] sm:$0xff] }
  0x30   :  { %v1635_v33 = vcombine.high %v44_v28, %v52_v29  ;;  %v163_v21 = vld [vmem:[%s2787_s0 + $0x460] sm:$0xff] }
  0x32   :  { %991 = vmatpush1.bf16.msra.mxu0 %v1644_v37  ;;  %1034 = vmatpush1.bf16.msra.mxu1 %v1646_v38  ;;  %v60_v37 = vld [vmem:[%s2787_s0 + $0x128] sm:$0xff] }
  0x33   :  { %992 = vmatprep.subr.bf16.mxu0 %v1661_v39  ;;  %1035 = vmatprep.subr.bf16.mxu1 %v1663_v40  ;;  %v68_v38 = vld [vmem:[%s2787_s0 + $0x168] sm:$0xff]  ;;  %v1632_v39 = vcombine.low %v43_v26, %v51_v27  ;;  %v1634_v40 = vcombine.low %v44_v28, %v52_v29  ;;  %v1745_v26 = vcombine.high %v155_v20, %v163_v21  ;;  %v29_v28 = vld [vmem:[%s2787_s0 + $0x30] sm:$0xff] }
  0x34   :  { %v1651_v42 = vcombine.high %v60_v37, %v68_v38  ;;  %v37_v29 = vld [vmem:[%s2787_s0 + $0x70] sm:$0xff] }
  0x36   :  { %993 = vmatpush1.bf16.msra.mxu0 %v1660_v45  ;;  %1036 = vmatpush1.bf16.msra.mxu1 %v1662_v46  ;;  %v76_v45 = vld [vmem:[%s2787_s0 + $0x1a8] sm:$0xff] }
  0x37   :  { %994 = vmatprep.subr.bf16.mxu0 %v1677_v47  ;;  %1037 = vmatprep.subr.bf16.mxu1 %v1679_v48  ;;  %v84_v46 = vld [vmem:[%s2787_s0 + $0x1e8] sm:$0xff]  ;;  %v1648_v47 = vcombine.low %v59_v34, %v67_v36  ;;  %v1650_v48 = vcombine.low %v60_v37, %v68_v38  ;;  %v1621_v34 = vcombine.high %v29_v28, %v37_v29  ;;  %v45_v37 = vld [vmem:[%s2787_s0 + $0xb0] sm:$0xff] }
  0x38   :  { %v1667_v50 = vcombine.high %v76_v45, %v84_v46  ;;  %v53_v38 = vld [vmem:[%s2787_s0 + $0xf0] sm:$0xff] }
  0x3a   :  { %995 = vmatpush1.bf16.msra.mxu0 %v1676_v53  ;;  %1038 = vmatpush1.bf16.msra.mxu1 %v1678_v54  ;;  %v92_v53 = vld [vmem:[%s2787_s0 + $0x228] sm:$0xff] }
  0x3b   :  { %996 = vmatprep.subr.bf16.mxu0 %v1693_v55  ;;  %1039 = vmatprep.subr.bf16.mxu1 %v1695_v56  ;;  %v100_v54 = vld [vmem:[%s2787_s0 + $0x268] sm:$0xff]  ;;  %v1664_v55 = vcombine.low %v75_v43, %v83_v44  ;;  %v1666_v56 = vcombine.low %v76_v45, %v84_v46  ;;  %v1637_v43 = vcombine.high %v45_v37, %v53_v38  ;;  %v61_v45 = vld [vmem:[%s2787_s0 + $0x130] sm:$0xff] }
  0x3c   :  { %v1683_v58 = vcombine.high %v92_v53, %v100_v54  ;;  %v69_v46 = vld [vmem:[%s2787_s0 + $0x170] sm:$0xff] }
  0x3e   :  { %997 = vmatpush1.bf16.msra.mxu0 %v1692_v61  ;;  %1040 = vmatpush1.bf16.msra.mxu1 %v1694_v62  ;;  %v108_v61 = vld [vmem:[%s2787_s0 + $0x2a8] sm:$0xff] }
  0x3f   :  { %998 = vmatprep.subr.bf16.mxu0 %v1709_v63  ;;  %1041 = vmatprep.subr.bf16.mxu1 %v1711_v0  ;;  %v116_v62 = vld [vmem:[%s2787_s0 + $0x2e8] sm:$0xff]  ;;  %v1680_v63 = vcombine.low %v91_v51, %v99_v52  ;;  %v1682_v0 = vcombine.low %v92_v53, %v100_v54  ;;  %v1653_v51 = vcombine.high %v61_v45, %v69_v46  ;;  %v77_v53 = vld [vmem:[%s2787_s0 + $0x1b0] sm:$0xff] }
  0x40   :  { %v1699_v2 = vcombine.high %v108_v61, %v116_v62  ;;  %v85_v54 = vld [vmem:[%s2787_s0 + $0x1f0] sm:$0xff] }
  0x42   :  { %999 = vmatpush1.bf16.msra.mxu0 %v1708_v5  ;;  %1042 = vmatpush1.bf16.msra.mxu1 %v1710_v6  ;;  %v124_v5 = vld [vmem:[%s2787_s0 + $0x328] sm:$0xff] }
  0x43   :  { %1000 = vmatprep.subr.bf16.mxu0 %v1725_v7  ;;  %1043 = vmatprep.subr.bf16.mxu1 %v1727_v8  ;;  %v132_v6 = vld [vmem:[%s2787_s0 + $0x368] sm:$0xff]  ;;  %v1696_v7 = vcombine.low %v107_v59, %v115_v60  ;;  %v1698_v8 = vcombine.low %v108_v61, %v116_v62  ;;  %v1669_v59 = vcombine.high %v77_v53, %v85_v54  ;;  %v93_v61 = vld [vmem:[%s2787_s0 + $0x230] sm:$0xff] }
  0x44   :  { %v1715_v10 = vcombine.high %v124_v5, %v132_v6  ;;  %v101_v62 = vld [vmem:[%s2787_s0 + $0x270] sm:$0xff] }
  0x46   :  { %1001 = vmatpush1.bf16.msra.mxu0 %v1724_v13  ;;  %1044 = vmatpush1.bf16.msra.mxu1 %v1726_v14  ;;  %v140_v13 = vld [vmem:[%s2787_s0 + $0x3a8] sm:$0xff] }
  0x47   :  { %1002 = vmatprep.subr.bf16.mxu0 %v1741_v15  ;;  %1045 = vmatprep.subr.bf16.mxu1 %v1743_v16  ;;  %v148_v14 = vld [vmem:[%s2787_s0 + $0x3e8] sm:$0xff]  ;;  %v1712_v15 = vcombine.low %v123_v3, %v131_v4  ;;  %v1714_v16 = vcombine.low %v124_v5, %v132_v6  ;;  %v109_v4 = vld [vmem:[%s2787_s0 + $0x2b0] sm:$0xff]  ;;  %v110_v6 = vld [vmem:[%s2787_s0 + $0x2b8] sm:$0xff] }
  0x48   :  { %v1731_v19 = vcombine.high %v140_v13, %v148_v14  ;;  %v117_v5 = vld [vmem:[%s2787_s0 + $0x2f0] sm:$0xff] }
  0x4a   :  { %1003 = vmatpush1.bf16.msra.mxu0 %v1740_v22  ;;  %1046 = vmatpush1.bf16.msra.mxu1 %v1742_v23  ;;  %v156_v22 = vld [vmem:[%s2787_s0 + $0x428] sm:$0xff] }
  0x4b   :  { %1072 = vmatprep.subr.bf16.mxu0 %v1617_v24  ;;  %1115 = vmatprep.subr.bf16.mxu1 %v1619_v25  ;;  %v164_v23 = vld [vmem:[%s2787_s0 + $0x468] sm:$0xff]  ;;  %v1728_v24 = vcombine.low %v139_v11, %v147_v12  ;;  %v1730_v25 = vcombine.low %v140_v13, %v148_v14  ;;  %v125_v12 = vld [vmem:[%s2787_s0 + $0x330] sm:$0xff]  ;;  %v126_v14 = vld [vmem:[%s2787_s0 + $0x338] sm:$0xff] }
  0x4c   :  { %v1747_v27 = vcombine.high %v156_v22, %v164_v23  ;;  %v133_v13 = vld [vmem:[%s2787_s0 + $0x370] sm:$0xff] }
  0x4d   :  { %1019 = vmatmul.mubr.bf16.vlgmr.msra.gmra.mrb[4].mxu0 %v1939_v17  ;;  %1062 = vmatmul.mubr.bf16.vlgmr.msra.gmra.mrb[4].mxu1 %v1939_v17 }
  0x4e   :  { %1073 = vmatpush1.bf16.msra.mxu0 %v1616_v30  ;;  %1116 = vmatpush1.bf16.msra.mxu1 %v1618_v31  ;;  %v30_v30 = vld [vmem:[%s2787_s0 + $0x38] sm:$0xff] }
  0x4f   :  { %1074 = vmatprep.subr.bf16.mxu0 %v1633_v32  ;;  %1117 = vmatprep.subr.bf16.mxu1 %v1635_v33  ;;  %v38_v31 = vld [vmem:[%s2787_s0 + $0x78] sm:$0xff]  ;;  %v1744_v32 = vcombine.low %v155_v20, %v163_v21  ;;  %v1746_v33 = vcombine.low %v156_v22, %v164_v23  ;;  %v141_v21 = vld [vmem:[%s2787_s0 + $0x3b0] sm:$0xff] }
  0x50   :  { %1756 = vmatprep.mubr.msk.bf16.mxu0 %vm896_vm0, %v1864_v35  ;;  %1757 = vmatprep.mubr.msk.bf16.mxu1 %vm896_vm0, %v1864_v35  ;;  %v1623_v36 = vcombine.high %v30_v30, %v38_v31  ;;  %v149_v22 = vld [vmem:[%s2787_s0 + $0x3f0] sm:$0xff]  ;;  %v142_v23 = vld [vmem:[%s2787_s0 + $0x3b8] sm:$0xff] }
  0x52   :  { %1075 = vmatpush1.bf16.msra.mxu0 %v1632_v39  ;;  %1118 = vmatpush1.bf16.msra.mxu1 %v1634_v40  ;;  %v46_v39 = vld [vmem:[%s2787_s0 + $0xb8] sm:$0xff] }
  0x53   :  { %1076 = vmatprep.subr.bf16.mxu0 %v1649_v41  ;;  %1119 = vmatprep.subr.bf16.mxu1 %v1651_v42  ;;  %v54_v40 = vld [vmem:[%s2787_s0 + $0xf8] sm:$0xff]  ;;  %v1620_v41 = vcombine.low %v29_v28, %v37_v29  ;;  %v1622_v42 = vcombine.low %v30_v30, %v38_v31  ;;  %v157_v29 = vld [vmem:[%s2787_s0 + $0x430] sm:$0xff] }
  0x54   :  { %v1639_v44 = vcombine.high %v46_v39, %v54_v40  ;;  %v165_v30 = vld [vmem:[%s2787_s0 + $0x470] sm:$0xff]  ;;  %v158_v31 = vld [vmem:[%s2787_s0 + $0x438] sm:$0xff] }
  0x56   :  { %1077 = vmatpush1.bf16.msra.mxu0 %v1648_v47  ;;  %1120 = vmatpush1.bf16.msra.mxu1 %v1650_v48  ;;  %v62_v47 = vld [vmem:[%s2787_s0 + $0x138] sm:$0xff] }
  0x57   :  { %1078 = vmatprep.subr.bf16.mxu0 %v1665_v49  ;;  %1121 = vmatprep.subr.bf16.mxu1 %v1667_v50  ;;  %v70_v48 = vld [vmem:[%s2787_s0 + $0x178] sm:$0xff]  ;;  %v1636_v49 = vcombine.low %v45_v37, %v53_v38  ;;  %v1638_v50 = vcombine.low %v46_v39, %v54_v40  ;;  %v1748_v38 = vcombine.low %v157_v29, %v165_v30 }
  0x58   :  { %v1655_v52 = vcombine.high %v62_v47, %v70_v48 }
  0x5a   :  { %1079 = vmatpush1.bf16.msra.mxu0 %v1664_v55  ;;  %1122 = vmatpush1.bf16.msra.mxu1 %v1666_v56  ;;  %v78_v55 = vld [vmem:[%s2787_s0 + $0x1b8] sm:$0xff] }
  0x5b   :  { %1080 = vmatprep.subr.bf16.mxu0 %v1681_v57  ;;  %1123 = vmatprep.subr.bf16.mxu1 %v1683_v58  ;;  %v86_v56 = vld [vmem:[%s2787_s0 + $0x1f8] sm:$0xff]  ;;  %v1652_v57 = vcombine.low %v61_v45, %v69_v46  ;;  %v1654_v58 = vcombine.low %v62_v47, %v70_v48 }
  0x5c   :  { %v1671_v60 = vcombine.high %v78_v55, %v86_v56 }
  0x5e   :  { %1081 = vmatpush1.bf16.msra.mxu0 %v1680_v63  ;;  %1124 = vmatpush1.bf16.msra.mxu1 %v1682_v0  ;;  %v102_v63 = vld [vmem:[%s2787_s0 + $0x278] sm:$0xff]  ;;  %v1668_v0 = vcombine.low %v77_v53, %v85_v54 }
  0x5f   :  { %1082 = vmatprep.subr.bf16.mxu0 %v1697_v1  ;;  %1125 = vmatprep.subr.bf16.mxu1 %v1699_v2  ;;  %v1670_v1 = vcombine.low %v78_v55, %v86_v56  ;;  %v1685_v2 = vcombine.high %v93_v61, %v101_v62 }
  0x62   :  { %1083 = vmatpush1.bf16.msra.mxu0 %v1696_v7  ;;  %1126 = vmatpush1.bf16.msra.mxu1 %v1698_v8  ;;  %v118_v7 = vld [vmem:[%s2787_s0 + $0x2f8] sm:$0xff]  ;;  %v1684_v8 = vcombine.low %v93_v61, %v101_v62 }
  0x63   :  { %1084 = vmatprep.subr.bf16.mxu0 %v1713_v9  ;;  %1127 = vmatprep.subr.bf16.mxu1 %v1715_v10  ;;  %v1701_v10 = vcombine.high %v109_v4, %v117_v5  ;;  %v1703_v11 = vcombine.high %v110_v6, %v118_v7 }
  0x66   :  { %1085 = vmatpush1.bf16.msra.mxu0 %v1712_v15  ;;  %1128 = vmatpush1.bf16.msra.mxu1 %v1714_v16  ;;  %v134_v15 = vld [vmem:[%s2787_s0 + $0x378] sm:$0xff]  ;;  %v1700_v16 = vcombine.low %v109_v4, %v117_v5 }
  0x67   :  { %1086 = vmatprep.subr.bf16.mxu0 %v1729_v18  ;;  %1129 = vmatprep.subr.bf16.mxu1 %v1731_v19  ;;  %v1702_v18 = vcombine.low %v110_v6, %v118_v7  ;;  %v1717_v19 = vcombine.high %v125_v12, %v133_v13  ;;  %v1719_v20 = vcombine.high %v126_v14, %v134_v15 }
  0x6a   :  { %1087 = vmatpush1.bf16.msra.mxu0 %v1728_v24  ;;  %1130 = vmatpush1.bf16.msra.mxu1 %v1730_v25  ;;  %v150_v24 = vld [vmem:[%s2787_s0 + $0x3f8] sm:$0xff]  ;;  %v1716_v25 = vcombine.low %v125_v12, %v133_v13 }
  0x6b   :  { %1088 = vmatprep.subr.bf16.mxu0 %v1745_v26  ;;  %1131 = vmatprep.subr.bf16.mxu1 %v1747_v27  ;;  %v1718_v26 = vcombine.low %v126_v14, %v134_v15  ;;  %v1733_v27 = vcombine.high %v141_v21, %v149_v22  ;;  %v1735_v28 = vcombine.high %v142_v23, %v150_v24 }
  0x6e   :  { %1089 = vmatpush1.bf16.msra.mxu0 %v1744_v32  ;;  %1132 = vmatpush1.bf16.msra.mxu1 %v1746_v33  ;;  %v166_v32 = vld [vmem:[%s2787_s0 + $0x478] sm:$0xff]  ;;  %v1732_v33 = vcombine.low %v141_v21, %v149_v22 }
  0x6f   :  { %1158 = vmatprep.subr.bf16.mxu0 %v1621_v34  ;;  %1201 = vmatprep.subr.bf16.mxu1 %v1623_v36  ;;  %v1734_v34 = vcombine.low %v142_v23, %v150_v24  ;;  %v1749_v36 = vcombine.high %v157_v29, %v165_v30  ;;  %v1751_v37 = vcombine.high %v158_v31, %v166_v32 }
  0x70   :  { %v1750_v39 = vcombine.low %v158_v31, %v166_v32 }
  0x71   :  { %1105 = vmatmul.mubr.bf16.vlgmr.msra.gmra.mrb[8].mxu0 %v1939_v17  ;;  %1148 = vmatmul.mubr.bf16.vlgmr.msra.gmra.mrb[8].mxu1 %v1939_v17 }
  0x72   :  { %1159 = vmatpush1.bf16.msra.mxu0 %v1620_v41  ;;  %1202 = vmatpush1.bf16.msra.mxu1 %v1622_v42 }
  0x73   :  { %1160 = vmatprep.subr.bf16.mxu0 %v1637_v43  ;;  %1203 = vmatprep.subr.bf16.mxu1 %v1639_v44 }
  0x74   :  { %1758 = vmatprep.mubr.msk.bf16.mxu0 %vm896_vm0, %v1864_v35  ;;  %1759 = vmatprep.mubr.msk.bf16.mxu1 %vm896_vm0, %v1864_v35  ;;  %v94_v35 = vld [vmem:[%s2787_s0 + $0x238] sm:$0xff] }
  0x75   :  { %v1687_v3 = vcombine.high %v94_v35, %v102_v63  ;;  %v1686_v9 = vcombine.low %v94_v35, %v102_v63 }
  0x76   :  { %1161 = vmatpush1.bf16.msra.mxu0 %v1636_v49  ;;  %1204 = vmatpush1.bf16.msra.mxu1 %v1638_v50 }
  0x77   :  { %1162 = vmatprep.subr.bf16.mxu0 %v1653_v51  ;;  %1205 = vmatprep.subr.bf16.mxu1 %v1655_v52 }
  0x7a   :  { %1163 = vmatpush1.bf16.msra.mxu0 %v1652_v57  ;;  %1206 = vmatpush1.bf16.msra.mxu1 %v1654_v58 }
  0x7b   :  { %1164 = vmatprep.subr.bf16.mxu0 %v1669_v59  ;;  %1207 = vmatprep.subr.bf16.mxu1 %v1671_v60 }
  0x7e   :  { %1165 = vmatpush1.bf16.msra.mxu0 %v1668_v0  ;;  %1208 = vmatpush1.bf16.msra.mxu1 %v1670_v1 }
  0x7f   :  { %1166 = vmatprep.subr.bf16.mxu0 %v1685_v2  ;;  %1209 = vmatprep.subr.bf16.mxu1 %v1687_v3 }
  0x82   :  { %1167 = vmatpush1.bf16.msra.mxu0 %v1684_v8  ;;  %1210 = vmatpush1.bf16.msra.mxu1 %v1686_v9 }
  0x83   :  { %1168 = vmatprep.subr.bf16.mxu0 %v1701_v10  ;;  %1211 = vmatprep.subr.bf16.mxu1 %v1703_v11 }
  0x86   :  { %1169 = vmatpush1.bf16.msra.mxu0 %v1700_v16  ;;  %1212 = vmatpush1.bf16.msra.mxu1 %v1702_v18 }
  0x87   :  { %1170 = vmatprep.subr.bf16.mxu0 %v1717_v19  ;;  %1213 = vmatprep.subr.bf16.mxu1 %v1719_v20 }
  0x8a   :  { %1171 = vmatpush1.bf16.msra.mxu0 %v1716_v25  ;;  %1214 = vmatpush1.bf16.msra.mxu1 %v1718_v26 }
  0x8b   :  { %1172 = vmatprep.subr.bf16.mxu0 %v1733_v27  ;;  %1215 = vmatprep.subr.bf16.mxu1 %v1735_v28 }
  0x8e   :  { %1173 = vmatpush1.bf16.msra.mxu0 %v1732_v33  ;;  %1216 = vmatpush1.bf16.msra.mxu1 %v1734_v34 }
  0x8f   :  { %1174 = vmatprep.subr.bf16.mxu0 %v1749_v36  ;;  %1217 = vmatprep.subr.bf16.mxu1 %v1751_v37 }
  0x92   :  { %1175 = vmatpush1.bf16.msra.mxu0 %v1748_v38  ;;  %1218 = vmatpush1.bf16.msra.mxu1 %v1750_v39 }
  0x95   :  { %1191 = vmatmul.mubr.bf16.vlgmr.msra.gmra.mrb[12].mxu0 %v1939_v17  ;;  %1234 = vmatmul.mubr.bf16.vlgmr.msra.gmra.mrb[12].mxu1 %v1939_v17 }
  0xfc   :  { %v2267_v40 = vpop.f32.mrb[0].mxu0  ;;  %v2271_v42 = vpop.f32.mrb[0].mxu1 }
  0xfd   :  { %v2269_v41 = vpop.f32.mrb[1].mxu0  ;;  %v2277_v45 = vpop.f32.mrb[1].mxu1 }
  0xfe   :  { %v1244_v43 = vadd.f32 %v2269_v41, %v2267_v40  ;;  %v2275_v44 = vpop.f32.mrb[2].mxu0  ;;  %v2281_v47 = vpop.f32.mrb[2].mxu1 }
  0xff   :  { %v2279_v46 = vpop.f32.mrb[3].mxu0  ;;  %v2286_v49 = vpop.f32.mrb[3].mxu1 }
 0x100   :  { %v1245_v48 = vadd.f32 %v1244_v43, %v2271_v42  ;;  %v1261_v17 = vadd.f32 %v2279_v46, %v2275_v44 }
 0x102   :  { %v1246_v50 = vadd.f32 %v1245_v48, %v2277_v45  ;;  %v1262_v51 = vadd.f32 %v1261_v17, %v2281_v47 }
 0x104   :  { %v1263_v52 = vadd.f32 %v1262_v51, %v2286_v49 }
 0x120   :  { %v1020_v53 = vpop.f32.mrb[4].mxu0  ;;  %v2293_v56 = vpop.f32.mrb[4].mxu1 }
 0x121   :  { %v1247_v54 = vadd.f32 %v1246_v50, %v1020_v53  ;;  %v2291_v55 = vpop.f32.mrb[5].mxu0  ;;  %v2297_v58 = vpop.f32.mrb[5].mxu1 }
 0x122   :  { %v2295_v57 = vpop.f32.mrb[6].mxu0  ;;  %v2303_v62 = vpop.f32.mrb[6].mxu1 }
 0x123   :  { %v1248_v59 = vadd.f32 %v1247_v54, %v2291_v55  ;;  %v1264_v60 = vadd.f32 %v1263_v52, %v2295_v57  ;;  %v2301_v61 = vpop.f32.mrb[7].mxu0  ;;  %v2305_v35 = vpop.f32.mrb[7].mxu1 }
 0x125   :  { %v1249_v63 = vadd.f32 %v1248_v59, %v2293_v56  ;;  %v1265_v0 = vadd.f32 %v1264_v60, %v2301_v61 }
 0x127   :  { %v1250_v1 = vadd.f32 %v1249_v63, %v2297_v58  ;;  %v1266_v2 = vadd.f32 %v1265_v0, %v2303_v62 }
 0x129   :  { %v1267_v3 = vadd.f32 %v1266_v2, %v2305_v35 }
 0x144   :  { %v1106_v4 = vpop.f32.mrb[8].mxu0  ;;  %v2314_v7 = vpop.f32.mrb[8].mxu1 }
 0x145   :  { %v1251_v5 = vadd.f32 %v1250_v1, %v1106_v4  ;;  %v2312_v6 = vpop.f32.mrb[9].mxu0  ;;  %v2318_v9 = vpop.f32.mrb[9].mxu1 }
 0x146   :  { %v2316_v8 = vpop.f32.mrb[10].mxu0  ;;  %v2324_v13 = vpop.f32.mrb[10].mxu1 }
 0x147   :  { %v1252_v10 = vadd.f32 %v1251_v5, %v2312_v6  ;;  %v1268_v11 = vadd.f32 %v1267_v3, %v2316_v8  ;;  %v2322_v12 = vpop.f32.mrb[11].mxu0  ;;  %v2326_v14 = vpop.f32.mrb[11].mxu1 }
 0x149   :  { %v1253_v15 = vadd.f32 %v1252_v10, %v2314_v7  ;;  %v1269_v16 = vadd.f32 %v1268_v11, %v2322_v12 }
 0x14b   :  { %v1254_v18 = vadd.f32 %v1253_v15, %v2318_v9  ;;  %v1270_v19 = vadd.f32 %v1269_v16, %v2324_v13 }
 0x14d   :  { %v1271_v20 = vadd.f32 %v1270_v19, %v2326_v14 }
 0x168   :  { %v2333_v21 = vpop.f32.mrb[12].mxu0  ;;  %v2338_v24 = vpop.f32.mrb[12].mxu1 }
 0x169   :  { %v1255_v22 = vadd.f32 %v1254_v18, %v2333_v21  ;;  %v2336_v23 = vpop.f32.mrb[13].mxu0  ;;  %v2342_v26 = vpop.f32.mrb[13].mxu1 }
 0x16a   :  { %v2340_v25 = vpop.f32.mrb[14].mxu0  ;;  %v2348_v30 = vpop.f32.mrb[14].mxu1 }
 0x16b   :  { %v1256_v27 = vadd.f32 %v1255_v22, %v2336_v23  ;;  %v1272_v28 = vadd.f32 %v1271_v20, %v2340_v25  ;;  %v2346_v29 = vpop.f32.mrb[15].mxu0  ;;  %v2350_v31 = vpop.f32.mrb[15].mxu1 }
 0x16d   :  { %v1257_v32 = vadd.f32 %v1256_v27, %v2338_v24  ;;  %v1273_v33 = vadd.f32 %v1272_v28, %v2346_v29 }
 0x16f   :  { %v1274_v34 = vadd.f32 %v1273_v33, %v2348_v30  ;;  %v1258_v36 = vadd.f32 %v1257_v32, %v2342_v26 }
 0x171   :  { %v1275_v37 = vadd.f32 %v1274_v34, %v2350_v31  ;;  %1259 = vadd.xlane.f32.xlu0 %v1258_v36 }
 0x175   :  { %1276 = vadd.xlane.f32.xlu0 %v1275_v37 }
 0x1fe   :  { %v1260_v38 = vpop.xlane.xlu0 %1259 }
 0x1ff   :  { %v2357_v39 = vmul.f32 0.00048828125, %v1260_v38 }
 0x201   :  { %v2361_v43 = vsub.f32 %v2267_v40, %v2357_v39  ;;  %v2365_v48 = vsub.f32 %v2269_v41, %v2357_v39  ;;  %v2369_v50 = vsub.f32 %v2271_v42, %v2357_v39  ;;  %v2379_v40 = vsub.f32 %v2277_v45, %v2357_v39 }
 0x202   :  { %v1277_v17 = vpop.xlane.xlu0 %1276  ;;  %v2382_v41 = vsub.f32 %v1020_v53, %v2357_v39  ;;  %v2396_v0 = vsub.f32 %v2291_v55, %v2357_v39  ;;  %v2402_v1 = vsub.f32 %v2293_v56, %v2357_v39  ;;  %v2416_v5 = vsub.f32 %v2297_v58, %v2357_v39 }
 0x203   :  { %v1312_v51 = vmul.f32 %v2361_v43, %v2361_v43  ;;  %v1313_v52 = vmul.f32 %v2365_v48, %v2365_v48  ;;  %v2375_v54 = vmul.f32 0.00048828125, %v1277_v17  ;;  %v1314_v59 = vmul.f32 %v2369_v50, %v2369_v50 }
 0x204   :  { %v1315_v45 = vmul.f32 %v2379_v40, %v2379_v40  ;;  %v1317_v56 = vmul.f32 %v2396_v0, %v2396_v0  ;;  %v1318_v15 = vmul.f32 %v2402_v1, %v2402_v1  ;;  %v2437_v20 = vsub.f32 %v2312_v6, %v2357_v39 }
 0x205   :  { %v1344_v42 = vadd.f32 %v1313_v52, %v1312_v51  ;;  %v2388_v60 = vsub.f32 %v2275_v44, %v2375_v54  ;;  %v2392_v63 = vsub.f32 %v2279_v46, %v2375_v54  ;;  %v1316_v44 = vmul.f32 %v2382_v41, %v2382_v41 }
 0x206   :  { %v2408_v46 = vsub.f32 %v2281_v47, %v2375_v54  ;;  %v2422_v11 = vsub.f32 %v2286_v49, %v2375_v54  ;;  %v2425_v47 = vsub.f32 %v1106_v4, %v2357_v39  ;;  %v2431_v18 = vsub.f32 %v2295_v57, %v2375_v54 }
 0x207   :  { %v1345_v53 = vadd.f32 %v1344_v42, %v1314_v59  ;;  %v1328_v55 = vmul.f32 %v2388_v60, %v2388_v60  ;;  %v1329_v3 = vmul.f32 %v2392_v63, %v2392_v63  ;;  %v1319_v49 = vmul.f32 %v2416_v5, %v2416_v5 }
 0x208   :  { %v1330_v58 = vmul.f32 %v2408_v46, %v2408_v46  ;;  %v2443_v22 = vsub.f32 %v2301_v61, %v2375_v54  ;;  %v1331_v57 = vmul.f32 %v2422_v11, %v2422_v11  ;;  %v2449_v28 = vsub.f32 %v2314_v7, %v2357_v39 }
 0x209   :  { %v1346_v2 = vadd.f32 %v1345_v53, %v1315_v45  ;;  %v1361_v19 = vadd.f32 %v1329_v3, %v1328_v55  ;;  %v1320_v6 = vmul.f32 %v2425_v47, %v2425_v47  ;;  %v2455_v33 = vsub.f32 %v2303_v62, %v2375_v54 }
 0x20a   :  { %v1332_v61 = vmul.f32 %v2431_v18, %v2431_v18  ;;  %v2461_v36 = vsub.f32 %v2318_v9, %v2357_v39  ;;  %v1321_v7 = vmul.f32 %v2437_v20, %v2437_v20  ;;  %v2467_v38 = vsub.f32 %v2305_v35, %v2375_v54 }
 0x20b   :  { %v1347_v10 = vadd.f32 %v1346_v2, %v1316_v44  ;;  %v1362_v27 = vadd.f32 %v1361_v19, %v1330_v58  ;;  %v1333_v62 = vmul.f32 %v2443_v22, %v2443_v22  ;;  %v2473_v51 = vsub.f32 %v2333_v21, %v2357_v39 }
 0x20c   :  { %v1322_v9 = vmul.f32 %v2449_v28, %v2449_v28  ;;  %v2479_v59 = vsub.f32 %v2316_v8, %v2375_v54  ;;  %v1334_v35 = vmul.f32 %v2455_v33, %v2455_v33  ;;  %v2485_v45 = vsub.f32 %v2336_v23, %v2357_v39 }
 0x20d   :  { %v1348_v16 = vadd.f32 %v1347_v10, %v1317_v56  ;;  %v1363_v34 = vadd.f32 %v1362_v27, %v1331_v57  ;;  %v1323_v21 = vmul.f32 %v2461_v36, %v2461_v36  ;;  %v2491_v44 = vsub.f32 %v2322_v12, %v2375_v54 }
 0x20e   :  { %v1335_v8 = vmul.f32 %v2467_v38, %v2467_v38  ;;  %v2497_v55 = vsub.f32 %v2338_v24, %v2357_v39  ;;  %v1324_v23 = vmul.f32 %v2473_v51, %v2473_v51  ;;  %v2503_v56 = vsub.f32 %v2324_v13, %v2375_v54 }
 0x20f   :  { %v1349_v4 = vadd.f32 %v1348_v16, %v1318_v15  ;;  %v1364_v17 = vadd.f32 %v1363_v34, %v1332_v61  ;;  %v1336_v12 = vmul.f32 %v2479_v59, %v2479_v59  ;;  %v2509_v15 = vsub.f32 %v2342_v26, %v2357_v39 }
 0x210   :  { %v1325_v24 = vmul.f32 %v2485_v45, %v2485_v45  ;;  %v2515_v58 = vsub.f32 %v2326_v14, %v2375_v54  ;;  %v1337_v13 = vmul.f32 %v2491_v44, %v2491_v44  ;;  %v2523_v26 = vsub.f32 %v2340_v25, %v2375_v54 }
 0x211   :  { %v1350_v32 = vadd.f32 %v1349_v4, %v1319_v49  ;;  %v1365_v42 = vadd.f32 %v1364_v17, %v1333_v62  ;;  %v1326_v49 = vmul.f32 %v2497_v55, %v2497_v55  ;;  %v1338_v39 = vmul.f32 %v2503_v56, %v2503_v56 }
 0x212   :  { %2797 = vst [vmem:[#allocation2_spill] sm:$0xff] %v2523_v26  ;;  %v1327_v14 = vmul.f32 %v2509_v15, %v2509_v15  ;;  %v2537_v25 = vsub.f32 %v2348_v30, %v2375_v54  ;;  %v2543_v62 = vsub.f32 %v2350_v31, %v2375_v54  ;;  %v1430_v31 = vld [vmem:[%s2789_s3] sm:$0xff] }
 0x213   :  { %v1351_v37 = vadd.f32 %v1350_v32, %v1320_v6  ;;  %v1366_v2 = vadd.f32 %v1365_v42, %v1334_v35  ;;  %v2531_v6 = vsub.f32 %v2346_v29, %v2375_v54  ;;  %v1339_v32 = vmul.f32 %v2515_v58, %v2515_v58 }
 0x214   :  { %2799 = vst [vmem:[#allocation4_spill] sm:$0xff] %v2537_v25  ;;  %2800 = vst [vmem:[#allocation5_spill] sm:$0xff] %v2543_v62  ;;  %v1343_v30 = vmul.f32 %v2543_v62, %v2543_v62 }
 0x215   :  { %v1352_v52 = vadd.f32 %v1351_v37, %v1321_v7  ;;  %v1367_v10 = vadd.f32 %v1366_v2, %v1335_v8  ;;  %2798 = vst [vmem:[#allocation3_spill] sm:$0xff] %v2531_v6  ;;  %v1340_v7 = vmul.f32 %v2523_v26, %v2523_v26  ;;  %v1341_v29 = vmul.f32 %v2531_v6, %v2531_v6 }
 0x217   :  { %v1353_v53 = vadd.f32 %v1352_v52, %v1322_v9  ;;  %v1368_v19 = vadd.f32 %v1367_v10, %v1336_v12  ;;  %v1342_v9 = vmul.f32 %v2537_v25, %v2537_v25  ;;  %v1380_v12 = vld [vmem:[%s2790_s2] sm:$0xff] }
 0x219   :  { %v1354_v3 = vadd.f32 %v1353_v53, %v1323_v21  ;;  %v1369_v57 = vadd.f32 %v1368_v19, %v1337_v13  ;;  %v1770_v21 = vmov 0  }
 0x21a   :  { %1762 = vset.pattern.permute.xlu1 %v1770_v21  ;;  %1761 = vset.pattern.permute.xlu0 %v1770_v21  ;;  %v1481_v21 = vld [vmem:[%s2791_s4 + $0x38] sm:$0xff] }
 0x21b   :  { %v1355_v16 = vadd.f32 %v1354_v3, %v1324_v23  ;;  %v1370_v61 = vadd.f32 %v1369_v57, %v1338_v39 }
 0x21d   :  { %v1356_v4 = vadd.f32 %v1355_v16, %v1325_v24  ;;  %v1371_v37 = vadd.f32 %v1370_v61, %v1339_v32  ;;  %v1381_v16 = vld [vmem:[%s2790_s2 + $0x8] sm:$0xff] }
 0x21f   :  { %v1357_v27 = vadd.f32 %v1356_v4, %v1326_v49  ;;  %v1372_v17 = vadd.f32 %v1371_v37, %v1340_v7  ;;  %v1431_v49 = vld [vmem:[%s2789_s3 + $0x8] sm:$0xff] }
 0x221   :  { %v1358_v34 = vadd.f32 %v1357_v27, %v1327_v14  ;;  %v1373_v52 = vadd.f32 %v1372_v17, %v1341_v29 }
 0x223   :  { %1359 = vadd.xlane.f32.xlu1 %v1358_v34  ;;  %v1374_v35 = vadd.f32 %v1373_v52, %v1342_v9  ;;  %v1480_v9 = vld [vmem:[%s2791_s4 + $0x30] sm:$0xff] }
 0x225   :  { %v1375_v42 = vadd.f32 %v1374_v35, %v1343_v30 }
 0x227   :  { %1376 = vadd.xlane.f32.xlu1 %v1375_v42 }
 0x238   :  { %1434 = vperm.xlu1 %1762, %v1430_v31   ;;  %v1482_v31 = vld [vmem:[%s2791_s4 + $0x40] sm:$0xff] }
 0x2b0   :  { %v1360_v54 = vpop.xlane.xlu1 %1359 }
 0x2b1   :  { %v1378_v53 = vmul.f32 0.00048828125, %v1360_v54  ;;  %v1483_v54 = vld [vmem:[%s2791_s4 + $0x48] sm:$0xff] }
 0x2b3   :  { %v1382_v8 = vadd.f32 1e-05, %v1378_v53 }
 0x2b4   :  { %v1377_v2 = vpop.xlane.xlu1 %1376 }
 0x2b5   :  { %1766 = vrsqrt.f32 %v1382_v8  ;;  %v1379_v23 = vmul.f32 0.00048828125, %v1377_v2 }
 0x2b7   :  { %v1383_v3 = vadd.f32 1e-05, %v1379_v23 }
 0x2b8   :  { %v1435_v17 = vpop.permute.xlu1 %1434 }
 0x2b9   :  { %1768 = vrsqrt.f32 %v1383_v3  ;;  %v1484_v3 = vld [vmem:[%s2791_s4 + $0x50] sm:$0xff] }
 0x2bf   :  { %v1767_v10 = vpop.eup %1766 }
 0x2c0   :  { %v1386_v24 = vmul.f32 %v1767_v10, %v1380_v12  ;;  %v1485_v12 = vld [vmem:[%s2791_s4 + $0x58] sm:$0xff]  ;;  %v1486_v10 = vld [vmem:[%s2791_s4 + $0x60] sm:$0xff] }
 0x2c2   :  { %1390 = vperm.xlu0 %1761, %v1386_v24  }
 0x2c3   :  { %v1769_v13 = vpop.eup %1768 }
 0x2c4   :  { %v1387_v19 = vmul.f32 %v1769_v13, %v1381_v16 }
 0x2c6   :  { %1395 = vperm.xlu1 %1762, %v1387_v19  }
 0x2ca   :  { %1439 = vperm.xlu1 %1762, %v1431_v49   ;;  %v1487_v49 = vld [vmem:[%s2791_s4 + $0x68] sm:$0xff] }
 0x341   :  { %v1391_v4 = vpop.permute.xlu0 %1390 }
 0x342   :  { %v1398_v39 = vmul.f32 %v1391_v4, %v2361_v43  ;;  %v1399_v57 = vmul.f32 %v1391_v4, %v2365_v48  ;;  %v1400_v14 = vmul.f32 %v1391_v4, %v2369_v50  ;;  %v1401_v27 = vmul.f32 %v1391_v4, %v2379_v40  ;;  %v1474_v50 = vld [vmem:[%s2791_s4] sm:$0xff] }
 0x343   :  { %v1402_v32 = vmul.f32 %v1391_v4, %v2382_v41  ;;  %v1403_v61 = vmul.f32 %v1391_v4, %v2396_v0  ;;  %v1404_v34 = vmul.f32 %v1391_v4, %v2402_v1  ;;  %v1405_v7 = vmul.f32 %v1391_v4, %v2416_v5  ;;  %v1475_v5 = vld [vmem:[%s2791_s4 + $0x8] sm:$0xff] }
 0x344   :  { %v1406_v37 = vmul.f32 %v1391_v4, %v2425_v47  ;;  %v1407_v29 = vmul.f32 %v1391_v4, %v2437_v20  ;;  %v1408_v43 = vmul.f32 %v1391_v4, %v2449_v28  ;;  %v1409_v48 = vmul.f32 %v1391_v4, %v2461_v36  ;;  %v1476_v47 = vld [vmem:[%s2791_s4 + $0x10] sm:$0xff]  ;;  %v1477_v20 = vld [vmem:[%s2791_s4 + $0x18] sm:$0xff] }
 0x345   :  { %v1410_v40 = vmul.f32 %v1391_v4, %v2473_v51  ;;  %v1411_v41 = vmul.f32 %v1391_v4, %v2485_v45  ;;  %v1412_v0 = vmul.f32 %v1391_v4, %v2497_v55  ;;  %v1413_v1 = vmul.f32 %v1391_v4, %v2509_v15  ;;  %v1478_v55 = vld [vmem:[%s2791_s4 + $0x20] sm:$0xff]  ;;  %v1479_v15 = vld [vmem:[%s2791_s4 + $0x28] sm:$0xff]  ;;  %v1488_v4 = vld [vmem:[%s2791_s4 + $0x70] sm:$0xff]  ;;  %v1396_v62 = vpop.permute.xlu1 %1395 }
 0x346   :  { %v1442_v28 = vadd.f32 %v1435_v17, %v1398_v39  ;;  %v1443_v36 = vadd.f32 %v1435_v17, %v1399_v57  ;;  %v1444_v51 = vadd.f32 %v1435_v17, %v1400_v14  ;;  %v1445_v45 = vadd.f32 %v1435_v17, %v1401_v27  ;;  %v1489_v39 = vld [vmem:[%s2791_s4 + $0x78] sm:$0xff] }
 0x347   :  { %v1446_v52 = vadd.f32 %v1435_v17, %v1402_v32  ;;  %v1447_v30 = vadd.f32 %v1435_v17, %v1403_v61  ;;  %v1448_v35 = vadd.f32 %v1435_v17, %v1404_v34  ;;  %v1449_v42 = vadd.f32 %v1435_v17, %v1405_v7 }
 0x348   :  { %v1450_v53 = vadd.f32 %v1435_v17, %v1406_v37  ;;  %v1451_v8 = vadd.f32 %v1435_v17, %v1407_v29  ;;  %v1452_v2 = vadd.f32 %v1435_v17, %v1408_v43  ;;  %v1453_v23 = vadd.f32 %v1435_v17, %v1409_v48 }
 0x349   :  { %v1454_v24 = vadd.f32 %v1435_v17, %v1410_v40  ;;  %v1455_v16 = vadd.f32 %v1435_v17, %v1411_v41  ;;  %v1456_v13 = vadd.f32 %v1435_v17, %v1412_v0  ;;  %v1457_v19 = vadd.f32 %v1435_v17, %v1413_v1 }
 0x34a   :  { %v1506_v57 = vadd.f32 %v1474_v50, %v1442_v28  ;;  %v1507_v14 = vadd.f32 %v1475_v5, %v1443_v36  ;;  %v1508_v27 = vadd.f32 %v1476_v47, %v1444_v51  ;;  %v1509_v32 = vadd.f32 %v1477_v20, %v1445_v45 }
 0x34b   :  { %v1510_v61 = vadd.f32 %v1478_v55, %v1446_v52  ;;  %v1511_v34 = vadd.f32 %v1479_v15, %v1447_v30  ;;  %v1512_v7 = vadd.f32 %v1480_v9, %v1448_v35  ;;  %v1513_v37 = vadd.f32 %v1481_v21, %v1449_v42  ;;  %v1440_v42 = vpop.permute.xlu1 %1439 }
 0x34c   :  { %v1514_v29 = vadd.f32 %v1482_v31, %v1450_v53  ;;  %v1515_v43 = vadd.f32 %v1483_v54, %v1451_v8  ;;  %v1516_v48 = vadd.f32 %v1484_v3, %v1452_v2  ;;  %v1517_v17 = vadd.f32 %v1485_v12, %v1453_v23  ;;  %v2801_v8 = vld [vmem:[#allocation2_spill] sm:$0xff]  ;;  %v2802_v23 = vld [vmem:[#allocation3_spill] sm:$0xff] }
 0x34d   :  { %v1518_v40 = vadd.f32 %v1486_v10, %v1454_v24  ;;  %v1519_v41 = vadd.f32 %v1487_v49, %v1455_v16  ;;  %v1520_v0 = vadd.f32 %v1488_v4, %v1456_v13  ;;  %v1521_v1 = vadd.f32 %v1489_v39, %v1457_v19  ;;  %v1494_v16 = vld [vmem:[%s2791_s4 + $0xa0] sm:$0xff]  ;;  %v1495_v13 = vld [vmem:[%s2791_s4 + $0xa8] sm:$0xff]  ;;  %v1496_v19 = vld [vmem:[%s2791_s4 + $0xb0] sm:$0xff] }
 0x34e   :  { %v1538_v25 = vmax.f32 %v1506_v57, 0.0  ;;  %v1539_v6 = vmax.f32 %v1507_v14, 0.0  ;;  %v1540_v26 = vmax.f32 %v1508_v27, 0.0  ;;  %v1541_v50 = vmax.f32 %v1509_v32, 0.0  ;;  %v1497_v14 = vld [vmem:[%s2791_s4 + $0xb8] sm:$0xff]  ;;  %v1498_v27 = vld [vmem:[%s2791_s4 + $0xc0] sm:$0xff] }
 0x34f   :  { %v1542_v5 = vmax.f32 %v1510_v61, 0.0  ;;  %v1543_v47 = vmax.f32 %v1511_v34, 0.0  ;;  %v1544_v20 = vmax.f32 %v1512_v7, 0.0  ;;  %v1545_v28 = vmax.f32 %v1513_v37, 0.0  ;;  %v1499_v32 = vld [vmem:[%s2791_s4 + $0xc8] sm:$0xff] }
 0x350   :  { %v1546_v36 = vmax.f32 %v1514_v29, 0.0  ;;  %v1547_v51 = vmax.f32 %v1515_v43, 0.0  ;;  %v1548_v45 = vmax.f32 %v1516_v48, 0.0  ;;  %v1549_v55 = vmax.f32 %v1517_v17, 0.0  ;;  %1570 = vst [vmem:[%s2792_s5] sm:$0xff] %v1538_v25  ;;  %1571 = vst [vmem:[%s2792_s5 + $0x8] sm:$0xff] %v1539_v6  ;;  %v1500_v29 = vld [vmem:[%s2791_s4 + $0xd0] sm:$0xff] }
 0x351   :  { %1572 = vst [vmem:[%s2792_s5 + $0x10] sm:$0xff] %v1540_v26  ;;  %1573 = vst [vmem:[%s2792_s5 + $0x18] sm:$0xff] %v1541_v50  ;;  %v1550_v15 = vmax.f32 %v1518_v40, 0.0  ;;  %v1551_v9 = vmax.f32 %v1519_v41, 0.0  ;;  %v1552_v52 = vmax.f32 %v1520_v0, 0.0  ;;  %v1553_v30 = vmax.f32 %v1521_v1, 0.0 }
 0x352   :  { %1574 = vst [vmem:[%s2792_s5 + $0x20] sm:$0xff] %v1542_v5  ;;  %1575 = vst [vmem:[%s2792_s5 + $0x28] sm:$0xff] %v1543_v47  ;;  %v1414_v26 = vmul.f32 %v1396_v62, %v2388_v60  ;;  %v1415_v6 = vmul.f32 %v1396_v62, %v2392_v63  ;;  %v1416_v25 = vmul.f32 %v1396_v62, %v2408_v46  ;;  %v1501_v43 = vld [vmem:[%s2791_s4 + $0xd8] sm:$0xff]  ;;  %v1502_v48 = vld [vmem:[%s2791_s4 + $0xe0] sm:$0xff] }
 0x353   :  { %1576 = vst [vmem:[%s2792_s5 + $0x30] sm:$0xff] %v1544_v20  ;;  %1577 = vst [vmem:[%s2792_s5 + $0x38] sm:$0xff] %v1545_v28  ;;  %v1417_v35 = vmul.f32 %v1396_v62, %v2422_v11  ;;  %v1418_v60 = vmul.f32 %v1396_v62, %v2431_v18  ;;  %v1419_v63 = vmul.f32 %v1396_v62, %v2443_v22  ;;  %v2803_v18 = vld [vmem:[#allocation4_spill] sm:$0xff]  ;;  %v2804_v22 = vld [vmem:[#allocation5_spill] sm:$0xff] }
 0x354   :  { %1578 = vst [vmem:[%s2792_s5 + $0x40] sm:$0xff] %v1546_v36  ;;  %1579 = vst [vmem:[%s2792_s5 + $0x48] sm:$0xff] %v1547_v51  ;;  %v1420_v46 = vmul.f32 %v1396_v62, %v2455_v33  ;;  %v1421_v11 = vmul.f32 %v1396_v62, %v2467_v38  ;;  %v1422_v21 = vmul.f32 %v1396_v62, %v2479_v59  ;;  %v1490_v33 = vld [vmem:[%s2791_s4 + $0x80] sm:$0xff]  ;;  %v1491_v38 = vld [vmem:[%s2791_s4 + $0x88] sm:$0xff] }
 0x355   :  { %1580 = vst [vmem:[%s2792_s5 + $0x50] sm:$0xff] %v1548_v45  ;;  %1581 = vst [vmem:[%s2792_s5 + $0x58] sm:$0xff] %v1549_v55  ;;  %v1423_v31 = vmul.f32 %v1396_v62, %v2491_v44  ;;  %v1424_v54 = vmul.f32 %v1396_v62, %v2503_v56  ;;  %v1425_v53 = vmul.f32 %v1396_v62, %v2515_v58  ;;  %v1492_v59 = vld [vmem:[%s2791_s4 + $0x90] sm:$0xff]  ;;  %v1493_v44 = vld [vmem:[%s2791_s4 + $0x98] sm:$0xff] }
 0x356   :  { %1582 = vst [vmem:[%s2792_s5 + $0x60] sm:$0xff] %v1550_v15  ;;  %1583 = vst [vmem:[%s2792_s5 + $0x68] sm:$0xff] %v1551_v9  ;;  %v1426_v2 = vmul.f32 %v1396_v62, %v2801_v8  ;;  %v1427_v3 = vmul.f32 %v1396_v62, %v2802_v23  ;;  %v1428_v12 = vmul.f32 %v1396_v62, %v2803_v18  ;;  %v1503_v1 = vld [vmem:[%s2791_s4 + $0xe8] sm:$0xff]  ;;  %v1504_v50 = vld [vmem:[%s2791_s4 + $0xf0] sm:$0xff] }
 0x357   :  { %1584 = vst [vmem:[%s2792_s5 + $0x70] sm:$0xff] %v1552_v52  ;;  %1585 = vst [vmem:[%s2792_s5 + $0x78] sm:$0xff] %v1553_v30  ;;  %v1429_v10 = vmul.f32 %v1396_v62, %v2804_v22  ;;  %v1458_v56 = vadd.f32 %v1440_v42, %v1414_v26  ;;  %v1459_v58 = vadd.f32 %v1440_v42, %v1415_v6  ;;  %v1505_v5 = vld [vmem:[%s2791_s4 + $0xf8] sm:$0xff] }
 0x358   :  { %v1460_v24 = vadd.f32 %v1440_v42, %v1416_v25  ;;  %v1461_v62 = vadd.f32 %v1440_v42, %v1417_v35  ;;  %v1462_v49 = vadd.f32 %v1440_v42, %v1418_v60  ;;  %v1463_v4 = vadd.f32 %v1440_v42, %v1419_v63 }
 0x359   :  { %v1464_v39 = vadd.f32 %v1440_v42, %v1420_v46  ;;  %v1465_v57 = vadd.f32 %v1440_v42, %v1421_v11  ;;  %v1466_v61 = vadd.f32 %v1440_v42, %v1422_v21  ;;  %v1467_v34 = vadd.f32 %v1440_v42, %v1423_v31 }
 0x35a   :  { %v1468_v7 = vadd.f32 %v1440_v42, %v1424_v54  ;;  %v1469_v37 = vadd.f32 %v1440_v42, %v1425_v53  ;;  %v1470_v17 = vadd.f32 %v1440_v42, %v1426_v2  ;;  %v1471_v40 = vadd.f32 %v1440_v42, %v1427_v3 }
 0x35b   :  { %v1472_v41 = vadd.f32 %v1440_v42, %v1428_v12  ;;  %v1473_v0 = vadd.f32 %v1440_v42, %v1429_v10  ;;  %v1522_v47 = vadd.f32 %v1490_v33, %v1458_v56  ;;  %v1523_v20 = vadd.f32 %v1491_v38, %v1459_v58 }
 0x35c   :  { %v1524_v28 = vadd.f32 %v1492_v59, %v1460_v24  ;;  %v1525_v36 = vadd.f32 %v1493_v44, %v1461_v62  ;;  %v1526_v51 = vadd.f32 %v1494_v16, %v1462_v49  ;;  %v1527_v45 = vadd.f32 %v1495_v13, %v1463_v4 }
 0x35d   :  { %v1528_v55 = vadd.f32 %v1496_v19, %v1464_v39  ;;  %v1529_v15 = vadd.f32 %v1497_v14, %v1465_v57  ;;  %v1530_v9 = vadd.f32 %v1498_v27, %v1466_v61  ;;  %v1531_v52 = vadd.f32 %v1499_v32, %v1467_v34 }
 0x35e   :  { %v1532_v30 = vadd.f32 %v1500_v29, %v1468_v7  ;;  %v1533_v26 = vadd.f32 %v1501_v43, %v1469_v37  ;;  %v1534_v6 = vadd.f32 %v1502_v48, %v1470_v17  ;;  %v1535_v25 = vadd.f32 %v1503_v1, %v1471_v40 }
 0x35f   :  { %v1536_v35 = vadd.f32 %v1504_v50, %v1472_v41  ;;  %v1537_v60 = vadd.f32 %v1505_v5, %v1473_v0  ;;  %v1554_v63 = vmax.f32 %v1522_v47, 0.0  ;;  %v1555_v46 = vmax.f32 %v1523_v20, 0.0 }
 0x360   :  { %v1556_v11 = vmax.f32 %v1524_v28, 0.0  ;;  %v1557_v42 = vmax.f32 %v1525_v36, 0.0  ;;  %v1558_v21 = vmax.f32 %v1526_v51, 0.0  ;;  %v1559_v31 = vmax.f32 %v1527_v45, 0.0 }
 0x361   :  { %v1560_v54 = vmax.f32 %v1528_v55, 0.0  ;;  %v1561_v53 = vmax.f32 %v1529_v15, 0.0  ;;  %v1562_v8 = vmax.f32 %v1530_v9, 0.0  ;;  %v1563_v2 = vmax.f32 %v1531_v52, 0.0  ;;  %1586 = vst [vmem:[%s2792_s5 + $0x80] sm:$0xff] %v1554_v63  ;;  %1587 = vst [vmem:[%s2792_s5 + $0x88] sm:$0xff] %v1555_v46 }
 0x362   :  { %v1564_v23 = vmax.f32 %v1532_v30, 0.0  ;;  %v1565_v3 = vmax.f32 %v1533_v26, 0.0  ;;  %1588 = vst [vmem:[%s2792_s5 + $0x90] sm:$0xff] %v1556_v11  ;;  %1589 = vst [vmem:[%s2792_s5 + $0x98] sm:$0xff] %v1557_v42  ;;  %v1566_v18 = vmax.f32 %v1534_v6, 0.0  ;;  %v1567_v12 = vmax.f32 %v1535_v25, 0.0 }
 0x363   :  { %v1568_v22 = vmax.f32 %v1536_v35, 0.0  ;;  %v1569_v10 = vmax.f32 %v1537_v60, 0.0  ;;  %1590 = vst [vmem:[%s2792_s5 + $0xa0] sm:$0xff] %v1558_v21  ;;  %1591 = vst [vmem:[%s2792_s5 + $0xa8] sm:$0xff] %v1559_v31 }
 0x364   :  { %1592 = vst [vmem:[%s2792_s5 + $0xb0] sm:$0xff] %v1560_v54  ;;  %1593 = vst [vmem:[%s2792_s5 + $0xb8] sm:$0xff] %v1561_v53 }
 0x365   :  { %1594 = vst [vmem:[%s2792_s5 + $0xc0] sm:$0xff] %v1562_v8  ;;  %1595 = vst [vmem:[%s2792_s5 + $0xc8] sm:$0xff] %v1563_v2 }
 0x366   :  { %1596 = vst [vmem:[%s2792_s5 + $0xd0] sm:$0xff] %v1564_v23  ;;  %1597 = vst [vmem:[%s2792_s5 + $0xd8] sm:$0xff] %v1565_v3 }
 0x367   :  { %1598 = vst [vmem:[%s2792_s5 + $0xe0] sm:$0xff] %v1566_v18  ;;  %1599 = vst [vmem:[%s2792_s5 + $0xe8] sm:$0xff] %v1567_v12 }
 0x368   :  { %1600 = vst [vmem:[%s2792_s5 + $0xf0] sm:$0xff] %v1568_v22  ;;  %1601 = vst [vmem:[%s2792_s5 + $0xf8] sm:$0xff] %v1569_v10 }

// kernel: resnet20_forward.30
= control target key start
LH: loop header
LB: loop body
LE: loop exit
PB: predicated region body
PF: predicated region fallthrough
CT: control target
= control target key end

     0   :  { %vm256_vm0 = vcmask 130048   ;;  %s994_s0 = inlined_call_operand.vmem [shape: bf16[144,512], index: 0, kind: input, shape index: {}]   ;;  %s995_s1 = inlined_call_operand.vmem [shape: bf16[32,144], index: 1, kind: input, shape index: {}]   ;;  %s996_s3 = inlined_call_operand.vmem [shape: f32[32,1], index: 3, kind: input, shape index: {}]   ;;  %s997_s2 = inlined_call_operand.vmem [shape: f32[32,1], index: 2, kind: input, shape index: {}]   ;;  %s998_s4 = inlined_call_operand.vmem [shape: f32[32,512], index: 4, kind: output, shape index: {}]  }
   0x1   :  { %v624_v0 = vld [vmem:[%s994_s0 + $0x4] ss:$16 sps:$4 sm:$0xff]   ;;  %v626_v1 = vld [vmem:[%s994_s0 + $0xc] ss:$16 sps:$4 sm:$0xff]   ;;  %v628_v2 = vld [vmem:[%s994_s0] ss:$16 sps:$4 sm:$0xff]  }
   0x2   :  { %263 = vmatprep.subr.bf16.mxu0 %v624_v0  ;;  %v629_v3 = vld [vmem:[%s994_s0 + $0x8] ss:$16 sps:$4 sm:$0xff]   ;;  %316 = vmatprep.subr.bf16.mxu1 %v626_v1  ;;  %v630_v4 = vld [vmem:[%s994_s0 + $0x24] ss:$16 sps:$4 sm:$0xff]   ;;  %v632_v5 = vld [vmem:[%s994_s0 + $0x2c] ss:$16 sps:$4 sm:$0xff]  }
   0x3   :  { %264 = vmatpush1.bf16.msra.mxu0 %v628_v2  ;;  %317 = vmatpush1.bf16.msra.mxu1 %v629_v3  ;;  %v634_v6 = vld [vmem:[%s994_s0 + $0x20] ss:$16 sps:$4 sm:$0xff]   ;;  %v635_v7 = vld [vmem:[%s994_s0 + $0x28] ss:$16 sps:$4 sm:$0xff]   ;;  %v636_v8 = vld [vmem:[%s994_s0 + $0x44] ss:$16 sps:$4 sm:$0xff]  }
   0x4   :  { %265 = vmatprep.subr.bf16.mxu0 %v630_v4  ;;  %318 = vmatprep.subr.bf16.mxu1 %v632_v5  ;;  %v638_v9 = vld [vmem:[%s994_s0 + $0x4c] ss:$16 sps:$4 sm:$0xff]   ;;  %v640_v10 = vld [vmem:[%s994_s0 + $0x40] ss:$16 sps:$4 sm:$0xff]   ;;  %v641_v11 = vld [vmem:[%s994_s0 + $0x48] ss:$16 sps:$4 sm:$0xff]  }
   0x5   :  { %v642_v12 = vld [vmem:[%s994_s0 + $0x64] ss:$16 sps:$4 sm:$0xff]   ;;  %v644_v13 = vld [vmem:[%s994_s0 + $0x6c] ss:$16 sps:$4 sm:$0xff]   ;;  %v646_v14 = vld [vmem:[%s994_s0 + $0x60] ss:$16 sps:$4 sm:$0xff]  }
   0x6   :  { %v647_v15 = vld [vmem:[%s994_s0 + $0x68] ss:$16 sps:$4 sm:$0xff]   ;;  %v648_v16 = vld [vmem:[%s994_s0 + $0x84] ss:$16 sps:$4 sm:$0xff]   ;;  %v650_v17 = vld [vmem:[%s994_s0 + $0x8c] ss:$16 sps:$4 sm:$0xff]  }
   0x7   :  { %266 = vmatpush1.bf16.msra.mxu0 %v634_v6  ;;  %319 = vmatpush1.bf16.msra.mxu1 %v635_v7  ;;  %v652_v18 = vld [vmem:[%s994_s0 + $0x80] ss:$16 sps:$4 sm:$0xff]   ;;  %v653_v19 = vld [vmem:[%s994_s0 + $0x88] ss:$16 sps:$4 sm:$0xff]   ;;  %v654_v20 = vld [vmem:[%s994_s0 + $0xa4] ss:$16 sps:$4 sm:$0xff]  }
   0x8   :  { %267 = vmatprep.subr.bf16.mxu0 %v636_v8  ;;  %320 = vmatprep.subr.bf16.mxu1 %v638_v9  ;;  %v656_v21 = vld [vmem:[%s994_s0 + $0xac] ss:$16 sps:$4 sm:$0xff]   ;;  %v658_v22 = vld [vmem:[%s994_s0 + $0xa0] ss:$16 sps:$4 sm:$0xff]   ;;  %v659_v23 = vld [vmem:[%s994_s0 + $0xa8] ss:$16 sps:$4 sm:$0xff]  }
   0x9   :  { %v660_v24 = vld [vmem:[%s994_s0 + $0xc4] ss:$16 sps:$4 sm:$0xff]   ;;  %v662_v25 = vld [vmem:[%s994_s0 + $0xcc] ss:$16 sps:$4 sm:$0xff]   ;;  %v664_v26 = vld [vmem:[%s994_s0 + $0xc0] ss:$16 sps:$4 sm:$0xff]  }
   0xa   :  { %v665_v27 = vld [vmem:[%s994_s0 + $0xc8] ss:$16 sps:$4 sm:$0xff]   ;;  %v666_v28 = vld [vmem:[%s994_s0 + $0xe4] ss:$16 sps:$4 sm:$0xff]   ;;  %v668_v29 = vld [vmem:[%s994_s0 + $0xec] ss:$16 sps:$4 sm:$0xff]  }
   0xb   :  { %268 = vmatpush1.bf16.msra.mxu0 %v640_v10  ;;  %321 = vmatpush1.bf16.msra.mxu1 %v641_v11  ;;  %v680_v30 = vld [vmem:[%s995_s1 + $0x4] ss:$8 sps:$4 sm:$0xff]   ;;  %v670_v31 = vld [vmem:[%s994_s0 + $0xe0] ss:$16 sps:$4 sm:$0xff]   ;;  %v671_v32 = vld [vmem:[%s994_s0 + $0xe8] ss:$16 sps:$4 sm:$0xff]  }
   0xc   :  { %269 = vmatprep.subr.bf16.mxu0 %v642_v12  ;;  %322 = vmatprep.subr.bf16.mxu1 %v644_v13  ;;  %v672_v33 = vld [vmem:[%s994_s0 + $0x104] ss:$16 sps:$4 sm:$0xff]   ;;  %v674_v34 = vld [vmem:[%s994_s0 + $0x10c] ss:$16 sps:$4 sm:$0xff]   ;;  %v676_v35 = vld [vmem:[%s994_s0 + $0x100] ss:$16 sps:$4 sm:$0xff]  }
   0xd   :  { %617 = vmatprep.mubr.msk.bf16.mxu0 %vm256_vm0, %v680_v30  ;;  %619 = vmatprep.mubr.msk.bf16.mxu1 %vm256_vm0, %v680_v30  ;;  %v677_v36 = vld [vmem:[%s994_s0 + $0x108] ss:$16 sps:$4 sm:$0xff]   ;;  %v681_v38 = vld [vmem:[%s995_s1 + $0x14] ss:$8 sps:$4 sm:$0xff]  }
   0xe   :  { %v678_v37 = vld [vmem:[%s995_s1] ss:$8 sps:$4 sm:$0xff]   ;;  %v683_v39 = vld [vmem:[%s995_s1 + $0x10] ss:$8 sps:$4 sm:$0xff]  }
   0xf   :  { %270 = vmatpush1.bf16.msra.mxu0 %v646_v14  ;;  %323 = vmatpush1.bf16.msra.mxu1 %v647_v15 }
  0x10   :  { %271 = vmatprep.subr.bf16.mxu0 %v648_v16  ;;  %324 = vmatprep.subr.bf16.mxu1 %v650_v17 }
  0x13   :  { %272 = vmatpush1.bf16.msra.mxu0 %v652_v18  ;;  %325 = vmatpush1.bf16.msra.mxu1 %v653_v19 }
  0x14   :  { %273 = vmatprep.subr.bf16.mxu0 %v654_v20  ;;  %326 = vmatprep.subr.bf16.mxu1 %v656_v21 }
  0x17   :  { %274 = vmatpush1.bf16.msra.mxu0 %v658_v22  ;;  %327 = vmatpush1.bf16.msra.mxu1 %v659_v23 }
  0x18   :  { %275 = vmatprep.subr.bf16.mxu0 %v660_v24  ;;  %328 = vmatprep.subr.bf16.mxu1 %v662_v25 }
  0x1b   :  { %276 = vmatpush1.bf16.msra.mxu0 %v664_v26  ;;  %329 = vmatpush1.bf16.msra.mxu1 %v665_v27 }
  0x1c   :  { %277 = vmatprep.subr.bf16.mxu0 %v666_v28  ;;  %330 = vmatprep.subr.bf16.mxu1 %v668_v29 }
  0x1f   :  { %278 = vmatpush1.bf16.msra.mxu0 %v670_v31  ;;  %331 = vmatpush1.bf16.msra.mxu1 %v671_v32 }
  0x20   :  { %279 = vmatprep.subr.bf16.mxu0 %v672_v33  ;;  %332 = vmatprep.subr.bf16.mxu1 %v674_v34 }
  0x23   :  { %280 = vmatpush1.bf16.msra.mxu0 %v676_v35  ;;  %333 = vmatpush1.bf16.msra.mxu1 %v677_v36 }
  0x26   :  { %296 = vmatmul.mubr.bf16.vlgmr.msra.gmra.mrb[0].mxu0 %v678_v37  ;;  %349 = vmatmul.mubr.bf16.vlgmr.msra.gmra.mrb[0].mxu1 %v678_v37 }
  0x27   :  { %618 = vmatprep.mubr.msk.bf16.mxu0 %vm256_vm0, %v681_v38  ;;  %620 = vmatprep.mubr.msk.bf16.mxu1 %vm256_vm0, %v681_v38 }
  0x2e   :  { %306 = vmatmul.mubr.bf16.gmra.mrb[4].mxu0 %v683_v39  ;;  %359 = vmatmul.mubr.bf16.gmra.mrb[4].mxu1 %v683_v39 }
  0xf9   :  { %v297_v40 = vpop.f32.mrb[0].mxu0  ;;  %v350_v41 = vpop.f32.mrb[0].mxu1 }
  0xfa   :  { %v299_v42 = vpop.f32.mrb[1].mxu0  ;;  %v352_v43 = vpop.f32.mrb[1].mxu1 }
  0xfb   :  { %v369_v44 = vadd.f32 %v299_v42, %v297_v40  ;;  %v301_v45 = vpop.f32.mrb[2].mxu0  ;;  %v354_v46 = vpop.f32.mrb[2].mxu1 }
  0xfc   :  { %v303_v47 = vpop.f32.mrb[3].mxu0  ;;  %v356_v48 = vpop.f32.mrb[3].mxu1 }
  0xfd   :  { %v374_v49 = vadd.f32 %v303_v47, %v301_v45  ;;  %v370_v50 = vadd.f32 %v369_v44, %v350_v41 }
  0xff   :  { %v371_v51 = vadd.f32 %v370_v50, %v352_v43  ;;  %v375_v52 = vadd.f32 %v374_v49, %v354_v46 }
 0x101   :  { %v360_v53 = vpop.f32.mrb[4].mxu1  ;;  %372 = vadd.xlane.f32.xlu0 %v371_v51  ;;  %v307_v54 = vpop.f32.mrb[4].mxu0  ;;  %v376_v55 = vadd.f32 %v375_v52, %v356_v48 }
 0x102   :  { %v309_v56 = vpop.f32.mrb[5].mxu0  ;;  %v362_v57 = vpop.f32.mrb[5].mxu1 }
 0x103   :  { %v379_v58 = vadd.f32 %v309_v56, %v307_v54  ;;  %v311_v59 = vpop.f32.mrb[6].mxu0  ;;  %v364_v60 = vpop.f32.mrb[6].mxu1 }
 0x104   :  { %v313_v61 = vpop.f32.mrb[7].mxu0  ;;  %v366_v62 = vpop.f32.mrb[7].mxu1 }
 0x105   :  { %v384_v63 = vadd.f32 %v313_v61, %v311_v59  ;;  %377 = vadd.xlane.f32.xlu0 %v376_v55  ;;  %v380_v0 = vadd.f32 %v379_v58, %v360_v53  ;;  %v502_v58 = vld [vmem:[%s996_s3 + $0x8] sm:$0xff] }
 0x107   :  { %v385_v1 = vadd.f32 %v384_v63, %v364_v60  ;;  %v381_v2 = vadd.f32 %v380_v0, %v362_v57 }
 0x109   :  { %v386_v3 = vadd.f32 %v385_v1, %v366_v62  ;;  %382 = vadd.xlane.f32.xlu1 %v381_v2 }
 0x10d   :  { %387 = vadd.xlane.f32.xlu1 %v386_v3 }
 0x18e   :  { %v373_v4 = vpop.xlane.xlu0 %372 }
 0x18f   :  { %v389_v5 = vmul.f32 0.001953125, %v373_v4 }
 0x191   :  { %v842_v6 = vsub.f32 %v297_v40, %v389_v5  ;;  %v844_v7 = vsub.f32 %v299_v42, %v389_v5  ;;  %v846_v8 = vsub.f32 %v350_v41, %v389_v5  ;;  %v848_v10 = vsub.f32 %v352_v43, %v389_v5 }
 0x192   :  { %v378_v9 = vpop.xlane.xlu0 %377 }
 0x193   :  { %v390_v11 = vmul.f32 0.001953125, %v378_v9  ;;  %v409_v12 = vmul.f32 %v842_v6, %v842_v6  ;;  %v410_v13 = vmul.f32 %v844_v7, %v844_v7  ;;  %v411_v14 = vmul.f32 %v846_v8, %v846_v8 }
 0x194   :  { %v412_v20 = vmul.f32 %v848_v10, %v848_v10 }
 0x195   :  { %v856_v15 = vsub.f32 %v301_v45, %v390_v11  ;;  %v858_v16 = vsub.f32 %v303_v47, %v390_v11  ;;  %v425_v17 = vadd.f32 %v410_v13, %v409_v12  ;;  %v860_v18 = vsub.f32 %v354_v46, %v390_v11 }
 0x196   :  { %v383_v19 = vpop.xlane.xlu1 %382  ;;  %v864_v21 = vsub.f32 %v356_v48, %v390_v11  ;;  %v449_v11 = vld [vmem:[%s997_s2] sm:$0xff] }
 0x197   :  { %v391_v22 = vmul.f32 0.001953125, %v383_v19  ;;  %v426_v23 = vadd.f32 %v425_v17, %v411_v14  ;;  %v413_v24 = vmul.f32 %v856_v15, %v856_v15  ;;  %v414_v25 = vmul.f32 %v858_v16, %v858_v16  ;;  %v450_v17 = vld [vmem:[%s997_s2 + $0x8] sm:$0xff] }
 0x198   :  { %v415_v26 = vmul.f32 %v860_v18, %v860_v18  ;;  %v416_v32 = vmul.f32 %v864_v21, %v864_v21 }
 0x199   :  { %v872_v27 = vsub.f32 %v307_v54, %v391_v22  ;;  %v874_v28 = vsub.f32 %v309_v56, %v391_v22  ;;  %v427_v29 = vadd.f32 %v426_v23, %v412_v20  ;;  %v430_v30 = vadd.f32 %v414_v25, %v413_v24  ;;  %v452_v25 = vld [vmem:[%s997_s2 + $0x18] sm:$0xff] }
 0x19a   :  { %v388_v31 = vpop.xlane.xlu1 %387  ;;  %v878_v33 = vsub.f32 %v360_v53, %v391_v22  ;;  %v880_v34 = vsub.f32 %v362_v57, %v391_v22  ;;  %v692_v56 = vmov 0   ;;  %v501_v57 = vld [vmem:[%s996_s3] sm:$0xff]  ;;  %v451_v22 = vld [vmem:[%s997_s2 + $0x10] sm:$0xff] }
 0x19b   :  { %v392_v35 = vmul.f32 0.001953125, %v388_v31  ;;  %428 = vadd.xlane.f32.xlu0 %v427_v29  ;;  %v431_v36 = vadd.f32 %v430_v30, %v415_v26  ;;  %v417_v37 = vmul.f32 %v872_v27, %v872_v27  ;;  %v418_v38 = vmul.f32 %v874_v28, %v874_v28  ;;  %623 = vset.pattern.permute.xlu1 %v692_v56  ;;  %v504_v30 = vld [vmem:[%s996_s3 + $0x18] sm:$0xff] }
 0x19c   :  { %v419_v39 = vmul.f32 %v878_v33, %v878_v33  ;;  %v420_v44 = vmul.f32 %v880_v34, %v880_v34  ;;  %622 = vset.pattern.permute.xlu0 %v692_v56 }
 0x19d   :  { %v888_v40 = vsub.f32 %v311_v59, %v392_v35  ;;  %v890_v41 = vsub.f32 %v313_v61, %v392_v35  ;;  %v432_v42 = vadd.f32 %v431_v36, %v416_v32  ;;  %v435_v43 = vadd.f32 %v418_v38, %v417_v37  ;;  %v503_v59 = vld [vmem:[%s996_s3 + $0x10] sm:$0xff] }
 0x19e   :  { %v894_v45 = vsub.f32 %v364_v60, %v392_v35  ;;  %v896_v47 = vsub.f32 %v366_v62, %v392_v35 }
 0x19f   :  { %433 = vadd.xlane.f32.xlu1 %v432_v42  ;;  %v436_v46 = vadd.f32 %v435_v43, %v419_v39  ;;  %v421_v48 = vmul.f32 %v888_v40, %v888_v40  ;;  %v422_v49 = vmul.f32 %v890_v41, %v890_v41 }
 0x1a0   :  { %v423_v51 = vmul.f32 %v894_v45, %v894_v45  ;;  %v424_v53 = vmul.f32 %v896_v47, %v896_v47 }
 0x1a1   :  { %v437_v50 = vadd.f32 %v436_v46, %v420_v44  ;;  %v440_v52 = vadd.f32 %v422_v49, %v421_v48 }
 0x1a3   :  { %438 = vadd.xlane.f32.xlu0 %v437_v50  ;;  %v441_v54 = vadd.f32 %v440_v52, %v423_v51 }
 0x1a5   :  { %v442_v55 = vadd.f32 %v441_v54, %v424_v53 }
 0x1a7   :  { %443 = vadd.xlane.f32.xlu1 %v442_v55 }
 0x1b8   :  { %507 = vperm.xlu1 %623, %v501_v57  }
 0x1bc   :  { %512 = vperm.xlu1 %623, %v502_v58  }
 0x1c0   :  { %517 = vperm.xlu1 %623, %v503_v59  }
 0x228   :  { %v429_v60 = vpop.xlane.xlu0 %428 }
 0x229   :  { %v445_v61 = vmul.f32 0.001953125, %v429_v60 }
 0x22b   :  { %v453_v62 = vadd.f32 1e-05, %v445_v61 }
 0x22c   :  { %v434_v63 = vpop.xlane.xlu1 %433 }
 0x22d   :  { %684 = vrsqrt.f32 %v453_v62  ;;  %v446_v0 = vmul.f32 0.001953125, %v434_v63 }
 0x22f   :  { %v454_v1 = vadd.f32 1e-05, %v446_v0 }
 0x230   :  { %v439_v2 = vpop.xlane.xlu0 %438 }
 0x231   :  { %686 = vrsqrt.f32 %v454_v1  ;;  %v447_v3 = vmul.f32 0.001953125, %v439_v2 }
 0x233   :  { %v455_v4 = vadd.f32 1e-05, %v447_v3 }
 0x234   :  { %v444_v5 = vpop.xlane.xlu1 %443 }
 0x235   :  { %688 = vrsqrt.f32 %v455_v4  ;;  %v448_v9 = vmul.f32 0.001953125, %v444_v5 }
 0x237   :  { %v685_v12 = vpop.eup %684  ;;  %v456_v13 = vadd.f32 1e-05, %v448_v9 }
 0x238   :  { %v461_v14 = vmul.f32 %v685_v12, %v449_v11  ;;  %v508_v31 = vpop.permute.xlu1 %507 }
 0x239   :  { %690 = vrsqrt.f32 %v456_v13 }
 0x23a   :  { %467 = vperm.xlu0 %622, %v461_v14  }
 0x23b   :  { %v687_v19 = vpop.eup %686 }
 0x23c   :  { %v462_v20 = vmul.f32 %v687_v19, %v450_v17  ;;  %v513_v32 = vpop.permute.xlu1 %512 }
 0x23e   :  { %472 = vperm.xlu1 %623, %v462_v20  }
 0x23f   :  { %v689_v23 = vpop.eup %688 }
 0x240   :  { %v463_v24 = vmul.f32 %v689_v23, %v451_v22  ;;  %v518_v35 = vpop.permute.xlu1 %517 }
 0x242   :  { %477 = vperm.xlu1 %623, %v463_v24  }
 0x243   :  { %v691_v26 = vpop.eup %690 }
 0x244   :  { %v464_v29 = vmul.f32 %v691_v26, %v452_v25 }
 0x246   :  { %482 = vperm.xlu1 %623, %v464_v29  }
 0x24a   :  { %522 = vperm.xlu1 %623, %v504_v30  }
 0x2b9   :  { %v468_v36 = vpop.permute.xlu0 %467 }
 0x2ba   :  { %v485_v37 = vmul.f32 %v468_v36, %v842_v6  ;;  %v486_v38 = vmul.f32 %v468_v36, %v844_v7  ;;  %v487_v39 = vmul.f32 %v468_v36, %v846_v8  ;;  %v488_v42 = vmul.f32 %v468_v36, %v848_v10 }
 0x2bc   :  { %v525_v43 = vadd.f32 %v508_v31, %v485_v37  ;;  %v526_v44 = vadd.f32 %v508_v31, %v486_v38  ;;  %v527_v46 = vadd.f32 %v508_v31, %v487_v39  ;;  %v528_v48 = vadd.f32 %v508_v31, %v488_v42 }
 0x2bd   :  { %v473_v49 = vpop.permute.xlu1 %472 }
 0x2be   :  { %v541_v50 = vmax.f32 %v525_v43, 0.0  ;;  %v542_v51 = vmax.f32 %v526_v44, 0.0  ;;  %v543_v52 = vmax.f32 %v527_v46, 0.0  ;;  %v544_v53 = vmax.f32 %v528_v48, 0.0 }
 0x2bf   :  { %v489_v54 = vmul.f32 %v473_v49, %v856_v15  ;;  %v490_v55 = vmul.f32 %v473_v49, %v858_v16  ;;  %v491_v6 = vmul.f32 %v473_v49, %v860_v18  ;;  %v492_v7 = vmul.f32 %v473_v49, %v864_v21 }
 0x2c0   :  { %557 = vst [vmem:[%s998_s4] sm:$0xff] %v541_v50  ;;  %558 = vst [vmem:[%s998_s4 + $0x8] sm:$0xff] %v542_v51 }
 0x2c1   :  { %559 = vst [vmem:[%s998_s4 + $0x10] sm:$0xff] %v543_v52  ;;  %560 = vst [vmem:[%s998_s4 + $0x18] sm:$0xff] %v544_v53  ;;  %v529_v8 = vadd.f32 %v513_v32, %v489_v54  ;;  %v530_v10 = vadd.f32 %v513_v32, %v490_v55  ;;  %v531_v15 = vadd.f32 %v513_v32, %v491_v6  ;;  %v478_v18 = vpop.permute.xlu1 %477 }
 0x2c2   :  { %v532_v16 = vadd.f32 %v513_v32, %v492_v7  ;;  %v493_v21 = vmul.f32 %v478_v18, %v872_v27  ;;  %v494_v56 = vmul.f32 %v478_v18, %v874_v28  ;;  %v495_v57 = vmul.f32 %v478_v18, %v878_v33 }
 0x2c3   :  { %v496_v58 = vmul.f32 %v478_v18, %v880_v34  ;;  %v545_v59 = vmax.f32 %v529_v8, 0.0  ;;  %v546_v60 = vmax.f32 %v530_v10, 0.0  ;;  %v547_v61 = vmax.f32 %v531_v15, 0.0 }
 0x2c4   :  { %v548_v62 = vmax.f32 %v532_v16, 0.0  ;;  %v533_v63 = vadd.f32 %v518_v35, %v493_v21  ;;  %v534_v0 = vadd.f32 %v518_v35, %v494_v56  ;;  %v535_v1 = vadd.f32 %v518_v35, %v495_v57 }
 0x2c5   :  { %v536_v2 = vadd.f32 %v518_v35, %v496_v58  ;;  %561 = vst [vmem:[%s998_s4 + $0x20] sm:$0xff] %v545_v59  ;;  %562 = vst [vmem:[%s998_s4 + $0x28] sm:$0xff] %v546_v60  ;;  %v483_v27 = vpop.permute.xlu1 %482 }
 0x2c6   :  { %563 = vst [vmem:[%s998_s4 + $0x30] sm:$0xff] %v547_v61  ;;  %564 = vst [vmem:[%s998_s4 + $0x38] sm:$0xff] %v548_v62  ;;  %v549_v28 = vmax.f32 %v533_v63, 0.0  ;;  %v550_v33 = vmax.f32 %v534_v0, 0.0  ;;  %v551_v34 = vmax.f32 %v535_v1, 0.0  ;;  %v497_v4 = vmul.f32 %v483_v27, %v888_v40 }
 0x2c7   :  { %v552_v3 = vmax.f32 %v536_v2, 0.0  ;;  %v498_v5 = vmul.f32 %v483_v27, %v890_v41  ;;  %v499_v9 = vmul.f32 %v483_v27, %v894_v45  ;;  %v500_v11 = vmul.f32 %v483_v27, %v896_v47 }
 0x2c8   :  { %565 = vst [vmem:[%s998_s4 + $0x40] sm:$0xff] %v549_v28  ;;  %566 = vst [vmem:[%s998_s4 + $0x48] sm:$0xff] %v550_v33 }
 0x2c9   :  { %567 = vst [vmem:[%s998_s4 + $0x50] sm:$0xff] %v551_v34  ;;  %568 = vst [vmem:[%s998_s4 + $0x58] sm:$0xff] %v552_v3  ;;  %v523_v12 = vpop.permute.xlu1 %522 }
 0x2ca   :  { %v537_v13 = vadd.f32 %v523_v12, %v497_v4  ;;  %v538_v14 = vadd.f32 %v523_v12, %v498_v5  ;;  %v539_v17 = vadd.f32 %v523_v12, %v499_v9  ;;  %v540_v19 = vadd.f32 %v523_v12, %v500_v11 }
 0x2cc   :  { %v553_v20 = vmax.f32 %v537_v13, 0.0  ;;  %v554_v22 = vmax.f32 %v538_v14, 0.0  ;;  %v555_v23 = vmax.f32 %v539_v17, 0.0  ;;  %v556_v24 = vmax.f32 %v540_v19, 0.0 }
 0x2ce   :  { %569 = vst [vmem:[%s998_s4 + $0x60] sm:$0xff] %v553_v20  ;;  %570 = vst [vmem:[%s998_s4 + $0x68] sm:$0xff] %v554_v22 }
 0x2cf   :  { %571 = vst [vmem:[%s998_s4 + $0x70] sm:$0xff] %v555_v23  ;;  %572 = vst [vmem:[%s998_s4 + $0x78] sm:$0xff] %v556_v24 }

// kernel: resnet20_forward.29
= control target key start
LH: loop header
LB: loop body
LE: loop exit
PB: predicated region body
PF: predicated region fallthrough
CT: control target
= control target key end

     0   :  { %v390_v1 = vmov 0   ;;  %vm56_vm0 = vcmask 130048   ;;  %s586_s0 = inlined_call_operand.vmem [shape: bf16[16,512], index: 0, kind: input, shape index: {}]   ;;  %s587_s1 = inlined_call_operand.vmem [shape: bf16[32,16], index: 1, kind: input, shape index: {}]   ;;  %s588_s3 = inlined_call_operand.vmem [shape: f32[32,1], index: 3, kind: input, shape index: {}]   ;;  %s589_s2 = inlined_call_operand.vmem [shape: f32[32,1], index: 2, kind: input, shape index: {}]   ;;  %s590_s4 = inlined_call_operand.vmem [shape: f32[32,512], index: 4, kind: output, shape index: {}]  }
   0x1   :  { %v374_v0 = vld [vmem:[%s586_s0 + $0x4] ss:$16 sps:$4 sm:$0xff]   ;;  %95 = vmatprep.mubr.bf16.mxu0 %v390_v1  ;;  %148 = vmatprep.mubr.bf16.mxu1 %v390_v1  ;;  %v376_v2 = vld [vmem:[%s586_s0 + $0xc] ss:$16 sps:$4 sm:$0xff]   ;;  %v378_v3 = vld [vmem:[%s586_s0] ss:$16 sps:$4 sm:$0xff]  }
   0x2   :  { %373 = vset.pattern.permute.xlu1 %v390_v1  ;;  %372 = vset.pattern.permute.xlu0 %v390_v1  ;;  %v379_v4 = vld [vmem:[%s586_s0 + $0x8] ss:$16 sps:$4 sm:$0xff]   ;;  %v380_v5 = vld [vmem:[%s587_s1] sm:$0xff]  }
   0x3   :  { %63 = vmatprep.subr.bf16.mxu0 %v374_v0  ;;  %116 = vmatprep.subr.bf16.mxu1 %v376_v2  ;;  %v381_v6 = vld [vmem:[%s587_s1 + $0x8] sm:$0xff]  }
   0x4   :  { %64 = vmatpush1.bf16.msra.mxu0 %v378_v3  ;;  %117 = vmatpush1.bf16.msra.mxu1 %v379_v4 }
   0x7   :  { %367 = vmatmul.mubr.msk.bf16.vlgmr.msra.gmra.mrb[0].mxu0 %vm56_vm0, %v380_v5  ;;  %369 = vmatmul.mubr.msk.bf16.vlgmr.msra.gmra.mrb[0].mxu1 %vm56_vm0, %v380_v5 }
   0x8   :  { %105 = vmatprep.mubr.bf16.mxu0 %v390_v1  ;;  %158 = vmatprep.mubr.bf16.mxu1 %v390_v1 }
   0xf   :  { %368 = vmatmul.mubr.msk.bf16.gmra.mrb[4].mxu0 %vm56_vm0, %v381_v6  ;;  %370 = vmatmul.mubr.msk.bf16.gmra.mrb[4].mxu1 %vm56_vm0, %v381_v6 }
  0xda   :  { %v97_v7 = vpop.f32.mrb[0].mxu0  ;;  %v150_v8 = vpop.f32.mrb[0].mxu1 }
  0xdb   :  { %v99_v9 = vpop.f32.mrb[1].mxu0  ;;  %v152_v10 = vpop.f32.mrb[1].mxu1 }
  0xdc   :  { %v169_v11 = vadd.f32 %v99_v9, %v97_v7  ;;  %v101_v12 = vpop.f32.mrb[2].mxu0  ;;  %v154_v13 = vpop.f32.mrb[2].mxu1 }
  0xdd   :  { %v103_v14 = vpop.f32.mrb[3].mxu0  ;;  %v156_v15 = vpop.f32.mrb[3].mxu1 }
  0xde   :  { %v174_v16 = vadd.f32 %v103_v14, %v101_v12  ;;  %v170_v17 = vadd.f32 %v169_v11, %v150_v8 }
  0xe0   :  { %v171_v18 = vadd.f32 %v170_v17, %v152_v10  ;;  %v175_v19 = vadd.f32 %v174_v16, %v154_v13 }
  0xe2   :  { %v160_v20 = vpop.f32.mrb[4].mxu1  ;;  %172 = vadd.xlane.f32.xlu0 %v171_v18  ;;  %v107_v21 = vpop.f32.mrb[4].mxu0  ;;  %v176_v22 = vadd.f32 %v175_v19, %v156_v15 }
  0xe3   :  { %v109_v23 = vpop.f32.mrb[5].mxu0  ;;  %v162_v24 = vpop.f32.mrb[5].mxu1 }
  0xe4   :  { %v179_v25 = vadd.f32 %v109_v23, %v107_v21  ;;  %v111_v26 = vpop.f32.mrb[6].mxu0  ;;  %v164_v27 = vpop.f32.mrb[6].mxu1 }
  0xe5   :  { %v113_v28 = vpop.f32.mrb[7].mxu0  ;;  %v166_v29 = vpop.f32.mrb[7].mxu1 }
  0xe6   :  { %v184_v30 = vadd.f32 %v113_v28, %v111_v26  ;;  %177 = vadd.xlane.f32.xlu0 %v176_v22  ;;  %v180_v31 = vadd.f32 %v179_v25, %v160_v20  ;;  %v303_v25 = vld [vmem:[%s588_s3 + $0x10] sm:$0xff] }
  0xe8   :  { %v185_v32 = vadd.f32 %v184_v30, %v164_v27  ;;  %v181_v33 = vadd.f32 %v180_v31, %v162_v24 }
  0xea   :  { %v186_v34 = vadd.f32 %v185_v32, %v166_v29  ;;  %182 = vadd.xlane.f32.xlu1 %v181_v33 }
  0xee   :  { %187 = vadd.xlane.f32.xlu1 %v186_v34 }
 0x16f   :  { %v173_v35 = vpop.xlane.xlu0 %172 }
 0x170   :  { %v189_v36 = vmul.f32 0.001953125, %v173_v35 }
 0x172   :  { %v434_v37 = vsub.f32 %v97_v7, %v189_v36  ;;  %v436_v38 = vsub.f32 %v99_v9, %v189_v36  ;;  %v438_v39 = vsub.f32 %v150_v8, %v189_v36  ;;  %v440_v41 = vsub.f32 %v152_v10, %v189_v36 }
 0x173   :  { %v178_v40 = vpop.xlane.xlu0 %177 }
 0x174   :  { %v190_v42 = vmul.f32 0.001953125, %v178_v40  ;;  %v209_v43 = vmul.f32 %v434_v37, %v434_v37  ;;  %v210_v44 = vmul.f32 %v436_v38, %v436_v38  ;;  %v211_v45 = vmul.f32 %v438_v39, %v438_v39  ;;  %v249_v40 = vld [vmem:[%s589_s2] sm:$0xff] }
 0x175   :  { %v212_v51 = vmul.f32 %v440_v41, %v440_v41 }
 0x176   :  { %v448_v46 = vsub.f32 %v101_v12, %v190_v42  ;;  %v450_v47 = vsub.f32 %v103_v14, %v190_v42  ;;  %v225_v48 = vadd.f32 %v210_v44, %v209_v43  ;;  %v452_v49 = vsub.f32 %v154_v13, %v190_v42 }
 0x177   :  { %v183_v50 = vpop.xlane.xlu1 %182  ;;  %v456_v52 = vsub.f32 %v156_v15, %v190_v42 }
 0x178   :  { %v191_v53 = vmul.f32 0.001953125, %v183_v50  ;;  %v226_v54 = vadd.f32 %v225_v48, %v211_v45  ;;  %v213_v55 = vmul.f32 %v448_v46, %v448_v46  ;;  %v214_v56 = vmul.f32 %v450_v47, %v450_v47  ;;  %v250_v45 = vld [vmem:[%s589_s2 + $0x8] sm:$0xff] }
 0x179   :  { %v215_v57 = vmul.f32 %v452_v49, %v452_v49  ;;  %v216_v63 = vmul.f32 %v456_v52, %v456_v52 }
 0x17a   :  { %v464_v58 = vsub.f32 %v107_v21, %v191_v53  ;;  %v466_v59 = vsub.f32 %v109_v23, %v191_v53  ;;  %v227_v60 = vadd.f32 %v226_v54, %v212_v51  ;;  %v230_v61 = vadd.f32 %v214_v56, %v213_v55  ;;  %v301_v23 = vld [vmem:[%s588_s3] sm:$0xff]  ;;  %v251_v51 = vld [vmem:[%s589_s2 + $0x10] sm:$0xff]  ;;  %v252_v55 = vld [vmem:[%s589_s2 + $0x18] sm:$0xff] }
 0x17b   :  { %v188_v62 = vpop.xlane.xlu1 %187  ;;  %v470_v0 = vsub.f32 %v160_v20, %v191_v53  ;;  %v472_v1 = vsub.f32 %v162_v24, %v191_v53  ;;  %v302_v24 = vld [vmem:[%s588_s3 + $0x8] sm:$0xff] }
 0x17c   :  { %v192_v2 = vmul.f32 0.001953125, %v188_v62  ;;  %228 = vadd.xlane.f32.xlu0 %v227_v60  ;;  %v231_v3 = vadd.f32 %v230_v61, %v215_v57  ;;  %v217_v4 = vmul.f32 %v464_v58, %v464_v58  ;;  %v218_v5 = vmul.f32 %v466_v59, %v466_v59  ;;  %v304_v60 = vld [vmem:[%s588_s3 + $0x18] sm:$0xff] }
 0x17d   :  { %v219_v6 = vmul.f32 %v470_v0, %v470_v0  ;;  %v220_v11 = vmul.f32 %v472_v1, %v472_v1 }
 0x17e   :  { %v480_v7 = vsub.f32 %v111_v26, %v192_v2  ;;  %v482_v8 = vsub.f32 %v113_v28, %v192_v2  ;;  %v232_v9 = vadd.f32 %v231_v3, %v216_v63  ;;  %v235_v10 = vadd.f32 %v218_v5, %v217_v4 }
 0x17f   :  { %v486_v12 = vsub.f32 %v164_v27, %v192_v2  ;;  %v488_v14 = vsub.f32 %v166_v29, %v192_v2 }
 0x180   :  { %233 = vadd.xlane.f32.xlu1 %v232_v9  ;;  %v236_v13 = vadd.f32 %v235_v10, %v219_v6  ;;  %v221_v15 = vmul.f32 %v480_v7, %v480_v7  ;;  %v222_v16 = vmul.f32 %v482_v8, %v482_v8 }
 0x181   :  { %v223_v18 = vmul.f32 %v486_v12, %v486_v12  ;;  %v224_v20 = vmul.f32 %v488_v14, %v488_v14 }
 0x182   :  { %v237_v17 = vadd.f32 %v236_v13, %v220_v11  ;;  %v240_v19 = vadd.f32 %v222_v16, %v221_v15 }
 0x184   :  { %238 = vadd.xlane.f32.xlu0 %v237_v17  ;;  %v241_v21 = vadd.f32 %v240_v19, %v223_v18 }
 0x186   :  { %v242_v22 = vadd.f32 %v241_v21, %v224_v20 }
 0x188   :  { %243 = vadd.xlane.f32.xlu1 %v242_v22 }
 0x199   :  { %307 = vperm.xlu1 %373, %v301_v23  }
 0x19d   :  { %312 = vperm.xlu1 %373, %v302_v24  }
 0x1a1   :  { %317 = vperm.xlu1 %373, %v303_v25  }
 0x209   :  { %v229_v26 = vpop.xlane.xlu0 %228 }
 0x20a   :  { %v245_v27 = vmul.f32 0.001953125, %v229_v26 }
 0x20c   :  { %v253_v28 = vadd.f32 1e-05, %v245_v27 }
 0x20d   :  { %v234_v29 = vpop.xlane.xlu1 %233 }
 0x20e   :  { %382 = vrsqrt.f32 %v253_v28  ;;  %v246_v30 = vmul.f32 0.001953125, %v234_v29 }
 0x210   :  { %v254_v31 = vadd.f32 1e-05, %v246_v30 }
 0x211   :  { %v239_v32 = vpop.xlane.xlu0 %238 }
 0x212   :  { %384 = vrsqrt.f32 %v254_v31  ;;  %v247_v33 = vmul.f32 0.001953125, %v239_v32 }
 0x214   :  { %v255_v34 = vadd.f32 1e-05, %v247_v33 }
 0x215   :  { %v244_v35 = vpop.xlane.xlu1 %243 }
 0x216   :  { %386 = vrsqrt.f32 %v255_v34  ;;  %v248_v36 = vmul.f32 0.001953125, %v244_v35 }
 0x218   :  { %v383_v42 = vpop.eup %382  ;;  %v256_v43 = vadd.f32 1e-05, %v248_v36 }
 0x219   :  { %v261_v44 = vmul.f32 %v383_v42, %v249_v40  ;;  %v308_v61 = vpop.permute.xlu1 %307 }
 0x21a   :  { %388 = vrsqrt.f32 %v256_v43 }
 0x21b   :  { %267 = vperm.xlu0 %372, %v261_v44  }
 0x21c   :  { %v385_v48 = vpop.eup %384 }
 0x21d   :  { %v262_v50 = vmul.f32 %v385_v48, %v250_v45  ;;  %v313_v62 = vpop.permute.xlu1 %312 }
 0x21f   :  { %272 = vperm.xlu1 %373, %v262_v50  }
 0x220   :  { %v387_v53 = vpop.eup %386 }
 0x221   :  { %v263_v54 = vmul.f32 %v387_v53, %v251_v51  ;;  %v318_v63 = vpop.permute.xlu1 %317 }
 0x223   :  { %277 = vperm.xlu1 %373, %v263_v54  }
 0x224   :  { %v389_v56 = vpop.eup %388 }
 0x225   :  { %v264_v57 = vmul.f32 %v389_v56, %v252_v55 }
 0x227   :  { %282 = vperm.xlu1 %373, %v264_v57  }
 0x22b   :  { %322 = vperm.xlu1 %373, %v304_v60  }
 0x29a   :  { %v268_v2 = vpop.permute.xlu0 %267 }
 0x29b   :  { %v285_v3 = vmul.f32 %v268_v2, %v434_v37  ;;  %v286_v4 = vmul.f32 %v268_v2, %v436_v38  ;;  %v287_v5 = vmul.f32 %v268_v2, %v438_v39  ;;  %v288_v6 = vmul.f32 %v268_v2, %v440_v41 }
 0x29d   :  { %v325_v9 = vadd.f32 %v308_v61, %v285_v3  ;;  %v326_v10 = vadd.f32 %v308_v61, %v286_v4  ;;  %v327_v11 = vadd.f32 %v308_v61, %v287_v5  ;;  %v328_v13 = vadd.f32 %v308_v61, %v288_v6 }
 0x29e   :  { %v273_v15 = vpop.permute.xlu1 %272 }
 0x29f   :  { %341 = vst [vmem:[%s590_s4] sm:$0xff] %v325_v9  ;;  %342 = vst [vmem:[%s590_s4 + $0x8] sm:$0xff] %v326_v10  ;;  %v289_v37 = vmul.f32 %v273_v15, %v448_v46  ;;  %v290_v38 = vmul.f32 %v273_v15, %v450_v47  ;;  %v291_v39 = vmul.f32 %v273_v15, %v452_v49 }
 0x2a0   :  { %343 = vst [vmem:[%s590_s4 + $0x10] sm:$0xff] %v327_v11  ;;  %344 = vst [vmem:[%s590_s4 + $0x18] sm:$0xff] %v328_v13  ;;  %v292_v41 = vmul.f32 %v273_v15, %v456_v52 }
 0x2a1   :  { %v329_v16 = vadd.f32 %v313_v62, %v289_v37  ;;  %v330_v17 = vadd.f32 %v313_v62, %v290_v38  ;;  %v331_v18 = vadd.f32 %v313_v62, %v291_v39 }
 0x2a2   :  { %v332_v19 = vadd.f32 %v313_v62, %v292_v41  ;;  %v278_v20 = vpop.permute.xlu1 %277 }
 0x2a3   :  { %345 = vst [vmem:[%s590_s4 + $0x20] sm:$0xff] %v329_v16  ;;  %346 = vst [vmem:[%s590_s4 + $0x28] sm:$0xff] %v330_v17  ;;  %v293_v46 = vmul.f32 %v278_v20, %v464_v58  ;;  %v294_v47 = vmul.f32 %v278_v20, %v466_v59  ;;  %v295_v49 = vmul.f32 %v278_v20, %v470_v0 }
 0x2a4   :  { %347 = vst [vmem:[%s590_s4 + $0x30] sm:$0xff] %v331_v18  ;;  %348 = vst [vmem:[%s590_s4 + $0x38] sm:$0xff] %v332_v19  ;;  %v296_v52 = vmul.f32 %v278_v20, %v472_v1 }
 0x2a5   :  { %v333_v21 = vadd.f32 %v318_v63, %v293_v46  ;;  %v334_v22 = vadd.f32 %v318_v63, %v294_v47  ;;  %v335_v23 = vadd.f32 %v318_v63, %v295_v49 }
 0x2a6   :  { %v336_v24 = vadd.f32 %v318_v63, %v296_v52  ;;  %v283_v25 = vpop.permute.xlu1 %282 }
 0x2a7   :  { %349 = vst [vmem:[%s590_s4 + $0x40] sm:$0xff] %v333_v21  ;;  %350 = vst [vmem:[%s590_s4 + $0x48] sm:$0xff] %v334_v22  ;;  %v297_v58 = vmul.f32 %v283_v25, %v480_v7  ;;  %v298_v59 = vmul.f32 %v283_v25, %v482_v8  ;;  %v299_v0 = vmul.f32 %v283_v25, %v486_v12 }
 0x2a8   :  { %351 = vst [vmem:[%s590_s4 + $0x50] sm:$0xff] %v335_v23  ;;  %352 = vst [vmem:[%s590_s4 + $0x58] sm:$0xff] %v336_v24  ;;  %v300_v1 = vmul.f32 %v283_v25, %v488_v14 }
 0x2aa   :  { %v323_v26 = vpop.permute.xlu1 %322 }
 0x2ab   :  { %v337_v27 = vadd.f32 %v323_v26, %v297_v58  ;;  %v338_v28 = vadd.f32 %v323_v26, %v298_v59  ;;  %v339_v29 = vadd.f32 %v323_v26, %v299_v0  ;;  %v340_v30 = vadd.f32 %v323_v26, %v300_v1 }
 0x2ad   :  { %353 = vst [vmem:[%s590_s4 + $0x60] sm:$0xff] %v337_v27  ;;  %354 = vst [vmem:[%s590_s4 + $0x68] sm:$0xff] %v338_v28 }
 0x2ae   :  { %355 = vst [vmem:[%s590_s4 + $0x70] sm:$0xff] %v339_v29  ;;  %356 = vst [vmem:[%s590_s4 + $0x78] sm:$0xff] %v340_v30 }

// kernel: resnet20_forward.31
= control target key start
LH: loop header
LB: loop body
LE: loop exit
PB: predicated region body
PF: predicated region fallthrough
CT: control target
= control target key end

     0   :  { %v1175_v1 = vmov 0   ;;  %vm491_vm0 = vcmask 261120   ;;  %s1646_s0 = inlined_call_operand.vmem [shape: bf16[288,512], index: 0, kind: input, shape index: {}]   ;;  %s1647_s1 = inlined_call_operand.vmem [shape: bf16[32,288], index: 1, kind: input, shape index: {}]   ;;  %s1648_s3 = inlined_call_operand.vmem [shape: f32[32,1], index: 3, kind: input, shape index: {}]   ;;  %s1649_s2 = inlined_call_operand.vmem [shape: f32[32,1], index: 2, kind: input, shape index: {}]   ;;  %s1650_s4 = inlined_call_operand.vmem [shape: f32[32,512], index: 4, kind: input, shape index: {}]   ;;  %s1651_s5 = inlined_call_operand.vmem [shape: f32[32,512], index: 5, kind: output, shape index: {}]  }
   0x1   :  { %v1051_v0 = vld [vmem:[%s1646_s0 + $0x4] ss:$16 sps:$4 sm:$0xff]   ;;  %1050 = vset.pattern.permute.xlu1 %v1175_v1  ;;  %1049 = vset.pattern.permute.xlu0 %v1175_v1  ;;  %v1053_v2 = vld [vmem:[%s1646_s0 + $0xc] ss:$16 sps:$4 sm:$0xff]   ;;  %v1055_v3 = vld [vmem:[%s1646_s0] ss:$16 sps:$4 sm:$0xff]  }
   0x2   :  { %498 = vmatprep.subr.bf16.mxu0 %v1051_v0  ;;  %v1056_v4 = vld [vmem:[%s1646_s0 + $0x8] ss:$16 sps:$4 sm:$0xff]   ;;  %604 = vmatprep.subr.bf16.mxu1 %v1053_v2  ;;  %v1057_v5 = vld [vmem:[%s1646_s0 + $0x24] ss:$16 sps:$4 sm:$0xff]   ;;  %v1059_v6 = vld [vmem:[%s1646_s0 + $0x2c] ss:$16 sps:$4 sm:$0xff]  }
   0x3   :  { %499 = vmatpush1.bf16.msra.mxu0 %v1055_v3  ;;  %605 = vmatpush1.bf16.msra.mxu1 %v1056_v4  ;;  %v1061_v7 = vld [vmem:[%s1646_s0 + $0x20] ss:$16 sps:$4 sm:$0xff]   ;;  %v1062_v8 = vld [vmem:[%s1646_s0 + $0x28] ss:$16 sps:$4 sm:$0xff]   ;;  %v1063_v9 = vld [vmem:[%s1646_s0 + $0x44] ss:$16 sps:$4 sm:$0xff]  }
   0x4   :  { %500 = vmatprep.subr.bf16.mxu0 %v1057_v5  ;;  %606 = vmatprep.subr.bf16.mxu1 %v1059_v6  ;;  %v1065_v10 = vld [vmem:[%s1646_s0 + $0x4c] ss:$16 sps:$4 sm:$0xff]   ;;  %v1067_v11 = vld [vmem:[%s1646_s0 + $0x40] ss:$16 sps:$4 sm:$0xff]   ;;  %v1068_v12 = vld [vmem:[%s1646_s0 + $0x48] ss:$16 sps:$4 sm:$0xff]  }
   0x5   :  { %v1069_v13 = vld [vmem:[%s1646_s0 + $0x64] ss:$16 sps:$4 sm:$0xff]   ;;  %v1071_v14 = vld [vmem:[%s1646_s0 + $0x6c] ss:$16 sps:$4 sm:$0xff]   ;;  %v1073_v15 = vld [vmem:[%s1646_s0 + $0x60] ss:$16 sps:$4 sm:$0xff]  }
   0x6   :  { %v1074_v16 = vld [vmem:[%s1646_s0 + $0x68] ss:$16 sps:$4 sm:$0xff]   ;;  %v1075_v17 = vld [vmem:[%s1646_s0 + $0x84] ss:$16 sps:$4 sm:$0xff]   ;;  %v1077_v18 = vld [vmem:[%s1646_s0 + $0x8c] ss:$16 sps:$4 sm:$0xff]  }
   0x7   :  { %501 = vmatpush1.bf16.msra.mxu0 %v1061_v7  ;;  %607 = vmatpush1.bf16.msra.mxu1 %v1062_v8  ;;  %v1079_v19 = vld [vmem:[%s1646_s0 + $0x80] ss:$16 sps:$4 sm:$0xff]   ;;  %v1080_v20 = vld [vmem:[%s1646_s0 + $0x88] ss:$16 sps:$4 sm:$0xff]   ;;  %v1081_v21 = vld [vmem:[%s1646_s0 + $0xa4] ss:$16 sps:$4 sm:$0xff]  }
   0x8   :  { %502 = vmatprep.subr.bf16.mxu0 %v1063_v9  ;;  %608 = vmatprep.subr.bf16.mxu1 %v1065_v10  ;;  %v1083_v22 = vld [vmem:[%s1646_s0 + $0xac] ss:$16 sps:$4 sm:$0xff]   ;;  %v1085_v23 = vld [vmem:[%s1646_s0 + $0xa0] ss:$16 sps:$4 sm:$0xff]   ;;  %v1086_v24 = vld [vmem:[%s1646_s0 + $0xa8] ss:$16 sps:$4 sm:$0xff]  }
   0x9   :  { %v1087_v25 = vld [vmem:[%s1646_s0 + $0xc4] ss:$16 sps:$4 sm:$0xff]   ;;  %v1089_v26 = vld [vmem:[%s1646_s0 + $0xcc] ss:$16 sps:$4 sm:$0xff]   ;;  %v1091_v27 = vld [vmem:[%s1646_s0 + $0xc0] ss:$16 sps:$4 sm:$0xff]  }
   0xa   :  { %v1092_v28 = vld [vmem:[%s1646_s0 + $0xc8] ss:$16 sps:$4 sm:$0xff]   ;;  %v1093_v29 = vld [vmem:[%s1646_s0 + $0xe4] ss:$16 sps:$4 sm:$0xff]   ;;  %v1095_v30 = vld [vmem:[%s1646_s0 + $0xec] ss:$16 sps:$4 sm:$0xff]  }
   0xb   :  { %503 = vmatpush1.bf16.msra.mxu0 %v1067_v11  ;;  %609 = vmatpush1.bf16.msra.mxu1 %v1068_v12  ;;  %v1097_v31 = vld [vmem:[%s1646_s0 + $0xe0] ss:$16 sps:$4 sm:$0xff]   ;;  %v1098_v32 = vld [vmem:[%s1646_s0 + $0xe8] ss:$16 sps:$4 sm:$0xff]   ;;  %v1099_v33 = vld [vmem:[%s1646_s0 + $0x104] ss:$16 sps:$4 sm:$0xff]  }
   0xc   :  { %504 = vmatprep.subr.bf16.mxu0 %v1069_v13  ;;  %610 = vmatprep.subr.bf16.mxu1 %v1071_v14  ;;  %v1101_v34 = vld [vmem:[%s1646_s0 + $0x10c] ss:$16 sps:$4 sm:$0xff]   ;;  %v1103_v35 = vld [vmem:[%s1646_s0 + $0x100] ss:$16 sps:$4 sm:$0xff]   ;;  %v1104_v36 = vld [vmem:[%s1646_s0 + $0x108] ss:$16 sps:$4 sm:$0xff]  }
   0xd   :  { %v1105_v37 = vld [vmem:[%s1646_s0 + $0x124] ss:$16 sps:$4 sm:$0xff]   ;;  %v1107_v38 = vld [vmem:[%s1646_s0 + $0x12c] ss:$16 sps:$4 sm:$0xff]   ;;  %v1109_v39 = vld [vmem:[%s1646_s0 + $0x120] ss:$16 sps:$4 sm:$0xff]  }
   0xe   :  { %v1110_v40 = vld [vmem:[%s1646_s0 + $0x128] ss:$16 sps:$4 sm:$0xff]   ;;  %v1111_v41 = vld [vmem:[%s1646_s0 + $0x144] ss:$16 sps:$4 sm:$0xff]   ;;  %v1113_v42 = vld [vmem:[%s1646_s0 + $0x14c] ss:$16 sps:$4 sm:$0xff]  }
   0xf   :  { %505 = vmatpush1.bf16.msra.mxu0 %v1073_v15  ;;  %611 = vmatpush1.bf16.msra.mxu1 %v1074_v16  ;;  %v1115_v43 = vld [vmem:[%s1646_s0 + $0x140] ss:$16 sps:$4 sm:$0xff]   ;;  %v1116_v44 = vld [vmem:[%s1646_s0 + $0x148] ss:$16 sps:$4 sm:$0xff]   ;;  %v1117_v45 = vld [vmem:[%s1646_s0 + $0x164] ss:$16 sps:$4 sm:$0xff]  }
  0x10   :  { %506 = vmatprep.subr.bf16.mxu0 %v1075_v17  ;;  %612 = vmatprep.subr.bf16.mxu1 %v1077_v18  ;;  %v1119_v46 = vld [vmem:[%s1646_s0 + $0x16c] ss:$16 sps:$4 sm:$0xff]   ;;  %v1121_v47 = vld [vmem:[%s1646_s0 + $0x160] ss:$16 sps:$4 sm:$0xff]   ;;  %v1122_v48 = vld [vmem:[%s1646_s0 + $0x168] ss:$16 sps:$4 sm:$0xff]  }
  0x11   :  { %v1149_v49 = vld [vmem:[%s1647_s1 + $0x4] ss:$12 sps:$4 sm:$0xff]   ;;  %v1125_v51 = vld [vmem:[%s1646_s0 + $0x18c] ss:$16 sps:$4 sm:$0xff]   ;;  %v1128_v53 = vld [vmem:[%s1646_s0 + $0x188] ss:$16 sps:$4 sm:$0xff]  }
  0x12   :  { %v1123_v50 = vld [vmem:[%s1646_s0 + $0x184] ss:$16 sps:$4 sm:$0xff]   ;;  %530 = vmatprep.mubr.bf16.mxu0 %v1149_v49  ;;  %636 = vmatprep.mubr.bf16.mxu1 %v1149_v49  ;;  %v1127_v52 = vld [vmem:[%s1646_s0 + $0x180] ss:$16 sps:$4 sm:$0xff]   ;;  %v1131_v55 = vld [vmem:[%s1646_s0 + $0x1ac] ss:$16 sps:$4 sm:$0xff]  }
  0x13   :  { %507 = vmatpush1.bf16.msra.mxu0 %v1079_v19  ;;  %613 = vmatpush1.bf16.msra.mxu1 %v1080_v20  ;;  %v1129_v54 = vld [vmem:[%s1646_s0 + $0x1a4] ss:$16 sps:$4 sm:$0xff]   ;;  %v1133_v56 = vld [vmem:[%s1646_s0 + $0x1a0] ss:$16 sps:$4 sm:$0xff]   ;;  %v1134_v57 = vld [vmem:[%s1646_s0 + $0x1a8] ss:$16 sps:$4 sm:$0xff]  }
  0x14   :  { %508 = vmatprep.subr.bf16.mxu0 %v1081_v21  ;;  %614 = vmatprep.subr.bf16.mxu1 %v1083_v22  ;;  %v1135_v58 = vld [vmem:[%s1646_s0 + $0x1c4] ss:$16 sps:$4 sm:$0xff]   ;;  %v1137_v59 = vld [vmem:[%s1646_s0 + $0x1cc] ss:$16 sps:$4 sm:$0xff]   ;;  %v1139_v60 = vld [vmem:[%s1646_s0 + $0x1c0] ss:$16 sps:$4 sm:$0xff]  }
  0x15   :  { %v1140_v61 = vld [vmem:[%s1646_s0 + $0x1c8] ss:$16 sps:$4 sm:$0xff]   ;;  %v1141_v62 = vld [vmem:[%s1646_s0 + $0x1e4] ss:$16 sps:$4 sm:$0xff]   ;;  %v1143_v63 = vld [vmem:[%s1646_s0 + $0x1ec] ss:$16 sps:$4 sm:$0xff]  }
  0x16   :  { %v1145_v0 = vld [vmem:[%s1646_s0 + $0x1e0] ss:$16 sps:$4 sm:$0xff]   ;;  %v1146_v2 = vld [vmem:[%s1646_s0 + $0x1e8] ss:$16 sps:$4 sm:$0xff]   ;;  %v1152_v3 = vld [vmem:[%s1646_s0 + $0x204] ss:$16 sps:$4 sm:$0xff]  }
  0x17   :  { %509 = vmatpush1.bf16.msra.mxu0 %v1085_v23  ;;  %615 = vmatpush1.bf16.msra.mxu1 %v1086_v24  ;;  %v1155_v4 = vld [vmem:[%s1646_s0 + $0x20c] ss:$16 sps:$4 sm:$0xff]   ;;  %v1150_v6 = vld [vmem:[%s1646_s0 + $0x200] ss:$16 sps:$4 sm:$0xff]   ;;  %v1153_v7 = vld [vmem:[%s1646_s0 + $0x208] ss:$16 sps:$4 sm:$0xff]  }
  0x18   :  { %510 = vmatprep.subr.bf16.mxu0 %v1087_v25  ;;  %616 = vmatprep.subr.bf16.mxu1 %v1089_v26  ;;  %v1147_v5 = vld [vmem:[%s1647_s1] ss:$12 sps:$4 sm:$0xff]   ;;  %v1156_v8 = vld [vmem:[%s1647_s1 + $0x1c] ss:$12 sps:$4 sm:$0xff]   ;;  %v1161_v9 = vld [vmem:[%s1646_s0 + $0x224] ss:$16 sps:$4 sm:$0xff]  }
  0x19   :  { %v1164_v10 = vld [vmem:[%s1646_s0 + $0x22c] ss:$16 sps:$4 sm:$0xff]   ;;  %v1159_v11 = vld [vmem:[%s1646_s0 + $0x220] ss:$16 sps:$4 sm:$0xff]   ;;  %v1162_v12 = vld [vmem:[%s1646_s0 + $0x228] ss:$16 sps:$4 sm:$0xff]  }
  0x1a   :  { %v1158_v13 = vld [vmem:[%s1647_s1 + $0x18] ss:$12 sps:$4 sm:$0xff]   ;;  %v1165_v14 = vld [vmem:[%s1647_s1 + $0x8] ss:$12 sps:$4 sm:$0xff]   ;;  %v1166_v15 = vld [vmem:[%s1647_s1 + $0x20] ss:$12 sps:$4 sm:$0xff]  }
  0x1b   :  { %511 = vmatpush1.bf16.msra.mxu0 %v1091_v27  ;;  %617 = vmatpush1.bf16.msra.mxu1 %v1092_v28 }
  0x1c   :  { %512 = vmatprep.subr.bf16.mxu0 %v1093_v29  ;;  %618 = vmatprep.subr.bf16.mxu1 %v1095_v30 }
  0x1f   :  { %513 = vmatpush1.bf16.msra.mxu0 %v1097_v31  ;;  %619 = vmatpush1.bf16.msra.mxu1 %v1098_v32 }
  0x20   :  { %514 = vmatprep.subr.bf16.mxu0 %v1099_v33  ;;  %620 = vmatprep.subr.bf16.mxu1 %v1101_v34 }
  0x23   :  { %515 = vmatpush1.bf16.msra.mxu0 %v1103_v35  ;;  %621 = vmatpush1.bf16.msra.mxu1 %v1104_v36 }
  0x24   :  { %516 = vmatprep.subr.bf16.mxu0 %v1105_v37  ;;  %622 = vmatprep.subr.bf16.mxu1 %v1107_v38 }
  0x27   :  { %517 = vmatpush1.bf16.msra.mxu0 %v1109_v39  ;;  %623 = vmatpush1.bf16.msra.mxu1 %v1110_v40 }
  0x28   :  { %518 = vmatprep.subr.bf16.mxu0 %v1111_v41  ;;  %624 = vmatprep.subr.bf16.mxu1 %v1113_v42 }
  0x2b   :  { %519 = vmatpush1.bf16.msra.mxu0 %v1115_v43  ;;  %625 = vmatpush1.bf16.msra.mxu1 %v1116_v44 }
  0x2c   :  { %520 = vmatprep.subr.bf16.mxu0 %v1117_v45  ;;  %626 = vmatprep.subr.bf16.mxu1 %v1119_v46 }
  0x2f   :  { %521 = vmatpush1.bf16.msra.mxu0 %v1121_v47  ;;  %627 = vmatpush1.bf16.msra.mxu1 %v1122_v48 }
  0x30   :  { %522 = vmatprep.subr.bf16.mxu0 %v1123_v50  ;;  %628 = vmatprep.subr.bf16.mxu1 %v1125_v51 }
  0x33   :  { %523 = vmatpush1.bf16.msra.mxu0 %v1127_v52  ;;  %629 = vmatpush1.bf16.msra.mxu1 %v1128_v53 }
  0x34   :  { %524 = vmatprep.subr.bf16.mxu0 %v1129_v54  ;;  %630 = vmatprep.subr.bf16.mxu1 %v1131_v55 }
  0x37   :  { %525 = vmatpush1.bf16.msra.mxu0 %v1133_v56  ;;  %631 = vmatpush1.bf16.msra.mxu1 %v1134_v57 }
  0x38   :  { %526 = vmatprep.subr.bf16.mxu0 %v1135_v58  ;;  %632 = vmatprep.subr.bf16.mxu1 %v1137_v59 }
  0x3b   :  { %527 = vmatpush1.bf16.msra.mxu0 %v1139_v60  ;;  %633 = vmatpush1.bf16.msra.mxu1 %v1140_v61 }
  0x3c   :  { %528 = vmatprep.subr.bf16.mxu0 %v1141_v62  ;;  %634 = vmatprep.subr.bf16.mxu1 %v1143_v63 }
  0x3f   :  { %529 = vmatpush1.bf16.msra.mxu0 %v1145_v0  ;;  %635 = vmatpush1.bf16.msra.mxu1 %v1146_v2 }
  0x40   :  { %551 = vmatprep.subr.bf16.mxu0 %v1152_v3  ;;  %657 = vmatprep.subr.bf16.mxu1 %v1155_v4 }
  0x42   :  { %531 = vmatmul.mubr.bf16.vlgmr.msra.gmra.mrb[0].mxu0 %v1147_v5  ;;  %637 = vmatmul.mubr.bf16.vlgmr.msra.gmra.mrb[0].mxu1 %v1147_v5 }
  0x43   :  { %552 = vmatpush1.bf16.msra.mxu0 %v1150_v6  ;;  %658 = vmatpush1.bf16.msra.mxu1 %v1153_v7 }
  0x44   :  { %540 = vmatprep.mubr.bf16.mxu0 %v1156_v8  ;;  %646 = vmatprep.mubr.bf16.mxu1 %v1156_v8 }
  0x45   :  { %553 = vmatprep.subr.bf16.mxu0 %v1161_v9  ;;  %659 = vmatprep.subr.bf16.mxu1 %v1164_v10 }
  0x47   :  { %554 = vmatpush1.bf16.msra.mxu0 %v1159_v11  ;;  %660 = vmatpush1.bf16.msra.mxu1 %v1162_v12 }
  0x4a   :  { %541 = vmatmul.mubr.bf16.gmra.mrb[4].mxu0 %v1158_v13  ;;  %647 = vmatmul.mubr.bf16.gmra.mrb[4].mxu1 %v1158_v13 }
  0x4b   :  { %583 = vmatprep.mubr.bf16.mxu0 %v1175_v1  ;;  %689 = vmatprep.mubr.bf16.mxu1 %v1175_v1 }
  0x52   :  { %1028 = vmatmul.mubr.msk.bf16.vlgmr.msra.gmra.mrb[0].mxu0 %vm491_vm0, %v1165_v14  ;;  %1030 = vmatmul.mubr.msk.bf16.vlgmr.msra.gmra.mrb[0].mxu1 %vm491_vm0, %v1165_v14 }
  0x53   :  { %593 = vmatprep.mubr.bf16.mxu0 %v1175_v1  ;;  %699 = vmatprep.mubr.bf16.mxu1 %v1175_v1 }
  0x5a   :  { %1029 = vmatmul.mubr.msk.bf16.gmra.mrb[4].mxu0 %vm491_vm0, %v1166_v15  ;;  %1031 = vmatmul.mubr.msk.bf16.gmra.mrb[4].mxu1 %vm491_vm0, %v1166_v15 }
 0x125   :  { %v585_v16 = vpop.f32.mrb[0].mxu0  ;;  %v691_v17 = vpop.f32.mrb[0].mxu1 }
 0x126   :  { %v587_v18 = vpop.f32.mrb[1].mxu0  ;;  %v693_v19 = vpop.f32.mrb[1].mxu1 }
 0x127   :  { %v710_v20 = vadd.f32 %v587_v18, %v585_v16  ;;  %v589_v21 = vpop.f32.mrb[2].mxu0  ;;  %v695_v22 = vpop.f32.mrb[2].mxu1 }
 0x128   :  { %v591_v23 = vpop.f32.mrb[3].mxu0  ;;  %v697_v24 = vpop.f32.mrb[3].mxu1 }
 0x129   :  { %v715_v25 = vadd.f32 %v591_v23, %v589_v21  ;;  %v711_v26 = vadd.f32 %v710_v20, %v691_v17 }
 0x12b   :  { %v712_v27 = vadd.f32 %v711_v26, %v693_v19  ;;  %v716_v28 = vadd.f32 %v715_v25, %v695_v22 }
 0x12d   :  { %v701_v1 = vpop.f32.mrb[4].mxu1  ;;  %713 = vadd.xlane.f32.xlu0 %v712_v27  ;;  %v595_v29 = vpop.f32.mrb[4].mxu0  ;;  %v717_v30 = vadd.f32 %v716_v28, %v697_v24 }
 0x12e   :  { %v597_v31 = vpop.f32.mrb[5].mxu0  ;;  %v703_v32 = vpop.f32.mrb[5].mxu1 }
 0x12f   :  { %v720_v33 = vadd.f32 %v597_v31, %v595_v29  ;;  %v599_v34 = vpop.f32.mrb[6].mxu0  ;;  %v705_v35 = vpop.f32.mrb[6].mxu1 }
 0x130   :  { %v601_v36 = vpop.f32.mrb[7].mxu0  ;;  %v707_v37 = vpop.f32.mrb[7].mxu1 }
 0x131   :  { %v725_v38 = vadd.f32 %v601_v36, %v599_v34  ;;  %718 = vadd.xlane.f32.xlu0 %v717_v30  ;;  %v721_v39 = vadd.f32 %v720_v33, %v701_v1  ;;  %v844_v33 = vld [vmem:[%s1648_s3 + $0x10] sm:$0xff] }
 0x133   :  { %v726_v40 = vadd.f32 %v725_v38, %v705_v35  ;;  %v722_v41 = vadd.f32 %v721_v39, %v703_v32 }
 0x135   :  { %v727_v42 = vadd.f32 %v726_v40, %v707_v37  ;;  %723 = vadd.xlane.f32.xlu1 %v722_v41 }
 0x139   :  { %728 = vadd.xlane.f32.xlu1 %v727_v42 }
 0x1ba   :  { %v714_v43 = vpop.xlane.xlu0 %713 }
 0x1bb   :  { %v730_v44 = vmul.f32 0.001953125, %v714_v43 }
 0x1bd   :  { %v1446_v45 = vsub.f32 %v585_v16, %v730_v44  ;;  %v1448_v46 = vsub.f32 %v587_v18, %v730_v44  ;;  %v1450_v47 = vsub.f32 %v691_v17, %v730_v44  ;;  %v1452_v49 = vsub.f32 %v693_v19, %v730_v44 }
 0x1be   :  { %v719_v48 = vpop.xlane.xlu0 %718 }
 0x1bf   :  { %v731_v50 = vmul.f32 0.001953125, %v719_v48  ;;  %v750_v51 = vmul.f32 %v1446_v45, %v1446_v45  ;;  %v751_v52 = vmul.f32 %v1448_v46, %v1448_v46  ;;  %v752_v53 = vmul.f32 %v1450_v47, %v1450_v47  ;;  %v790_v48 = vld [vmem:[%s1649_s2] sm:$0xff] }
 0x1c0   :  { %v753_v59 = vmul.f32 %v1452_v49, %v1452_v49 }
 0x1c1   :  { %v1460_v54 = vsub.f32 %v589_v21, %v731_v50  ;;  %v1462_v55 = vsub.f32 %v591_v23, %v731_v50  ;;  %v766_v56 = vadd.f32 %v751_v52, %v750_v51  ;;  %v1464_v57 = vsub.f32 %v695_v22, %v731_v50 }
 0x1c2   :  { %v724_v58 = vpop.xlane.xlu1 %723  ;;  %v1468_v60 = vsub.f32 %v697_v24, %v731_v50 }
 0x1c3   :  { %v732_v61 = vmul.f32 0.001953125, %v724_v58  ;;  %v767_v62 = vadd.f32 %v766_v56, %v752_v53  ;;  %v754_v63 = vmul.f32 %v1460_v54, %v1460_v54  ;;  %v755_v0 = vmul.f32 %v1462_v55, %v1462_v55  ;;  %v791_v53 = vld [vmem:[%s1649_s2 + $0x8] sm:$0xff] }
 0x1c4   :  { %v756_v2 = vmul.f32 %v1464_v57, %v1464_v57  ;;  %v757_v8 = vmul.f32 %v1468_v60, %v1468_v60 }
 0x1c5   :  { %v1476_v3 = vsub.f32 %v595_v29, %v732_v61  ;;  %v1478_v4 = vsub.f32 %v597_v31, %v732_v61  ;;  %v768_v5 = vadd.f32 %v767_v62, %v753_v59  ;;  %v771_v6 = vadd.f32 %v755_v0, %v754_v63  ;;  %v842_v31 = vld [vmem:[%s1648_s3] sm:$0xff]  ;;  %v792_v59 = vld [vmem:[%s1649_s2 + $0x10] sm:$0xff]  ;;  %v793_v63 = vld [vmem:[%s1649_s2 + $0x18] sm:$0xff] }
 0x1c6   :  { %v729_v7 = vpop.xlane.xlu1 %728  ;;  %v1482_v9 = vsub.f32 %v701_v1, %v732_v61  ;;  %v1484_v10 = vsub.f32 %v703_v32, %v732_v61  ;;  %v843_v32 = vld [vmem:[%s1648_s3 + $0x8] sm:$0xff] }
 0x1c7   :  { %v733_v11 = vmul.f32 0.001953125, %v729_v7  ;;  %769 = vadd.xlane.f32.xlu0 %v768_v5  ;;  %v772_v12 = vadd.f32 %v771_v6, %v756_v2  ;;  %v758_v13 = vmul.f32 %v1476_v3, %v1476_v3  ;;  %v759_v14 = vmul.f32 %v1478_v4, %v1478_v4  ;;  %v845_v5 = vld [vmem:[%s1648_s3 + $0x18] sm:$0xff] }
 0x1c8   :  { %v760_v15 = vmul.f32 %v1482_v9, %v1482_v9  ;;  %v761_v20 = vmul.f32 %v1484_v10, %v1484_v10 }
 0x1c9   :  { %v1492_v16 = vsub.f32 %v599_v34, %v733_v11  ;;  %v1494_v17 = vsub.f32 %v601_v36, %v733_v11  ;;  %v773_v18 = vadd.f32 %v772_v12, %v757_v8  ;;  %v776_v19 = vadd.f32 %v759_v14, %v758_v13  ;;  %v882_v12 = vld [vmem:[%s1650_s4] sm:$0xff] }
 0x1ca   :  { %v1498_v21 = vsub.f32 %v705_v35, %v733_v11  ;;  %v1500_v23 = vsub.f32 %v707_v37, %v733_v11 }
 0x1cb   :  { %774 = vadd.xlane.f32.xlu1 %v773_v18  ;;  %v777_v22 = vadd.f32 %v776_v19, %v760_v15  ;;  %v762_v24 = vmul.f32 %v1492_v16, %v1492_v16  ;;  %v763_v25 = vmul.f32 %v1494_v17, %v1494_v17  ;;  %v883_v19 = vld [vmem:[%s1650_s4 + $0x8] sm:$0xff] }
 0x1cc   :  { %v764_v27 = vmul.f32 %v1498_v21, %v1498_v21  ;;  %v765_v1 = vmul.f32 %v1500_v23, %v1500_v23 }
 0x1cd   :  { %v778_v26 = vadd.f32 %v777_v22, %v761_v20  ;;  %v781_v28 = vadd.f32 %v763_v25, %v762_v24  ;;  %v884_v20 = vld [vmem:[%s1650_s4 + $0x10] sm:$0xff]  ;;  %v885_v22 = vld [vmem:[%s1650_s4 + $0x18] sm:$0xff] }
 0x1cf   :  { %779 = vadd.xlane.f32.xlu0 %v778_v26  ;;  %v782_v29 = vadd.f32 %v781_v28, %v764_v27 }
 0x1d1   :  { %v783_v30 = vadd.f32 %v782_v29, %v765_v1  ;;  %v886_v1 = vld [vmem:[%s1650_s4 + $0x20] sm:$0xff]  ;;  %v887_v29 = vld [vmem:[%s1650_s4 + $0x28] sm:$0xff] }
 0x1d3   :  { %784 = vadd.xlane.f32.xlu1 %v783_v30 }
 0x1e4   :  { %848 = vperm.xlu1 %1050, %v842_v31  }
 0x1e8   :  { %853 = vperm.xlu1 %1050, %v843_v32  }
 0x1ec   :  { %858 = vperm.xlu1 %1050, %v844_v33  }
 0x254   :  { %v770_v34 = vpop.xlane.xlu0 %769 }
 0x255   :  { %v786_v35 = vmul.f32 0.001953125, %v770_v34 }
 0x257   :  { %v794_v36 = vadd.f32 1e-05, %v786_v35 }
 0x258   :  { %v775_v37 = vpop.xlane.xlu1 %774 }
 0x259   :  { %1167 = vrsqrt.f32 %v794_v36  ;;  %v787_v38 = vmul.f32 0.001953125, %v775_v37 }
 0x25b   :  { %v795_v39 = vadd.f32 1e-05, %v787_v38  ;;  %v888_v38 = vld [vmem:[%s1650_s4 + $0x30] sm:$0xff] }
 0x25c   :  { %v780_v40 = vpop.xlane.xlu0 %779 }
 0x25d   :  { %1169 = vrsqrt.f32 %v795_v39  ;;  %v788_v41 = vmul.f32 0.001953125, %v780_v40  ;;  %v889_v39 = vld [vmem:[%s1650_s4 + $0x38] sm:$0xff] }
 0x25f   :  { %v796_v42 = vadd.f32 1e-05, %v788_v41 }
 0x260   :  { %v785_v43 = vpop.xlane.xlu1 %784 }
 0x261   :  { %1171 = vrsqrt.f32 %v796_v42  ;;  %v789_v44 = vmul.f32 0.001953125, %v785_v43 }
 0x263   :  { %v1168_v50 = vpop.eup %1167  ;;  %v797_v51 = vadd.f32 1e-05, %v789_v44 }
 0x264   :  { %v802_v52 = vmul.f32 %v1168_v50, %v790_v48  ;;  %v849_v6 = vpop.permute.xlu1 %848 }
 0x265   :  { %1173 = vrsqrt.f32 %v797_v51 }
 0x266   :  { %808 = vperm.xlu0 %1049, %v802_v52  }
 0x267   :  { %v1170_v56 = vpop.eup %1169 }
 0x268   :  { %v803_v58 = vmul.f32 %v1170_v56, %v791_v53  ;;  %v854_v7 = vpop.permute.xlu1 %853  ;;  %v891_v56 = vld [vmem:[%s1650_s4 + $0x48] sm:$0xff] }
 0x26a   :  { %813 = vperm.xlu1 %1050, %v803_v58   ;;  %v892_v58 = vld [vmem:[%s1650_s4 + $0x50] sm:$0xff] }
 0x26b   :  { %v1172_v61 = vpop.eup %1171 }
 0x26c   :  { %v804_v62 = vmul.f32 %v1172_v61, %v792_v59  ;;  %v859_v8 = vpop.permute.xlu1 %858 }
 0x26e   :  { %818 = vperm.xlu1 %1050, %v804_v62  }
 0x26f   :  { %v1174_v0 = vpop.eup %1173 }
 0x270   :  { %v805_v2 = vmul.f32 %v1174_v0, %v793_v63 }
 0x272   :  { %823 = vperm.xlu1 %1050, %v805_v2  }
 0x276   :  { %863 = vperm.xlu1 %1050, %v845_v5  }
 0x2e5   :  { %v809_v11 = vpop.permute.xlu0 %808 }
 0x2e6   :  { %v826_v13 = vmul.f32 %v809_v11, %v1446_v45  ;;  %v827_v14 = vmul.f32 %v809_v11, %v1448_v46  ;;  %v828_v15 = vmul.f32 %v809_v11, %v1450_v47  ;;  %v829_v18 = vmul.f32 %v809_v11, %v1452_v49 }
 0x2e8   :  { %v866_v24 = vadd.f32 %v849_v6, %v826_v13  ;;  %v867_v45 = vadd.f32 %v849_v6, %v827_v14  ;;  %v868_v25 = vadd.f32 %v849_v6, %v828_v15  ;;  %v869_v46 = vadd.f32 %v849_v6, %v829_v18 }
 0x2e9   :  { %v814_v26 = vpop.permute.xlu1 %813 }
 0x2ea   :  { %v898_v47 = vadd.f32 %v882_v12, %v866_v24  ;;  %v899_v27 = vadd.f32 %v883_v19, %v867_v45  ;;  %v900_v49 = vadd.f32 %v884_v20, %v868_v25  ;;  %v901_v28 = vadd.f32 %v885_v22, %v869_v46  ;;  %v894_v22 = vld [vmem:[%s1650_s4 + $0x60] sm:$0xff]  ;;  %v895_v24 = vld [vmem:[%s1650_s4 + $0x68] sm:$0xff] }
 0x2eb   :  { %v830_v30 = vmul.f32 %v814_v26, %v1460_v54  ;;  %v831_v31 = vmul.f32 %v814_v26, %v1462_v55  ;;  %v832_v32 = vmul.f32 %v814_v26, %v1464_v57  ;;  %v833_v33 = vmul.f32 %v814_v26, %v1468_v60  ;;  %v890_v57 = vld [vmem:[%s1650_s4 + $0x40] sm:$0xff] }
 0x2ec   :  { %v914_v34 = vmax.f32 %v898_v47, 0.0  ;;  %v915_v35 = vmax.f32 %v899_v27, 0.0  ;;  %v916_v36 = vmax.f32 %v900_v49, 0.0  ;;  %v917_v37 = vmax.f32 %v901_v28, 0.0 }
 0x2ed   :  { %v870_v40 = vadd.f32 %v854_v7, %v830_v30  ;;  %v871_v54 = vadd.f32 %v854_v7, %v831_v31  ;;  %v872_v41 = vadd.f32 %v854_v7, %v832_v32  ;;  %v873_v55 = vadd.f32 %v854_v7, %v833_v33  ;;  %v819_v42 = vpop.permute.xlu1 %818 }
 0x2ee   :  { %930 = vst [vmem:[%s1651_s5] sm:$0xff] %v914_v34  ;;  %931 = vst [vmem:[%s1651_s5 + $0x8] sm:$0xff] %v915_v35  ;;  %v834_v60 = vmul.f32 %v819_v42, %v1476_v3  ;;  %v835_v43 = vmul.f32 %v819_v42, %v1478_v4  ;;  %v836_v44 = vmul.f32 %v819_v42, %v1482_v9  ;;  %v893_v3 = vld [vmem:[%s1650_s4 + $0x58] sm:$0xff] }
 0x2ef   :  { %932 = vst [vmem:[%s1651_s5 + $0x10] sm:$0xff] %v916_v36  ;;  %933 = vst [vmem:[%s1651_s5 + $0x18] sm:$0xff] %v917_v37  ;;  %v837_v48 = vmul.f32 %v819_v42, %v1484_v10  ;;  %v902_v50 = vadd.f32 %v886_v1, %v870_v40  ;;  %v903_v51 = vadd.f32 %v887_v29, %v871_v54 }
 0x2f0   :  { %v904_v52 = vadd.f32 %v888_v38, %v872_v41  ;;  %v905_v53 = vadd.f32 %v889_v39, %v873_v55  ;;  %v874_v4 = vadd.f32 %v859_v8, %v834_v60  ;;  %v875_v9 = vadd.f32 %v859_v8, %v835_v43 }
 0x2f1   :  { %v876_v59 = vadd.f32 %v859_v8, %v836_v44  ;;  %v877_v10 = vadd.f32 %v859_v8, %v837_v48  ;;  %v918_v61 = vmax.f32 %v902_v50, 0.0  ;;  %v919_v62 = vmax.f32 %v903_v51, 0.0  ;;  %v824_v2 = vpop.permute.xlu1 %823 }
 0x2f2   :  { %v920_v63 = vmax.f32 %v904_v52, 0.0  ;;  %v921_v0 = vmax.f32 %v905_v53, 0.0  ;;  %v906_v5 = vadd.f32 %v890_v57, %v874_v4  ;;  %v907_v6 = vadd.f32 %v891_v56, %v875_v9 }
 0x2f3   :  { %v908_v7 = vadd.f32 %v892_v58, %v876_v59  ;;  %v909_v11 = vadd.f32 %v893_v3, %v877_v10  ;;  %934 = vst [vmem:[%s1651_s5 + $0x20] sm:$0xff] %v918_v61  ;;  %935 = vst [vmem:[%s1651_s5 + $0x28] sm:$0xff] %v919_v62  ;;  %v838_v8 = vmul.f32 %v824_v2, %v1492_v16  ;;  %v896_v16 = vld [vmem:[%s1650_s4 + $0x70] sm:$0xff] }
 0x2f4   :  { %936 = vst [vmem:[%s1651_s5 + $0x30] sm:$0xff] %v920_v63  ;;  %937 = vst [vmem:[%s1651_s5 + $0x38] sm:$0xff] %v921_v0  ;;  %v839_v12 = vmul.f32 %v824_v2, %v1494_v17  ;;  %v840_v13 = vmul.f32 %v824_v2, %v1498_v21  ;;  %v841_v14 = vmul.f32 %v824_v2, %v1500_v23  ;;  %v922_v15 = vmax.f32 %v906_v5, 0.0  ;;  %v897_v17 = vld [vmem:[%s1650_s4 + $0x78] sm:$0xff] }
 0x2f5   :  { %v923_v18 = vmax.f32 %v907_v6, 0.0  ;;  %v924_v19 = vmax.f32 %v908_v7, 0.0  ;;  %v925_v20 = vmax.f32 %v909_v11, 0.0  ;;  %v864_v21 = vpop.permute.xlu1 %863 }
 0x2f6   :  { %938 = vst [vmem:[%s1651_s5 + $0x40] sm:$0xff] %v922_v15  ;;  %v878_v23 = vadd.f32 %v864_v21, %v838_v8  ;;  %v879_v45 = vadd.f32 %v864_v21, %v839_v12  ;;  %v880_v25 = vadd.f32 %v864_v21, %v840_v13  ;;  %v881_v46 = vadd.f32 %v864_v21, %v841_v14 }
 0x2f7   :  { %939 = vst [vmem:[%s1651_s5 + $0x48] sm:$0xff] %v923_v18  ;;  %940 = vst [vmem:[%s1651_s5 + $0x50] sm:$0xff] %v924_v19 }
 0x2f8   :  { %941 = vst [vmem:[%s1651_s5 + $0x58] sm:$0xff] %v925_v20  ;;  %v910_v26 = vadd.f32 %v894_v22, %v878_v23  ;;  %v911_v47 = vadd.f32 %v895_v24, %v879_v45  ;;  %v912_v27 = vadd.f32 %v896_v16, %v880_v25  ;;  %v913_v49 = vadd.f32 %v897_v17, %v881_v46 }
 0x2fa   :  { %v926_v28 = vmax.f32 %v910_v26, 0.0  ;;  %v927_v1 = vmax.f32 %v911_v47, 0.0  ;;  %v928_v29 = vmax.f32 %v912_v27, 0.0  ;;  %v929_v30 = vmax.f32 %v913_v49, 0.0 }
 0x2fc   :  { %942 = vst [vmem:[%s1651_s5 + $0x60] sm:$0xff] %v926_v28  ;;  %943 = vst [vmem:[%s1651_s5 + $0x68] sm:$0xff] %v927_v1 }
 0x2fd   :  { %944 = vst [vmem:[%s1651_s5 + $0x70] sm:$0xff] %v928_v29  ;;  %945 = vst [vmem:[%s1651_s5 + $0x78] sm:$0xff] %v929_v30 }

// kernel: resnet20_forward.32
= control target key start
LH: loop header
LB: loop body
LE: loop exit
PB: predicated region body
PF: predicated region fallthrough
CT: control target
= control target key end

     0   :  { %v1140_v1 = vmov 0   ;;  %vm488_vm0 = vcmask 261120   ;;  %s1558_s0 = inlined_call_operand.vmem [shape: bf16[288,512], index: 0, kind: input, shape index: {}]   ;;  %s1559_s1 = inlined_call_operand.vmem [shape: bf16[32,288], index: 1, kind: input, shape index: {}]   ;;  %s1560_s3 = inlined_call_operand.vmem [shape: f32[32,1], index: 3, kind: input, shape index: {}]   ;;  %s1561_s2 = inlined_call_operand.vmem [shape: f32[32,1], index: 2, kind: input, shape index: {}]   ;;  %s1562_s4 = inlined_call_operand.vmem [shape: f32[32,512], index: 4, kind: output, shape index: {}]  }
   0x1   :  { %v1016_v0 = vld [vmem:[%s1558_s0 + $0x4] ss:$16 sps:$4 sm:$0xff]   ;;  %1015 = vset.pattern.permute.xlu1 %v1140_v1  ;;  %1014 = vset.pattern.permute.xlu0 %v1140_v1  ;;  %v1018_v2 = vld [vmem:[%s1558_s0 + $0xc] ss:$16 sps:$4 sm:$0xff]   ;;  %v1020_v3 = vld [vmem:[%s1558_s0] ss:$16 sps:$4 sm:$0xff]  }
   0x2   :  { %495 = vmatprep.subr.bf16.mxu0 %v1016_v0  ;;  %v1021_v4 = vld [vmem:[%s1558_s0 + $0x8] ss:$16 sps:$4 sm:$0xff]   ;;  %601 = vmatprep.subr.bf16.mxu1 %v1018_v2  ;;  %v1022_v5 = vld [vmem:[%s1558_s0 + $0x24] ss:$16 sps:$4 sm:$0xff]   ;;  %v1024_v6 = vld [vmem:[%s1558_s0 + $0x2c] ss:$16 sps:$4 sm:$0xff]  }
   0x3   :  { %496 = vmatpush1.bf16.msra.mxu0 %v1020_v3  ;;  %602 = vmatpush1.bf16.msra.mxu1 %v1021_v4  ;;  %v1026_v7 = vld [vmem:[%s1558_s0 + $0x20] ss:$16 sps:$4 sm:$0xff]   ;;  %v1027_v8 = vld [vmem:[%s1558_s0 + $0x28] ss:$16 sps:$4 sm:$0xff]   ;;  %v1028_v9 = vld [vmem:[%s1558_s0 + $0x44] ss:$16 sps:$4 sm:$0xff]  }
   0x4   :  { %497 = vmatprep.subr.bf16.mxu0 %v1022_v5  ;;  %603 = vmatprep.subr.bf16.mxu1 %v1024_v6  ;;  %v1030_v10 = vld [vmem:[%s1558_s0 + $0x4c] ss:$16 sps:$4 sm:$0xff]   ;;  %v1032_v11 = vld [vmem:[%s1558_s0 + $0x40] ss:$16 sps:$4 sm:$0xff]   ;;  %v1033_v12 = vld [vmem:[%s1558_s0 + $0x48] ss:$16 sps:$4 sm:$0xff]  }
   0x5   :  { %v1034_v13 = vld [vmem:[%s1558_s0 + $0x64] ss:$16 sps:$4 sm:$0xff]   ;;  %v1036_v14 = vld [vmem:[%s1558_s0 + $0x6c] ss:$16 sps:$4 sm:$0xff]   ;;  %v1038_v15 = vld [vmem:[%s1558_s0 + $0x60] ss:$16 sps:$4 sm:$0xff]  }
   0x6   :  { %v1039_v16 = vld [vmem:[%s1558_s0 + $0x68] ss:$16 sps:$4 sm:$0xff]   ;;  %v1040_v17 = vld [vmem:[%s1558_s0 + $0x84] ss:$16 sps:$4 sm:$0xff]   ;;  %v1042_v18 = vld [vmem:[%s1558_s0 + $0x8c] ss:$16 sps:$4 sm:$0xff]  }
   0x7   :  { %498 = vmatpush1.bf16.msra.mxu0 %v1026_v7  ;;  %604 = vmatpush1.bf16.msra.mxu1 %v1027_v8  ;;  %v1044_v19 = vld [vmem:[%s1558_s0 + $0x80] ss:$16 sps:$4 sm:$0xff]   ;;  %v1045_v20 = vld [vmem:[%s1558_s0 + $0x88] ss:$16 sps:$4 sm:$0xff]   ;;  %v1046_v21 = vld [vmem:[%s1558_s0 + $0xa4] ss:$16 sps:$4 sm:$0xff]  }
   0x8   :  { %499 = vmatprep.subr.bf16.mxu0 %v1028_v9  ;;  %605 = vmatprep.subr.bf16.mxu1 %v1030_v10  ;;  %v1048_v22 = vld [vmem:[%s1558_s0 + $0xac] ss:$16 sps:$4 sm:$0xff]   ;;  %v1050_v23 = vld [vmem:[%s1558_s0 + $0xa0] ss:$16 sps:$4 sm:$0xff]   ;;  %v1051_v24 = vld [vmem:[%s1558_s0 + $0xa8] ss:$16 sps:$4 sm:$0xff]  }
   0x9   :  { %v1052_v25 = vld [vmem:[%s1558_s0 + $0xc4] ss:$16 sps:$4 sm:$0xff]   ;;  %v1054_v26 = vld [vmem:[%s1558_s0 + $0xcc] ss:$16 sps:$4 sm:$0xff]   ;;  %v1056_v27 = vld [vmem:[%s1558_s0 + $0xc0] ss:$16 sps:$4 sm:$0xff]  }
   0xa   :  { %v1057_v28 = vld [vmem:[%s1558_s0 + $0xc8] ss:$16 sps:$4 sm:$0xff]   ;;  %v1058_v29 = vld [vmem:[%s1558_s0 + $0xe4] ss:$16 sps:$4 sm:$0xff]   ;;  %v1060_v30 = vld [vmem:[%s1558_s0 + $0xec] ss:$16 sps:$4 sm:$0xff]  }
   0xb   :  { %500 = vmatpush1.bf16.msra.mxu0 %v1032_v11  ;;  %606 = vmatpush1.bf16.msra.mxu1 %v1033_v12  ;;  %v1062_v31 = vld [vmem:[%s1558_s0 + $0xe0] ss:$16 sps:$4 sm:$0xff]   ;;  %v1063_v32 = vld [vmem:[%s1558_s0 + $0xe8] ss:$16 sps:$4 sm:$0xff]   ;;  %v1064_v33 = vld [vmem:[%s1558_s0 + $0x104] ss:$16 sps:$4 sm:$0xff]  }
   0xc   :  { %501 = vmatprep.subr.bf16.mxu0 %v1034_v13  ;;  %607 = vmatprep.subr.bf16.mxu1 %v1036_v14  ;;  %v1066_v34 = vld [vmem:[%s1558_s0 + $0x10c] ss:$16 sps:$4 sm:$0xff]   ;;  %v1068_v35 = vld [vmem:[%s1558_s0 + $0x100] ss:$16 sps:$4 sm:$0xff]   ;;  %v1069_v36 = vld [vmem:[%s1558_s0 + $0x108] ss:$16 sps:$4 sm:$0xff]  }
   0xd   :  { %v1070_v37 = vld [vmem:[%s1558_s0 + $0x124] ss:$16 sps:$4 sm:$0xff]   ;;  %v1072_v38 = vld [vmem:[%s1558_s0 + $0x12c] ss:$16 sps:$4 sm:$0xff]   ;;  %v1074_v39 = vld [vmem:[%s1558_s0 + $0x120] ss:$16 sps:$4 sm:$0xff]  }
   0xe   :  { %v1075_v40 = vld [vmem:[%s1558_s0 + $0x128] ss:$16 sps:$4 sm:$0xff]   ;;  %v1076_v41 = vld [vmem:[%s1558_s0 + $0x144] ss:$16 sps:$4 sm:$0xff]   ;;  %v1078_v42 = vld [vmem:[%s1558_s0 + $0x14c] ss:$16 sps:$4 sm:$0xff]  }
   0xf   :  { %502 = vmatpush1.bf16.msra.mxu0 %v1038_v15  ;;  %608 = vmatpush1.bf16.msra.mxu1 %v1039_v16  ;;  %v1080_v43 = vld [vmem:[%s1558_s0 + $0x140] ss:$16 sps:$4 sm:$0xff]   ;;  %v1081_v44 = vld [vmem:[%s1558_s0 + $0x148] ss:$16 sps:$4 sm:$0xff]   ;;  %v1082_v45 = vld [vmem:[%s1558_s0 + $0x164] ss:$16 sps:$4 sm:$0xff]  }
  0x10   :  { %503 = vmatprep.subr.bf16.mxu0 %v1040_v17  ;;  %609 = vmatprep.subr.bf16.mxu1 %v1042_v18  ;;  %v1084_v46 = vld [vmem:[%s1558_s0 + $0x16c] ss:$16 sps:$4 sm:$0xff]   ;;  %v1086_v47 = vld [vmem:[%s1558_s0 + $0x160] ss:$16 sps:$4 sm:$0xff]   ;;  %v1087_v48 = vld [vmem:[%s1558_s0 + $0x168] ss:$16 sps:$4 sm:$0xff]  }
  0x11   :  { %v1114_v49 = vld [vmem:[%s1559_s1 + $0x4] ss:$12 sps:$4 sm:$0xff]   ;;  %v1090_v51 = vld [vmem:[%s1558_s0 + $0x18c] ss:$16 sps:$4 sm:$0xff]   ;;  %v1093_v53 = vld [vmem:[%s1558_s0 + $0x188] ss:$16 sps:$4 sm:$0xff]  }
  0x12   :  { %v1088_v50 = vld [vmem:[%s1558_s0 + $0x184] ss:$16 sps:$4 sm:$0xff]   ;;  %527 = vmatprep.mubr.bf16.mxu0 %v1114_v49  ;;  %633 = vmatprep.mubr.bf16.mxu1 %v1114_v49  ;;  %v1092_v52 = vld [vmem:[%s1558_s0 + $0x180] ss:$16 sps:$4 sm:$0xff]   ;;  %v1096_v55 = vld [vmem:[%s1558_s0 + $0x1ac] ss:$16 sps:$4 sm:$0xff]  }
  0x13   :  { %504 = vmatpush1.bf16.msra.mxu0 %v1044_v19  ;;  %610 = vmatpush1.bf16.msra.mxu1 %v1045_v20  ;;  %v1094_v54 = vld [vmem:[%s1558_s0 + $0x1a4] ss:$16 sps:$4 sm:$0xff]   ;;  %v1098_v56 = vld [vmem:[%s1558_s0 + $0x1a0] ss:$16 sps:$4 sm:$0xff]   ;;  %v1099_v57 = vld [vmem:[%s1558_s0 + $0x1a8] ss:$16 sps:$4 sm:$0xff]  }
  0x14   :  { %505 = vmatprep.subr.bf16.mxu0 %v1046_v21  ;;  %611 = vmatprep.subr.bf16.mxu1 %v1048_v22  ;;  %v1100_v58 = vld [vmem:[%s1558_s0 + $0x1c4] ss:$16 sps:$4 sm:$0xff]   ;;  %v1102_v59 = vld [vmem:[%s1558_s0 + $0x1cc] ss:$16 sps:$4 sm:$0xff]   ;;  %v1104_v60 = vld [vmem:[%s1558_s0 + $0x1c0] ss:$16 sps:$4 sm:$0xff]  }
  0x15   :  { %v1105_v61 = vld [vmem:[%s1558_s0 + $0x1c8] ss:$16 sps:$4 sm:$0xff]   ;;  %v1106_v62 = vld [vmem:[%s1558_s0 + $0x1e4] ss:$16 sps:$4 sm:$0xff]   ;;  %v1108_v63 = vld [vmem:[%s1558_s0 + $0x1ec] ss:$16 sps:$4 sm:$0xff]  }
  0x16   :  { %v1110_v0 = vld [vmem:[%s1558_s0 + $0x1e0] ss:$16 sps:$4 sm:$0xff]   ;;  %v1111_v2 = vld [vmem:[%s1558_s0 + $0x1e8] ss:$16 sps:$4 sm:$0xff]   ;;  %v1117_v3 = vld [vmem:[%s1558_s0 + $0x204] ss:$16 sps:$4 sm:$0xff]  }
  0x17   :  { %506 = vmatpush1.bf16.msra.mxu0 %v1050_v23  ;;  %612 = vmatpush1.bf16.msra.mxu1 %v1051_v24  ;;  %v1120_v4 = vld [vmem:[%s1558_s0 + $0x20c] ss:$16 sps:$4 sm:$0xff]   ;;  %v1115_v6 = vld [vmem:[%s1558_s0 + $0x200] ss:$16 sps:$4 sm:$0xff]   ;;  %v1118_v7 = vld [vmem:[%s1558_s0 + $0x208] ss:$16 sps:$4 sm:$0xff]  }
  0x18   :  { %507 = vmatprep.subr.bf16.mxu0 %v1052_v25  ;;  %613 = vmatprep.subr.bf16.mxu1 %v1054_v26  ;;  %v1112_v5 = vld [vmem:[%s1559_s1] ss:$12 sps:$4 sm:$0xff]   ;;  %v1121_v8 = vld [vmem:[%s1559_s1 + $0x1c] ss:$12 sps:$4 sm:$0xff]   ;;  %v1126_v9 = vld [vmem:[%s1558_s0 + $0x224] ss:$16 sps:$4 sm:$0xff]  }
  0x19   :  { %v1129_v10 = vld [vmem:[%s1558_s0 + $0x22c] ss:$16 sps:$4 sm:$0xff]   ;;  %v1124_v11 = vld [vmem:[%s1558_s0 + $0x220] ss:$16 sps:$4 sm:$0xff]   ;;  %v1127_v12 = vld [vmem:[%s1558_s0 + $0x228] ss:$16 sps:$4 sm:$0xff]  }
  0x1a   :  { %v1123_v13 = vld [vmem:[%s1559_s1 + $0x18] ss:$12 sps:$4 sm:$0xff]   ;;  %v1130_v14 = vld [vmem:[%s1559_s1 + $0x8] ss:$12 sps:$4 sm:$0xff]   ;;  %v1131_v15 = vld [vmem:[%s1559_s1 + $0x20] ss:$12 sps:$4 sm:$0xff]  }
  0x1b   :  { %508 = vmatpush1.bf16.msra.mxu0 %v1056_v27  ;;  %614 = vmatpush1.bf16.msra.mxu1 %v1057_v28 }
  0x1c   :  { %509 = vmatprep.subr.bf16.mxu0 %v1058_v29  ;;  %615 = vmatprep.subr.bf16.mxu1 %v1060_v30 }
  0x1f   :  { %510 = vmatpush1.bf16.msra.mxu0 %v1062_v31  ;;  %616 = vmatpush1.bf16.msra.mxu1 %v1063_v32 }
  0x20   :  { %511 = vmatprep.subr.bf16.mxu0 %v1064_v33  ;;  %617 = vmatprep.subr.bf16.mxu1 %v1066_v34 }
  0x23   :  { %512 = vmatpush1.bf16.msra.mxu0 %v1068_v35  ;;  %618 = vmatpush1.bf16.msra.mxu1 %v1069_v36 }
  0x24   :  { %513 = vmatprep.subr.bf16.mxu0 %v1070_v37  ;;  %619 = vmatprep.subr.bf16.mxu1 %v1072_v38 }
  0x27   :  { %514 = vmatpush1.bf16.msra.mxu0 %v1074_v39  ;;  %620 = vmatpush1.bf16.msra.mxu1 %v1075_v40 }
  0x28   :  { %515 = vmatprep.subr.bf16.mxu0 %v1076_v41  ;;  %621 = vmatprep.subr.bf16.mxu1 %v1078_v42 }
  0x2b   :  { %516 = vmatpush1.bf16.msra.mxu0 %v1080_v43  ;;  %622 = vmatpush1.bf16.msra.mxu1 %v1081_v44 }
  0x2c   :  { %517 = vmatprep.subr.bf16.mxu0 %v1082_v45  ;;  %623 = vmatprep.subr.bf16.mxu1 %v1084_v46 }
  0x2f   :  { %518 = vmatpush1.bf16.msra.mxu0 %v1086_v47  ;;  %624 = vmatpush1.bf16.msra.mxu1 %v1087_v48 }
  0x30   :  { %519 = vmatprep.subr.bf16.mxu0 %v1088_v50  ;;  %625 = vmatprep.subr.bf16.mxu1 %v1090_v51 }
  0x33   :  { %520 = vmatpush1.bf16.msra.mxu0 %v1092_v52  ;;  %626 = vmatpush1.bf16.msra.mxu1 %v1093_v53 }
  0x34   :  { %521 = vmatprep.subr.bf16.mxu0 %v1094_v54  ;;  %627 = vmatprep.subr.bf16.mxu1 %v1096_v55 }
  0x37   :  { %522 = vmatpush1.bf16.msra.mxu0 %v1098_v56  ;;  %628 = vmatpush1.bf16.msra.mxu1 %v1099_v57 }
  0x38   :  { %523 = vmatprep.subr.bf16.mxu0 %v1100_v58  ;;  %629 = vmatprep.subr.bf16.mxu1 %v1102_v59 }
  0x3b   :  { %524 = vmatpush1.bf16.msra.mxu0 %v1104_v60  ;;  %630 = vmatpush1.bf16.msra.mxu1 %v1105_v61 }
  0x3c   :  { %525 = vmatprep.subr.bf16.mxu0 %v1106_v62  ;;  %631 = vmatprep.subr.bf16.mxu1 %v1108_v63 }
  0x3f   :  { %526 = vmatpush1.bf16.msra.mxu0 %v1110_v0  ;;  %632 = vmatpush1.bf16.msra.mxu1 %v1111_v2 }
  0x40   :  { %548 = vmatprep.subr.bf16.mxu0 %v1117_v3  ;;  %654 = vmatprep.subr.bf16.mxu1 %v1120_v4 }
  0x42   :  { %528 = vmatmul.mubr.bf16.vlgmr.msra.gmra.mrb[0].mxu0 %v1112_v5  ;;  %634 = vmatmul.mubr.bf16.vlgmr.msra.gmra.mrb[0].mxu1 %v1112_v5 }
  0x43   :  { %549 = vmatpush1.bf16.msra.mxu0 %v1115_v6  ;;  %655 = vmatpush1.bf16.msra.mxu1 %v1118_v7 }
  0x44   :  { %537 = vmatprep.mubr.bf16.mxu0 %v1121_v8  ;;  %643 = vmatprep.mubr.bf16.mxu1 %v1121_v8 }
  0x45   :  { %550 = vmatprep.subr.bf16.mxu0 %v1126_v9  ;;  %656 = vmatprep.subr.bf16.mxu1 %v1129_v10 }
  0x47   :  { %551 = vmatpush1.bf16.msra.mxu0 %v1124_v11  ;;  %657 = vmatpush1.bf16.msra.mxu1 %v1127_v12 }
  0x4a   :  { %538 = vmatmul.mubr.bf16.gmra.mrb[4].mxu0 %v1123_v13  ;;  %644 = vmatmul.mubr.bf16.gmra.mrb[4].mxu1 %v1123_v13 }
  0x4b   :  { %580 = vmatprep.mubr.bf16.mxu0 %v1140_v1  ;;  %686 = vmatprep.mubr.bf16.mxu1 %v1140_v1 }
  0x52   :  { %993 = vmatmul.mubr.msk.bf16.vlgmr.msra.gmra.mrb[0].mxu0 %vm488_vm0, %v1130_v14  ;;  %995 = vmatmul.mubr.msk.bf16.vlgmr.msra.gmra.mrb[0].mxu1 %vm488_vm0, %v1130_v14 }
  0x53   :  { %590 = vmatprep.mubr.bf16.mxu0 %v1140_v1  ;;  %696 = vmatprep.mubr.bf16.mxu1 %v1140_v1 }
  0x5a   :  { %994 = vmatmul.mubr.msk.bf16.gmra.mrb[4].mxu0 %vm488_vm0, %v1131_v15  ;;  %996 = vmatmul.mubr.msk.bf16.gmra.mrb[4].mxu1 %vm488_vm0, %v1131_v15 }
 0x125   :  { %v582_v16 = vpop.f32.mrb[0].mxu0  ;;  %v688_v17 = vpop.f32.mrb[0].mxu1 }
 0x126   :  { %v584_v18 = vpop.f32.mrb[1].mxu0  ;;  %v690_v19 = vpop.f32.mrb[1].mxu1 }
 0x127   :  { %v707_v20 = vadd.f32 %v584_v18, %v582_v16  ;;  %v586_v21 = vpop.f32.mrb[2].mxu0  ;;  %v692_v22 = vpop.f32.mrb[2].mxu1 }
 0x128   :  { %v588_v23 = vpop.f32.mrb[3].mxu0  ;;  %v694_v24 = vpop.f32.mrb[3].mxu1 }
 0x129   :  { %v712_v25 = vadd.f32 %v588_v23, %v586_v21  ;;  %v708_v26 = vadd.f32 %v707_v20, %v688_v17 }
 0x12b   :  { %v709_v27 = vadd.f32 %v708_v26, %v690_v19  ;;  %v713_v28 = vadd.f32 %v712_v25, %v692_v22 }
 0x12d   :  { %v698_v1 = vpop.f32.mrb[4].mxu1  ;;  %710 = vadd.xlane.f32.xlu0 %v709_v27  ;;  %v592_v29 = vpop.f32.mrb[4].mxu0  ;;  %v714_v30 = vadd.f32 %v713_v28, %v694_v24 }
 0x12e   :  { %v594_v31 = vpop.f32.mrb[5].mxu0  ;;  %v700_v32 = vpop.f32.mrb[5].mxu1 }
 0x12f   :  { %v717_v33 = vadd.f32 %v594_v31, %v592_v29  ;;  %v596_v34 = vpop.f32.mrb[6].mxu0  ;;  %v702_v35 = vpop.f32.mrb[6].mxu1 }
 0x130   :  { %v598_v36 = vpop.f32.mrb[7].mxu0  ;;  %v704_v37 = vpop.f32.mrb[7].mxu1 }
 0x131   :  { %v722_v38 = vadd.f32 %v598_v36, %v596_v34  ;;  %715 = vadd.xlane.f32.xlu0 %v714_v30  ;;  %v718_v39 = vadd.f32 %v717_v33, %v698_v1  ;;  %v841_v33 = vld [vmem:[%s1560_s3 + $0x10] sm:$0xff] }
 0x133   :  { %v723_v40 = vadd.f32 %v722_v38, %v702_v35  ;;  %v719_v41 = vadd.f32 %v718_v39, %v700_v32 }
 0x135   :  { %v724_v42 = vadd.f32 %v723_v40, %v704_v37  ;;  %720 = vadd.xlane.f32.xlu1 %v719_v41 }
 0x139   :  { %725 = vadd.xlane.f32.xlu1 %v724_v42 }
 0x1ba   :  { %v711_v43 = vpop.xlane.xlu0 %710 }
 0x1bb   :  { %v727_v44 = vmul.f32 0.001953125, %v711_v43 }
 0x1bd   :  { %v1406_v45 = vsub.f32 %v582_v16, %v727_v44  ;;  %v1408_v46 = vsub.f32 %v584_v18, %v727_v44  ;;  %v1410_v47 = vsub.f32 %v688_v17, %v727_v44  ;;  %v1412_v49 = vsub.f32 %v690_v19, %v727_v44 }
 0x1be   :  { %v716_v48 = vpop.xlane.xlu0 %715 }
 0x1bf   :  { %v728_v50 = vmul.f32 0.001953125, %v716_v48  ;;  %v747_v51 = vmul.f32 %v1406_v45, %v1406_v45  ;;  %v748_v52 = vmul.f32 %v1408_v46, %v1408_v46  ;;  %v749_v53 = vmul.f32 %v1410_v47, %v1410_v47  ;;  %v787_v48 = vld [vmem:[%s1561_s2] sm:$0xff] }
 0x1c0   :  { %v750_v59 = vmul.f32 %v1412_v49, %v1412_v49 }
 0x1c1   :  { %v1420_v54 = vsub.f32 %v586_v21, %v728_v50  ;;  %v1422_v55 = vsub.f32 %v588_v23, %v728_v50  ;;  %v763_v56 = vadd.f32 %v748_v52, %v747_v51  ;;  %v1424_v57 = vsub.f32 %v692_v22, %v728_v50 }
 0x1c2   :  { %v721_v58 = vpop.xlane.xlu1 %720  ;;  %v1428_v60 = vsub.f32 %v694_v24, %v728_v50 }
 0x1c3   :  { %v729_v61 = vmul.f32 0.001953125, %v721_v58  ;;  %v764_v62 = vadd.f32 %v763_v56, %v749_v53  ;;  %v751_v63 = vmul.f32 %v1420_v54, %v1420_v54  ;;  %v752_v0 = vmul.f32 %v1422_v55, %v1422_v55  ;;  %v788_v53 = vld [vmem:[%s1561_s2 + $0x8] sm:$0xff] }
 0x1c4   :  { %v753_v2 = vmul.f32 %v1424_v57, %v1424_v57  ;;  %v754_v8 = vmul.f32 %v1428_v60, %v1428_v60 }
 0x1c5   :  { %v1436_v3 = vsub.f32 %v592_v29, %v729_v61  ;;  %v1438_v4 = vsub.f32 %v594_v31, %v729_v61  ;;  %v765_v5 = vadd.f32 %v764_v62, %v750_v59  ;;  %v768_v6 = vadd.f32 %v752_v0, %v751_v63  ;;  %v839_v31 = vld [vmem:[%s1560_s3] sm:$0xff]  ;;  %v789_v59 = vld [vmem:[%s1561_s2 + $0x10] sm:$0xff]  ;;  %v790_v63 = vld [vmem:[%s1561_s2 + $0x18] sm:$0xff] }
 0x1c6   :  { %v726_v7 = vpop.xlane.xlu1 %725  ;;  %v1442_v9 = vsub.f32 %v698_v1, %v729_v61  ;;  %v1444_v10 = vsub.f32 %v700_v32, %v729_v61  ;;  %v840_v32 = vld [vmem:[%s1560_s3 + $0x8] sm:$0xff] }
 0x1c7   :  { %v730_v11 = vmul.f32 0.001953125, %v726_v7  ;;  %766 = vadd.xlane.f32.xlu0 %v765_v5  ;;  %v769_v12 = vadd.f32 %v768_v6, %v753_v2  ;;  %v755_v13 = vmul.f32 %v1436_v3, %v1436_v3  ;;  %v756_v14 = vmul.f32 %v1438_v4, %v1438_v4  ;;  %v842_v5 = vld [vmem:[%s1560_s3 + $0x18] sm:$0xff] }
 0x1c8   :  { %v757_v15 = vmul.f32 %v1442_v9, %v1442_v9  ;;  %v758_v20 = vmul.f32 %v1444_v10, %v1444_v10 }
 0x1c9   :  { %v1452_v16 = vsub.f32 %v596_v34, %v730_v11  ;;  %v1454_v17 = vsub.f32 %v598_v36, %v730_v11  ;;  %v770_v18 = vadd.f32 %v769_v12, %v754_v8  ;;  %v773_v19 = vadd.f32 %v756_v14, %v755_v13 }
 0x1ca   :  { %v1458_v21 = vsub.f32 %v702_v35, %v730_v11  ;;  %v1460_v23 = vsub.f32 %v704_v37, %v730_v11 }
 0x1cb   :  { %771 = vadd.xlane.f32.xlu1 %v770_v18  ;;  %v774_v22 = vadd.f32 %v773_v19, %v757_v15  ;;  %v759_v24 = vmul.f32 %v1452_v16, %v1452_v16  ;;  %v760_v25 = vmul.f32 %v1454_v17, %v1454_v17 }
 0x1cc   :  { %v761_v27 = vmul.f32 %v1458_v21, %v1458_v21  ;;  %v762_v1 = vmul.f32 %v1460_v23, %v1460_v23 }
 0x1cd   :  { %v775_v26 = vadd.f32 %v774_v22, %v758_v20  ;;  %v778_v28 = vadd.f32 %v760_v25, %v759_v24 }
 0x1cf   :  { %776 = vadd.xlane.f32.xlu0 %v775_v26  ;;  %v779_v29 = vadd.f32 %v778_v28, %v761_v27 }
 0x1d1   :  { %v780_v30 = vadd.f32 %v779_v29, %v762_v1 }
 0x1d3   :  { %781 = vadd.xlane.f32.xlu1 %v780_v30 }
 0x1e4   :  { %845 = vperm.xlu1 %1015, %v839_v31  }
 0x1e8   :  { %850 = vperm.xlu1 %1015, %v840_v32  }
 0x1ec   :  { %855 = vperm.xlu1 %1015, %v841_v33  }
 0x254   :  { %v767_v34 = vpop.xlane.xlu0 %766 }
 0x255   :  { %v783_v35 = vmul.f32 0.001953125, %v767_v34 }
 0x257   :  { %v791_v36 = vadd.f32 1e-05, %v783_v35 }
 0x258   :  { %v772_v37 = vpop.xlane.xlu1 %771 }
 0x259   :  { %1132 = vrsqrt.f32 %v791_v36  ;;  %v784_v38 = vmul.f32 0.001953125, %v772_v37 }
 0x25b   :  { %v792_v39 = vadd.f32 1e-05, %v784_v38 }
 0x25c   :  { %v777_v40 = vpop.xlane.xlu0 %776 }
 0x25d   :  { %1134 = vrsqrt.f32 %v792_v39  ;;  %v785_v41 = vmul.f32 0.001953125, %v777_v40 }
 0x25f   :  { %v793_v42 = vadd.f32 1e-05, %v785_v41 }
 0x260   :  { %v782_v43 = vpop.xlane.xlu1 %781 }
 0x261   :  { %1136 = vrsqrt.f32 %v793_v42  ;;  %v786_v44 = vmul.f32 0.001953125, %v782_v43 }
 0x263   :  { %v1133_v50 = vpop.eup %1132  ;;  %v794_v51 = vadd.f32 1e-05, %v786_v44 }
 0x264   :  { %v799_v52 = vmul.f32 %v1133_v50, %v787_v48  ;;  %v846_v6 = vpop.permute.xlu1 %845 }
 0x265   :  { %1138 = vrsqrt.f32 %v794_v51 }
 0x266   :  { %805 = vperm.xlu0 %1014, %v799_v52  }
 0x267   :  { %v1135_v56 = vpop.eup %1134 }
 0x268   :  { %v800_v58 = vmul.f32 %v1135_v56, %v788_v53  ;;  %v851_v7 = vpop.permute.xlu1 %850 }
 0x26a   :  { %810 = vperm.xlu1 %1015, %v800_v58  }
 0x26b   :  { %v1137_v61 = vpop.eup %1136 }
 0x26c   :  { %v801_v62 = vmul.f32 %v1137_v61, %v789_v59  ;;  %v856_v8 = vpop.permute.xlu1 %855 }
 0x26e   :  { %815 = vperm.xlu1 %1015, %v801_v62  }
 0x26f   :  { %v1139_v0 = vpop.eup %1138 }
 0x270   :  { %v802_v2 = vmul.f32 %v1139_v0, %v790_v63 }
 0x272   :  { %820 = vperm.xlu1 %1015, %v802_v2  }
 0x276   :  { %860 = vperm.xlu1 %1015, %v842_v5  }
 0x2e5   :  { %v806_v11 = vpop.permute.xlu0 %805 }
 0x2e6   :  { %v823_v12 = vmul.f32 %v806_v11, %v1406_v45  ;;  %v824_v13 = vmul.f32 %v806_v11, %v1408_v46  ;;  %v825_v14 = vmul.f32 %v806_v11, %v1410_v47  ;;  %v826_v15 = vmul.f32 %v806_v11, %v1412_v49 }
 0x2e8   :  { %v863_v18 = vadd.f32 %v846_v6, %v823_v12  ;;  %v864_v19 = vadd.f32 %v846_v6, %v824_v13  ;;  %v865_v20 = vadd.f32 %v846_v6, %v825_v14  ;;  %v866_v22 = vadd.f32 %v846_v6, %v826_v15 }
 0x2e9   :  { %v811_v24 = vpop.permute.xlu1 %810 }
 0x2ea   :  { %v879_v25 = vmax.f32 %v863_v18, 0.0  ;;  %v880_v26 = vmax.f32 %v864_v19, 0.0  ;;  %v881_v27 = vmax.f32 %v865_v20, 0.0  ;;  %v882_v28 = vmax.f32 %v866_v22, 0.0 }
 0x2eb   :  { %v827_v1 = vmul.f32 %v811_v24, %v1420_v54  ;;  %v828_v29 = vmul.f32 %v811_v24, %v1422_v55  ;;  %v829_v45 = vmul.f32 %v811_v24, %v1424_v57  ;;  %v830_v46 = vmul.f32 %v811_v24, %v1428_v60 }
 0x2ec   :  { %895 = vst [vmem:[%s1562_s4] sm:$0xff] %v879_v25  ;;  %896 = vst [vmem:[%s1562_s4 + $0x8] sm:$0xff] %v880_v26 }
 0x2ed   :  { %897 = vst [vmem:[%s1562_s4 + $0x10] sm:$0xff] %v881_v27  ;;  %898 = vst [vmem:[%s1562_s4 + $0x18] sm:$0xff] %v882_v28  ;;  %v867_v47 = vadd.f32 %v851_v7, %v827_v1  ;;  %v868_v49 = vadd.f32 %v851_v7, %v828_v29  ;;  %v869_v54 = vadd.f32 %v851_v7, %v829_v45  ;;  %v816_v57 = vpop.permute.xlu1 %815 }
 0x2ee   :  { %v870_v55 = vadd.f32 %v851_v7, %v830_v46  ;;  %v831_v60 = vmul.f32 %v816_v57, %v1436_v3  ;;  %v832_v30 = vmul.f32 %v816_v57, %v1438_v4  ;;  %v833_v31 = vmul.f32 %v816_v57, %v1442_v9 }
 0x2ef   :  { %v834_v32 = vmul.f32 %v816_v57, %v1444_v10  ;;  %v883_v33 = vmax.f32 %v867_v47, 0.0  ;;  %v884_v34 = vmax.f32 %v868_v49, 0.0  ;;  %v885_v35 = vmax.f32 %v869_v54, 0.0 }
 0x2f0   :  { %v886_v36 = vmax.f32 %v870_v55, 0.0  ;;  %v871_v37 = vadd.f32 %v856_v8, %v831_v60  ;;  %v872_v38 = vadd.f32 %v856_v8, %v832_v30  ;;  %v873_v39 = vadd.f32 %v856_v8, %v833_v31 }
 0x2f1   :  { %v874_v40 = vadd.f32 %v856_v8, %v834_v32  ;;  %899 = vst [vmem:[%s1562_s4 + $0x20] sm:$0xff] %v883_v33  ;;  %900 = vst [vmem:[%s1562_s4 + $0x28] sm:$0xff] %v884_v34  ;;  %v821_v3 = vpop.permute.xlu1 %820 }
 0x2f2   :  { %901 = vst [vmem:[%s1562_s4 + $0x30] sm:$0xff] %v885_v35  ;;  %902 = vst [vmem:[%s1562_s4 + $0x38] sm:$0xff] %v886_v36  ;;  %v887_v4 = vmax.f32 %v871_v37, 0.0  ;;  %v888_v9 = vmax.f32 %v872_v38, 0.0  ;;  %v889_v10 = vmax.f32 %v873_v39, 0.0  ;;  %v835_v42 = vmul.f32 %v821_v3, %v1452_v16 }
 0x2f3   :  { %v890_v41 = vmax.f32 %v874_v40, 0.0  ;;  %v836_v43 = vmul.f32 %v821_v3, %v1454_v17  ;;  %v837_v44 = vmul.f32 %v821_v3, %v1458_v21  ;;  %v838_v48 = vmul.f32 %v821_v3, %v1460_v23 }
 0x2f4   :  { %903 = vst [vmem:[%s1562_s4 + $0x40] sm:$0xff] %v887_v4  ;;  %904 = vst [vmem:[%s1562_s4 + $0x48] sm:$0xff] %v888_v9 }
 0x2f5   :  { %905 = vst [vmem:[%s1562_s4 + $0x50] sm:$0xff] %v889_v10  ;;  %906 = vst [vmem:[%s1562_s4 + $0x58] sm:$0xff] %v890_v41  ;;  %v861_v50 = vpop.permute.xlu1 %860 }
 0x2f6   :  { %v875_v51 = vadd.f32 %v861_v50, %v835_v42  ;;  %v876_v52 = vadd.f32 %v861_v50, %v836_v43  ;;  %v877_v53 = vadd.f32 %v861_v50, %v837_v44  ;;  %v878_v56 = vadd.f32 %v861_v50, %v838_v48 }
 0x2f8   :  { %v891_v58 = vmax.f32 %v875_v51, 0.0  ;;  %v892_v59 = vmax.f32 %v876_v52, 0.0  ;;  %v893_v61 = vmax.f32 %v877_v53, 0.0  ;;  %v894_v62 = vmax.f32 %v878_v56, 0.0 }
 0x2fa   :  { %907 = vst [vmem:[%s1562_s4 + $0x60] sm:$0xff] %v891_v58  ;;  %908 = vst [vmem:[%s1562_s4 + $0x68] sm:$0xff] %v892_v59 }
 0x2fb   :  { %909 = vst [vmem:[%s1562_s4 + $0x70] sm:$0xff] %v893_v61  ;;  %910 = vst [vmem:[%s1562_s4 + $0x78] sm:$0xff] %v894_v62 }

// kernel: resnet20_forward.37
= control target key start
LH: loop header
LB: loop body
LE: loop exit
PB: predicated region body
PF: predicated region fallthrough
CT: control target
= control target key end

     0   :  { %vm238_vm0 = vcmask 261120   ;;  %s994_s0 = inlined_call_operand.vmem [shape: bf16[288,128], index: 0, kind: input, shape index: {}]   ;;  %s995_s1 = inlined_call_operand.vmem [shape: bf16[64,288], index: 1, kind: input, shape index: {}]   ;;  %s996_s3 = inlined_call_operand.vmem [shape: f32[64,1], index: 3, kind: input, shape index: {}]   ;;  %s997_s2 = inlined_call_operand.vmem [shape: f32[64,1], index: 2, kind: input, shape index: {}]   ;;  %s998_s4 = inlined_call_operand.vmem [shape: f32[64,128], index: 4, kind: output, shape index: {}]  }
   0x1   :  { %v712_v0 = vld [vmem:[%s994_s0 + $0x40] sm:$0xff]   ;;  %v714_v2 = vld [vmem:[%s994_s0 + $0x48] sm:$0xff]   ;;  %v716_v4 = vld [vmem:[%s994_s0 + $0x50] sm:$0xff]  }
   0x2   :  { %v713_v1 = vld [vmem:[%s994_s0] sm:$0xff]   ;;  %635 = vmatprep.subr.bf16.mxu0 %v712_v0  ;;  %693 = vmatprep.subr.bf16.mxu1 %v712_v0  ;;  %v715_v3 = vld [vmem:[%s994_s0 + $0x8] sm:$0xff]   ;;  %v717_v5 = vld [vmem:[%s994_s0 + $0x10] sm:$0xff]  }
   0x3   :  { %636 = vmatpush3.bf16.msra.mxu0 %v713_v1  ;;  %701 = vmatpush3.bf16.msra.mxu1 %v713_v1  ;;  %v718_v6 = vld [vmem:[%s994_s0 + $0x58] sm:$0xff]   ;;  %v720_v8 = vld [vmem:[%s994_s0 + $0x60] sm:$0xff]   ;;  %v722_v10 = vld [vmem:[%s994_s0 + $0x68] sm:$0xff]  }
   0x4   :  { %637 = vmatprep.subr.bf16.mxu0 %v714_v2  ;;  %694 = vmatprep.subr.bf16.mxu1 %v714_v2  ;;  %v719_v7 = vld [vmem:[%s994_s0 + $0x18] sm:$0xff]   ;;  %v721_v9 = vld [vmem:[%s994_s0 + $0x20] sm:$0xff]   ;;  %v723_v13 = vld [vmem:[%s994_s0 + $0x28] sm:$0xff]  }
   0x5   :  { %v730_v11 = vld [vmem:[%s995_s1 + $0x4] ss:$12 sps:$4 sm:$0xff]   ;;  %v733_v12 = vld [vmem:[%s995_s1 + $0x4c] ss:$12 sps:$4 sm:$0xff]   ;;  %v731_v20 = vld [vmem:[%s995_s1 + $0x48] ss:$12 sps:$4 sm:$0xff]  }
   0x6   :  { %v724_v14 = vld [vmem:[%s994_s0 + $0x70] sm:$0xff]   ;;  %283 = vmatprep.mubr.bf16.mxu0 %v730_v11  ;;  %307 = vmatprep.mubr.bf16.mxu1 %v733_v12  ;;  %v726_v16 = vld [vmem:[%s994_s0 + $0x78] sm:$0xff]   ;;  %v734_v18 = vld [vmem:[%s994_s0 + $0x80] sm:$0xff]  }
   0x7   :  { %638 = vmatpush3.bf16.msra.mxu0 %v715_v3  ;;  %702 = vmatpush3.bf16.msra.mxu1 %v715_v3  ;;  %v725_v15 = vld [vmem:[%s994_s0 + $0x30] sm:$0xff]   ;;  %v727_v17 = vld [vmem:[%s994_s0 + $0x38] sm:$0xff]   ;;  %v728_v19 = vld [vmem:[%s995_s1] ss:$12 sps:$4 sm:$0xff]  }
   0x8   :  { %639 = vmatprep.subr.bf16.mxu0 %v716_v4  ;;  %695 = vmatprep.subr.bf16.mxu1 %v716_v4  ;;  %v736_v21 = vld [vmem:[%s995_s1 + $0x1c] ss:$12 sps:$4 sm:$0xff]   ;;  %v739_v24 = vld [vmem:[%s995_s1 + $0x18] ss:$12 sps:$4 sm:$0xff]   ;;  %v740_v25 = vld [vmem:[%s995_s1 + $0x20] ss:$12 sps:$4 sm:$0xff]  }
   0x9   :  { %v735_v22 = vld [vmem:[%s994_s0 + $0x88] sm:$0xff]   ;;  %v741_v26 = vld [vmem:[%s995_s1 + $0x34] ss:$12 sps:$4 sm:$0xff]   ;;  %v743_v27 = vld [vmem:[%s995_s1 + $0x38] ss:$12 sps:$4 sm:$0xff]  }
   0xa   :  { %v738_v23 = vld [vmem:[%s995_s1 + $0x8] ss:$12 sps:$4 sm:$0xff]   ;;  %v744_v28 = vld [vmem:[%s995_s1 + $0x30] ss:$12 sps:$4 sm:$0xff]  }
   0xb   :  { %640 = vmatpush3.bf16.msra.mxu0 %v717_v5  ;;  %703 = vmatpush3.bf16.msra.mxu1 %v717_v5  ;;  %v745_v29 = vld [vmem:[%s995_s1 + $0x50] ss:$12 sps:$4 sm:$0xff]  }
   0xc   :  { %641 = vmatprep.subr.bf16.mxu0 %v718_v6  ;;  %696 = vmatprep.subr.bf16.mxu1 %v718_v6 }
   0xf   :  { %642 = vmatpush3.bf16.msra.mxu0 %v719_v7  ;;  %704 = vmatpush3.bf16.msra.mxu1 %v719_v7 }
  0x10   :  { %643 = vmatprep.subr.bf16.mxu0 %v720_v8  ;;  %697 = vmatprep.subr.bf16.mxu1 %v720_v8 }
  0x13   :  { %644 = vmatpush3.bf16.msra.mxu0 %v721_v9  ;;  %705 = vmatpush3.bf16.msra.mxu1 %v721_v9 }
  0x14   :  { %645 = vmatprep.subr.bf16.mxu0 %v722_v10  ;;  %698 = vmatprep.subr.bf16.mxu1 %v722_v10 }
  0x17   :  { %646 = vmatpush3.bf16.msra.mxu0 %v723_v13  ;;  %706 = vmatpush3.bf16.msra.mxu1 %v723_v13 }
  0x18   :  { %647 = vmatprep.subr.bf16.mxu0 %v724_v14  ;;  %699 = vmatprep.subr.bf16.mxu1 %v724_v14 }
  0x1b   :  { %648 = vmatpush3.bf16.msra.mxu0 %v725_v15  ;;  %707 = vmatpush3.bf16.msra.mxu1 %v725_v15 }
  0x1c   :  { %649 = vmatprep.subr.bf16.mxu0 %v726_v16  ;;  %700 = vmatprep.subr.bf16.mxu1 %v726_v16 }
  0x1f   :  { %650 = vmatpush3.bf16.msra.mxu0 %v727_v17  ;;  %708 = vmatpush3.bf16.msra.mxu1 %v727_v17 }
  0x20   :  { %681 = vmatprep.subr.bf16.mxu1 %v734_v18 }
  0x22   :  { %284 = vmatmul.mubr.bf16.vlgmr.msra.gmra.mrb[0].mxu0 %v728_v19  ;;  %308 = vmatmul.mubr.bf16.vlgmr.msra.gmra.mrb[0].mxu1 %v731_v20 }
  0x23   :  { %682 = vmatpush3.bf16.msra.mxu1 %v734_v18  ;;  %291 = vmatprep.mubr.bf16.mxu0 %v736_v21 }
  0x24   :  { %683 = vmatprep.subr.bf16.mxu1 %v735_v22  ;;  %685 = vmatprep.mubr.msk.bf16.mxu1 %vm238_vm0, %v738_v23 }
  0x27   :  { %684 = vmatpush3.bf16.msra.mxu1 %v735_v22 }
  0x2a   :  { %292 = vmatmul.mubr.bf16.gmra.mrb[4].mxu0 %v739_v24  ;;  %686 = vmatmul.mubr.msk.bf16.vlgmr.msra.gmra.mrb[4].mxu1 %vm238_vm0, %v740_v25 }
  0x2b   :  { %299 = vmatprep.mubr.bf16.mxu0 %v741_v26  ;;  %689 = vmatprep.mubr.msk.bf16.mxu1 %vm238_vm0, %v743_v27 }
  0x32   :  { %300 = vmatmul.mubr.bf16.gmra.mrb[8].mxu0 %v744_v28  ;;  %690 = vmatmul.mubr.msk.bf16.gmra.mrb[8].mxu1 %vm238_vm0, %v745_v29 }
  0xf5   :  { %v651_v30 = vpop.f32.mrb[0].mxu0  ;;  %v669_v31 = vpop.f32.mrb[0].mxu1 }
  0xf6   :  { %v652_v32 = vpop.f32.mrb[1].mxu0  ;;  %v670_v33 = vpop.f32.mrb[1].mxu1 }
  0xf7   :  { %v653_v34 = vadd.f32 %v652_v32, %v651_v30  ;;  %v671_v35 = vadd.f32 %v670_v33, %v669_v31  ;;  %v654_v36 = vpop.f32.mrb[2].mxu0  ;;  %v672_v37 = vpop.f32.mrb[2].mxu1 }
  0xf8   :  { %v655_v38 = vpop.f32.mrb[3].mxu0  ;;  %v673_v39 = vpop.f32.mrb[3].mxu1 }
  0xf9   :  { %v656_v40 = vadd.f32 %v655_v38, %v654_v36  ;;  %v674_v41 = vadd.f32 %v673_v39, %v672_v37  ;;  %v762_v38 = vmov 0   ;;  %v525_v39 = vld [vmem:[%s996_s3] sm:$0xff] }
  0xfa   :  { %710 = vset.pattern.permute.xlu1 %v762_v38  ;;  %711 = vset.pattern.permute.xlu0 %v762_v38  ;;  %v531_v38 = vld [vmem:[%s996_s3 + $0x30] sm:$0xff] }
  0xfd   :  { %v657_v42 = vpop.f32.mrb[4].mxu0  ;;  %v687_v43 = vpop.f32.mrb[4].mxu1 }
  0xfe   :  { %v658_v44 = vpop.f32.mrb[5].mxu0  ;;  %v350_v45 = vpop.f32.mrb[5].mxu1 }
  0xff   :  { %v659_v46 = vadd.f32 %v658_v44, %v657_v42  ;;  %v351_v47 = vadd.f32 %v653_v34, %v350_v45  ;;  %v660_v48 = vpop.f32.mrb[6].mxu0  ;;  %v688_v49 = vpop.f32.mrb[6].mxu1  ;;  %v528_v42 = vld [vmem:[%s996_s3 + $0x18] sm:$0xff]  ;;  %v530_v44 = vld [vmem:[%s996_s3 + $0x28] sm:$0xff] }
 0x100   :  { %v661_v50 = vpop.f32.mrb[7].mxu0  ;;  %v353_v51 = vpop.f32.mrb[7].mxu1 }
 0x101   :  { %v662_v52 = vadd.f32 %v661_v50, %v660_v48  ;;  %v354_v53 = vadd.f32 %v656_v40, %v353_v51  ;;  %381 = vadd.xlane.f32.xlu0 %v351_v47  ;;  %v359_v54 = vadd.f32 %v687_v43, %v659_v46  ;;  %v526_v40 = vld [vmem:[%s996_s3 + $0x8] sm:$0xff]  ;;  %v529_v43 = vld [vmem:[%s996_s3 + $0x20] sm:$0xff] }
 0x103   :  { %385 = vadd.xlane.f32.xlu1 %v359_v54  ;;  %v362_v55 = vadd.f32 %v688_v49, %v662_v52 }
 0x105   :  { %v663_v56 = vpop.f32.mrb[8].mxu0  ;;  %v691_v57 = vpop.f32.mrb[8].mxu1  ;;  %383 = vadd.xlane.f32.xlu0 %v354_v53 }
 0x106   :  { %v375_v58 = vadd.f32 %v691_v57, %v671_v35  ;;  %v664_v59 = vpop.f32.mrb[9].mxu0  ;;  %v366_v60 = vpop.f32.mrb[9].mxu1 }
 0x107   :  { %v665_v61 = vadd.f32 %v664_v59, %v663_v56  ;;  %v666_v62 = vpop.f32.mrb[10].mxu0  ;;  %v692_v63 = vpop.f32.mrb[10].mxu1  ;;  %387 = vadd.xlane.f32.xlu1 %v362_v55  ;;  %v445_v59 = vld [vmem:[%s997_s2] sm:$0xff] }
 0x108   :  { %v378_v0 = vadd.f32 %v692_v63, %v674_v41  ;;  %v667_v1 = vpop.f32.mrb[11].mxu0  ;;  %v369_v2 = vpop.f32.mrb[11].mxu1  ;;  %v527_v41 = vld [vmem:[%s996_s3 + $0x10] sm:$0xff] }
 0x109   :  { %v367_v3 = vadd.f32 %v665_v61, %v366_v60  ;;  %v668_v4 = vadd.f32 %v667_v1, %v666_v62 }
 0x10b   :  { %v370_v5 = vadd.f32 %v668_v4, %v369_v2  ;;  %389 = vadd.xlane.f32.xlu0 %v367_v3 }
 0x10d   :  { %391 = vadd.xlane.f32.xlu1 %v370_v5 }
 0x10f   :  { %393 = vadd.xlane.f32.xlu0 %v375_v58 }
 0x111   :  { %395 = vadd.xlane.f32.xlu1 %v378_v0 }
 0x18e   :  { %v382_v6 = vpop.xlane.xlu0 %381 }
 0x18f   :  { %v397_v7 = vmul.f32 0.0078125, %v382_v6 }
 0x190   :  { %v386_v8 = vpop.xlane.xlu1 %385 }
 0x191   :  { %v882_v9 = vsub.f32 %v351_v47, %v397_v7  ;;  %v399_v10 = vmul.f32 0.0078125, %v386_v8  ;;  %v532_v7 = vld [vmem:[%s996_s3 + $0x38] sm:$0xff] }
 0x192   :  { %v384_v11 = vpop.xlane.xlu0 %383 }
 0x193   :  { %v884_v12 = vsub.f32 %v359_v54, %v399_v10  ;;  %v398_v13 = vmul.f32 0.0078125, %v384_v11  ;;  %v413_v14 = vmul.f32 %v882_v9, %v882_v9  ;;  %v447_v11 = vld [vmem:[%s997_s2 + $0x10] sm:$0xff] }
 0x194   :  { %v388_v15 = vpop.xlane.xlu1 %387 }
 0x195   :  { %v888_v16 = vsub.f32 %v354_v53, %v398_v13  ;;  %v400_v17 = vmul.f32 0.0078125, %v388_v15  ;;  %421 = vadd.xlane.f32.xlu0 %v413_v14  ;;  %v415_v19 = vmul.f32 %v884_v12, %v884_v12 }
 0x197   :  { %v890_v18 = vsub.f32 %v362_v55, %v400_v17  ;;  %v414_v20 = vmul.f32 %v888_v16, %v888_v16 }
 0x198   :  { %v390_v21 = vpop.xlane.xlu0 %389 }
 0x199   :  { %v401_v22 = vmul.f32 0.0078125, %v390_v21  ;;  %425 = vadd.xlane.f32.xlu0 %v415_v19  ;;  %423 = vadd.xlane.f32.xlu1 %v414_v20  ;;  %v416_v26 = vmul.f32 %v890_v18, %v890_v18  ;;  %v448_v19 = vld [vmem:[%s997_s2 + $0x18] sm:$0xff] }
 0x19a   :  { %v392_v23 = vpop.xlane.xlu1 %391 }
 0x19b   :  { %v896_v24 = vsub.f32 %v367_v3, %v401_v22  ;;  %v402_v25 = vmul.f32 0.0078125, %v392_v23  ;;  %v446_v3 = vld [vmem:[%s997_s2 + $0x8] sm:$0xff]  ;;  %v451_v23 = vld [vmem:[%s997_s2 + $0x30] sm:$0xff] }
 0x19c   :  { %v394_v27 = vpop.xlane.xlu0 %393 }
 0x19d   :  { %v900_v28 = vsub.f32 %v370_v5, %v402_v25  ;;  %v403_v29 = vmul.f32 0.0078125, %v394_v27  ;;  %427 = vadd.xlane.f32.xlu1 %v416_v26  ;;  %v417_v30 = vmul.f32 %v896_v24, %v896_v24  ;;  %v452_v27 = vld [vmem:[%s997_s2 + $0x38] sm:$0xff] }
 0x19e   :  { %v396_v31 = vpop.xlane.xlu1 %395 }
 0x19f   :  { %v904_v32 = vsub.f32 %v375_v58, %v403_v29  ;;  %v404_v33 = vmul.f32 0.0078125, %v396_v31  ;;  %429 = vadd.xlane.f32.xlu0 %v417_v30  ;;  %v418_v34 = vmul.f32 %v900_v28, %v900_v28  ;;  %v449_v31 = vld [vmem:[%s997_s2 + $0x20] sm:$0xff] }
 0x1a1   :  { %v908_v35 = vsub.f32 %v378_v0, %v404_v33  ;;  %431 = vadd.xlane.f32.xlu1 %v418_v34  ;;  %v419_v36 = vmul.f32 %v904_v32, %v904_v32 }
 0x1a3   :  { %433 = vadd.xlane.f32.xlu0 %v419_v36  ;;  %v420_v37 = vmul.f32 %v908_v35, %v908_v35  ;;  %v450_v36 = vld [vmem:[%s997_s2 + $0x28] sm:$0xff] }
 0x1a5   :  { %435 = vadd.xlane.f32.xlu1 %v420_v37 }
 0x1b6   :  { %535 = vperm.xlu1 %710, %v525_v39  }
 0x1b9   :  { %540 = vperm.xlu0 %711, %v526_v40  }
 0x1ba   :  { %545 = vperm.xlu1 %710, %v527_v41  }
 0x1bd   :  { %550 = vperm.xlu0 %711, %v528_v42  }
 0x1be   :  { %555 = vperm.xlu1 %710, %v529_v43  }
 0x1c1   :  { %560 = vperm.xlu0 %711, %v530_v44  }
 0x222   :  { %v422_v45 = vpop.xlane.xlu0 %421 }
 0x223   :  { %v437_v46 = vmul.f32 0.0078125, %v422_v45 }
 0x225   :  { %v453_v47 = vadd.f32 1e-05, %v437_v46 }
 0x226   :  { %v424_v48 = vpop.xlane.xlu1 %423  ;;  %v426_v49 = vpop.xlane.xlu0 %425 }
 0x227   :  { %746 = vrsqrt.f32 %v453_v47  ;;  %v438_v50 = vmul.f32 0.0078125, %v424_v48  ;;  %v439_v51 = vmul.f32 0.0078125, %v426_v49 }
 0x229   :  { %v454_v52 = vadd.f32 1e-05, %v438_v50  ;;  %v455_v53 = vadd.f32 1e-05, %v439_v51 }
 0x22a   :  { %v428_v54 = vpop.xlane.xlu1 %427 }
 0x22b   :  { %748 = vrsqrt.f32 %v454_v52  ;;  %v440_v55 = vmul.f32 0.0078125, %v428_v54 }
 0x22c   :  { %v430_v56 = vpop.xlane.xlu0 %429  ;;  %750 = vrsqrt.f32 %v455_v53 }
 0x22d   :  { %v456_v57 = vadd.f32 1e-05, %v440_v55  ;;  %v441_v5 = vmul.f32 0.0078125, %v430_v56 }
 0x22e   :  { %v432_v58 = vpop.xlane.xlu1 %431 }
 0x22f   :  { %752 = vrsqrt.f32 %v456_v57  ;;  %v457_v13 = vadd.f32 1e-05, %v441_v5  ;;  %v442_v14 = vmul.f32 0.0078125, %v432_v58 }
 0x230   :  { %v434_v60 = vpop.xlane.xlu0 %433 }
 0x231   :  { %v747_v61 = vpop.eup %746  ;;  %v443_v62 = vmul.f32 0.0078125, %v434_v60  ;;  %v458_v20 = vadd.f32 1e-05, %v442_v14 }
 0x232   :  { %v436_v63 = vpop.xlane.xlu1 %435  ;;  %v469_v0 = vmul.f32 %v747_v61, %v445_v59 }
 0x233   :  { %v459_v1 = vadd.f32 1e-05, %v443_v62  ;;  %v444_v2 = vmul.f32 0.0078125, %v436_v63 }
 0x234   :  { %479 = vperm.xlu0 %711, %v469_v0  }
 0x235   :  { %v749_v4 = vpop.eup %748  ;;  %754 = vrsqrt.f32 %v459_v1  ;;  %v460_v6 = vadd.f32 1e-05, %v444_v2 }
 0x236   :  { %v470_v8 = vmul.f32 %v749_v4, %v446_v3  ;;  %v751_v10 = vpop.eup %750  ;;  %v536_v40 = vpop.permute.xlu1 %535 }
 0x237   :  { %756 = vrsqrt.f32 %v460_v6  ;;  %v471_v15 = vmul.f32 %v751_v10, %v447_v11 }
 0x238   :  { %484 = vperm.xlu1 %710, %v470_v8   ;;  %570 = vperm.xlu0 %711, %v532_v7   ;;  %758 = vrsqrt.f32 %v457_v13  ;;  %v541_v39 = vpop.permute.xlu0 %540 }
 0x239   :  { %v753_v17 = vpop.eup %752  ;;  %760 = vrsqrt.f32 %v458_v20 }
 0x23a   :  { %v472_v21 = vmul.f32 %v753_v17, %v448_v19  ;;  %v546_v42 = vpop.permute.xlu1 %545 }
 0x23c   :  { %489 = vperm.xlu1 %710, %v471_v15   ;;  %v551_v41 = vpop.permute.xlu0 %550 }
 0x23e   :  { %v556_v44 = vpop.permute.xlu1 %555 }
 0x23f   :  { %v755_v22 = vpop.eup %754 }
 0x240   :  { %494 = vperm.xlu1 %710, %v472_v21   ;;  %v475_v25 = vmul.f32 %v755_v22, %v451_v23  ;;  %v561_v43 = vpop.permute.xlu0 %560 }
 0x241   :  { %v757_v26 = vpop.eup %756 }
 0x242   :  { %v476_v29 = vmul.f32 %v757_v26, %v452_v27  ;;  %v759_v30 = vpop.eup %758 }
 0x243   :  { %v473_v33 = vmul.f32 %v759_v30, %v449_v31  ;;  %v761_v34 = vpop.eup %760 }
 0x244   :  { %509 = vperm.xlu1 %710, %v475_v25   ;;  %v474_v37 = vmul.f32 %v761_v34, %v450_v36 }
 0x248   :  { %514 = vperm.xlu1 %710, %v476_v29  }
 0x24c   :  { %499 = vperm.xlu1 %710, %v473_v33  }
 0x250   :  { %504 = vperm.xlu1 %710, %v474_v37  }
 0x254   :  { %565 = vperm.xlu1 %710, %v531_v38  }
 0x2b3   :  { %v480_v45 = vpop.permute.xlu0 %479 }
 0x2b4   :  { %v517_v46 = vmul.f32 %v480_v45, %v882_v9 }
 0x2b6   :  { %v573_v47 = vadd.f32 %v536_v40, %v517_v46 }
 0x2b7   :  { %v485_v48 = vpop.permute.xlu1 %484  ;;  %v571_v61 = vpop.permute.xlu0 %570 }
 0x2b8   :  { %v581_v49 = vmax.f32 %v573_v47, 0.0  ;;  %v518_v50 = vmul.f32 %v485_v48, %v888_v16 }
 0x2ba   :  { %589 = vst [vmem:[%s998_s4] sm:$0xff] %v581_v49  ;;  %v574_v51 = vadd.f32 %v541_v39, %v518_v50 }
 0x2bb   :  { %v490_v52 = vpop.permute.xlu1 %489 }
 0x2bc   :  { %v582_v53 = vmax.f32 %v574_v51, 0.0  ;;  %v519_v54 = vmul.f32 %v490_v52, %v884_v12 }
 0x2be   :  { %590 = vst [vmem:[%s998_s4 + $0x8] sm:$0xff] %v582_v53  ;;  %v575_v55 = vadd.f32 %v546_v42, %v519_v54 }
 0x2bf   :  { %v495_v9 = vpop.permute.xlu1 %494 }
 0x2c0   :  { %v583_v56 = vmax.f32 %v575_v55, 0.0  ;;  %v520_v57 = vmul.f32 %v495_v9, %v890_v18 }
 0x2c2   :  { %591 = vst [vmem:[%s998_s4 + $0x10] sm:$0xff] %v583_v56  ;;  %v576_v16 = vadd.f32 %v551_v41, %v520_v57 }
 0x2c3   :  { %v510_v58 = vpop.permute.xlu1 %509 }
 0x2c4   :  { %v584_v59 = vmax.f32 %v576_v16, 0.0  ;;  %v523_v5 = vmul.f32 %v510_v58, %v904_v32 }
 0x2c6   :  { %592 = vst [vmem:[%s998_s4 + $0x18] sm:$0xff] %v584_v59 }
 0x2c7   :  { %v515_v12 = vpop.permute.xlu1 %514 }
 0x2c8   :  { %v524_v60 = vmul.f32 %v515_v12, %v908_v35 }
 0x2ca   :  { %v580_v62 = vadd.f32 %v571_v61, %v524_v60 }
 0x2cb   :  { %v500_v63 = vpop.permute.xlu1 %499 }
 0x2cc   :  { %v588_v0 = vmax.f32 %v580_v62, 0.0  ;;  %v521_v18 = vmul.f32 %v500_v63, %v896_v24 }
 0x2ce   :  { %596 = vst [vmem:[%s998_s4 + $0x38] sm:$0xff] %v588_v0  ;;  %v577_v1 = vadd.f32 %v556_v44, %v521_v18 }
 0x2cf   :  { %v505_v2 = vpop.permute.xlu1 %504 }
 0x2d0   :  { %v585_v3 = vmax.f32 %v577_v1, 0.0  ;;  %v522_v4 = vmul.f32 %v505_v2, %v900_v28 }
 0x2d2   :  { %593 = vst [vmem:[%s998_s4 + $0x20] sm:$0xff] %v585_v3  ;;  %v578_v35 = vadd.f32 %v561_v43, %v522_v4 }
 0x2d3   :  { %v566_v6 = vpop.permute.xlu1 %565 }
 0x2d4   :  { %v586_v7 = vmax.f32 %v578_v35, 0.0  ;;  %v579_v8 = vadd.f32 %v566_v6, %v523_v5 }
 0x2d6   :  { %594 = vst [vmem:[%s998_s4 + $0x28] sm:$0xff] %v586_v7  ;;  %v587_v24 = vmax.f32 %v579_v8, 0.0 }
 0x2d8   :  { %595 = vst [vmem:[%s998_s4 + $0x30] sm:$0xff] %v587_v24 }

// kernel: resnet20_forward.36
= control target key start
LH: loop header
LB: loop body
LE: loop exit
PB: predicated region body
PF: predicated region fallthrough
CT: control target
= control target key end

     0   :  { %vm62_vm0 = vcmask 261120   ;;  %v409_v46 = vmov 0   ;;  %s565_s0 = inlined_call_operand.vmem [shape: bf16[32,128], index: 0, kind: input, shape index: {}]   ;;  %s566_s1 = inlined_call_operand.vmem [shape: bf16[64,32], index: 1, kind: input, shape index: {}]   ;;  %s567_s3 = inlined_call_operand.vmem [shape: f32[64,1], index: 3, kind: input, shape index: {}]   ;;  %s568_s2 = inlined_call_operand.vmem [shape: f32[64,1], index: 2, kind: input, shape index: {}]   ;;  %s569_s4 = inlined_call_operand.vmem [shape: f32[64,128], index: 4, kind: output, shape index: {}]  }
   0x1   :  { %v387_v0 = vld [vmem:[%s565_s0] sm:$0xff]   ;;  %v388_v1 = vld [vmem:[%s565_s0 + $0x8] sm:$0xff]   ;;  %v391_v3 = vld [vmem:[%s566_s1 + $0x10] sm:$0xff]   ;;  %385 = vset.pattern.permute.xlu1 %v409_v46  ;;  %386 = vset.pattern.permute.xlu0 %v409_v46 }
   0x2   :  { %368 = vmatprep.subr.bf16.mxu0 %v387_v0  ;;  %380 = vmatprep.subr.bf16.mxu1 %v387_v0  ;;  %v389_v2 = vld [vmem:[%s566_s1] sm:$0xff]   ;;  %v390_v4 = vld [vmem:[%s566_s1 + $0x8] sm:$0xff]   ;;  %v392_v5 = vld [vmem:[%s566_s1 + $0x18] sm:$0xff]  }
   0x3   :  { %369 = vmatpush3.bf16.msra.mxu0 %v387_v0  ;;  %382 = vmatpush3.bf16.msra.mxu1 %v387_v0  ;;  %v284_v47 = vld [vmem:[%s567_s3] sm:$0xff]  ;;  %v285_v48 = vld [vmem:[%s567_s3 + $0x8] sm:$0xff]  ;;  %v286_v49 = vld [vmem:[%s567_s3 + $0x10] sm:$0xff] }
   0x4   :  { %370 = vmatprep.subr.bf16.mxu0 %v388_v1  ;;  %381 = vmatprep.subr.bf16.mxu1 %v388_v1  ;;  %v287_v50 = vld [vmem:[%s567_s3 + $0x18] sm:$0xff]  ;;  %v288_v51 = vld [vmem:[%s567_s3 + $0x20] sm:$0xff]  ;;  %v289_v52 = vld [vmem:[%s567_s3 + $0x28] sm:$0xff] }
   0x5   :  { %372 = vmatprep.mubr.msk.bf16.mxu0 %vm62_vm0, %v389_v2  ;;  %376 = vmatprep.mubr.msk.bf16.mxu1 %vm62_vm0, %v391_v3  ;;  %v290_v46 = vld [vmem:[%s567_s3 + $0x30] sm:$0xff] }
   0x7   :  { %371 = vmatpush3.bf16.msra.mxu0 %v388_v1  ;;  %383 = vmatpush3.bf16.msra.mxu1 %v388_v1  ;;  %v206_v1 = vld [vmem:[%s568_s2 + $0x10] sm:$0xff] }
   0xa   :  { %373 = vmatmul.mubr.msk.bf16.vlgmr.msra.gmra.mrb[0].mxu0 %vm62_vm0, %v390_v4  ;;  %377 = vmatmul.mubr.msk.bf16.vlgmr.msra.gmra.mrb[0].mxu1 %vm62_vm0, %v392_v5 }
  0xdd   :  { %v374_v6 = vpop.f32.mrb[0].mxu0  ;;  %v378_v7 = vpop.f32.mrb[0].mxu1 }
  0xde   :  { %144 = vadd.xlane.f32.xlu1 %v374_v6  ;;  %v109_v8 = vpop.f32.mrb[1].mxu0  ;;  %v125_v9 = vpop.f32.mrb[1].mxu1 }
  0xdf   :  { %140 = vadd.xlane.f32.xlu0 %v109_v8  ;;  %v375_v10 = vpop.f32.mrb[2].mxu0  ;;  %v379_v11 = vpop.f32.mrb[2].mxu1 }
  0xe0   :  { %v112_v12 = vpop.f32.mrb[3].mxu0  ;;  %v128_v13 = vpop.f32.mrb[3].mxu1 }
  0xe2   :  { %146 = vadd.xlane.f32.xlu1 %v375_v10 }
  0xe3   :  { %148 = vadd.xlane.f32.xlu0 %v125_v9 }
  0xe6   :  { %150 = vadd.xlane.f32.xlu1 %v128_v13 }
  0xe7   :  { %142 = vadd.xlane.f32.xlu0 %v112_v12 }
  0xea   :  { %154 = vadd.xlane.f32.xlu1 %v379_v11 }
  0xeb   :  { %152 = vadd.xlane.f32.xlu0 %v378_v7 }
 0x16b   :  { %v145_v14 = vpop.xlane.xlu1 %144 }
 0x16c   :  { %v158_v15 = vmul.f32 0.0078125, %v145_v14  ;;  %v141_v16 = vpop.xlane.xlu0 %140  ;;  %v291_v14 = vld [vmem:[%s567_s3 + $0x38] sm:$0xff] }
 0x16d   :  { %v156_v17 = vmul.f32 0.0078125, %v141_v16 }
 0x16e   :  { %v453_v18 = vsub.f32 %v374_v6, %v158_v15 }
 0x16f   :  { %v147_v19 = vpop.xlane.xlu1 %146  ;;  %v455_v20 = vsub.f32 %v109_v8, %v156_v17  ;;  %v210_v17 = vld [vmem:[%s568_s2 + $0x30] sm:$0xff] }
 0x170   :  { %v159_v21 = vmul.f32 0.0078125, %v147_v19  ;;  %v149_v22 = vpop.xlane.xlu0 %148  ;;  %v174_v23 = vmul.f32 %v453_v18, %v453_v18 }
 0x171   :  { %v160_v24 = vmul.f32 0.0078125, %v149_v22  ;;  %v172_v30 = vmul.f32 %v455_v20, %v455_v20 }
 0x172   :  { %v459_v25 = vsub.f32 %v375_v10, %v159_v21  ;;  %184 = vadd.xlane.f32.xlu0 %v174_v23 }
 0x173   :  { %v151_v26 = vpop.xlane.xlu1 %150  ;;  %v461_v27 = vsub.f32 %v125_v9, %v160_v24  ;;  %v204_v9 = vld [vmem:[%s568_s2] sm:$0xff] }
 0x174   :  { %v143_v28 = vpop.xlane.xlu0 %142  ;;  %v175_v29 = vmul.f32 %v459_v25, %v459_v25  ;;  %v161_v31 = vmul.f32 0.0078125, %v151_v26  ;;  %v208_v26 = vld [vmem:[%s568_s2 + $0x20] sm:$0xff] }
 0x175   :  { %v157_v32 = vmul.f32 0.0078125, %v143_v28  ;;  %v176_v36 = vmul.f32 %v461_v27, %v461_v27 }
 0x176   :  { %186 = vadd.xlane.f32.xlu1 %v175_v29  ;;  %180 = vadd.xlane.f32.xlu0 %v172_v30  ;;  %v471_v37 = vsub.f32 %v128_v13, %v161_v31  ;;  %v207_v31 = vld [vmem:[%s568_s2 + $0x18] sm:$0xff] }
 0x177   :  { %v467_v33 = vsub.f32 %v112_v12, %v157_v32  ;;  %v155_v34 = vpop.xlane.xlu1 %154 }
 0x178   :  { %v153_v35 = vpop.xlane.xlu0 %152  ;;  %v163_v38 = vmul.f32 0.0078125, %v155_v34  ;;  %v177_v43 = vmul.f32 %v471_v37, %v471_v37 }
 0x179   :  { %v162_v39 = vmul.f32 0.0078125, %v153_v35  ;;  %v173_v40 = vmul.f32 %v467_v33, %v467_v33  ;;  %v211_v35 = vld [vmem:[%s568_s2 + $0x38] sm:$0xff] }
 0x17a   :  { %188 = vadd.xlane.f32.xlu0 %v176_v36  ;;  %v477_v42 = vsub.f32 %v379_v11, %v163_v38 }
 0x17b   :  { %v475_v41 = vsub.f32 %v378_v7, %v162_v39  ;;  %182 = vadd.xlane.f32.xlu1 %v173_v40  ;;  %v205_v39 = vld [vmem:[%s568_s2 + $0x8] sm:$0xff] }
 0x17c   :  { %v179_v45 = vmul.f32 %v477_v42, %v477_v42 }
 0x17d   :  { %v178_v44 = vmul.f32 %v475_v41, %v475_v41 }
 0x17f   :  { %190 = vadd.xlane.f32.xlu1 %v177_v43  ;;  %192 = vadd.xlane.f32.xlu0 %v178_v44  ;;  %v209_v44 = vld [vmem:[%s568_s2 + $0x28] sm:$0xff] }
 0x183   :  { %194 = vadd.xlane.f32.xlu1 %v179_v45 }
 0x194   :  { %294 = vperm.xlu1 %385, %v284_v47  }
 0x195   :  { %299 = vperm.xlu0 %386, %v285_v48  }
 0x198   :  { %304 = vperm.xlu1 %385, %v286_v49  }
 0x199   :  { %309 = vperm.xlu0 %386, %v287_v50  }
 0x19c   :  { %314 = vperm.xlu1 %385, %v288_v51  }
 0x19d   :  { %319 = vperm.xlu0 %386, %v289_v52  }
 0x1ff   :  { %v185_v53 = vpop.xlane.xlu0 %184 }
 0x200   :  { %v198_v54 = vmul.f32 0.0078125, %v185_v53 }
 0x202   :  { %v214_v55 = vadd.f32 1e-05, %v198_v54 }
 0x203   :  { %v187_v56 = vpop.xlane.xlu1 %186  ;;  %v181_v57 = vpop.xlane.xlu0 %180 }
 0x204   :  { %393 = vrsqrt.f32 %v214_v55  ;;  %v196_v58 = vmul.f32 0.0078125, %v181_v57  ;;  %v199_v6 = vmul.f32 0.0078125, %v187_v56 }
 0x206   :  { %v212_v59 = vadd.f32 1e-05, %v196_v58  ;;  %v215_v11 = vadd.f32 1e-05, %v199_v6 }
 0x207   :  { %v189_v60 = vpop.xlane.xlu0 %188 }
 0x208   :  { %v183_v61 = vpop.xlane.xlu1 %182  ;;  %395 = vrsqrt.f32 %v212_v59  ;;  %v200_v62 = vmul.f32 0.0078125, %v189_v60 }
 0x209   :  { %v197_v15 = vmul.f32 0.0078125, %v183_v61 }
 0x20a   :  { %v216_v7 = vadd.f32 1e-05, %v200_v62 }
 0x20b   :  { %v213_v21 = vadd.f32 1e-05, %v197_v15 }
 0x20c   :  { %v191_v63 = vpop.xlane.xlu1 %190  ;;  %v193_v0 = vpop.xlane.xlu0 %192 }
 0x20d   :  { %v202_v2 = vmul.f32 0.0078125, %v193_v0  ;;  %v201_v22 = vmul.f32 0.0078125, %v191_v63 }
 0x20e   :  { %v394_v3 = vpop.eup %393 }
 0x20f   :  { %v218_v4 = vadd.f32 1e-05, %v202_v2  ;;  %v230_v5 = vmul.f32 %v394_v3, %v206_v1  ;;  %v217_v28 = vadd.f32 1e-05, %v201_v22 }
 0x210   :  { %v195_v8 = vpop.xlane.xlu1 %194 }
 0x211   :  { %248 = vperm.xlu1 %385, %v230_v5   ;;  %397 = vrsqrt.f32 %v218_v4  ;;  %v203_v12 = vmul.f32 0.0078125, %v195_v8 }
 0x212   :  { %v396_v10 = vpop.eup %395  ;;  %399 = vrsqrt.f32 %v216_v7 }
 0x213   :  { %v228_v13 = vmul.f32 %v396_v10, %v204_v9  ;;  %401 = vrsqrt.f32 %v215_v11  ;;  %v219_v16 = vadd.f32 1e-05, %v203_v12 }
 0x214   :  { %v295_v47 = vpop.permute.xlu1 %294  ;;  %v300_v48 = vpop.permute.xlu0 %299 }
 0x215   :  { %238 = vperm.xlu0 %386, %v228_v13   ;;  %403 = vrsqrt.f32 %v219_v16 }
 0x216   :  { %405 = vrsqrt.f32 %v213_v21 }
 0x217   :  { %407 = vrsqrt.f32 %v217_v28 }
 0x218   :  { %v305_v49 = vpop.permute.xlu1 %304  ;;  %v310_v50 = vpop.permute.xlu0 %309 }
 0x219   :  { %329 = vperm.xlu0 %386, %v291_v14  }
 0x21b   :  { %v398_v19 = vpop.eup %397 }
 0x21c   :  { %v234_v23 = vmul.f32 %v398_v19, %v210_v17  ;;  %v400_v24 = vpop.eup %399  ;;  %v315_v51 = vpop.permute.xlu1 %314 }
 0x21d   :  { %v232_v29 = vmul.f32 %v400_v24, %v208_v26  ;;  %v402_v30 = vpop.eup %401  ;;  %v320_v52 = vpop.permute.xlu0 %319 }
 0x21e   :  { %268 = vperm.xlu1 %385, %v234_v23   ;;  %v231_v32 = vmul.f32 %v402_v30, %v207_v31 }
 0x21f   :  { %v404_v34 = vpop.eup %403 }
 0x220   :  { %v235_v36 = vmul.f32 %v404_v34, %v211_v35  ;;  %v406_v38 = vpop.eup %405 }
 0x221   :  { %v229_v40 = vmul.f32 %v406_v38, %v205_v39  ;;  %v408_v43 = vpop.eup %407 }
 0x222   :  { %258 = vperm.xlu1 %385, %v232_v29   ;;  %v233_v45 = vmul.f32 %v408_v43, %v209_v44 }
 0x226   :  { %253 = vperm.xlu1 %385, %v231_v32  }
 0x22a   :  { %273 = vperm.xlu1 %385, %v235_v36  }
 0x22e   :  { %243 = vperm.xlu1 %385, %v229_v40  }
 0x232   :  { %263 = vperm.xlu1 %385, %v233_v45  }
 0x236   :  { %324 = vperm.xlu1 %385, %v290_v46  }
 0x290   :  { %v249_v53 = vpop.permute.xlu1 %248 }
 0x291   :  { %v278_v54 = vmul.f32 %v249_v53, %v453_v18 }
 0x293   :  { %v334_v55 = vadd.f32 %v305_v49, %v278_v54 }
 0x294   :  { %v239_v56 = vpop.permute.xlu0 %238 }
 0x295   :  { %342 = vst [vmem:[%s569_s4 + $0x10] sm:$0xff] %v334_v55  ;;  %v276_v57 = vmul.f32 %v239_v56, %v455_v20 }
 0x297   :  { %v332_v58 = vadd.f32 %v295_v47, %v276_v57 }
 0x298   :  { %v330_v2 = vpop.permute.xlu0 %329 }
 0x299   :  { %340 = vst [vmem:[%s569_s4] sm:$0xff] %v332_v58 }
 0x29d   :  { %v269_v59 = vpop.permute.xlu1 %268 }
 0x29e   :  { %v282_v7 = vmul.f32 %v269_v59, %v475_v41 }
 0x2a1   :  { %v259_v60 = vpop.permute.xlu1 %258 }
 0x2a2   :  { %v280_v61 = vmul.f32 %v259_v60, %v461_v27 }
 0x2a4   :  { %v336_v62 = vadd.f32 %v315_v51, %v280_v61 }
 0x2a5   :  { %v254_v63 = vpop.permute.xlu1 %253 }
 0x2a6   :  { %344 = vst [vmem:[%s569_s4 + $0x20] sm:$0xff] %v336_v62  ;;  %v279_v18 = vmul.f32 %v254_v63, %v459_v25 }
 0x2a8   :  { %v335_v0 = vadd.f32 %v310_v50, %v279_v18 }
 0x2a9   :  { %v274_v1 = vpop.permute.xlu1 %273 }
 0x2aa   :  { %343 = vst [vmem:[%s569_s4 + $0x18] sm:$0xff] %v335_v0  ;;  %v283_v20 = vmul.f32 %v274_v1, %v477_v42 }
 0x2ac   :  { %v339_v3 = vadd.f32 %v330_v2, %v283_v20 }
 0x2ad   :  { %v244_v4 = vpop.permute.xlu1 %243 }
 0x2ae   :  { %347 = vst [vmem:[%s569_s4 + $0x38] sm:$0xff] %v339_v3  ;;  %v277_v27 = vmul.f32 %v244_v4, %v467_v33 }
 0x2b0   :  { %v333_v5 = vadd.f32 %v300_v48, %v277_v27 }
 0x2b1   :  { %v264_v6 = vpop.permute.xlu1 %263 }
 0x2b2   :  { %341 = vst [vmem:[%s569_s4 + $0x8] sm:$0xff] %v333_v5  ;;  %v281_v25 = vmul.f32 %v264_v6, %v471_v37 }
 0x2b4   :  { %v337_v42 = vadd.f32 %v320_v52, %v281_v25 }
 0x2b5   :  { %v325_v8 = vpop.permute.xlu1 %324 }
 0x2b6   :  { %345 = vst [vmem:[%s569_s4 + $0x28] sm:$0xff] %v337_v42  ;;  %v338_v9 = vadd.f32 %v325_v8, %v282_v7 }
 0x2b8   :  { %346 = vst [vmem:[%s569_s4 + $0x30] sm:$0xff] %v338_v9 }

// kernel: resnet20_forward.38
= control target key start
LH: loop header
LB: loop body
LE: loop exit
PB: predicated region body
PF: predicated region fallthrough
CT: control target
= control target key end

     0   :  { %vm433_vm0 = vcmask 523264   ;;  %s1467_s0 = inlined_call_operand.vmem [shape: bf16[576,128], index: 0, kind: input, shape index: {}]   ;;  %s1468_s1 = inlined_call_operand.vmem [shape: bf16[64,576], index: 1, kind: input, shape index: {}]   ;;  %s1469_s3 = inlined_call_operand.vmem [shape: f32[64,1], index: 3, kind: input, shape index: {}]   ;;  %s1470_s2 = inlined_call_operand.vmem [shape: f32[64,1], index: 2, kind: input, shape index: {}]   ;;  %s1471_s4 = inlined_call_operand.vmem [shape: f32[64,128], index: 4, kind: input, shape index: {}]   ;;  %s1472_s5 = inlined_call_operand.vmem [shape: f32[64,128], index: 5, kind: output, shape index: {}]  }
   0x1   :  { %v1052_v0 = vld [vmem:[%s1467_s0 + $0x40] sm:$0xff]   ;;  %v1056_v4 = vld [vmem:[%s1467_s0 + $0x48] sm:$0xff]   ;;  %v1060_v8 = vld [vmem:[%s1467_s0 + $0x50] sm:$0xff]  }
   0x2   :  { %v1053_v1 = vld [vmem:[%s1467_s0 + $0xc0] sm:$0xff]   ;;  %937 = vmatprep.subr.bf16.mxu0 %v1052_v0  ;;  %v1057_v5 = vld [vmem:[%s1467_s0 + $0xc8] sm:$0xff]   ;;  %v1061_v9 = vld [vmem:[%s1467_s0 + $0xd0] sm:$0xff]  }
   0x3   :  { %v1054_v2 = vld [vmem:[%s1467_s0] sm:$0xff]   ;;  %977 = vmatprep.subr.bf16.mxu1 %v1053_v1  ;;  %v1058_v6 = vld [vmem:[%s1467_s0 + $0x8] sm:$0xff]   ;;  %v1062_v10 = vld [vmem:[%s1467_s0 + $0x10] sm:$0xff]  }
   0x4   :  { %v1055_v3 = vld [vmem:[%s1467_s0 + $0x80] sm:$0xff]   ;;  %938 = vmatpush3.bf16.msra.mxu0 %v1054_v2  ;;  %v1059_v7 = vld [vmem:[%s1467_s0 + $0x88] sm:$0xff]   ;;  %v1063_v11 = vld [vmem:[%s1467_s0 + $0x90] sm:$0xff]  }
   0x5   :  { %978 = vmatpush3.bf16.msra.mxu1 %v1055_v3  ;;  %939 = vmatprep.subr.bf16.mxu0 %v1056_v4  ;;  %v1064_v12 = vld [vmem:[%s1467_s0 + $0x58] sm:$0xff]   ;;  %v1068_v16 = vld [vmem:[%s1467_s0 + $0x60] sm:$0xff]   ;;  %v1072_v20 = vld [vmem:[%s1467_s0 + $0x68] sm:$0xff]  }
   0x6   :  { %979 = vmatprep.subr.bf16.mxu1 %v1057_v5  ;;  %v1065_v13 = vld [vmem:[%s1467_s0 + $0xd8] sm:$0xff]   ;;  %v1069_v17 = vld [vmem:[%s1467_s0 + $0xe0] sm:$0xff]   ;;  %v1073_v21 = vld [vmem:[%s1467_s0 + $0xe8] sm:$0xff]  }
   0x7   :  { %v1066_v14 = vld [vmem:[%s1467_s0 + $0x18] sm:$0xff]   ;;  %v1070_v18 = vld [vmem:[%s1467_s0 + $0x20] sm:$0xff]   ;;  %v1074_v22 = vld [vmem:[%s1467_s0 + $0x28] sm:$0xff]  }
   0x8   :  { %940 = vmatpush3.bf16.msra.mxu0 %v1058_v6  ;;  %v1067_v15 = vld [vmem:[%s1467_s0 + $0x98] sm:$0xff]   ;;  %v1071_v19 = vld [vmem:[%s1467_s0 + $0xa0] sm:$0xff]   ;;  %v1075_v23 = vld [vmem:[%s1467_s0 + $0xa8] sm:$0xff]  }
   0x9   :  { %980 = vmatpush3.bf16.msra.mxu1 %v1059_v7  ;;  %941 = vmatprep.subr.bf16.mxu0 %v1060_v8  ;;  %v1076_v24 = vld [vmem:[%s1467_s0 + $0x70] sm:$0xff]   ;;  %v1080_v28 = vld [vmem:[%s1467_s0 + $0x78] sm:$0xff]   ;;  %v1089_v35 = vld [vmem:[%s1468_s1 + $0xc] ss:$20 sps:$4 sm:$0xff]  }
   0xa   :  { %981 = vmatprep.subr.bf16.mxu1 %v1061_v9  ;;  %v1077_v25 = vld [vmem:[%s1467_s0 + $0xf0] sm:$0xff]   ;;  %v1081_v29 = vld [vmem:[%s1467_s0 + $0xf8] sm:$0xff]   ;;  %v1090_v36 = vld [vmem:[%s1467_s0 + $0x100] sm:$0xff]   ;;  %543 = vmatprep.mubr.bf16.mxu1 %v1089_v35 }
   0xb   :  { %v1078_v26 = vld [vmem:[%s1467_s0 + $0x30] sm:$0xff]   ;;  %v1082_v30 = vld [vmem:[%s1467_s0 + $0x38] sm:$0xff]   ;;  %v1091_v37 = vld [vmem:[%s1468_s1 + $0x2c] ss:$20 sps:$4 sm:$0xff]  }
   0xc   :  { %942 = vmatpush3.bf16.msra.mxu0 %v1062_v10  ;;  %v1079_v27 = vld [vmem:[%s1467_s0 + $0xb0] sm:$0xff]   ;;  %v1083_v31 = vld [vmem:[%s1467_s0 + $0xb8] sm:$0xff]   ;;  %v1097_v39 = vld [vmem:[%s1467_s0 + $0x108] sm:$0xff]  }
   0xd   :  { %982 = vmatpush3.bf16.msra.mxu1 %v1063_v11  ;;  %943 = vmatprep.subr.bf16.mxu0 %v1064_v12  ;;  %v1084_v32 = vld [vmem:[%s1468_s1] ss:$20 sps:$4 sm:$0xff]   ;;  %v1086_v33 = vld [vmem:[%s1468_s1 + $0x4] ss:$20 sps:$4 sm:$0xff]   ;;  %v1087_v34 = vld [vmem:[%s1468_s1 + $0x8] ss:$20 sps:$4 sm:$0xff]  }
   0xe   :  { %983 = vmatprep.subr.bf16.mxu1 %v1065_v13  ;;  %478 = vmatprep.mubr.bf16.mxu0 %v1086_v33  ;;  %v1093_v38 = vld [vmem:[%s1468_s1 + $0x34] ss:$20 sps:$4 sm:$0xff]   ;;  %v1096_v41 = vld [vmem:[%s1468_s1 + $0x30] ss:$20 sps:$4 sm:$0xff]   ;;  %v1111_v45 = vld [vmem:[%s1467_s0 + $0x118] sm:$0xff]  }
   0xf   :  { %v1095_v40 = vld [vmem:[%s1468_s1 + $0x28] ss:$20 sps:$4 sm:$0xff]   ;;  %v1104_v44 = vld [vmem:[%s1467_s0 + $0x110] sm:$0xff]   ;;  %v1103_v47 = vld [vmem:[%s1468_s1 + $0x58] ss:$20 sps:$4 sm:$0xff]  }
  0x10   :  { %944 = vmatpush3.bf16.msra.mxu0 %v1066_v14  ;;  %v1098_v42 = vld [vmem:[%s1468_s1 + $0x54] ss:$20 sps:$4 sm:$0xff]   ;;  %v1100_v43 = vld [vmem:[%s1468_s1 + $0x5c] ss:$20 sps:$4 sm:$0xff]   ;;  %v1107_v49 = vld [vmem:[%s1468_s1 + $0x84] ss:$20 sps:$4 sm:$0xff]  }
  0x11   :  { %984 = vmatpush3.bf16.msra.mxu1 %v1067_v15  ;;  %945 = vmatprep.subr.bf16.mxu0 %v1068_v16  ;;  %v1102_v46 = vld [vmem:[%s1468_s1 + $0x50] ss:$20 sps:$4 sm:$0xff]   ;;  %v1109_v50 = vld [vmem:[%s1468_s1 + $0x78] ss:$20 sps:$4 sm:$0xff]   ;;  %v1110_v51 = vld [vmem:[%s1468_s1 + $0x80] ss:$20 sps:$4 sm:$0xff]  }
  0x12   :  { %985 = vmatprep.subr.bf16.mxu1 %v1069_v17  ;;  %v1105_v48 = vld [vmem:[%s1468_s1 + $0x7c] ss:$20 sps:$4 sm:$0xff]   ;;  %v1113_v53 = vld [vmem:[%s1468_s1 + $0x60] ss:$20 sps:$4 sm:$0xff]   ;;  %v1114_v54 = vld [vmem:[%s1468_s1 + $0x38] ss:$20 sps:$4 sm:$0xff]  }
  0x13   :  { %v1112_v52 = vld [vmem:[%s1468_s1 + $0x10] ss:$20 sps:$4 sm:$0xff]   ;;  %v1115_v55 = vld [vmem:[%s1468_s1 + $0x88] ss:$20 sps:$4 sm:$0xff]  }
  0x14   :  { %946 = vmatpush3.bf16.msra.mxu0 %v1070_v18 }
  0x15   :  { %986 = vmatpush3.bf16.msra.mxu1 %v1071_v19  ;;  %947 = vmatprep.subr.bf16.mxu0 %v1072_v20 }
  0x16   :  { %987 = vmatprep.subr.bf16.mxu1 %v1073_v21 }
  0x18   :  { %948 = vmatpush3.bf16.msra.mxu0 %v1074_v22 }
  0x19   :  { %988 = vmatpush3.bf16.msra.mxu1 %v1075_v23  ;;  %949 = vmatprep.subr.bf16.mxu0 %v1076_v24 }
  0x1a   :  { %989 = vmatprep.subr.bf16.mxu1 %v1077_v25 }
  0x1c   :  { %950 = vmatpush3.bf16.msra.mxu0 %v1078_v26 }
  0x1d   :  { %990 = vmatpush3.bf16.msra.mxu1 %v1079_v27  ;;  %951 = vmatprep.subr.bf16.mxu0 %v1080_v28 }
  0x1e   :  { %991 = vmatprep.subr.bf16.mxu1 %v1081_v29 }
  0x20   :  { %952 = vmatpush3.bf16.msra.mxu0 %v1082_v30 }
  0x21   :  { %992 = vmatpush3.bf16.msra.mxu1 %v1083_v31  ;;  %1025 = vmatprep.subr.bf16.mxu0 %v1090_v36 }
  0x22   :  { %1041 = vmatprep.subr.bf16.mxu1 %v1090_v36 }
  0x23   :  { %479 = vmatmul.mubr.bf16.vlgmr.msra.gmra.mrb[0].mxu0 %v1084_v32 }
  0x24   :  { %544 = vmatmul.mubr.bf16.vlgmr.msra.gmra.mrb[0].mxu1 %v1087_v34  ;;  %1026 = vmatpush3.bf16.msra.mxu0 %v1090_v36 }
  0x25   :  { %1045 = vmatpush3.bf16.msra.mxu1 %v1090_v36  ;;  %486 = vmatprep.mubr.bf16.mxu0 %v1091_v37 }
  0x26   :  { %551 = vmatprep.mubr.bf16.mxu1 %v1093_v38  ;;  %1027 = vmatprep.subr.bf16.mxu0 %v1097_v39 }
  0x27   :  { %1042 = vmatprep.subr.bf16.mxu1 %v1097_v39 }
  0x28   :  { %1028 = vmatpush3.bf16.msra.mxu0 %v1097_v39 }
  0x29   :  { %1046 = vmatpush3.bf16.msra.mxu1 %v1097_v39  ;;  %1029 = vmatprep.subr.bf16.mxu0 %v1104_v44 }
  0x2a   :  { %1043 = vmatprep.subr.bf16.mxu1 %v1104_v44 }
  0x2b   :  { %487 = vmatmul.mubr.bf16.gmra.mrb[4].mxu0 %v1095_v40 }
  0x2c   :  { %552 = vmatmul.mubr.bf16.gmra.mrb[4].mxu1 %v1096_v41  ;;  %494 = vmatprep.mubr.bf16.mxu0 %v1098_v42 }
  0x2d   :  { %559 = vmatprep.mubr.bf16.mxu1 %v1100_v43  ;;  %1030 = vmatpush3.bf16.msra.mxu0 %v1104_v44 }
  0x2e   :  { %1047 = vmatpush3.bf16.msra.mxu1 %v1104_v44  ;;  %1031 = vmatprep.subr.bf16.mxu0 %v1111_v45 }
  0x2f   :  { %1044 = vmatprep.subr.bf16.mxu1 %v1111_v45 }
  0x31   :  { %1032 = vmatpush3.bf16.msra.mxu0 %v1111_v45 }
  0x32   :  { %1048 = vmatpush3.bf16.msra.mxu1 %v1111_v45 }
  0x33   :  { %495 = vmatmul.mubr.bf16.gmra.mrb[8].mxu0 %v1102_v46 }
  0x34   :  { %560 = vmatmul.mubr.bf16.gmra.mrb[8].mxu1 %v1103_v47  ;;  %502 = vmatprep.mubr.bf16.mxu0 %v1105_v48 }
  0x35   :  { %567 = vmatprep.mubr.bf16.mxu1 %v1107_v49 }
  0x3b   :  { %503 = vmatmul.mubr.bf16.gmra.mrb[12].mxu0 %v1109_v50 }
  0x3c   :  { %568 = vmatmul.mubr.bf16.gmra.mrb[12].mxu1 %v1110_v51  ;;  %1033 = vmatprep.mubr.msk.bf16.mxu0 %vm433_vm0, %v1112_v52 }
  0x3d   :  { %1037 = vmatprep.mubr.msk.bf16.mxu1 %vm433_vm0, %v1113_v53 }
  0x43   :  { %1034 = vmatmul.mubr.msk.bf16.vlgmr.msra.gmra.mrb[16].mxu0 %vm433_vm0, %v1114_v54 }
  0x44   :  { %1038 = vmatmul.mubr.msk.bf16.vlgmr.msra.gmra.mrb[16].mxu1 %vm433_vm0, %v1115_v55 }
  0xf6   :  { %v953_v56 = vpop.f32.mrb[0].mxu0 }
  0xf7   :  { %v993_v57 = vpop.f32.mrb[0].mxu1  ;;  %v954_v58 = vpop.f32.mrb[1].mxu0 }
  0xf8   :  { %v955_v59 = vadd.f32 %v954_v58, %v953_v56  ;;  %v994_v60 = vpop.f32.mrb[1].mxu1  ;;  %v956_v61 = vpop.f32.mrb[2].mxu0 }
  0xf9   :  { %v995_v62 = vadd.f32 %v994_v60, %v993_v57  ;;  %v996_v63 = vpop.f32.mrb[2].mxu1  ;;  %v957_v0 = vpop.f32.mrb[3].mxu0 }
  0xfa   :  { %v958_v1 = vadd.f32 %v957_v0, %v956_v61  ;;  %v997_v2 = vpop.f32.mrb[3].mxu1 }
  0xfb   :  { %v998_v3 = vadd.f32 %v997_v2, %v996_v63  ;;  %v546_v4 = vadd.f32 %v995_v62, %v955_v59 }
  0xfd   :  { %v549_v5 = vadd.f32 %v998_v3, %v958_v1 }
  0xfe   :  { %v959_v6 = vpop.f32.mrb[4].mxu0 }
  0xff   :  { %v999_v7 = vpop.f32.mrb[4].mxu1  ;;  %v960_v8 = vpop.f32.mrb[5].mxu0 }
 0x100   :  { %v961_v9 = vadd.f32 %v960_v8, %v959_v6  ;;  %v1000_v10 = vpop.f32.mrb[5].mxu1  ;;  %v962_v11 = vpop.f32.mrb[6].mxu0 }
 0x101   :  { %v1001_v12 = vadd.f32 %v1000_v10, %v999_v7  ;;  %v1002_v13 = vpop.f32.mrb[6].mxu1  ;;  %v963_v14 = vpop.f32.mrb[7].mxu0 }
 0x102   :  { %v964_v15 = vadd.f32 %v963_v14, %v962_v11  ;;  %v1003_v16 = vpop.f32.mrb[7].mxu1 }
 0x103   :  { %v1004_v17 = vadd.f32 %v1003_v16, %v1002_v13  ;;  %v554_v18 = vadd.f32 %v1001_v12, %v961_v9 }
 0x105   :  { %v557_v19 = vadd.f32 %v1004_v17, %v964_v15 }
 0x106   :  { %v965_v20 = vpop.f32.mrb[8].mxu0 }
 0x107   :  { %v1005_v21 = vpop.f32.mrb[8].mxu1  ;;  %v966_v22 = vpop.f32.mrb[9].mxu0 }
 0x108   :  { %v967_v23 = vadd.f32 %v966_v22, %v965_v20  ;;  %v1006_v24 = vpop.f32.mrb[9].mxu1  ;;  %v968_v25 = vpop.f32.mrb[10].mxu0 }
 0x109   :  { %v1007_v26 = vadd.f32 %v1006_v24, %v1005_v21  ;;  %v1008_v27 = vpop.f32.mrb[10].mxu1  ;;  %v969_v28 = vpop.f32.mrb[11].mxu0 }
 0x10a   :  { %v970_v29 = vadd.f32 %v969_v28, %v968_v25  ;;  %v1009_v30 = vpop.f32.mrb[11].mxu1 }
 0x10b   :  { %v1010_v31 = vadd.f32 %v1009_v30, %v1008_v27  ;;  %v562_v32 = vadd.f32 %v1007_v26, %v967_v23 }
 0x10d   :  { %v565_v33 = vadd.f32 %v1010_v31, %v970_v29 }
 0x10e   :  { %v971_v34 = vpop.f32.mrb[12].mxu0 }
 0x10f   :  { %v1011_v35 = vpop.f32.mrb[12].mxu1  ;;  %v972_v36 = vpop.f32.mrb[13].mxu0 }
 0x110   :  { %v973_v37 = vadd.f32 %v972_v36, %v971_v34  ;;  %v1012_v38 = vpop.f32.mrb[13].mxu1  ;;  %v974_v39 = vpop.f32.mrb[14].mxu0  ;;  %v786_v34 = vld [vmem:[%s1469_s3 + $0x8] sm:$0xff]  ;;  %v788_v36 = vld [vmem:[%s1469_s3 + $0x18] sm:$0xff] }
 0x111   :  { %v1013_v40 = vadd.f32 %v1012_v38, %v1011_v35  ;;  %v1014_v41 = vpop.f32.mrb[14].mxu1  ;;  %v975_v42 = vpop.f32.mrb[15].mxu0  ;;  %v787_v35 = vld [vmem:[%s1469_s3 + $0x10] sm:$0xff]  ;;  %v790_v38 = vld [vmem:[%s1469_s3 + $0x28] sm:$0xff] }
 0x112   :  { %v976_v43 = vadd.f32 %v975_v42, %v974_v39  ;;  %v1015_v44 = vpop.f32.mrb[15].mxu1 }
 0x113   :  { %v1016_v45 = vadd.f32 %v1015_v44, %v1014_v41  ;;  %v570_v46 = vadd.f32 %v1013_v40, %v973_v37  ;;  %v789_v37 = vld [vmem:[%s1469_s3 + $0x20] sm:$0xff] }
 0x115   :  { %v573_v47 = vadd.f32 %v1016_v45, %v976_v43 }
 0x116   :  { %v1035_v48 = vpop.f32.mrb[16].mxu0 }
 0x117   :  { %v619_v49 = vadd.f32 %v1035_v48, %v554_v18  ;;  %v1039_v50 = vpop.f32.mrb[16].mxu1  ;;  %v610_v51 = vpop.f32.mrb[17].mxu0 }
 0x118   :  { %v635_v52 = vadd.f32 %v1039_v50, %v570_v46  ;;  %v611_v53 = vadd.f32 %v610_v51, %v546_v4  ;;  %v626_v54 = vpop.f32.mrb[17].mxu1  ;;  %v1036_v55 = vpop.f32.mrb[18].mxu0  ;;  %v707_v51 = vld [vmem:[%s1470_s2 + $0x10] sm:$0xff] }
 0x119   :  { %v627_v56 = vadd.f32 %v626_v54, %v562_v32  ;;  %v622_v57 = vadd.f32 %v1036_v55, %v557_v19  ;;  %v1040_v58 = vpop.f32.mrb[18].mxu1  ;;  %v613_v59 = vpop.f32.mrb[19].mxu0  ;;  %645 = vadd.xlane.f32.xlu1 %v619_v49  ;;  %v1132_v32 = vmov 0  }
 0x11a   :  { %v638_v60 = vadd.f32 %v1040_v58, %v573_v47  ;;  %v614_v61 = vadd.f32 %v613_v59, %v549_v5  ;;  %v629_v62 = vpop.f32.mrb[19].mxu1  ;;  %641 = vadd.xlane.f32.xlu0 %v611_v53  ;;  %1050 = vset.pattern.permute.xlu1 %v1132_v32  ;;  %v705_v59 = vld [vmem:[%s1470_s2] sm:$0xff] }
 0x11b   :  { %v630_v63 = vadd.f32 %v629_v62, %v565_v33  ;;  %1051 = vset.pattern.permute.xlu0 %v1132_v32  ;;  %v785_v33 = vld [vmem:[%s1469_s3] sm:$0xff]  ;;  %v791_v32 = vld [vmem:[%s1469_s3 + $0x30] sm:$0xff] }
 0x11d   :  { %647 = vadd.xlane.f32.xlu1 %v622_v57 }
 0x11e   :  { %649 = vadd.xlane.f32.xlu0 %v627_v56 }
 0x121   :  { %651 = vadd.xlane.f32.xlu1 %v630_v63 }
 0x122   :  { %643 = vadd.xlane.f32.xlu0 %v614_v61 }
 0x125   :  { %655 = vadd.xlane.f32.xlu1 %v638_v60 }
 0x126   :  { %653 = vadd.xlane.f32.xlu0 %v635_v52 }
 0x1a6   :  { %v646_v0 = vpop.xlane.xlu1 %645 }
 0x1a7   :  { %v659_v1 = vmul.f32 0.0078125, %v646_v0  ;;  %v642_v2 = vpop.xlane.xlu0 %641  ;;  %v792_v0 = vld [vmem:[%s1469_s3 + $0x38] sm:$0xff] }
 0x1a8   :  { %v657_v3 = vmul.f32 0.0078125, %v642_v2 }
 0x1a9   :  { %v1331_v4 = vsub.f32 %v619_v49, %v659_v1 }
 0x1aa   :  { %v648_v6 = vpop.xlane.xlu1 %647  ;;  %v1333_v7 = vsub.f32 %v611_v53, %v657_v3  ;;  %v711_v3 = vld [vmem:[%s1470_s2 + $0x30] sm:$0xff] }
 0x1ab   :  { %v660_v8 = vmul.f32 0.0078125, %v648_v6  ;;  %v650_v5 = vpop.xlane.xlu0 %649  ;;  %v675_v9 = vmul.f32 %v1331_v4, %v1331_v4 }
 0x1ac   :  { %v661_v10 = vmul.f32 0.0078125, %v650_v5  ;;  %v673_v16 = vmul.f32 %v1333_v7, %v1333_v7 }
 0x1ad   :  { %v1337_v11 = vsub.f32 %v622_v57, %v660_v8  ;;  %685 = vadd.xlane.f32.xlu0 %v675_v9 }
 0x1ae   :  { %v652_v12 = vpop.xlane.xlu1 %651  ;;  %v1339_v13 = vsub.f32 %v627_v56, %v661_v10 }
 0x1af   :  { %v644_v14 = vpop.xlane.xlu0 %643  ;;  %v676_v15 = vmul.f32 %v1337_v11, %v1337_v11  ;;  %v662_v17 = vmul.f32 0.0078125, %v652_v12  ;;  %v709_v12 = vld [vmem:[%s1470_s2 + $0x20] sm:$0xff] }
 0x1b0   :  { %v658_v18 = vmul.f32 0.0078125, %v644_v14  ;;  %v677_v22 = vmul.f32 %v1339_v13, %v1339_v13 }
 0x1b1   :  { %687 = vadd.xlane.f32.xlu1 %v676_v15  ;;  %681 = vadd.xlane.f32.xlu0 %v673_v16  ;;  %v1349_v23 = vsub.f32 %v630_v63, %v662_v17  ;;  %v708_v17 = vld [vmem:[%s1470_s2 + $0x18] sm:$0xff] }
 0x1b2   :  { %v1345_v19 = vsub.f32 %v614_v61, %v658_v18  ;;  %v656_v20 = vpop.xlane.xlu1 %655 }
 0x1b3   :  { %v654_v21 = vpop.xlane.xlu0 %653  ;;  %v664_v24 = vmul.f32 0.0078125, %v656_v20  ;;  %v678_v29 = vmul.f32 %v1349_v23, %v1349_v23 }
 0x1b4   :  { %v663_v25 = vmul.f32 0.0078125, %v654_v21  ;;  %v674_v26 = vmul.f32 %v1345_v19, %v1345_v19  ;;  %v712_v21 = vld [vmem:[%s1470_s2 + $0x38] sm:$0xff] }
 0x1b5   :  { %689 = vadd.xlane.f32.xlu0 %v677_v22  ;;  %v1355_v28 = vsub.f32 %v638_v60, %v664_v24 }
 0x1b6   :  { %v1353_v27 = vsub.f32 %v635_v52, %v663_v25  ;;  %683 = vadd.xlane.f32.xlu1 %v674_v26  ;;  %v706_v25 = vld [vmem:[%s1470_s2 + $0x8] sm:$0xff] }
 0x1b7   :  { %v680_v31 = vmul.f32 %v1355_v28, %v1355_v28 }
 0x1b8   :  { %v679_v30 = vmul.f32 %v1353_v27, %v1353_v27 }
 0x1ba   :  { %691 = vadd.xlane.f32.xlu1 %v678_v29  ;;  %693 = vadd.xlane.f32.xlu0 %v679_v30  ;;  %v710_v30 = vld [vmem:[%s1470_s2 + $0x28] sm:$0xff] }
 0x1be   :  { %695 = vadd.xlane.f32.xlu1 %v680_v31 }
 0x1cf   :  { %795 = vperm.xlu1 %1050, %v785_v33  }
 0x1d0   :  { %800 = vperm.xlu0 %1051, %v786_v34  }
 0x1d3   :  { %805 = vperm.xlu1 %1050, %v787_v35  }
 0x1d4   :  { %810 = vperm.xlu0 %1051, %v788_v36  }
 0x1d7   :  { %815 = vperm.xlu1 %1050, %v789_v37  }
 0x1d8   :  { %820 = vperm.xlu0 %1051, %v790_v38  }
 0x23a   :  { %v686_v39 = vpop.xlane.xlu0 %685 }
 0x23b   :  { %v699_v40 = vmul.f32 0.0078125, %v686_v39 }
 0x23d   :  { %v715_v41 = vadd.f32 1e-05, %v699_v40 }
 0x23e   :  { %v688_v42 = vpop.xlane.xlu1 %687  ;;  %v682_v43 = vpop.xlane.xlu0 %681 }
 0x23f   :  { %1116 = vrsqrt.f32 %v715_v41  ;;  %v697_v44 = vmul.f32 0.0078125, %v682_v43  ;;  %v700_v56 = vmul.f32 0.0078125, %v688_v42  ;;  %v843_v41 = vld [vmem:[%s1471_s4 + $0x10] sm:$0xff] }
 0x241   :  { %v713_v45 = vadd.f32 1e-05, %v697_v44  ;;  %v716_v61 = vadd.f32 1e-05, %v700_v56 }
 0x242   :  { %v690_v46 = vpop.xlane.xlu0 %689 }
 0x243   :  { %v684_v47 = vpop.xlane.xlu1 %683  ;;  %1118 = vrsqrt.f32 %v713_v45  ;;  %v701_v48 = vmul.f32 0.0078125, %v690_v46 }
 0x244   :  { %v698_v1 = vmul.f32 0.0078125, %v684_v47  ;;  %v841_v47 = vld [vmem:[%s1471_s4] sm:$0xff] }
 0x245   :  { %v717_v57 = vadd.f32 1e-05, %v701_v48 }
 0x246   :  { %v714_v8 = vadd.f32 1e-05, %v698_v1 }
 0x247   :  { %v692_v49 = vpop.xlane.xlu1 %691  ;;  %v694_v50 = vpop.xlane.xlu0 %693 }
 0x248   :  { %v703_v52 = vmul.f32 0.0078125, %v694_v50  ;;  %v702_v5 = vmul.f32 0.0078125, %v692_v49 }
 0x249   :  { %v1117_v53 = vpop.eup %1116 }
 0x24a   :  { %v719_v54 = vadd.f32 1e-05, %v703_v52  ;;  %v731_v55 = vmul.f32 %v1117_v53, %v707_v51  ;;  %v718_v14 = vadd.f32 1e-05, %v702_v5  ;;  %v845_v52 = vld [vmem:[%s1471_s4 + $0x20] sm:$0xff] }
 0x24b   :  { %v696_v58 = vpop.xlane.xlu1 %695 }
 0x24c   :  { %749 = vperm.xlu1 %1050, %v731_v55   ;;  %1120 = vrsqrt.f32 %v719_v54  ;;  %v704_v62 = vmul.f32 0.0078125, %v696_v58 }
 0x24d   :  { %v1119_v60 = vpop.eup %1118  ;;  %1122 = vrsqrt.f32 %v717_v57  ;;  %v844_v57 = vld [vmem:[%s1471_s4 + $0x18] sm:$0xff] }
 0x24e   :  { %v729_v63 = vmul.f32 %v1119_v60, %v705_v59  ;;  %1124 = vrsqrt.f32 %v716_v61  ;;  %v720_v2 = vadd.f32 1e-05, %v704_v62 }
 0x24f   :  { %v796_v33 = vpop.permute.xlu1 %795  ;;  %v801_v34 = vpop.permute.xlu0 %800 }
 0x250   :  { %739 = vperm.xlu0 %1051, %v729_v63   ;;  %1126 = vrsqrt.f32 %v720_v2  ;;  %v848_v63 = vld [vmem:[%s1471_s4 + $0x38] sm:$0xff] }
 0x251   :  { %1128 = vrsqrt.f32 %v714_v8 }
 0x252   :  { %1130 = vrsqrt.f32 %v718_v14 }
 0x253   :  { %v806_v35 = vpop.permute.xlu1 %805  ;;  %v811_v36 = vpop.permute.xlu0 %810 }
 0x254   :  { %830 = vperm.xlu0 %1051, %v792_v0  }
 0x256   :  { %v1121_v6 = vpop.eup %1120 }
 0x257   :  { %v735_v9 = vmul.f32 %v1121_v6, %v711_v3  ;;  %v1123_v10 = vpop.eup %1122  ;;  %v816_v37 = vpop.permute.xlu1 %815  ;;  %v842_v6 = vld [vmem:[%s1471_s4 + $0x8] sm:$0xff] }
 0x258   :  { %v733_v15 = vmul.f32 %v1123_v10, %v709_v12  ;;  %v1125_v16 = vpop.eup %1124  ;;  %v821_v38 = vpop.permute.xlu0 %820  ;;  %v846_v12 = vld [vmem:[%s1471_s4 + $0x28] sm:$0xff] }
 0x259   :  { %769 = vperm.xlu1 %1050, %v735_v9   ;;  %v732_v18 = vmul.f32 %v1125_v16, %v708_v17  ;;  %v847_v16 = vld [vmem:[%s1471_s4 + $0x30] sm:$0xff] }
 0x25a   :  { %v1127_v20 = vpop.eup %1126 }
 0x25b   :  { %v736_v22 = vmul.f32 %v1127_v20, %v712_v21  ;;  %v1129_v24 = vpop.eup %1128 }
 0x25c   :  { %v730_v26 = vmul.f32 %v1129_v24, %v706_v25  ;;  %v1131_v29 = vpop.eup %1130 }
 0x25d   :  { %759 = vperm.xlu1 %1050, %v733_v15   ;;  %v734_v31 = vmul.f32 %v1131_v29, %v710_v30 }
 0x261   :  { %754 = vperm.xlu1 %1050, %v732_v18  }
 0x265   :  { %774 = vperm.xlu1 %1050, %v736_v22  }
 0x269   :  { %744 = vperm.xlu1 %1050, %v730_v26  }
 0x26d   :  { %764 = vperm.xlu1 %1050, %v734_v31  }
 0x271   :  { %825 = vperm.xlu1 %1050, %v791_v32  }
 0x2cb   :  { %v750_v39 = vpop.permute.xlu1 %749 }
 0x2cc   :  { %v779_v40 = vmul.f32 %v750_v39, %v1331_v4 }
 0x2ce   :  { %v835_v42 = vadd.f32 %v806_v35, %v779_v40 }
 0x2cf   :  { %v740_v44 = vpop.permute.xlu0 %739 }
 0x2d0   :  { %v851_v43 = vadd.f32 %v843_v41, %v835_v42  ;;  %v777_v45 = vmul.f32 %v740_v44, %v1333_v7 }
 0x2d2   :  { %v859_v46 = vmax.f32 %v851_v43, 0.0  ;;  %v833_v48 = vadd.f32 %v796_v33, %v777_v45 }
 0x2d3   :  { %v831_v62 = vpop.permute.xlu0 %830 }
 0x2d4   :  { %867 = vst [vmem:[%s1472_s5 + $0x10] sm:$0xff] %v859_v46  ;;  %v849_v4 = vadd.f32 %v841_v47, %v833_v48 }
 0x2d6   :  { %v857_v49 = vmax.f32 %v849_v4, 0.0 }
 0x2d8   :  { %865 = vst [vmem:[%s1472_s5] sm:$0xff] %v857_v49  ;;  %v770_v50 = vpop.permute.xlu1 %769 }
 0x2dc   :  { %v760_v51 = vpop.permute.xlu1 %759 }
 0x2dd   :  { %v781_v7 = vmul.f32 %v760_v51, %v1339_v13 }
 0x2df   :  { %v837_v53 = vadd.f32 %v816_v37, %v781_v7 }
 0x2e0   :  { %v755_v54 = vpop.permute.xlu1 %754 }
 0x2e1   :  { %v853_v55 = vadd.f32 %v845_v52, %v837_v53  ;;  %v780_v56 = vmul.f32 %v755_v54, %v1337_v11 }
 0x2e3   :  { %v861_v58 = vmax.f32 %v853_v55, 0.0  ;;  %v836_v59 = vadd.f32 %v811_v36, %v780_v56 }
 0x2e4   :  { %v775_v60 = vpop.permute.xlu1 %774 }
 0x2e5   :  { %869 = vst [vmem:[%s1472_s5 + $0x20] sm:$0xff] %v861_v58  ;;  %v852_v13 = vadd.f32 %v844_v57, %v836_v59  ;;  %v784_v61 = vmul.f32 %v775_v60, %v1355_v28 }
 0x2e7   :  { %v860_v11 = vmax.f32 %v852_v13, 0.0  ;;  %v840_v0 = vadd.f32 %v831_v62, %v784_v61 }
 0x2e8   :  { %v745_v1 = vpop.permute.xlu1 %744 }
 0x2e9   :  { %868 = vst [vmem:[%s1472_s5 + $0x18] sm:$0xff] %v860_v11  ;;  %v856_v2 = vadd.f32 %v848_v63, %v840_v0  ;;  %v778_v3 = vmul.f32 %v745_v1, %v1345_v19  ;;  %v783_v19 = vmul.f32 %v770_v50, %v1353_v27 }
 0x2eb   :  { %v864_v28 = vmax.f32 %v856_v2, 0.0  ;;  %v834_v8 = vadd.f32 %v801_v34, %v778_v3 }
 0x2ec   :  { %v765_v5 = vpop.permute.xlu1 %764 }
 0x2ed   :  { %872 = vst [vmem:[%s1472_s5 + $0x38] sm:$0xff] %v864_v28  ;;  %v850_v9 = vadd.f32 %v842_v6, %v834_v8  ;;  %v782_v10 = vmul.f32 %v765_v5, %v1349_v23 }
 0x2ef   :  { %v858_v14 = vmax.f32 %v850_v9, 0.0  ;;  %v838_v15 = vadd.f32 %v821_v38, %v782_v10 }
 0x2f0   :  { %v826_v17 = vpop.permute.xlu1 %825 }
 0x2f1   :  { %866 = vst [vmem:[%s1472_s5 + $0x8] sm:$0xff] %v858_v14  ;;  %v854_v18 = vadd.f32 %v846_v12, %v838_v15  ;;  %v839_v20 = vadd.f32 %v826_v17, %v783_v19 }
 0x2f3   :  { %v862_v23 = vmax.f32 %v854_v18, 0.0  ;;  %v855_v21 = vadd.f32 %v847_v16, %v839_v20 }
 0x2f5   :  { %870 = vst [vmem:[%s1472_s5 + $0x28] sm:$0xff] %v862_v23  ;;  %v863_v27 = vmax.f32 %v855_v21, 0.0 }
 0x2f7   :  { %871 = vst [vmem:[%s1472_s5 + $0x30] sm:$0xff] %v863_v27 }

// kernel: resnet20_forward.39
= control target key start
LH: loop header
LB: loop body
LE: loop exit
PB: predicated region body
PF: predicated region fallthrough
CT: control target
= control target key end

     0   :  { %vm430_vm0 = vcmask 523264   ;;  %s1419_s0 = inlined_call_operand.vmem [shape: bf16[576,128], index: 0, kind: input, shape index: {}]   ;;  %s1420_s1 = inlined_call_operand.vmem [shape: bf16[64,576], index: 1, kind: input, shape index: {}]   ;;  %s1421_s3 = inlined_call_operand.vmem [shape: f32[64,1], index: 3, kind: input, shape index: {}]   ;;  %s1422_s2 = inlined_call_operand.vmem [shape: f32[64,1], index: 2, kind: input, shape index: {}]   ;;  %s1423_s4 = inlined_call_operand.vmem [shape: f32[64,128], index: 4, kind: output, shape index: {}]  }
   0x1   :  { %v1033_v0 = vld [vmem:[%s1419_s0 + $0x40] sm:$0xff]   ;;  %v1037_v4 = vld [vmem:[%s1419_s0 + $0x48] sm:$0xff]   ;;  %v1041_v8 = vld [vmem:[%s1419_s0 + $0x50] sm:$0xff]  }
   0x2   :  { %v1034_v1 = vld [vmem:[%s1419_s0 + $0xc0] sm:$0xff]   ;;  %918 = vmatprep.subr.bf16.mxu0 %v1033_v0  ;;  %v1038_v5 = vld [vmem:[%s1419_s0 + $0xc8] sm:$0xff]   ;;  %v1042_v9 = vld [vmem:[%s1419_s0 + $0xd0] sm:$0xff]  }
   0x3   :  { %v1035_v2 = vld [vmem:[%s1419_s0] sm:$0xff]   ;;  %958 = vmatprep.subr.bf16.mxu1 %v1034_v1  ;;  %v1039_v6 = vld [vmem:[%s1419_s0 + $0x8] sm:$0xff]   ;;  %v1043_v10 = vld [vmem:[%s1419_s0 + $0x10] sm:$0xff]  }
   0x4   :  { %v1036_v3 = vld [vmem:[%s1419_s0 + $0x80] sm:$0xff]   ;;  %919 = vmatpush3.bf16.msra.mxu0 %v1035_v2  ;;  %v1040_v7 = vld [vmem:[%s1419_s0 + $0x88] sm:$0xff]   ;;  %v1044_v11 = vld [vmem:[%s1419_s0 + $0x90] sm:$0xff]  }
   0x5   :  { %959 = vmatpush3.bf16.msra.mxu1 %v1036_v3  ;;  %920 = vmatprep.subr.bf16.mxu0 %v1037_v4  ;;  %v1045_v12 = vld [vmem:[%s1419_s0 + $0x58] sm:$0xff]   ;;  %v1049_v16 = vld [vmem:[%s1419_s0 + $0x60] sm:$0xff]   ;;  %v1053_v20 = vld [vmem:[%s1419_s0 + $0x68] sm:$0xff]  }
   0x6   :  { %960 = vmatprep.subr.bf16.mxu1 %v1038_v5  ;;  %v1046_v13 = vld [vmem:[%s1419_s0 + $0xd8] sm:$0xff]   ;;  %v1050_v17 = vld [vmem:[%s1419_s0 + $0xe0] sm:$0xff]   ;;  %v1054_v21 = vld [vmem:[%s1419_s0 + $0xe8] sm:$0xff]  }
   0x7   :  { %v1047_v14 = vld [vmem:[%s1419_s0 + $0x18] sm:$0xff]   ;;  %v1051_v18 = vld [vmem:[%s1419_s0 + $0x20] sm:$0xff]   ;;  %v1055_v22 = vld [vmem:[%s1419_s0 + $0x28] sm:$0xff]  }
   0x8   :  { %921 = vmatpush3.bf16.msra.mxu0 %v1039_v6  ;;  %v1048_v15 = vld [vmem:[%s1419_s0 + $0x98] sm:$0xff]   ;;  %v1052_v19 = vld [vmem:[%s1419_s0 + $0xa0] sm:$0xff]   ;;  %v1056_v23 = vld [vmem:[%s1419_s0 + $0xa8] sm:$0xff]  }
   0x9   :  { %961 = vmatpush3.bf16.msra.mxu1 %v1040_v7  ;;  %922 = vmatprep.subr.bf16.mxu0 %v1041_v8  ;;  %v1057_v24 = vld [vmem:[%s1419_s0 + $0x70] sm:$0xff]   ;;  %v1061_v28 = vld [vmem:[%s1419_s0 + $0x78] sm:$0xff]   ;;  %v1070_v35 = vld [vmem:[%s1420_s1 + $0xc] ss:$20 sps:$4 sm:$0xff]  }
   0xa   :  { %962 = vmatprep.subr.bf16.mxu1 %v1042_v9  ;;  %v1058_v25 = vld [vmem:[%s1419_s0 + $0xf0] sm:$0xff]   ;;  %v1062_v29 = vld [vmem:[%s1419_s0 + $0xf8] sm:$0xff]   ;;  %v1071_v36 = vld [vmem:[%s1419_s0 + $0x100] sm:$0xff]   ;;  %540 = vmatprep.mubr.bf16.mxu1 %v1070_v35 }
   0xb   :  { %v1059_v26 = vld [vmem:[%s1419_s0 + $0x30] sm:$0xff]   ;;  %v1063_v30 = vld [vmem:[%s1419_s0 + $0x38] sm:$0xff]   ;;  %v1072_v37 = vld [vmem:[%s1420_s1 + $0x2c] ss:$20 sps:$4 sm:$0xff]  }
   0xc   :  { %923 = vmatpush3.bf16.msra.mxu0 %v1043_v10  ;;  %v1060_v27 = vld [vmem:[%s1419_s0 + $0xb0] sm:$0xff]   ;;  %v1064_v31 = vld [vmem:[%s1419_s0 + $0xb8] sm:$0xff]   ;;  %v1078_v39 = vld [vmem:[%s1419_s0 + $0x108] sm:$0xff]  }
   0xd   :  { %963 = vmatpush3.bf16.msra.mxu1 %v1044_v11  ;;  %924 = vmatprep.subr.bf16.mxu0 %v1045_v12  ;;  %v1065_v32 = vld [vmem:[%s1420_s1] ss:$20 sps:$4 sm:$0xff]   ;;  %v1067_v33 = vld [vmem:[%s1420_s1 + $0x4] ss:$20 sps:$4 sm:$0xff]   ;;  %v1068_v34 = vld [vmem:[%s1420_s1 + $0x8] ss:$20 sps:$4 sm:$0xff]  }
   0xe   :  { %964 = vmatprep.subr.bf16.mxu1 %v1046_v13  ;;  %475 = vmatprep.mubr.bf16.mxu0 %v1067_v33  ;;  %v1074_v38 = vld [vmem:[%s1420_s1 + $0x34] ss:$20 sps:$4 sm:$0xff]   ;;  %v1077_v41 = vld [vmem:[%s1420_s1 + $0x30] ss:$20 sps:$4 sm:$0xff]   ;;  %v1092_v45 = vld [vmem:[%s1419_s0 + $0x118] sm:$0xff]  }
   0xf   :  { %v1076_v40 = vld [vmem:[%s1420_s1 + $0x28] ss:$20 sps:$4 sm:$0xff]   ;;  %v1085_v44 = vld [vmem:[%s1419_s0 + $0x110] sm:$0xff]   ;;  %v1084_v47 = vld [vmem:[%s1420_s1 + $0x58] ss:$20 sps:$4 sm:$0xff]  }
  0x10   :  { %925 = vmatpush3.bf16.msra.mxu0 %v1047_v14  ;;  %v1079_v42 = vld [vmem:[%s1420_s1 + $0x54] ss:$20 sps:$4 sm:$0xff]   ;;  %v1081_v43 = vld [vmem:[%s1420_s1 + $0x5c] ss:$20 sps:$4 sm:$0xff]   ;;  %v1088_v49 = vld [vmem:[%s1420_s1 + $0x84] ss:$20 sps:$4 sm:$0xff]  }
  0x11   :  { %965 = vmatpush3.bf16.msra.mxu1 %v1048_v15  ;;  %926 = vmatprep.subr.bf16.mxu0 %v1049_v16  ;;  %v1083_v46 = vld [vmem:[%s1420_s1 + $0x50] ss:$20 sps:$4 sm:$0xff]   ;;  %v1090_v50 = vld [vmem:[%s1420_s1 + $0x78] ss:$20 sps:$4 sm:$0xff]   ;;  %v1091_v51 = vld [vmem:[%s1420_s1 + $0x80] ss:$20 sps:$4 sm:$0xff]  }
  0x12   :  { %966 = vmatprep.subr.bf16.mxu1 %v1050_v17  ;;  %v1086_v48 = vld [vmem:[%s1420_s1 + $0x7c] ss:$20 sps:$4 sm:$0xff]   ;;  %v1094_v53 = vld [vmem:[%s1420_s1 + $0x60] ss:$20 sps:$4 sm:$0xff]   ;;  %v1095_v54 = vld [vmem:[%s1420_s1 + $0x38] ss:$20 sps:$4 sm:$0xff]  }
  0x13   :  { %v1093_v52 = vld [vmem:[%s1420_s1 + $0x10] ss:$20 sps:$4 sm:$0xff]   ;;  %v1096_v55 = vld [vmem:[%s1420_s1 + $0x88] ss:$20 sps:$4 sm:$0xff]  }
  0x14   :  { %927 = vmatpush3.bf16.msra.mxu0 %v1051_v18 }
  0x15   :  { %967 = vmatpush3.bf16.msra.mxu1 %v1052_v19  ;;  %928 = vmatprep.subr.bf16.mxu0 %v1053_v20 }
  0x16   :  { %968 = vmatprep.subr.bf16.mxu1 %v1054_v21 }
  0x18   :  { %929 = vmatpush3.bf16.msra.mxu0 %v1055_v22 }
  0x19   :  { %969 = vmatpush3.bf16.msra.mxu1 %v1056_v23  ;;  %930 = vmatprep.subr.bf16.mxu0 %v1057_v24 }
  0x1a   :  { %970 = vmatprep.subr.bf16.mxu1 %v1058_v25 }
  0x1c   :  { %931 = vmatpush3.bf16.msra.mxu0 %v1059_v26 }
  0x1d   :  { %971 = vmatpush3.bf16.msra.mxu1 %v1060_v27  ;;  %932 = vmatprep.subr.bf16.mxu0 %v1061_v28 }
  0x1e   :  { %972 = vmatprep.subr.bf16.mxu1 %v1062_v29 }
  0x20   :  { %933 = vmatpush3.bf16.msra.mxu0 %v1063_v30 }
  0x21   :  { %973 = vmatpush3.bf16.msra.mxu1 %v1064_v31  ;;  %1006 = vmatprep.subr.bf16.mxu0 %v1071_v36 }
  0x22   :  { %1022 = vmatprep.subr.bf16.mxu1 %v1071_v36 }
  0x23   :  { %476 = vmatmul.mubr.bf16.vlgmr.msra.gmra.mrb[0].mxu0 %v1065_v32 }
  0x24   :  { %541 = vmatmul.mubr.bf16.vlgmr.msra.gmra.mrb[0].mxu1 %v1068_v34  ;;  %1007 = vmatpush3.bf16.msra.mxu0 %v1071_v36 }
  0x25   :  { %1026 = vmatpush3.bf16.msra.mxu1 %v1071_v36  ;;  %483 = vmatprep.mubr.bf16.mxu0 %v1072_v37 }
  0x26   :  { %548 = vmatprep.mubr.bf16.mxu1 %v1074_v38  ;;  %1008 = vmatprep.subr.bf16.mxu0 %v1078_v39 }
  0x27   :  { %1023 = vmatprep.subr.bf16.mxu1 %v1078_v39 }
  0x28   :  { %1009 = vmatpush3.bf16.msra.mxu0 %v1078_v39 }
  0x29   :  { %1027 = vmatpush3.bf16.msra.mxu1 %v1078_v39  ;;  %1010 = vmatprep.subr.bf16.mxu0 %v1085_v44 }
  0x2a   :  { %1024 = vmatprep.subr.bf16.mxu1 %v1085_v44 }
  0x2b   :  { %484 = vmatmul.mubr.bf16.gmra.mrb[4].mxu0 %v1076_v40 }
  0x2c   :  { %549 = vmatmul.mubr.bf16.gmra.mrb[4].mxu1 %v1077_v41  ;;  %491 = vmatprep.mubr.bf16.mxu0 %v1079_v42 }
  0x2d   :  { %556 = vmatprep.mubr.bf16.mxu1 %v1081_v43  ;;  %1011 = vmatpush3.bf16.msra.mxu0 %v1085_v44 }
  0x2e   :  { %1028 = vmatpush3.bf16.msra.mxu1 %v1085_v44  ;;  %1012 = vmatprep.subr.bf16.mxu0 %v1092_v45 }
  0x2f   :  { %1025 = vmatprep.subr.bf16.mxu1 %v1092_v45 }
  0x31   :  { %1013 = vmatpush3.bf16.msra.mxu0 %v1092_v45 }
  0x32   :  { %1029 = vmatpush3.bf16.msra.mxu1 %v1092_v45 }
  0x33   :  { %492 = vmatmul.mubr.bf16.gmra.mrb[8].mxu0 %v1083_v46 }
  0x34   :  { %557 = vmatmul.mubr.bf16.gmra.mrb[8].mxu1 %v1084_v47  ;;  %499 = vmatprep.mubr.bf16.mxu0 %v1086_v48 }
  0x35   :  { %564 = vmatprep.mubr.bf16.mxu1 %v1088_v49 }
  0x3b   :  { %500 = vmatmul.mubr.bf16.gmra.mrb[12].mxu0 %v1090_v50 }
  0x3c   :  { %565 = vmatmul.mubr.bf16.gmra.mrb[12].mxu1 %v1091_v51  ;;  %1014 = vmatprep.mubr.msk.bf16.mxu0 %vm430_vm0, %v1093_v52 }
  0x3d   :  { %1018 = vmatprep.mubr.msk.bf16.mxu1 %vm430_vm0, %v1094_v53 }
  0x43   :  { %1015 = vmatmul.mubr.msk.bf16.vlgmr.msra.gmra.mrb[16].mxu0 %vm430_vm0, %v1095_v54 }
  0x44   :  { %1019 = vmatmul.mubr.msk.bf16.vlgmr.msra.gmra.mrb[16].mxu1 %vm430_vm0, %v1096_v55 }
  0xf6   :  { %v934_v56 = vpop.f32.mrb[0].mxu0 }
  0xf7   :  { %v974_v57 = vpop.f32.mrb[0].mxu1  ;;  %v935_v58 = vpop.f32.mrb[1].mxu0 }
  0xf8   :  { %v936_v59 = vadd.f32 %v935_v58, %v934_v56  ;;  %v975_v60 = vpop.f32.mrb[1].mxu1  ;;  %v937_v61 = vpop.f32.mrb[2].mxu0 }
  0xf9   :  { %v976_v62 = vadd.f32 %v975_v60, %v974_v57  ;;  %v977_v63 = vpop.f32.mrb[2].mxu1  ;;  %v938_v0 = vpop.f32.mrb[3].mxu0 }
  0xfa   :  { %v939_v1 = vadd.f32 %v938_v0, %v937_v61  ;;  %v978_v2 = vpop.f32.mrb[3].mxu1 }
  0xfb   :  { %v979_v3 = vadd.f32 %v978_v2, %v977_v63  ;;  %v543_v4 = vadd.f32 %v976_v62, %v936_v59 }
  0xfd   :  { %v546_v5 = vadd.f32 %v979_v3, %v939_v1 }
  0xfe   :  { %v940_v6 = vpop.f32.mrb[4].mxu0 }
  0xff   :  { %v980_v7 = vpop.f32.mrb[4].mxu1  ;;  %v941_v8 = vpop.f32.mrb[5].mxu0 }
 0x100   :  { %v942_v9 = vadd.f32 %v941_v8, %v940_v6  ;;  %v981_v10 = vpop.f32.mrb[5].mxu1  ;;  %v943_v11 = vpop.f32.mrb[6].mxu0 }
 0x101   :  { %v982_v12 = vadd.f32 %v981_v10, %v980_v7  ;;  %v983_v13 = vpop.f32.mrb[6].mxu1  ;;  %v944_v14 = vpop.f32.mrb[7].mxu0 }
 0x102   :  { %v945_v15 = vadd.f32 %v944_v14, %v943_v11  ;;  %v984_v16 = vpop.f32.mrb[7].mxu1 }
 0x103   :  { %v985_v17 = vadd.f32 %v984_v16, %v983_v13  ;;  %v551_v18 = vadd.f32 %v982_v12, %v942_v9 }
 0x105   :  { %v554_v19 = vadd.f32 %v985_v17, %v945_v15 }
 0x106   :  { %v946_v20 = vpop.f32.mrb[8].mxu0 }
 0x107   :  { %v986_v21 = vpop.f32.mrb[8].mxu1  ;;  %v947_v22 = vpop.f32.mrb[9].mxu0 }
 0x108   :  { %v948_v23 = vadd.f32 %v947_v22, %v946_v20  ;;  %v987_v24 = vpop.f32.mrb[9].mxu1  ;;  %v949_v25 = vpop.f32.mrb[10].mxu0 }
 0x109   :  { %v988_v26 = vadd.f32 %v987_v24, %v986_v21  ;;  %v989_v27 = vpop.f32.mrb[10].mxu1  ;;  %v950_v28 = vpop.f32.mrb[11].mxu0 }
 0x10a   :  { %v951_v29 = vadd.f32 %v950_v28, %v949_v25  ;;  %v990_v30 = vpop.f32.mrb[11].mxu1 }
 0x10b   :  { %v991_v31 = vadd.f32 %v990_v30, %v989_v27  ;;  %v559_v32 = vadd.f32 %v988_v26, %v948_v23 }
 0x10d   :  { %v562_v33 = vadd.f32 %v991_v31, %v951_v29 }
 0x10e   :  { %v952_v34 = vpop.f32.mrb[12].mxu0 }
 0x10f   :  { %v992_v35 = vpop.f32.mrb[12].mxu1  ;;  %v953_v36 = vpop.f32.mrb[13].mxu0 }
 0x110   :  { %v954_v37 = vadd.f32 %v953_v36, %v952_v34  ;;  %v993_v38 = vpop.f32.mrb[13].mxu1  ;;  %v955_v39 = vpop.f32.mrb[14].mxu0  ;;  %v783_v34 = vld [vmem:[%s1421_s3 + $0x8] sm:$0xff]  ;;  %v785_v36 = vld [vmem:[%s1421_s3 + $0x18] sm:$0xff] }
 0x111   :  { %v994_v40 = vadd.f32 %v993_v38, %v992_v35  ;;  %v995_v41 = vpop.f32.mrb[14].mxu1  ;;  %v956_v42 = vpop.f32.mrb[15].mxu0  ;;  %v784_v35 = vld [vmem:[%s1421_s3 + $0x10] sm:$0xff]  ;;  %v787_v38 = vld [vmem:[%s1421_s3 + $0x28] sm:$0xff] }
 0x112   :  { %v957_v43 = vadd.f32 %v956_v42, %v955_v39  ;;  %v996_v44 = vpop.f32.mrb[15].mxu1 }
 0x113   :  { %v997_v45 = vadd.f32 %v996_v44, %v995_v41  ;;  %v567_v46 = vadd.f32 %v994_v40, %v954_v37  ;;  %v786_v37 = vld [vmem:[%s1421_s3 + $0x20] sm:$0xff] }
 0x115   :  { %v570_v47 = vadd.f32 %v997_v45, %v957_v43 }
 0x116   :  { %v1016_v48 = vpop.f32.mrb[16].mxu0 }
 0x117   :  { %v616_v49 = vadd.f32 %v1016_v48, %v551_v18  ;;  %v1020_v50 = vpop.f32.mrb[16].mxu1  ;;  %v607_v51 = vpop.f32.mrb[17].mxu0 }
 0x118   :  { %v632_v52 = vadd.f32 %v1020_v50, %v567_v46  ;;  %v608_v53 = vadd.f32 %v607_v51, %v543_v4  ;;  %v623_v54 = vpop.f32.mrb[17].mxu1  ;;  %v1017_v55 = vpop.f32.mrb[18].mxu0  ;;  %v704_v51 = vld [vmem:[%s1422_s2 + $0x10] sm:$0xff] }
 0x119   :  { %v624_v56 = vadd.f32 %v623_v54, %v559_v32  ;;  %v619_v57 = vadd.f32 %v1017_v55, %v554_v19  ;;  %v1021_v58 = vpop.f32.mrb[18].mxu1  ;;  %v610_v59 = vpop.f32.mrb[19].mxu0  ;;  %642 = vadd.xlane.f32.xlu1 %v616_v49  ;;  %v1113_v32 = vmov 0  }
 0x11a   :  { %v635_v60 = vadd.f32 %v1021_v58, %v570_v47  ;;  %v611_v61 = vadd.f32 %v610_v59, %v546_v5  ;;  %v626_v62 = vpop.f32.mrb[19].mxu1  ;;  %638 = vadd.xlane.f32.xlu0 %v608_v53  ;;  %1031 = vset.pattern.permute.xlu1 %v1113_v32  ;;  %v702_v59 = vld [vmem:[%s1422_s2] sm:$0xff] }
 0x11b   :  { %v627_v63 = vadd.f32 %v626_v62, %v562_v33  ;;  %1032 = vset.pattern.permute.xlu0 %v1113_v32  ;;  %v782_v33 = vld [vmem:[%s1421_s3] sm:$0xff]  ;;  %v788_v32 = vld [vmem:[%s1421_s3 + $0x30] sm:$0xff] }
 0x11d   :  { %644 = vadd.xlane.f32.xlu1 %v619_v57 }
 0x11e   :  { %646 = vadd.xlane.f32.xlu0 %v624_v56 }
 0x121   :  { %648 = vadd.xlane.f32.xlu1 %v627_v63 }
 0x122   :  { %640 = vadd.xlane.f32.xlu0 %v611_v61 }
 0x125   :  { %652 = vadd.xlane.f32.xlu1 %v635_v60 }
 0x126   :  { %650 = vadd.xlane.f32.xlu0 %v632_v52 }
 0x1a6   :  { %v643_v0 = vpop.xlane.xlu1 %642 }
 0x1a7   :  { %v656_v1 = vmul.f32 0.0078125, %v643_v0  ;;  %v639_v2 = vpop.xlane.xlu0 %638  ;;  %v789_v0 = vld [vmem:[%s1421_s3 + $0x38] sm:$0xff] }
 0x1a8   :  { %v654_v3 = vmul.f32 0.0078125, %v639_v2 }
 0x1a9   :  { %v1307_v4 = vsub.f32 %v616_v49, %v656_v1 }
 0x1aa   :  { %v645_v6 = vpop.xlane.xlu1 %644  ;;  %v1309_v7 = vsub.f32 %v608_v53, %v654_v3  ;;  %v708_v3 = vld [vmem:[%s1422_s2 + $0x30] sm:$0xff] }
 0x1ab   :  { %v657_v8 = vmul.f32 0.0078125, %v645_v6  ;;  %v647_v5 = vpop.xlane.xlu0 %646  ;;  %v672_v9 = vmul.f32 %v1307_v4, %v1307_v4 }
 0x1ac   :  { %v658_v10 = vmul.f32 0.0078125, %v647_v5  ;;  %v670_v16 = vmul.f32 %v1309_v7, %v1309_v7 }
 0x1ad   :  { %v1313_v11 = vsub.f32 %v619_v57, %v657_v8  ;;  %682 = vadd.xlane.f32.xlu0 %v672_v9 }
 0x1ae   :  { %v649_v12 = vpop.xlane.xlu1 %648  ;;  %v1315_v13 = vsub.f32 %v624_v56, %v658_v10 }
 0x1af   :  { %v641_v14 = vpop.xlane.xlu0 %640  ;;  %v673_v15 = vmul.f32 %v1313_v11, %v1313_v11  ;;  %v659_v17 = vmul.f32 0.0078125, %v649_v12  ;;  %v706_v12 = vld [vmem:[%s1422_s2 + $0x20] sm:$0xff] }
 0x1b0   :  { %v655_v18 = vmul.f32 0.0078125, %v641_v14  ;;  %v674_v22 = vmul.f32 %v1315_v13, %v1315_v13 }
 0x1b1   :  { %684 = vadd.xlane.f32.xlu1 %v673_v15  ;;  %678 = vadd.xlane.f32.xlu0 %v670_v16  ;;  %v1325_v23 = vsub.f32 %v627_v63, %v659_v17  ;;  %v705_v17 = vld [vmem:[%s1422_s2 + $0x18] sm:$0xff] }
 0x1b2   :  { %v1321_v19 = vsub.f32 %v611_v61, %v655_v18  ;;  %v653_v20 = vpop.xlane.xlu1 %652 }
 0x1b3   :  { %v651_v21 = vpop.xlane.xlu0 %650  ;;  %v661_v24 = vmul.f32 0.0078125, %v653_v20  ;;  %v675_v29 = vmul.f32 %v1325_v23, %v1325_v23 }
 0x1b4   :  { %v660_v25 = vmul.f32 0.0078125, %v651_v21  ;;  %v671_v26 = vmul.f32 %v1321_v19, %v1321_v19  ;;  %v709_v21 = vld [vmem:[%s1422_s2 + $0x38] sm:$0xff] }
 0x1b5   :  { %686 = vadd.xlane.f32.xlu0 %v674_v22  ;;  %v1331_v28 = vsub.f32 %v635_v60, %v661_v24 }
 0x1b6   :  { %v1329_v27 = vsub.f32 %v632_v52, %v660_v25  ;;  %680 = vadd.xlane.f32.xlu1 %v671_v26  ;;  %v703_v25 = vld [vmem:[%s1422_s2 + $0x8] sm:$0xff] }
 0x1b7   :  { %v677_v31 = vmul.f32 %v1331_v28, %v1331_v28 }
 0x1b8   :  { %v676_v30 = vmul.f32 %v1329_v27, %v1329_v27 }
 0x1ba   :  { %688 = vadd.xlane.f32.xlu1 %v675_v29  ;;  %690 = vadd.xlane.f32.xlu0 %v676_v30  ;;  %v707_v30 = vld [vmem:[%s1422_s2 + $0x28] sm:$0xff] }
 0x1be   :  { %692 = vadd.xlane.f32.xlu1 %v677_v31 }
 0x1cf   :  { %792 = vperm.xlu1 %1031, %v782_v33  }
 0x1d0   :  { %797 = vperm.xlu0 %1032, %v783_v34  }
 0x1d3   :  { %802 = vperm.xlu1 %1031, %v784_v35  }
 0x1d4   :  { %807 = vperm.xlu0 %1032, %v785_v36  }
 0x1d7   :  { %812 = vperm.xlu1 %1031, %v786_v37  }
 0x1d8   :  { %817 = vperm.xlu0 %1032, %v787_v38  }
 0x23a   :  { %v683_v39 = vpop.xlane.xlu0 %682 }
 0x23b   :  { %v696_v40 = vmul.f32 0.0078125, %v683_v39 }
 0x23d   :  { %v712_v41 = vadd.f32 1e-05, %v696_v40 }
 0x23e   :  { %v685_v42 = vpop.xlane.xlu1 %684  ;;  %v679_v43 = vpop.xlane.xlu0 %678 }
 0x23f   :  { %1097 = vrsqrt.f32 %v712_v41  ;;  %v694_v44 = vmul.f32 0.0078125, %v679_v43  ;;  %v697_v56 = vmul.f32 0.0078125, %v685_v42 }
 0x241   :  { %v710_v45 = vadd.f32 1e-05, %v694_v44  ;;  %v713_v61 = vadd.f32 1e-05, %v697_v56 }
 0x242   :  { %v687_v46 = vpop.xlane.xlu0 %686 }
 0x243   :  { %v681_v47 = vpop.xlane.xlu1 %680  ;;  %1099 = vrsqrt.f32 %v710_v45  ;;  %v698_v48 = vmul.f32 0.0078125, %v687_v46 }
 0x244   :  { %v695_v1 = vmul.f32 0.0078125, %v681_v47 }
 0x245   :  { %v714_v57 = vadd.f32 1e-05, %v698_v48 }
 0x246   :  { %v711_v8 = vadd.f32 1e-05, %v695_v1 }
 0x247   :  { %v689_v49 = vpop.xlane.xlu1 %688  ;;  %v691_v50 = vpop.xlane.xlu0 %690 }
 0x248   :  { %v700_v52 = vmul.f32 0.0078125, %v691_v50  ;;  %v699_v5 = vmul.f32 0.0078125, %v689_v49 }
 0x249   :  { %v1098_v53 = vpop.eup %1097 }
 0x24a   :  { %v716_v54 = vadd.f32 1e-05, %v700_v52  ;;  %v728_v55 = vmul.f32 %v1098_v53, %v704_v51  ;;  %v715_v14 = vadd.f32 1e-05, %v699_v5 }
 0x24b   :  { %v693_v58 = vpop.xlane.xlu1 %692 }
 0x24c   :  { %746 = vperm.xlu1 %1031, %v728_v55   ;;  %1101 = vrsqrt.f32 %v716_v54  ;;  %v701_v62 = vmul.f32 0.0078125, %v693_v58 }
 0x24d   :  { %v1100_v60 = vpop.eup %1099  ;;  %1103 = vrsqrt.f32 %v714_v57 }
 0x24e   :  { %v726_v63 = vmul.f32 %v1100_v60, %v702_v59  ;;  %1105 = vrsqrt.f32 %v713_v61  ;;  %v717_v2 = vadd.f32 1e-05, %v701_v62 }
 0x24f   :  { %v793_v33 = vpop.permute.xlu1 %792  ;;  %v798_v34 = vpop.permute.xlu0 %797 }
 0x250   :  { %736 = vperm.xlu0 %1032, %v726_v63   ;;  %1107 = vrsqrt.f32 %v717_v2 }
 0x251   :  { %1109 = vrsqrt.f32 %v711_v8 }
 0x252   :  { %1111 = vrsqrt.f32 %v715_v14 }
 0x253   :  { %v803_v35 = vpop.permute.xlu1 %802  ;;  %v808_v36 = vpop.permute.xlu0 %807 }
 0x254   :  { %827 = vperm.xlu0 %1032, %v789_v0  }
 0x256   :  { %v1102_v6 = vpop.eup %1101 }
 0x257   :  { %v732_v9 = vmul.f32 %v1102_v6, %v708_v3  ;;  %v1104_v10 = vpop.eup %1103  ;;  %v813_v37 = vpop.permute.xlu1 %812 }
 0x258   :  { %v730_v15 = vmul.f32 %v1104_v10, %v706_v12  ;;  %v1106_v16 = vpop.eup %1105  ;;  %v818_v38 = vpop.permute.xlu0 %817 }
 0x259   :  { %766 = vperm.xlu1 %1031, %v732_v9   ;;  %v729_v18 = vmul.f32 %v1106_v16, %v705_v17 }
 0x25a   :  { %v1108_v20 = vpop.eup %1107 }
 0x25b   :  { %v733_v22 = vmul.f32 %v1108_v20, %v709_v21  ;;  %v1110_v24 = vpop.eup %1109 }
 0x25c   :  { %v727_v26 = vmul.f32 %v1110_v24, %v703_v25  ;;  %v1112_v29 = vpop.eup %1111 }
 0x25d   :  { %756 = vperm.xlu1 %1031, %v730_v15   ;;  %v731_v31 = vmul.f32 %v1112_v29, %v707_v30 }
 0x261   :  { %751 = vperm.xlu1 %1031, %v729_v18  }
 0x265   :  { %771 = vperm.xlu1 %1031, %v733_v22  }
 0x269   :  { %741 = vperm.xlu1 %1031, %v727_v26  }
 0x26d   :  { %761 = vperm.xlu1 %1031, %v731_v31  }
 0x271   :  { %822 = vperm.xlu1 %1031, %v788_v32  }
 0x2cb   :  { %v747_v39 = vpop.permute.xlu1 %746 }
 0x2cc   :  { %v776_v40 = vmul.f32 %v747_v39, %v1307_v4 }
 0x2ce   :  { %v832_v41 = vadd.f32 %v803_v35, %v776_v40 }
 0x2cf   :  { %v737_v43 = vpop.permute.xlu0 %736 }
 0x2d0   :  { %v840_v42 = vmax.f32 %v832_v41, 0.0  ;;  %v774_v44 = vmul.f32 %v737_v43, %v1309_v7 }
 0x2d2   :  { %848 = vst [vmem:[%s1423_s4 + $0x10] sm:$0xff] %v840_v42  ;;  %v830_v45 = vadd.f32 %v793_v33, %v774_v44 }
 0x2d3   :  { %v828_v56 = vpop.permute.xlu0 %827 }
 0x2d4   :  { %v838_v46 = vmax.f32 %v830_v45, 0.0 }
 0x2d6   :  { %846 = vst [vmem:[%s1423_s4] sm:$0xff] %v838_v46 }
 0x2d8   :  { %v767_v47 = vpop.permute.xlu1 %766 }
 0x2dc   :  { %v757_v48 = vpop.permute.xlu1 %756 }
 0x2dd   :  { %v778_v49 = vmul.f32 %v757_v48, %v1315_v13 }
 0x2df   :  { %v834_v4 = vadd.f32 %v813_v37, %v778_v49 }
 0x2e0   :  { %v752_v50 = vpop.permute.xlu1 %751 }
 0x2e1   :  { %v842_v51 = vmax.f32 %v834_v4, 0.0  ;;  %v777_v52 = vmul.f32 %v752_v50, %v1313_v11 }
 0x2e3   :  { %850 = vst [vmem:[%s1423_s4 + $0x20] sm:$0xff] %v842_v51  ;;  %v833_v7 = vadd.f32 %v808_v36, %v777_v52 }
 0x2e4   :  { %v772_v53 = vpop.permute.xlu1 %771 }
 0x2e5   :  { %v841_v54 = vmax.f32 %v833_v7, 0.0  ;;  %v781_v55 = vmul.f32 %v772_v53, %v1331_v28  ;;  %v780_v28 = vmul.f32 %v767_v47, %v1329_v27 }
 0x2e7   :  { %849 = vst [vmem:[%s1423_s4 + $0x18] sm:$0xff] %v841_v54  ;;  %v837_v13 = vadd.f32 %v828_v56, %v781_v55 }
 0x2e8   :  { %v742_v57 = vpop.permute.xlu1 %741 }
 0x2e9   :  { %v845_v58 = vmax.f32 %v837_v13, 0.0  ;;  %v775_v59 = vmul.f32 %v742_v57, %v1321_v19 }
 0x2eb   :  { %853 = vst [vmem:[%s1423_s4 + $0x38] sm:$0xff] %v845_v58  ;;  %v831_v11 = vadd.f32 %v798_v34, %v775_v59 }
 0x2ec   :  { %v762_v60 = vpop.permute.xlu1 %761 }
 0x2ed   :  { %v839_v61 = vmax.f32 %v831_v11, 0.0  ;;  %v779_v62 = vmul.f32 %v762_v60, %v1325_v23 }
 0x2ef   :  { %847 = vst [vmem:[%s1423_s4 + $0x8] sm:$0xff] %v839_v61  ;;  %v835_v63 = vadd.f32 %v818_v38, %v779_v62 }
 0x2f0   :  { %v823_v0 = vpop.permute.xlu1 %822 }
 0x2f1   :  { %v843_v1 = vmax.f32 %v835_v63, 0.0  ;;  %v836_v2 = vadd.f32 %v823_v0, %v780_v28 }
 0x2f3   :  { %851 = vst [vmem:[%s1423_s4 + $0x28] sm:$0xff] %v843_v1  ;;  %v844_v19 = vmax.f32 %v836_v2, 0.0 }
 0x2f5   :  { %852 = vst [vmem:[%s1423_s4 + $0x30] sm:$0xff] %v844_v19 }

// kernel: resnet20_forward.43
= control target key start
LH: loop header
LB: loop body
LE: loop exit
PB: predicated region body
PF: predicated region fallthrough
CT: control target
= control target key end

     0   :  { %vm78_vm0 = vcmask 517120   ;;  %vm743_vm1 = vcmask 523264   ;;  %vm672_vm2 = vcmask 1041409   ;;  %vm674_vm3 = vcmask 1042434   ;;  %s1434_s0 = inlined_call_operand.vmem [shape: f32[64,2,64], index: 0, kind: input, shape index: {}]   ;;  %s1435_s1 = inlined_call_operand.vmem [shape: f32[10,64], index: 1, kind: input, shape index: {}]   ;;  %s1436_s2 = inlined_call_operand.vmem [shape: f32[10,1], index: 2, kind: input, shape index: {}]   ;;  %s1437_s3 = inlined_call_operand.vmem [shape: f32[10,2], index: 3, kind: output, shape index: {}]  }
   0x1   :  { %v22_v0 = vld [vmem:[%s1434_s0 + $0x10] sm:$0x3]  ;;  %v14_v1 = vld [vmem:[%s1434_s0] sm:$0x3]  ;;  %v23_v2 = vld [vmem:[%s1434_s0 + $0x12] sm:$0x3] }
   0x2   :  { %v103_v3 = vsel %vm78_vm0, %v22_v0, 0.0  ;;  %v79_v4 = vsel %vm78_vm0, %v14_v1, 0.0  ;;  %v15_v5 = vld [vmem:[%s1434_s0 + $0x2] sm:$0x3]  ;;  %v106_v6 = vsel %vm78_vm0, %v23_v2, 0.0  ;;  %vm676_vm4 = vcmask 1043459  }
   0x3   :  { %104 = vadd.xlane.f32.xlu1 %v103_v3  ;;  %80 = vadd.xlane.f32.xlu0 %v79_v4  ;;  %v82_v7 = vsel %vm78_vm0, %v15_v5, 0.0  ;;  %v24_v8 = vld [vmem:[%s1434_s0 + $0x14] sm:$0x3]  ;;  %v16_v9 = vld [vmem:[%s1434_s0 + $0x4] sm:$0x3]  ;;  %vm678_vm5 = vcmask 1044484  }
   0x4   :  { %v109_v10 = vsel %vm78_vm0, %v24_v8, 0.0  ;;  %v85_v11 = vsel %vm78_vm0, %v16_v9, 0.0  ;;  %v25_v12 = vld [vmem:[%s1434_s0 + $0x16] sm:$0x3]  ;;  %v17_v13 = vld [vmem:[%s1434_s0 + $0x6] sm:$0x3] }
   0x5   :  { %v112_v14 = vsel %vm78_vm0, %v25_v12, 0.0  ;;  %v88_v15 = vsel %vm78_vm0, %v17_v13, 0.0  ;;  %v26_v16 = vld [vmem:[%s1434_s0 + $0x18] sm:$0x3]  ;;  %v18_v17 = vld [vmem:[%s1434_s0 + $0x8] sm:$0x3] }
   0x6   :  { %v27_v18 = vld [vmem:[%s1434_s0 + $0x1a] sm:$0x3]  ;;  %v19_v19 = vld [vmem:[%s1434_s0 + $0xa] sm:$0x3]  ;;  %v31_v20 = vld [vmem:[%s1434_s0 + $0x22] sm:$0x3] }
   0x7   :  { %107 = vadd.xlane.f32.xlu1 %v106_v6  ;;  %83 = vadd.xlane.f32.xlu0 %v82_v7  ;;  %v30_v21 = vld [vmem:[%s1434_s0 + $0x20] sm:$0x3]  ;;  %v39_v22 = vld [vmem:[%s1434_s0 + $0x32] sm:$0x3]  ;;  %v38_v23 = vld [vmem:[%s1434_s0 + $0x30] sm:$0x3] }
   0x8   :  { %v28_v24 = vld [vmem:[%s1434_s0 + $0x1c] sm:$0x3]  ;;  %v20_v25 = vld [vmem:[%s1434_s0 + $0xc] sm:$0x3]  ;;  %v115_v26 = vsel %vm78_vm0, %v26_v16, 0.0  ;;  %v91_v27 = vsel %vm78_vm0, %v18_v17, 0.0 }
   0x9   :  { %v118_v28 = vsel %vm78_vm0, %v27_v18, 0.0  ;;  %v94_v29 = vsel %vm78_vm0, %v19_v19, 0.0  ;;  %v130_v30 = vsel %vm78_vm0, %v31_v20, 0.0  ;;  %v127_v31 = vsel %vm78_vm0, %v30_v21, 0.0  ;;  %v44_v36 = vld [vmem:[%s1434_s0 + $0x3c] sm:$0x3] }
   0xa   :  { %v973_v32 = vsel %vm78_vm0, %v39_v22, 0.0  ;;  %v976_v33 = vsel %vm78_vm0, %v38_v23, 0.0  ;;  %v979_v34 = vsel %vm78_vm0, %v28_v24, 0.0  ;;  %v982_v35 = vsel %vm78_vm0, %v20_v25, 0.0  ;;  %v36_v37 = vld [vmem:[%s1434_s0 + $0x2c] sm:$0x3] }
   0xb   :  { %110 = vadd.xlane.f32.xlu1 %v109_v10  ;;  %86 = vadd.xlane.f32.xlu0 %v85_v11  ;;  %v991_v38 = vsel %vm78_vm0, %v44_v36, 0.0  ;;  %v994_v39 = vsel %vm78_vm0, %v36_v37, 0.0  ;;  %v56_v40 = vld [vmem:[%s1434_s0 + $0x54] sm:$0x3]  ;;  %v48_v41 = vld [vmem:[%s1434_s0 + $0x44] sm:$0x3] }
   0xc   :  { %v1003_v42 = vsel %vm78_vm0, %v56_v40, 0.0  ;;  %v1006_v43 = vsel %vm78_vm0, %v48_v41, 0.0  ;;  %v45_v44 = vld [vmem:[%s1434_s0 + $0x3e] sm:$0x3]  ;;  %v37_v45 = vld [vmem:[%s1434_s0 + $0x2e] sm:$0x3] }
   0xd   :  { %v1015_v46 = vsel %vm78_vm0, %v45_v44, 0.0  ;;  %v1018_v47 = vsel %vm78_vm0, %v37_v45, 0.0  ;;  %v57_v48 = vld [vmem:[%s1434_s0 + $0x56] sm:$0x3]  ;;  %v49_v49 = vld [vmem:[%s1434_s0 + $0x46] sm:$0x3] }
   0xe   :  { %v1027_v50 = vsel %vm78_vm0, %v57_v48, 0.0  ;;  %v1030_v51 = vsel %vm78_vm0, %v49_v49, 0.0  ;;  %v58_v52 = vld [vmem:[%s1434_s0 + $0x58] sm:$0x3]  ;;  %v50_v53 = vld [vmem:[%s1434_s0 + $0x48] sm:$0x3] }
   0xf   :  { %113 = vadd.xlane.f32.xlu1 %v112_v14  ;;  %89 = vadd.xlane.f32.xlu0 %v88_v15  ;;  %v1039_v54 = vsel %vm78_vm0, %v58_v52, 0.0  ;;  %v1042_v55 = vsel %vm78_vm0, %v50_v53, 0.0  ;;  %v59_v56 = vld [vmem:[%s1434_s0 + $0x5a] sm:$0x3]  ;;  %v51_v57 = vld [vmem:[%s1434_s0 + $0x4a] sm:$0x3] }
  0x10   :  { %v1051_v58 = vsel %vm78_vm0, %v59_v56, 0.0  ;;  %v1054_v59 = vsel %vm78_vm0, %v51_v57, 0.0  ;;  %v63_v60 = vld [vmem:[%s1434_s0 + $0x62] sm:$0x3]  ;;  %v62_v61 = vld [vmem:[%s1434_s0 + $0x60] sm:$0x3] }
  0x11   :  { %v1063_v62 = vsel %vm78_vm0, %v63_v60, 0.0  ;;  %v1066_v63 = vsel %vm78_vm0, %v62_v61, 0.0  ;;  %v71_v0 = vld [vmem:[%s1434_s0 + $0x72] sm:$0x3]  ;;  %v70_v1 = vld [vmem:[%s1434_s0 + $0x70] sm:$0x3] }
  0x12   :  { %v1075_v2 = vsel %vm78_vm0, %v71_v0, 0.0  ;;  %v1078_v3 = vsel %vm78_vm0, %v70_v1, 0.0  ;;  %v60_v4 = vld [vmem:[%s1434_s0 + $0x5c] sm:$0x3]  ;;  %v52_v5 = vld [vmem:[%s1434_s0 + $0x4c] sm:$0x3] }
  0x13   :  { %116 = vadd.xlane.f32.xlu1 %v115_v26  ;;  %92 = vadd.xlane.f32.xlu0 %v91_v27  ;;  %v1087_v6 = vsel %vm78_vm0, %v60_v4, 0.0  ;;  %v1090_v7 = vsel %vm78_vm0, %v52_v5, 0.0  ;;  %v72_v8 = vld [vmem:[%s1434_s0 + $0x74] sm:$0x3]  ;;  %v64_v9 = vld [vmem:[%s1434_s0 + $0x64] sm:$0x3] }
  0x14   :  { %v1099_v10 = vsel %vm78_vm0, %v72_v8, 0.0  ;;  %v1102_v11 = vsel %vm78_vm0, %v64_v9, 0.0  ;;  %v61_v12 = vld [vmem:[%s1434_s0 + $0x5e] sm:$0x3]  ;;  %v53_v13 = vld [vmem:[%s1434_s0 + $0x4e] sm:$0x3] }
  0x15   :  { %v1111_v14 = vsel %vm78_vm0, %v61_v12, 0.0  ;;  %v1114_v15 = vsel %vm78_vm0, %v53_v13, 0.0  ;;  %v73_v16 = vld [vmem:[%s1434_s0 + $0x76] sm:$0x3]  ;;  %v65_v17 = vld [vmem:[%s1434_s0 + $0x66] sm:$0x3] }
  0x16   :  { %v1123_v18 = vsel %vm78_vm0, %v73_v16, 0.0  ;;  %v1126_v19 = vsel %vm78_vm0, %v65_v17, 0.0  ;;  %v74_v20 = vld [vmem:[%s1434_s0 + $0x78] sm:$0x3]  ;;  %v66_v21 = vld [vmem:[%s1434_s0 + $0x68] sm:$0x3] }
  0x17   :  { %119 = vadd.xlane.f32.xlu1 %v118_v28  ;;  %95 = vadd.xlane.f32.xlu0 %v94_v29  ;;  %v1135_v22 = vsel %vm78_vm0, %v74_v20, 0.0  ;;  %v1138_v23 = vsel %vm78_vm0, %v66_v21, 0.0  ;;  %v75_v24 = vld [vmem:[%s1434_s0 + $0x7a] sm:$0x3]  ;;  %v67_v25 = vld [vmem:[%s1434_s0 + $0x6a] sm:$0x3] }
  0x18   :  { %v1149_v26 = vsel %vm78_vm0, %v75_v24, 0.0  ;;  %v1152_v27 = vsel %vm78_vm0, %v67_v25, 0.0  ;;  %v76_v28 = vld [vmem:[%s1434_s0 + $0x7c] sm:$0x3]  ;;  %v68_v29 = vld [vmem:[%s1434_s0 + $0x6c] sm:$0x3] }
  0x19   :  { %v40_v36 = vld [vmem:[%s1434_s0 + $0x34] sm:$0x3]  ;;  %v32_v37 = vld [vmem:[%s1434_s0 + $0x24] sm:$0x3]  ;;  %v29_v48 = vld [vmem:[%s1434_s0 + $0x1e] sm:$0x3] }
  0x1a   :  { %v157_v44 = vsel %vm78_vm0, %v40_v36, 0.0  ;;  %v133_v45 = vsel %vm78_vm0, %v32_v37, 0.0  ;;  %v21_v49 = vld [vmem:[%s1434_s0 + $0xe] sm:$0x3]  ;;  %v124_v52 = vsel %vm78_vm0, %v29_v48, 0.0  ;;  %vm680_vm6 = vcmask 1045509  }
  0x1b   :  { %131 = vadd.xlane.f32.xlu1 %v130_v30  ;;  %128 = vadd.xlane.f32.xlu0 %v127_v31  ;;  %v1161_v30 = vsel %vm78_vm0, %v76_v28, 0.0  ;;  %v1164_v31 = vsel %vm78_vm0, %v68_v29, 0.0  ;;  %v33_v53 = vld [vmem:[%s1434_s0 + $0x26] sm:$0x3]  ;;  %v42_v60 = vld [vmem:[%s1434_s0 + $0x38] sm:$0x3] }
  0x1c   :  { %v136_v57 = vsel %vm78_vm0, %v33_v53, 0.0  ;;  %v34_v61 = vld [vmem:[%s1434_s0 + $0x28] sm:$0x3]  ;;  %v163_v0 = vsel %vm78_vm0, %v42_v60, 0.0  ;;  %v43_v4 = vld [vmem:[%s1434_s0 + $0x3a] sm:$0x3] }
  0x1d   :  { %v139_v1 = vsel %vm78_vm0, %v34_v61, 0.0  ;;  %v35_v5 = vld [vmem:[%s1434_s0 + $0x2a] sm:$0x3]  ;;  %v166_v8 = vsel %vm78_vm0, %v43_v4, 0.0  ;;  %v47_v12 = vld [vmem:[%s1434_s0 + $0x42] sm:$0x3] }
  0x1e   :  { %v142_v9 = vsel %vm78_vm0, %v35_v5, 0.0  ;;  %v46_v13 = vld [vmem:[%s1434_s0 + $0x40] sm:$0x3]  ;;  %v178_v16 = vsel %vm78_vm0, %v47_v12, 0.0  ;;  %v55_v20 = vld [vmem:[%s1434_s0 + $0x52] sm:$0x3] }
  0x1f   :  { %155 = vadd.xlane.f32.xlu1 %v973_v32  ;;  %152 = vadd.xlane.f32.xlu0 %v976_v33  ;;  %v77_v32 = vld [vmem:[%s1434_s0 + $0x7e] sm:$0x3]  ;;  %v69_v33 = vld [vmem:[%s1434_s0 + $0x6e] sm:$0x3]  ;;  %v175_v17 = vsel %vm78_vm0, %v46_v13, 0.0  ;;  %v202_v24 = vsel %vm78_vm0, %v55_v20, 0.0 }
  0x20   :  { %v1179_v40 = vsel %vm78_vm0, %v77_v32, 0.0  ;;  %v1182_v41 = vsel %vm78_vm0, %v69_v33, 0.0  ;;  %v54_v21 = vld [vmem:[%s1434_s0 + $0x50] sm:$0x3]  ;;  %vm682_vm7 = vcmask 1046534   ;;  %vm684_vm8 = vcmask 1047559  }
  0x21   :  { %v199_v25 = vsel %vm78_vm0, %v54_v21, 0.0  ;;  %vm827_vm9 = vcmask 9216   ;;  %vm825_vm10 = vcmask 15360  }
  0x23   :  { %122 = vadd.xlane.f32.xlu1 %v979_v34  ;;  %98 = vadd.xlane.f32.xlu0 %v982_v35  ;;  %v100_v34 = vsel %vm78_vm0, %v21_v49, 0.0  ;;  %v41_v35 = vld [vmem:[%s1434_s0 + $0x36] sm:$0x3] }
  0x24   :  { %v160_v56 = vsel %vm78_vm0, %v41_v35, 0.0 }
  0x27   :  { %158 = vadd.xlane.f32.xlu1 %v157_v44  ;;  %134 = vadd.xlane.f32.xlu0 %v133_v45 }
  0x2b   :  { %125 = vadd.xlane.f32.xlu1 %v124_v52  ;;  %101 = vadd.xlane.f32.xlu0 %v100_v34 }
  0x2f   :  { %161 = vadd.xlane.f32.xlu1 %v160_v56  ;;  %137 = vadd.xlane.f32.xlu0 %v136_v57 }
  0x33   :  { %164 = vadd.xlane.f32.xlu1 %v163_v0  ;;  %140 = vadd.xlane.f32.xlu0 %v139_v1 }
  0x37   :  { %167 = vadd.xlane.f32.xlu1 %v166_v8  ;;  %143 = vadd.xlane.f32.xlu0 %v142_v9 }
  0x3b   :  { %179 = vadd.xlane.f32.xlu1 %v178_v16  ;;  %176 = vadd.xlane.f32.xlu0 %v175_v17 }
  0x3f   :  { %203 = vadd.xlane.f32.xlu1 %v202_v24  ;;  %200 = vadd.xlane.f32.xlu0 %v199_v25 }
  0x43   :  { %170 = vadd.xlane.f32.xlu1 %v991_v38  ;;  %146 = vadd.xlane.f32.xlu0 %v994_v39 }
  0x47   :  { %206 = vadd.xlane.f32.xlu1 %v1003_v42  ;;  %182 = vadd.xlane.f32.xlu0 %v1006_v43 }
  0x4b   :  { %173 = vadd.xlane.f32.xlu1 %v1015_v46  ;;  %149 = vadd.xlane.f32.xlu0 %v1018_v47  ;;  %v336_v46 = vld [vmem:[%s1435_s1] sm:$0xff] }
  0x4c   :  { %861 = vmatprep.mubr.msk.f32.mxu0 %vm743_vm1, %v336_v46 }
  0x4f   :  { %209 = vadd.xlane.f32.xlu1 %v1027_v50  ;;  %185 = vadd.xlane.f32.xlu0 %v1030_v51  ;;  %v883_v51 = vmov 0  }
  0x50   :  { %882 = vset.pattern.permute.xlu1 %v883_v51  ;;  %881 = vset.pattern.permute.xlu0 %v883_v51 }
  0x53   :  { %212 = vadd.xlane.f32.xlu1 %v1039_v54  ;;  %188 = vadd.xlane.f32.xlu0 %v1042_v55  ;;  %v339_v54 = vld [vmem:[%s1436_s2 + $0x8] sm:$0x3]  ;;  %v338_v55 = vld [vmem:[%s1436_s2] sm:$0xff] }
  0x57   :  { %215 = vadd.xlane.f32.xlu1 %v1051_v58  ;;  %191 = vadd.xlane.f32.xlu0 %v1054_v59 }
  0x5b   :  { %227 = vadd.xlane.f32.xlu1 %v1063_v62  ;;  %224 = vadd.xlane.f32.xlu0 %v1066_v63 }
  0x5f   :  { %251 = vadd.xlane.f32.xlu1 %v1075_v2  ;;  %248 = vadd.xlane.f32.xlu0 %v1078_v3 }
  0x63   :  { %218 = vadd.xlane.f32.xlu1 %v1087_v6  ;;  %194 = vadd.xlane.f32.xlu0 %v1090_v7  ;;  %v414_v6 = vlaneseq }
  0x67   :  { %254 = vadd.xlane.f32.xlu1 %v1099_v10  ;;  %230 = vadd.xlane.f32.xlu0 %v1102_v11  ;;  %v415_v11 = vand.u32 127, %v414_v6 }
  0x6b   :  { %221 = vadd.xlane.f32.xlu1 %v1111_v14  ;;  %197 = vadd.xlane.f32.xlu0 %v1114_v15  ;;  %v417_v14 = vshrl.u32 %v414_v6, 7 }
  0x6f   :  { %257 = vadd.xlane.f32.xlu1 %v1123_v18  ;;  %233 = vadd.xlane.f32.xlu0 %v1126_v19  ;;  %v1286_v19 = vsub.s32 %v415_v11, %v417_v14 }
  0x73   :  { %260 = vadd.xlane.f32.xlu1 %v1135_v22  ;;  %236 = vadd.xlane.f32.xlu0 %v1138_v23 }
  0x77   :  { %263 = vadd.xlane.f32.xlu1 %v1149_v26  ;;  %239 = vadd.xlane.f32.xlu0 %v1152_v27 }
  0x7b   :  { %266 = vadd.xlane.f32.xlu1 %v1161_v30  ;;  %242 = vadd.xlane.f32.xlu0 %v1164_v31 }
  0x7f   :  { %269 = vadd.xlane.f32.xlu1 %v1179_v40  ;;  %245 = vadd.xlane.f32.xlu0 %v1182_v41 }
  0x90   :  { %v105_v38 = vpop.xlane.xlu1 %104  ;;  %v81_v39 = vpop.xlane.xlu0 %80  ;;  %347 = vperm.xlu1 %882, %v339_v54  }
  0x91   :  { %v280_v30 = vmul.f32 0.015625, %v105_v38  ;;  %v272_v31 = vmul.f32 0.015625, %v81_v39 }
  0x93   :  { %v451_v56 = vrot.slane %v280_v30, %v1286_v19  ;;  %v419_v57 = vrot.slane %v272_v31, %v1286_v19 }
  0x94   :  { %v108_v42 = vpop.xlane.xlu1 %107  ;;  %v84_v43 = vpop.xlane.xlu0 %83 }
  0x95   :  { %342 = vperm.xlu0 %881, %v338_v55   ;;  %v281_v22 = vmul.f32 0.015625, %v108_v42  ;;  %v273_v23 = vmul.f32 0.015625, %v84_v43 }
  0x97   :  { %v455_v40 = vrot.slane %v281_v22, %v1286_v19  ;;  %v423_v41 = vrot.slane %v273_v23, %v1286_v19 }
  0x98   :  { %v111_v47 = vpop.xlane.xlu1 %110  ;;  %v87_v50 = vpop.xlane.xlu0 %86 }
  0x99   :  { %v282_v26 = vmul.f32 0.015625, %v111_v47  ;;  %v274_v27 = vmul.f32 0.015625, %v87_v50  ;;  %v686_v4 = vsel %vm672_vm2, %v455_v40, %v451_v56  ;;  %v673_v5 = vsel %vm672_vm2, %v423_v41, %v419_v57 }
  0x9b   :  { %v459_v48 = vrot.slane %v282_v26, %v1286_v19  ;;  %v427_v49 = vrot.slane %v274_v27, %v1286_v19 }
  0x9c   :  { %v114_v58 = vpop.xlane.xlu1 %113  ;;  %v90_v59 = vpop.xlane.xlu0 %89 }
  0x9d   :  { %v283_v32 = vmul.f32 0.015625, %v114_v58  ;;  %v275_v33 = vmul.f32 0.015625, %v90_v59  ;;  %v687_v12 = vsel %vm674_vm3, %v459_v48, %v686_v4  ;;  %v675_v13 = vsel %vm674_vm3, %v427_v49, %v673_v5 }
  0x9f   :  { %v463_v60 = vrot.slane %v283_v32, %v1286_v19  ;;  %v431_v61 = vrot.slane %v275_v33, %v1286_v19 }
  0xa0   :  { %v117_v62 = vpop.xlane.xlu1 %116  ;;  %v93_v63 = vpop.xlane.xlu0 %92 }
  0xa1   :  { %v284_v36 = vmul.f32 0.015625, %v117_v62  ;;  %v276_v37 = vmul.f32 0.015625, %v93_v63  ;;  %v688_v24 = vsel %vm676_vm4, %v463_v60, %v687_v12  ;;  %v677_v25 = vsel %vm676_vm4, %v431_v61, %v675_v13 }
  0xa3   :  { %v467_v0 = vrot.slane %v284_v36, %v1286_v19  ;;  %v435_v1 = vrot.slane %v276_v37, %v1286_v19 }
  0xa4   :  { %v120_v2 = vpop.xlane.xlu1 %119  ;;  %v96_v3 = vpop.xlane.xlu0 %95 }
  0xa5   :  { %v285_v44 = vmul.f32 0.015625, %v120_v2  ;;  %v277_v45 = vmul.f32 0.015625, %v96_v3  ;;  %v689_v42 = vsel %vm678_vm5, %v467_v0, %v688_v24  ;;  %v679_v43 = vsel %vm678_vm5, %v435_v1, %v677_v25 }
  0xa7   :  { %v471_v8 = vrot.slane %v285_v44, %v1286_v19  ;;  %v439_v9 = vrot.slane %v277_v45, %v1286_v19 }
  0xa8   :  { %v1278_v7 = vpop.xlane.xlu1 %131  ;;  %v1280_v10 = vpop.xlane.xlu0 %128 }
  0xa9   :  { %v681_v50 = vsel %vm680_vm6, %v439_v9, %v679_v43  ;;  %v690_v51 = vsel %vm680_vm6, %v471_v8, %v689_v42 }
  0xac   :  { %v1282_v15 = vpop.xlane.xlu1 %155  ;;  %v1284_v18 = vpop.xlane.xlu0 %152 }
  0xad   :  { %v297_v30 = vmul.f32 0.015625, %v1282_v15  ;;  %v296_v31 = vmul.f32 0.015625, %v1284_v18 }
  0xb0   :  { %v123_v28 = vpop.xlane.xlu1 %122  ;;  %v99_v29 = vpop.xlane.xlu0 %98 }
  0xb1   :  { %v286_v52 = vmul.f32 0.015625, %v123_v28  ;;  %v278_v34 = vmul.f32 0.015625, %v99_v29  ;;  %v289_v28 = vmul.f32 0.015625, %v1278_v7  ;;  %v288_v29 = vmul.f32 0.015625, %v1280_v10 }
  0xb2   :  { %v519_v7 = vrot.slane %v297_v30, %v1286_v19  ;;  %v515_v10 = vrot.slane %v296_v31, %v1286_v19 }
  0xb3   :  { %v475_v16 = vrot.slane %v286_v52, %v1286_v19  ;;  %v443_v17 = vrot.slane %v278_v34, %v1286_v19  ;;  %v487_v44 = vrot.slane %v289_v28, %v1286_v19  ;;  %v483_v45 = vrot.slane %v288_v29, %v1286_v19 }
  0xb4   :  { %v159_v35 = vpop.xlane.xlu1 %158  ;;  %v135_v53 = vpop.xlane.xlu0 %134  ;;  %v700_v5 = vsel %vm672_vm2, %v519_v7, %v515_v10 }
  0xb5   :  { %v683_v58 = vsel %vm682_vm7, %v443_v17, %v681_v50  ;;  %v691_v59 = vsel %vm682_vm7, %v475_v16, %v690_v51  ;;  %v298_v32 = vmul.f32 0.015625, %v159_v35  ;;  %v290_v33 = vmul.f32 0.015625, %v135_v53 }
  0xb6   :  { %v693_v4 = vsel %vm672_vm2, %v487_v44, %v483_v45 }
  0xb7   :  { %v523_v18 = vrot.slane %v298_v32, %v1286_v19  ;;  %v491_v34 = vrot.slane %v290_v33, %v1286_v19 }
  0xb8   :  { %v126_v20 = vpop.xlane.xlu1 %125  ;;  %v102_v21 = vpop.xlane.xlu0 %101 }
  0xb9   :  { %v287_v38 = vmul.f32 0.015625, %v126_v20  ;;  %v279_v39 = vmul.f32 0.015625, %v102_v21  ;;  %v701_v12 = vsel %vm674_vm3, %v523_v18, %v700_v5  ;;  %v694_v13 = vsel %vm674_vm3, %v491_v34, %v693_v4 }
  0xbb   :  { %v479_v46 = vrot.slane %v287_v38, %v1286_v19  ;;  %v447_v47 = vrot.slane %v279_v39, %v1286_v19 }
  0xbc   :  { %v162_v54 = vpop.xlane.xlu1 %161  ;;  %v138_v55 = vpop.xlane.xlu0 %137 }
  0xbd   :  { %v685_v62 = vsel %vm684_vm8, %v447_v47, %v683_v58  ;;  %v692_v63 = vsel %vm684_vm8, %v479_v46, %v691_v59  ;;  %v299_v40 = vmul.f32 0.015625, %v162_v54  ;;  %v291_v41 = vmul.f32 0.015625, %v138_v55 }
  0xbe   :  { %v864_v2 = vpack.c.bf16 %v692_v63, %v685_v62 }
  0xbf   :  { %v527_v60 = vrot.slane %v299_v40, %v1286_v19  ;;  %v495_v61 = vrot.slane %v291_v41, %v1286_v19 }
  0xc0   :  { %v165_v3 = vpop.xlane.xlu1 %164  ;;  %865 = vmatprep.subr.bf16.mxu0 %v864_v2  ;;  %v141_v6 = vpop.xlane.xlu0 %140 }
  0xc1   :  { %867 = vmatpush3.bf16.msra.mxu0 %v864_v2  ;;  %v300_v48 = vmul.f32 0.015625, %v165_v3  ;;  %v292_v49 = vmul.f32 0.015625, %v141_v6  ;;  %v702_v24 = vsel %vm676_vm4, %v527_v60, %v701_v12  ;;  %v695_v25 = vsel %vm676_vm4, %v495_v61, %v694_v13 }
  0xc3   :  { %v531_v0 = vrot.slane %v300_v48, %v1286_v19  ;;  %v499_v1 = vrot.slane %v292_v49, %v1286_v19 }
  0xc4   :  { %v168_v11 = vpop.xlane.xlu1 %167  ;;  %v144_v14 = vpop.xlane.xlu0 %143 }
  0xc5   :  { %v301_v52 = vmul.f32 0.015625, %v168_v11  ;;  %v293_v15 = vmul.f32 0.015625, %v144_v14  ;;  %v703_v42 = vsel %vm678_vm5, %v531_v0, %v702_v24  ;;  %v696_v43 = vsel %vm678_vm5, %v499_v1, %v695_v25 }
  0xc7   :  { %v535_v8 = vrot.slane %v301_v52, %v1286_v19  ;;  %v503_v9 = vrot.slane %v293_v15, %v1286_v19 }
  0xc8   :  { %v1318_v22 = vpop.xlane.xlu1 %179  ;;  %v1320_v23 = vpop.xlane.xlu0 %176 }
  0xc9   :  { %v704_v46 = vsel %vm680_vm6, %v535_v8, %v703_v42  ;;  %v697_v47 = vsel %vm680_vm6, %v503_v9, %v696_v43  ;;  %v305_v32 = vmul.f32 0.015625, %v1318_v22  ;;  %v304_v33 = vmul.f32 0.015625, %v1320_v23 }
  0xcb   :  { %v551_v7 = vrot.slane %v305_v32, %v1286_v19  ;;  %v547_v10 = vrot.slane %v304_v33, %v1286_v19 }
  0xcc   :  { %v1322_v26 = vpop.xlane.xlu1 %203  ;;  %v1324_v27 = vpop.xlane.xlu0 %200 }
  0xcd   :  { %v707_v4 = vsel %vm672_vm2, %v551_v7, %v547_v10 }
  0xd0   :  { %v171_v36 = vpop.xlane.xlu1 %170  ;;  %v147_v37 = vpop.xlane.xlu0 %146 }
  0xd1   :  { %v302_v35 = vmul.f32 0.015625, %v171_v36  ;;  %v294_v53 = vmul.f32 0.015625, %v147_v37  ;;  %v313_v36 = vmul.f32 0.015625, %v1322_v26  ;;  %v312_v37 = vmul.f32 0.015625, %v1324_v27 }
  0xd3   :  { %v539_v16 = vrot.slane %v302_v35, %v1286_v19  ;;  %v507_v17 = vrot.slane %v294_v53, %v1286_v19  ;;  %v583_v22 = vrot.slane %v313_v36, %v1286_v19  ;;  %v579_v23 = vrot.slane %v312_v37, %v1286_v19 }
  0xd4   :  { %v207_v56 = vpop.xlane.xlu1 %206  ;;  %v183_v57 = vpop.xlane.xlu0 %182 }
  0xd5   :  { %v705_v54 = vsel %vm682_vm7, %v539_v16, %v704_v46  ;;  %v698_v55 = vsel %vm682_vm7, %v507_v17, %v697_v47  ;;  %v314_v40 = vmul.f32 0.015625, %v207_v56  ;;  %v306_v41 = vmul.f32 0.015625, %v183_v57 }
  0xd6   :  { %v714_v5 = vsel %vm672_vm2, %v583_v22, %v579_v23 }
  0xd7   :  { %v587_v27 = vrot.slane %v314_v40, %v1286_v19  ;;  %v555_v34 = vrot.slane %v306_v41, %v1286_v19 }
  0xd8   :  { %v174_v20 = vpop.xlane.xlu1 %173  ;;  %v150_v21 = vpop.xlane.xlu0 %149 }
  0xd9   :  { %v303_v38 = vmul.f32 0.015625, %v174_v20  ;;  %v295_v39 = vmul.f32 0.015625, %v150_v21  ;;  %v715_v12 = vsel %vm674_vm3, %v587_v27, %v714_v5  ;;  %v708_v13 = vsel %vm674_vm3, %v555_v34, %v707_v4 }
  0xdb   :  { %v543_v50 = vrot.slane %v303_v38, %v1286_v19  ;;  %v511_v51 = vrot.slane %v295_v39, %v1286_v19 }
  0xdc   :  { %v210_v58 = vpop.xlane.xlu1 %209  ;;  %v186_v59 = vpop.xlane.xlu0 %185 }
  0xdd   :  { %v699_v62 = vsel %vm684_vm8, %v511_v51, %v698_v55  ;;  %v706_v63 = vsel %vm684_vm8, %v543_v50, %v705_v54  ;;  %v315_v48 = vmul.f32 0.015625, %v210_v58  ;;  %v307_v49 = vmul.f32 0.015625, %v186_v59 }
  0xde   :  { %v868_v2 = vpack.c.bf16 %v706_v63, %v699_v62 }
  0xdf   :  { %v591_v60 = vrot.slane %v315_v48, %v1286_v19  ;;  %v559_v61 = vrot.slane %v307_v49, %v1286_v19 }
  0xe0   :  { %v213_v3 = vpop.xlane.xlu1 %212  ;;  %869 = vmatprep.subr.bf16.mxu0 %v868_v2  ;;  %v189_v6 = vpop.xlane.xlu0 %188 }
  0xe1   :  { %871 = vmatpush3.bf16.msra.mxu0 %v868_v2  ;;  %v316_v52 = vmul.f32 0.015625, %v213_v3  ;;  %v308_v15 = vmul.f32 0.015625, %v189_v6  ;;  %v716_v24 = vsel %vm676_vm4, %v591_v60, %v715_v12  ;;  %v709_v25 = vsel %vm676_vm4, %v559_v61, %v708_v13 }
  0xe3   :  { %v595_v0 = vrot.slane %v316_v52, %v1286_v19  ;;  %v563_v1 = vrot.slane %v308_v15, %v1286_v19 }
  0xe4   :  { %v216_v11 = vpop.xlane.xlu1 %215  ;;  %v192_v14 = vpop.xlane.xlu0 %191 }
  0xe5   :  { %v317_v18 = vmul.f32 0.015625, %v216_v11  ;;  %v309_v26 = vmul.f32 0.015625, %v192_v14  ;;  %v717_v42 = vsel %vm678_vm5, %v595_v0, %v716_v24  ;;  %v710_v43 = vsel %vm678_vm5, %v563_v1, %v709_v25 }
  0xe7   :  { %v599_v8 = vrot.slane %v317_v18, %v1286_v19  ;;  %v567_v9 = vrot.slane %v309_v26, %v1286_v19 }
  0xe8   :  { %v228_v28 = vpop.xlane.xlu1 %227  ;;  %v225_v29 = vpop.xlane.xlu0 %224 }
  0xe9   :  { %v718_v46 = vsel %vm680_vm6, %v599_v8, %v717_v42  ;;  %v711_v47 = vsel %vm680_vm6, %v567_v9, %v710_v43  ;;  %v321_v11 = vmul.f32 0.015625, %v228_v28  ;;  %v320_v14 = vmul.f32 0.015625, %v225_v29 }
  0xeb   :  { %v615_v48 = vrot.slane %v321_v11, %v1286_v19  ;;  %v611_v49 = vrot.slane %v320_v14, %v1286_v19 }
  0xec   :  { %v252_v30 = vpop.xlane.xlu1 %251  ;;  %v249_v31 = vpop.xlane.xlu0 %248 }
  0xed   :  { %v329_v32 = vmul.f32 0.015625, %v252_v30  ;;  %v328_v33 = vmul.f32 0.015625, %v249_v31 }
  0xef   :  { %v647_v52 = vrot.slane %v329_v32, %v1286_v19  ;;  %v643_v15 = vrot.slane %v328_v33, %v1286_v19 }
  0xf0   :  { %v219_v44 = vpop.xlane.xlu1 %218  ;;  %v195_v45 = vpop.xlane.xlu0 %194 }
  0xf1   :  { %v318_v35 = vmul.f32 0.015625, %v219_v44  ;;  %v310_v53 = vmul.f32 0.015625, %v195_v45 }
  0xf3   :  { %v603_v16 = vrot.slane %v318_v35, %v1286_v19  ;;  %v571_v17 = vrot.slane %v310_v53, %v1286_v19 }
  0xf4   :  { %v255_v56 = vpop.xlane.xlu1 %254  ;;  %v231_v57 = vpop.xlane.xlu0 %230 }
  0xf5   :  { %v719_v54 = vsel %vm682_vm7, %v603_v16, %v718_v46  ;;  %v712_v55 = vsel %vm682_vm7, %v571_v17, %v711_v47  ;;  %v330_v36 = vmul.f32 0.015625, %v255_v56  ;;  %v322_v37 = vmul.f32 0.015625, %v231_v57 }
  0xf6   :  { %v721_v56 = vsel %vm672_vm2, %v615_v48, %v611_v49  ;;  %v728_v57 = vsel %vm672_vm2, %v647_v52, %v643_v15 }
  0xf7   :  { %v651_v30 = vrot.slane %v330_v36, %v1286_v19  ;;  %v619_v31 = vrot.slane %v322_v37, %v1286_v19 }
  0xf8   :  { %v222_v20 = vpop.xlane.xlu1 %221  ;;  %v198_v21 = vpop.xlane.xlu0 %197 }
  0xf9   :  { %v319_v38 = vmul.f32 0.015625, %v222_v20  ;;  %v311_v39 = vmul.f32 0.015625, %v198_v21  ;;  %v729_v0 = vsel %vm674_vm3, %v651_v30, %v728_v57  ;;  %v722_v1 = vsel %vm674_vm3, %v619_v31, %v721_v56 }
  0xfb   :  { %v607_v50 = vrot.slane %v319_v38, %v1286_v19  ;;  %v575_v51 = vrot.slane %v311_v39, %v1286_v19 }
  0xfc   :  { %v258_v58 = vpop.xlane.xlu1 %257  ;;  %v234_v59 = vpop.xlane.xlu0 %233 }
  0xfd   :  { %v713_v62 = vsel %vm684_vm8, %v575_v51, %v712_v55  ;;  %v720_v63 = vsel %vm684_vm8, %v607_v50, %v719_v54  ;;  %v331_v44 = vmul.f32 0.015625, %v258_v58  ;;  %v323_v45 = vmul.f32 0.015625, %v234_v59  ;;  %v337_v51 = vld [vmem:[%s1435_s1 + $0x8] sm:$0x3] }
  0xfe   :  { %v872_v2 = vpack.c.bf16 %v720_v63, %v713_v62 }
  0xff   :  { %v655_v18 = vrot.slane %v331_v44, %v1286_v19  ;;  %v623_v26 = vrot.slane %v323_v45, %v1286_v19 }
 0x100   :  { %v261_v3 = vpop.xlane.xlu1 %260  ;;  %873 = vmatprep.subr.bf16.mxu0 %v872_v2  ;;  %v237_v6 = vpop.xlane.xlu0 %236 }
 0x101   :  { %875 = vmatpush3.bf16.msra.mxu0 %v872_v2  ;;  %v332_v7 = vmul.f32 0.015625, %v261_v3  ;;  %v324_v10 = vmul.f32 0.015625, %v237_v6  ;;  %v730_v12 = vsel %vm676_vm4, %v655_v18, %v729_v0  ;;  %v723_v13 = vsel %vm676_vm4, %v623_v26, %v722_v1 }
 0x103   :  { %v659_v35 = vrot.slane %v332_v7, %v1286_v19  ;;  %v627_v53 = vrot.slane %v324_v10, %v1286_v19 }
 0x104   :  { %v264_v40 = vpop.xlane.xlu1 %263  ;;  %v240_v41 = vpop.xlane.xlu0 %239 }
 0x105   :  { %v333_v28 = vmul.f32 0.015625, %v264_v40  ;;  %v325_v29 = vmul.f32 0.015625, %v240_v41  ;;  %v731_v20 = vsel %vm678_vm5, %v659_v35, %v730_v12  ;;  %v724_v21 = vsel %vm678_vm5, %v627_v53, %v723_v13 }
 0x107   :  { %v663_v60 = vrot.slane %v333_v28, %v1286_v19  ;;  %v631_v61 = vrot.slane %v325_v29, %v1286_v19 }
 0x108   :  { %v267_v22 = vpop.xlane.xlu1 %266  ;;  %v243_v23 = vpop.xlane.xlu0 %242 }
 0x109   :  { %v334_v27 = vmul.f32 0.015625, %v267_v22  ;;  %v326_v34 = vmul.f32 0.015625, %v243_v23  ;;  %v732_v24 = vsel %vm680_vm6, %v663_v60, %v731_v20  ;;  %v725_v25 = vsel %vm680_vm6, %v631_v61, %v724_v21 }
 0x10b   :  { %v667_v4 = vrot.slane %v334_v27, %v1286_v19  ;;  %v635_v5 = vrot.slane %v326_v34, %v1286_v19 }
 0x10c   :  { %v270_v8 = vpop.xlane.xlu1 %269  ;;  %v246_v9 = vpop.xlane.xlu0 %245 }
 0x10d   :  { %v335_v16 = vmul.f32 0.015625, %v270_v8  ;;  %v327_v17 = vmul.f32 0.015625, %v246_v9  ;;  %v733_v42 = vsel %vm682_vm7, %v667_v4, %v732_v24  ;;  %v726_v43 = vsel %vm682_vm7, %v635_v5, %v725_v25 }
 0x10f   :  { %v671_v38 = vrot.slane %v335_v16, %v1286_v19  ;;  %v639_v39 = vrot.slane %v327_v17, %v1286_v19 }
 0x110   :  { %v348_v54 = vpop.permute.xlu1 %347 }
 0x111   :  { %v727_v46 = vsel %vm684_vm8, %v639_v39, %v726_v43  ;;  %v734_v47 = vsel %vm684_vm8, %v671_v38, %v733_v42 }
 0x112   :  { %v876_v50 = vpack.c.bf16 %v734_v47, %v727_v46 }
 0x114   :  { %877 = vmatprep.subr.bf16.mxu0 %v876_v50  ;;  %v343_v55 = vpop.permute.xlu0 %342 }
 0x115   :  { %879 = vmatpush3.bf16.msra.mxu0 %v876_v50 }
 0x118   :  { %862 = vmatmul.mubr.msk.f32.vlgmr.msra.gmra.mrb[0].mxu0 %vm743_vm1, %v337_v51 }
 0x1eb   :  { %v863_v19 = vpop.f32.mrb[0].mxu0 }
 0x1ec   :  { %v822_v58 = vadd.f32 %v863_v19, %v348_v54  ;;  %v816_v59 = vpop.f32.mrb[1].mxu0 }
 0x1ed   :  { %v817_v62 = vadd.f32 %v816_v59, %v343_v55 }
 0x1ee   :  { %828 = vst.msk [vmem:[%s1437_s3 + $0x8] sm:$0x3] %vm827_vm9, %v822_v58 }
 0x1ef   :  { %826 = vst.msk [vmem:[%s1437_s3] sm:$0xff] %vm825_vm10, %v817_v62 }

</bundles_post_ra>
